<compile_context>
chip_gen: v6e
topology: v6e:2x2x1
jax: 0.10.0
libtpu: 0.0.40
codegen_flags: <defaults>
</compile_context>

<pallas_src>
import functools

import jax
import jax.numpy as jnp
from jax.experimental import pallas as pl
from jax.experimental.pallas import tpu as pltpu


# ---------------------------------------------------------------------------
# generation-aware VMEM budget
# ---------------------------------------------------------------------------

def _vmem_limit_bytes():
    try:
        cap = int(pltpu.get_tpu_info().vmem_capacity_bytes)
    except Exception:
        cap = 64 * 1024 * 1024          # conservative fallback (v7x per-TC VMEM)
    return max(32 * 1024 * 1024, int(cap * 0.7))


VMEM_LIMIT = _vmem_limit_bytes()
TILE_BUDGET = max(8 * 1024 * 1024, VMEM_LIMIT // 4)   # per-block row budget


def _row_tile(n, bytes_per_row, multiple=8, budget=None, min_blocks=2):
    """Largest divisor of n (preferring multiples of `multiple`) that fits the VMEM
    budget and, when the size allows, leaves >= min_blocks blocks along this
    (parallel) axis so both v7x TensorCores stay busy and the pipeline has >= 2 steps."""
    if budget is None:
        budget = TILE_BUDGET
    cap = max(1, int(budget) // max(int(bytes_per_row), 1))
    if min_blocks > 1 and n % min_blocks == 0:
        cap = min(cap, n // min_blocks)
    if n <= cap:
        return n
    best = None
    d = multiple
    while d <= min(n, cap):
        if n % d == 0:
            best = d
        d += multiple
    if best is not None:
        return best
    d = min(n, cap)
    while d >= 1:
        if n % d == 0:
            return d
        d -= 1
    return n                                            # n prime: full extent (layout-legal)


# ---------------------------------------------------------------------------
# Kernel 1: fully fused attention branch (per (b, t) grid step), residual folded
# ---------------------------------------------------------------------------

def _attn_branch_kernel(
        x_ref,
        w1q_ref, s1q_ref, b1q_ref, w3q_ref, w2q_ref, s2q_ref, b2q_ref,
        mask_ref,
        w1p_ref, s1p_ref, b1p_ref, w3p_ref, w2p_ref, s2p_ref, b2p_ref,
        o_ref,
        mem_head, mem_qkv, mem_att, xp_ref,
        *, H, W, C, tau_inv):
    N = H * W

    @pl.when(pl.program_id(1) == 0)
    def _():
        mem_head[...] = jnp.zeros_like(mem_head)
        mem_qkv[...] = jnp.zeros_like(mem_qkv)
        mem_att[...] = jnp.zeros_like(mem_att)

    def dw3x3_padded(y, pad_bias, w3):
        """BNAndPad border (pad value = folded BN bias) + depthwise 3x3.
        y: (N, C) interior, pad_bias: (1, C), w3: (3, 3, C) -> (N, C)."""
        # interior written once; only the 4 one-pixel border strips are filled separately
        xp_ref[1:H + 1, 1:W + 1, :] = y.reshape(H, W, C)
        row = jnp.broadcast_to(pad_bias.reshape(1, 1, C), (1, W + 2, C))
        col = jnp.broadcast_to(pad_bias.reshape(1, 1, C), (H + 2, 1, C))
        xp_ref[0:1, :, :] = row
        xp_ref[H + 1:H + 2, :, :] = row
        xp_ref[:, 0:1, :] = col
        xp_ref[:, W + 1:W + 2, :] = col
        xp = xp_ref[...]
        acc = jnp.zeros((H, W, C), jnp.float32)
        for dh in range(3):
            for dw in range(3):
                acc = acc + xp[dh:dh + H, dw:dw + W, :] * w3[dh, dw, :]
        return acc.reshape(N, C)

    # ---- head LIF ----
    x = x_ref[0, 0]                                            # (N, C) f32
    vh = mem_head[...] + (x - mem_head[...]) * tau_inv
    mem_head[...] = jnp.where(vh >= 1.0, 0.0, vh)
    spk_h = (vh >= 1.0).astype(jnp.bfloat16)

    # ---- q/k/v RepConv + BN + LIF, one channel group at a time (no dense block-diag) ----
    spk_qkv = []
    for g in range(3):
        y = jnp.dot(spk_h, w1q_ref[g], preferred_element_type=jnp.float32)
        y = y * s1q_ref[g] + b1q_ref[g]                        # BNAndPad BN affine
        acc = dw3x3_padded(y, b1q_ref[g], w3q_ref[g])          # pad value = folded BN bias
        z = jnp.dot(acc.astype(jnp.bfloat16), w2q_ref[g],
                    preferred_element_type=jnp.float32)
        z = z * s2q_ref[g] + b2q_ref[g]                        # RepConv BN * outer BN
        vg = mem_qkv[g] + (z - mem_qkv[g]) * tau_inv
        mem_qkv[g] = jnp.where(vg >= 1.0, 0.0, vg)
        spk_qkv.append((vg >= 1.0).astype(jnp.float32))        # 0/1 spikes

    q16 = spk_qkv[0].astype(jnp.bfloat16)                      # (N, C)
    kT16 = spk_qkv[1].T.astype(jnp.bfloat16)                   # (C, N)
    v16 = spk_qkv[2].astype(jnp.bfloat16)                      # (N, C)

    # ---- linear attention: per-head K^T V via hoisted block-diagonal mask ----
    kv = jnp.dot(kT16, v16, preferred_element_type=jnp.float32)   # (C, C) integer counts
    kv = kv * mask_ref[...]
    if N <= 256:   # spike counts <= N exactly representable in bf16
        att = jnp.dot(q16, kv.astype(jnp.bfloat16), preferred_element_type=jnp.float32)
    else:
        att = jnp.dot(q16.astype(jnp.float32), kv, preferred_element_type=jnp.float32)

    # ---- attn LIF (0.125 scale folded into threshold: 0.5 / 0.125 = 4.0) ----
    va = mem_att[...] + (att - mem_att[...]) * tau_inv
    mem_att[...] = jnp.where(va >= 4.0, 0.0, va)
    spk_a = (va >= 4.0).astype(jnp.bfloat16)

    # ---- proj RepConv + BN + residual ----
    y = jnp.dot(spk_a, w1p_ref[...], preferred_element_type=jnp.float32)
    y = y * s1p_ref[...] + b1p_ref[...]
    acc = dw3x3_padded(y, b1p_ref[...], w3p_ref[...])
    z = jnp.dot(acc.astype(jnp.bfloat16), w2p_ref[...],
                preferred_element_type=jnp.float32)
    o_ref[0, 0] = x + z * s2p_ref[...] + b2p_ref[...]          # residual folded in-kernel


def attn_branch(xcl, p, *, num_heads, H, W, tau=2.0):
    """xcl: (T, B, N, C) f32.  Returns x + attn(x), same shape."""
    T, B, N, C = xcl.shape
    d = C // num_heads
    gid = jnp.arange(C, dtype=jnp.int32) // d
    mask = (gid[:, None] == gid[None, :]).astype(jnp.float32)  # hoisted head mask

    qkv, proj = p["qkv"], p["proj"]
    kernel = functools.partial(_attn_branch_kernel, H=H, W=W, C=C, tau_inv=1.0 / tau)

    const2 = lambda b, t: (0, 0)
    const3 = lambda b, t: (0, 0, 0)
    const4 = lambda b, t: (0, 0, 0, 0)

    return pl.pallas_call(
        kernel,
        out_shape=jax.ShapeDtypeStruct((T, B, N, C), jnp.float32),
        grid=(B, T),                                   # B parallel, T carries LIF membranes
        in_specs=[
            pl.BlockSpec((1, 1, N, C), lambda b, t: (t, b, 0, 0)),
            pl.BlockSpec((3, C, C), const3),           # q|k|v first 1x1 (stacked)
            pl.BlockSpec((3, 1, C), const3),           # BNAndPad BN scale
            pl.BlockSpec((3, 1, C), const3),           # BNAndPad BN bias (= pad value)
            pl.BlockSpec((3, 3, 3, C), const4),        # depthwise 3x3 (per group)
            pl.BlockSpec((3, C, C), const3),           # second 1x1 per group
            pl.BlockSpec((3, 1, C), const3),           # fused RepConv BN * outer BN scale
            pl.BlockSpec((3, 1, C), const3),           # ... bias
            pl.BlockSpec((C, C), const2),              # block-diag head mask (hoisted)
            pl.BlockSpec((C, C), const2),              # proj first 1x1
            pl.BlockSpec((1, C), const2),              # proj BNAndPad scale
            pl.BlockSpec((1, C), const2),              # proj BNAndPad bias
            pl.BlockSpec((3, 3, C), const3),           # proj depthwise 3x3
            pl.BlockSpec((C, C), const2),              # proj second 1x1
            pl.BlockSpec((1, C), const2),              # proj fused BN scale
            pl.BlockSpec((1, C), const2),              # proj fused BN bias
        ],
        out_specs=pl.BlockSpec((1, 1, N, C), lambda b, t: (t, b, 0, 0)),
        scratch_shapes=[
            pltpu.VMEM((N, C), jnp.float32),            # head_lif membrane
            pltpu.VMEM((3, N, C), jnp.float32),         # q/k/v LIF membranes
            pltpu.VMEM((N, C), jnp.float32),            # attn_lif membrane
            pltpu.VMEM((H + 2, W + 2, C), jnp.float32), # BNAndPad buffer (reused per group)
        ],
        compiler_params=pltpu.CompilerParams(
            dimension_semantics=("parallel", "arbitrary"),
            vmem_limit_bytes=VMEM_LIMIT),
    )(xcl,
      qkv["w1"], qkv["s1"], qkv["b1"], qkv["w3"], qkv["w2"], qkv["s2"], qkv["b2"],
      mask,
      proj["w1"], proj["s1"], proj["b1"], proj["w3"], proj["w2"], proj["s2"], proj["b2"])


# ---------------------------------------------------------------------------
# Kernel 2: fused MLP branch (fc1 LIF+conv+BN -> fc2 LIF+conv+BN -> residual)
# ---------------------------------------------------------------------------

def _mlp_kernel(x_ref, w1_ref, s1_ref, b1_ref, w2_ref, s2_ref, b2_ref, o_ref,
                mem1, mem2, *, tau_inv):
    @pl.when(pl.program_id(1) == 0)
    def _():
        mem1[...] = jnp.zeros_like(mem1)
        mem2[...] = jnp.zeros_like(mem2)

    x = x_ref[0]                                               # (tm, C) f32
    v1 = mem1[...] + (x - mem1[...]) * tau_inv
    mem1[...] = jnp.where(v1 >= 1.0, 0.0, v1)
    spk1 = (v1 >= 1.0).astype(jnp.bfloat16)

    h = jnp.dot(spk1, w1_ref[...], preferred_element_type=jnp.float32)
    h = h * s1_ref[...] + b1_ref[...]                          # 4C hidden never leaves VMEM

    v2 = mem2[...] + (h - mem2[...]) * tau_inv
    mem2[...] = jnp.where(v2 >= 1.0, 0.0, v2)
    spk2 = (v2 >= 1.0).astype(jnp.bfloat16)

    o = jnp.dot(spk2, w2_ref[...], preferred_element_type=jnp.float32)
    o_ref[0] = x + o * s2_ref[...] + b2_ref[...]               # fc2 BN + residual


def mlp_branch(x, p, tau=2.0):
    """x: (T, M, C) f32.  Returns x + MLP(x)."""
    T, M, C = x.shape
    Chid = p["w1"].shape[1]
    bytes_per_row = 4 * (4 * C + 3 * Chid)       # dbuf'd in/out + membranes + hidden
    tm = _row_tile(M, bytes_per_row=bytes_per_row)
    kernel = functools.partial(_mlp_kernel, tau_inv=1.0 / tau)
    return pl.pallas_call(
        kernel,
        out_shape=jax.ShapeDtypeStruct((T, M, C), jnp.float32),
        grid=(M // tm, T),                                     # T innermost: membranes carried
        in_specs=[
            pl.BlockSpec((1, tm, C), lambda m, t: (t, m, 0)),
            pl.BlockSpec((C, Chid), lambda m, t: (0, 0)),
            pl.BlockSpec((1, Chid), lambda m, t: (0, 0)),
            pl.BlockSpec((1, Chid), lambda m, t: (0, 0)),
            pl.BlockSpec((Chid, C), lambda m, t: (0, 0)),
            pl.BlockSpec((1, C), lambda m, t: (0, 0)),
            pl.BlockSpec((1, C), lambda m, t: (0, 0)),
        ],
        out_specs=pl.BlockSpec((1, tm, C), lambda m, t: (t, m, 0)),
        scratch_shapes=[pltpu.VMEM((tm, C), jnp.float32),      # fc1_lif membrane
                        pltpu.VMEM((tm, Chid), jnp.float32)],  # fc2_lif membrane
        compiler_params=pltpu.CompilerParams(
            dimension_semantics=("parallel", "arbitrary"),
            vmem_limit_bytes=VMEM_LIMIT),
    )(x, p["w1"], p["s1"], p["b1"], p["w2"], p["s2"], p["b2"])


# ---------------------------------------------------------------------------
# MS_Block forward (wrapper is reshape-only except one entry/exit transpose)
# ---------------------------------------------------------------------------

def ms_block_forward(x, params, *, num_heads):
    T, B, C, H, W = x.shape
    N = H * W
    xcl = jnp.transpose(x, (0, 1, 3, 4, 2)).reshape(T, B, N, C)
    x1 = attn_branch(xcl, params["attn"], num_heads=num_heads, H=H, W=W)   # x + attn(x)
    x2 = mlp_branch(x1.reshape(T, B * N, C), params["mlp"])                # x1 + mlp(x1)
    return jnp.transpose(x2.reshape(T, B, H, W, C), (0, 1, 4, 2, 3))


# ---------------------------------------------------------------------------
# Deterministic synthetic parameters (inference-mode BN folded to affine)
# ---------------------------------------------------------------------------

def bn_affine(gamma, beta, mean, var, eps=1e-5):
    s = gamma / jnp.sqrt(var + eps)
    return s, beta - mean * s


def init_bn(key, C):
    k1, k2, k3, k4 = jax.random.split(key, 4)
    gamma = 1.0 + 0.1 * jax.random.normal(k1, (C,), jnp.float32)
    beta = 0.1 * jax.random.normal(k2, (C,), jnp.float32)
    mean = 0.1 * jax.random.normal(k3, (C,), jnp.float32)
    var = 1.0 + 0.1 * jax.random.uniform(k4, (C,), jnp.float32)
    return bn_affine(gamma, beta, mean, var)


def init_repconv_bn(key, C):
    """RepConv(C->C) + trailing BatchNorm2d, BNs folded (inference mode)."""
    ks = jax.random.split(key, 6)
    w1 = jax.random.normal(ks[0], (C, C), jnp.float32) / jnp.sqrt(C)      # 1x1 (in->in)
    s1, b1 = init_bn(ks[1], C)                                            # BNAndPadLayer BN
    w3 = 0.2 * jax.random.normal(ks[2], (3, 3, C), jnp.float32)           # depthwise 3x3
    w2 = jax.random.normal(ks[3], (C, C), jnp.float32) / jnp.sqrt(C)      # 1x1 (in->out)
    s3, b3 = init_bn(ks[4], C)                                            # RepConv trailing BN
    s4, b4 = init_bn(ks[5], C)                                            # outer BatchNorm2d
    return dict(w1=w1.astype(jnp.bfloat16), s1=s1.reshape(1, C), b1=b1.reshape(1, C),
                w3=w3, w2=w2.astype(jnp.bfloat16),
                s2=(s3 * s4).reshape(1, C), b2=(b3 * s4 + b4).reshape(1, C))


def stack_qkv(pq, pk, pv):
    """Stack the q/k/v RepConv branches group-major (no dense block-diagonal weights)."""
    stk = lambda k: jnp.stack([pq[k], pk[k], pv[k]], axis=0)
    return {k: stk(k) for k in ("w1", "s1", "b1", "w3", "w2", "s2", "b2")}


def init_mlp(key, C, hidden):
    ks = jax.random.split(key, 6)
    w1 = jax.random.normal(ks[0], (C, hidden), jnp.float32) / jnp.sqrt(C)
    cb1 = 0.1 * jax.random.normal(ks[1], (hidden,), jnp.float32)          # conv1d bias
    s1, b1 = init_bn(ks[2], hidden)
    w2 = jax.random.normal(ks[3], (hidden, C), jnp.float32) / jnp.sqrt(hidden)
    cb2 = 0.1 * jax.random.normal(ks[4], (C,), jnp.float32)
    s2, b2 = init_bn(ks[5], C)
    # fold conv1d bias into the BN affine: BN(xW + cb) = xW*s + (cb*s + b)
    return dict(w1=w1.astype(jnp.bfloat16), s1=s1.reshape(1, hidden),
                b1=(s1 * cb1 + b1).reshape(1, hidden),
                w2=w2.astype(jnp.bfloat16), s2=s2.reshape(1, C),
                b2=(s2 * cb2 + b2).reshape(1, C))


# ---------------------------------------------------------------------------
# main
# ---------------------------------------------------------------------------

if __name__ == "__main__":
    key = jax.random.PRNGKey(0)
    T, B, C, H, W = 2, 2, 32, 8, 8          # dim=32, spatial 8x8, time steps T=2
    num_heads = 4
    mlp_ratio = 4.0

    kx, kp = jax.random.split(key)
    x = 1.5 * jax.random.normal(kx, (T, B, C, H, W), jnp.float32)

    key_q, key_k, key_v, key_proj, key_mlp = jax.random.split(kp, 5)
    params = {
        "attn": {
            "qkv": stack_qkv(init_repconv_bn(key_q, C),
                             init_repconv_bn(key_k, C),
                             init_repconv_bn(key_v, C)),
            "proj": init_repconv_bn(key_proj, C),
        },
        "mlp": init_mlp(key_mlp, C, int(C * mlp_ratio)),
    }

    fwd = jax.jit(functools.partial(ms_block_forward, num_heads=num_heads))
    out = jax.block_until_ready(fwd(x, params))

    assert out.shape == (T, B, C, H, W), out.shape
    assert bool(jnp.all(jnp.isfinite(out)))
    print("KERNEL_OK")
</pallas_src>

<mosaic_0001>
module attributes {stable_mosaic.version = 11 : i64} {
  func.func @_attn_branch_kernel(%arg0: i32, %arg1: i32, %arg2: memref<1x1x64x32xf32, #tpu.memory_space<vmem>>, %arg3: memref<3x32x32xbf16, #tpu.memory_space<vmem>>, %arg4: memref<3x1x32xf32, #tpu.memory_space<vmem>>, %arg5: memref<3x1x32xf32, #tpu.memory_space<vmem>>, %arg6: memref<3x3x3x32xf32, #tpu.memory_space<vmem>>, %arg7: memref<3x32x32xbf16, #tpu.memory_space<vmem>>, %arg8: memref<3x1x32xf32, #tpu.memory_space<vmem>>, %arg9: memref<3x1x32xf32, #tpu.memory_space<vmem>>, %arg10: memref<32x32xf32, #tpu.memory_space<vmem>>, %arg11: memref<32x32xbf16, #tpu.memory_space<vmem>>, %arg12: memref<1x32xf32, #tpu.memory_space<vmem>>, %arg13: memref<1x32xf32, #tpu.memory_space<vmem>>, %arg14: memref<3x3x32xf32, #tpu.memory_space<vmem>>, %arg15: memref<32x32xbf16, #tpu.memory_space<vmem>>, %arg16: memref<1x32xf32, #tpu.memory_space<vmem>>, %arg17: memref<1x32xf32, #tpu.memory_space<vmem>>, %arg18: memref<1x1x64x32xf32, #tpu.memory_space<vmem>>, %arg19: memref<64x32xf32, #tpu.memory_space<vmem>>, %arg20: memref<3x64x32xf32, #tpu.memory_space<vmem>>, %arg21: memref<64x32xf32, #tpu.memory_space<vmem>>, %arg22: memref<10x10x32xf32, #tpu.memory_space<vmem>>) attributes {dimension_semantics = [#tpu.dimension_semantics<parallel>, #tpu.dimension_semantics<arbitrary>], iteration_bounds = array<i64: 2, 2>, scalar_prefetch = 0 : i64, scratch_operands = 4 : i64, tpu.core_type = #tpu.core_type<tc>, window_params = [{transform_indices = @transform_0, window_bounds = array<i64: 1, 1, 64, 32>}, {pipeline_mode = #tpu.pipeline_mode<synchronous>, transform_indices = @transform_1, window_bounds = array<i64: 3, 32, 32>}, {pipeline_mode = #tpu.pipeline_mode<synchronous>, transform_indices = @transform_2, window_bounds = array<i64: 3, 1, 32>}, {pipeline_mode = #tpu.pipeline_mode<synchronous>, transform_indices = @transform_3, window_bounds = array<i64: 3, 1, 32>}, {pipeline_mode = #tpu.pipeline_mode<synchronous>, transform_indices = @transform_4, window_bounds = array<i64: 3, 3, 3, 32>}, {pipeline_mode = #tpu.pipeline_mode<synchronous>, transform_indices = @transform_5, window_bounds = array<i64: 3, 32, 32>}, {pipeline_mode = #tpu.pipeline_mode<synchronous>, transform_indices = @transform_6, window_bounds = array<i64: 3, 1, 32>}, {pipeline_mode = #tpu.pipeline_mode<synchronous>, transform_indices = @transform_7, window_bounds = array<i64: 3, 1, 32>}, {pipeline_mode = #tpu.pipeline_mode<synchronous>, transform_indices = @transform_8, window_bounds = array<i64: 32, 32>}, {pipeline_mode = #tpu.pipeline_mode<synchronous>, transform_indices = @transform_9, window_bounds = array<i64: 32, 32>}, {pipeline_mode = #tpu.pipeline_mode<synchronous>, transform_indices = @transform_10, window_bounds = array<i64: 1, 32>}, {pipeline_mode = #tpu.pipeline_mode<synchronous>, transform_indices = @transform_11, window_bounds = array<i64: 1, 32>}, {pipeline_mode = #tpu.pipeline_mode<synchronous>, transform_indices = @transform_12, window_bounds = array<i64: 3, 3, 32>}, {pipeline_mode = #tpu.pipeline_mode<synchronous>, transform_indices = @transform_13, window_bounds = array<i64: 32, 32>}, {pipeline_mode = #tpu.pipeline_mode<synchronous>, transform_indices = @transform_14, window_bounds = array<i64: 1, 32>}, {pipeline_mode = #tpu.pipeline_mode<synchronous>, transform_indices = @transform_15, window_bounds = array<i64: 1, 32>}, {transform_indices = @transform_16, window_bounds = array<i64: 1, 1, 64, 32>}]} {
    %c0_i32 = arith.constant 0 : i32
    %0 = arith.cmpi eq, %arg1, %c0_i32 : i32
    %1 = arith.extui %0 : i1 to i32
    %c0_i32_0 = arith.constant 0 : i32
    %2 = arith.cmpi ne, %1, %c0_i32_0 : i32
    scf.if %2 {
      %cst_243 = arith.constant 0.000000e+00 : f32
      %519 = vector.broadcast %cst_243 : f32 to vector<64x32xf32>
      %c0_244 = arith.constant 0 : index
      %c0_245 = arith.constant 0 : index
      %520 = vector.load %arg19[%c0_244, %c0_245] : memref<64x32xf32, #tpu.memory_space<vmem>>, vector<64x32xf32>
      tpu.vector_store %arg19[%c0_244, %c0_245], %519 {strides = array<i32>} : memref<64x32xf32, #tpu.memory_space<vmem>>, vector<64x32xf32>,
      %cst_246 = arith.constant 0.000000e+00 : f32
      %521 = vector.broadcast %cst_246 : f32 to vector<3x64x32xf32>
      %c0_247 = arith.constant 0 : index
      %c0_248 = arith.constant 0 : index
      %c0_249 = arith.constant 0 : index
      %522 = vector.load %arg20[%c0_247, %c0_248, %c0_249] : memref<3x64x32xf32, #tpu.memory_space<vmem>>, vector<3x64x32xf32>
      tpu.vector_store %arg20[%c0_247, %c0_248, %c0_249], %521 {strides = array<i32>} : memref<3x64x32xf32, #tpu.memory_space<vmem>>, vector<3x64x32xf32>,
      %cst_250 = arith.constant 0.000000e+00 : f32
      %523 = vector.broadcast %cst_250 : f32 to vector<64x32xf32>
      %c0_251 = arith.constant 0 : index
      %c0_252 = arith.constant 0 : index
      %524 = vector.load %arg21[%c0_251, %c0_252] : memref<64x32xf32, #tpu.memory_space<vmem>>, vector<64x32xf32>
      tpu.vector_store %arg21[%c0_251, %c0_252], %523 {strides = array<i32>} : memref<64x32xf32, #tpu.memory_space<vmem>>, vector<64x32xf32>,
    } else {
    }
    %c0 = arith.constant 0 : index
    %c0_1 = arith.constant 0 : index
    %c0_2 = arith.constant 0 : index
    %c0_3 = arith.constant 0 : index
    %3 = vector.load %arg2[%c0, %c0_1, %c0_2, %c0_3] : memref<1x1x64x32xf32, #tpu.memory_space<vmem>>, vector<1x1x64x32xf32>
    %4 = vector.shape_cast %3 : vector<1x1x64x32xf32> to vector<64x32xf32>
    %c0_4 = arith.constant 0 : index
    %c0_5 = arith.constant 0 : index
    %5 = vector.load %arg19[%c0_4, %c0_5] : memref<64x32xf32, #tpu.memory_space<vmem>>, vector<64x32xf32>
    %c0_6 = arith.constant 0 : index
    %c0_7 = arith.constant 0 : index
    %6 = vector.load %arg19[%c0_6, %c0_7] : memref<64x32xf32, #tpu.memory_space<vmem>>, vector<64x32xf32>
    %7 = arith.subf %4, %6 : vector<64x32xf32>
    %cst = arith.constant 5.000000e-01 : f32
    %8 = vector.broadcast %cst : f32 to vector<64x32xf32>
    %9 = arith.mulf %7, %8 : vector<64x32xf32>
    %10 = arith.addf %5, %9 : vector<64x32xf32>
    %cst_8 = arith.constant 1.000000e+00 : f32
    %11 = vector.broadcast %cst_8 : f32 to vector<64x32xf32>
    %12 = arith.cmpf oge, %10, %11 : vector<64x32xf32>
    %cst_9 = arith.constant 0.000000e+00 : f32
    %13 = vector.broadcast %cst_9 : f32 to vector<64x32xf32>
    %14 = arith.select %12, %13, %10 : vector<64x32xi1>, vector<64x32xf32>
    %c0_10 = arith.constant 0 : index
    %c0_11 = arith.constant 0 : index
    %15 = vector.load %arg19[%c0_10, %c0_11] : memref<64x32xf32, #tpu.memory_space<vmem>>, vector<64x32xf32>
    tpu.vector_store %arg19[%c0_10, %c0_11], %14 {strides = array<i32>} : memref<64x32xf32, #tpu.memory_space<vmem>>, vector<64x32xf32>,
    %cst_12 = arith.constant 1.000000e+00 : f32
    %16 = vector.broadcast %cst_12 : f32 to vector<64x32xf32>
    %17 = arith.cmpf oge, %10, %16 : vector<64x32xf32>
    %18 = arith.extui %17 : vector<64x32xi1> to vector<64x32xi32>
    %19 = arith.sitofp %18 : vector<64x32xi32> to vector<64x32xf32>
    %20 = arith.truncf %19 : vector<64x32xf32> to vector<64x32xbf16>
    %c0_13 = arith.constant 0 : index
    %c0_14 = arith.constant 0 : index
    %c0_15 = arith.constant 0 : index
    %21 = vector.load %arg3[%c0_13, %c0_14, %c0_15] : memref<3x32x32xbf16, #tpu.memory_space<vmem>>, vector<1x32x32xbf16>
    %22 = vector.shape_cast %21 : vector<1x32x32xbf16> to vector<32x32xbf16>
    %cst_16 = arith.constant dense<0.000000e+00> : vector<64x32xf32>
    %23 = tpu.matmul %20, %22, %cst_16 {dimension_numbers = #tpu.dot_dimension_numbers<[1], [0], [0], [1], [0, 0, 1, 1], [], []>} : vector<64x32xbf16>, vector<32x32xbf16>, vector<64x32xf32> -> vector<64x32xf32>
    %c0_17 = arith.constant 0 : index
    %c0_18 = arith.constant 0 : index
    %c0_19 = arith.constant 0 : index
    %24 = vector.load %arg4[%c0_17, %c0_18, %c0_19] : memref<3x1x32xf32, #tpu.memory_space<vmem>>, vector<1x1x32xf32>
    %25 = vector.shape_cast %24 : vector<1x1x32xf32> to vector<1x32xf32>
    %26 = vector.broadcast %25 : vector<1x32xf32> to vector<64x32xf32>
    %27 = arith.mulf %23, %26 : vector<64x32xf32>
    %c0_20 = arith.constant 0 : index
    %c0_21 = arith.constant 0 : index
    %c0_22 = arith.constant 0 : index
    %28 = vector.load %arg5[%c0_20, %c0_21, %c0_22] : memref<3x1x32xf32, #tpu.memory_space<vmem>>, vector<1x1x32xf32>
    %29 = vector.shape_cast %28 : vector<1x1x32xf32> to vector<1x32xf32>
    %30 = vector.broadcast %29 : vector<1x32xf32> to vector<64x32xf32>
    %31 = arith.addf %27, %30 : vector<64x32xf32>
    %c0_23 = arith.constant 0 : index
    %c0_24 = arith.constant 0 : index
    %c0_25 = arith.constant 0 : index
    %32 = vector.load %arg5[%c0_23, %c0_24, %c0_25] : memref<3x1x32xf32, #tpu.memory_space<vmem>>, vector<1x1x32xf32>
    %33 = vector.shape_cast %32 : vector<1x1x32xf32> to vector<1x32xf32>
    %c0_26 = arith.constant 0 : index
    %c0_27 = arith.constant 0 : index
    %c0_28 = arith.constant 0 : index
    %c0_29 = arith.constant 0 : index
    %34 = vector.load %arg6[%c0_26, %c0_27, %c0_28, %c0_29] : memref<3x3x3x32xf32, #tpu.memory_space<vmem>>, vector<1x3x3x32xf32>
    %35 = vector.shape_cast %34 : vector<1x3x3x32xf32> to vector<3x3x32xf32>
    %36 = vector.shape_cast %31 : vector<64x32xf32> to vector<8x8x32xf32>
    %c1 = arith.constant 1 : index
    %c1_30 = arith.constant 1 : index
    %c0_31 = arith.constant 0 : index
    %37 = vector.load %arg22[%c1, %c1_30, %c0_31] : memref<10x10x32xf32, #tpu.memory_space<vmem>>, vector<8x8x32xf32>
    tpu.vector_store %arg22[%c1, %c1_30, %c0_31], %36 {strides = array<i32>} : memref<10x10x32xf32, #tpu.memory_space<vmem>>, vector<8x8x32xf32>,
    %38 = vector.shape_cast %33 : vector<1x32xf32> to vector<1x1x32xf32>
    %39 = vector.shape_cast %38 : vector<1x1x32xf32> to vector<1x1x32xf32>
    %40 = vector.broadcast %39 : vector<1x1x32xf32> to vector<1x10x32xf32>
    %41 = vector.shape_cast %33 : vector<1x32xf32> to vector<1x1x32xf32>
    %42 = vector.shape_cast %41 : vector<1x1x32xf32> to vector<1x1x32xf32>
    %43 = vector.broadcast %42 : vector<1x1x32xf32> to vector<10x1x32xf32>
    %c0_32 = arith.constant 0 : index
    %c0_33 = arith.constant 0 : index
    %c0_34 = arith.constant 0 : index
    %44 = vector.load %arg22[%c0_32, %c0_33, %c0_34] : memref<10x10x32xf32, #tpu.memory_space<vmem>>, vector<1x10x32xf32>
    tpu.vector_store %arg22[%c0_32, %c0_33, %c0_34], %40 {strides = array<i32>} : memref<10x10x32xf32, #tpu.memory_space<vmem>>, vector<1x10x32xf32>,
    %c9 = arith.constant 9 : index
    %c0_35 = arith.constant 0 : index
    %c0_36 = arith.constant 0 : index
    %45 = vector.load %arg22[%c9, %c0_35, %c0_36] : memref<10x10x32xf32, #tpu.memory_space<vmem>>, vector<1x10x32xf32>
    tpu.vector_store %arg22[%c9, %c0_35, %c0_36], %40 {strides = array<i32>} : memref<10x10x32xf32, #tpu.memory_space<vmem>>, vector<1x10x32xf32>,
    %c0_37 = arith.constant 0 : index
    %c0_38 = arith.constant 0 : index
    %c0_39 = arith.constant 0 : index
    %46 = vector.load %arg22[%c0_37, %c0_38, %c0_39] : memref<10x10x32xf32, #tpu.memory_space<vmem>>, vector<10x1x32xf32>
    tpu.vector_store %arg22[%c0_37, %c0_38, %c0_39], %43 {strides = array<i32>} : memref<10x10x32xf32, #tpu.memory_space<vmem>>, vector<10x1x32xf32>,
    %c0_40 = arith.constant 0 : index
    %c9_41 = arith.constant 9 : index
    %c0_42 = arith.constant 0 : index
    %47 = vector.load %arg22[%c0_40, %c9_41, %c0_42] : memref<10x10x32xf32, #tpu.memory_space<vmem>>, vector<10x1x32xf32>
    tpu.vector_store %arg22[%c0_40, %c9_41, %c0_42], %43 {strides = array<i32>} : memref<10x10x32xf32, #tpu.memory_space<vmem>>, vector<10x1x32xf32>,
    %c0_43 = arith.constant 0 : index
    %c0_44 = arith.constant 0 : index
    %c0_45 = arith.constant 0 : index
    %48 = vector.load %arg22[%c0_43, %c0_44, %c0_45] : memref<10x10x32xf32, #tpu.memory_space<vmem>>, vector<10x10x32xf32>
    %cst_46 = arith.constant 0.000000e+00 : f32
    %49 = vector.broadcast %cst_46 : f32 to vector<8x8x32xf32>
    %50 = vector.extract_strided_slice %48 {offsets = [0, 0, 0], sizes = [8, 8, 32], strides = [1, 1, 1]} : vector<10x10x32xf32> to vector<8x8x32xf32>
    %51 = vector.extract_strided_slice %35 {offsets = [0, 0, 0], sizes = [1, 1, 32], strides = [1, 1, 1]} : vector<3x3x32xf32> to vector<1x1x32xf32>
    %52 = vector.shape_cast %51 : vector<1x1x32xf32> to vector<32xf32>
    %53 = vector.shape_cast %52 : vector<32xf32> to vector<1x1x32xf32>
    %54 = vector.broadcast %53 : vector<1x1x32xf32> to vector<8x8x32xf32>
    %55 = arith.mulf %50, %54 : vector<8x8x32xf32>
    %56 = arith.addf %49, %55 : vector<8x8x32xf32>
    %57 = vector.extract_strided_slice %48 {offsets = [0, 1, 0], sizes = [8, 8, 32], strides = [1, 1, 1]} : vector<10x10x32xf32> to vector<8x8x32xf32>
    %58 = vector.extract_strided_slice %35 {offsets = [0, 1, 0], sizes = [1, 1, 32], strides = [1, 1, 1]} : vector<3x3x32xf32> to vector<1x1x32xf32>
    %59 = vector.shape_cast %58 : vector<1x1x32xf32> to vector<32xf32>
    %60 = vector.shape_cast %59 : vector<32xf32> to vector<1x1x32xf32>
    %61 = vector.broadcast %60 : vector<1x1x32xf32> to vector<8x8x32xf32>
    %62 = arith.mulf %57, %61 : vector<8x8x32xf32>
    %63 = arith.addf %56, %62 : vector<8x8x32xf32>
    %64 = vector.extract_strided_slice %48 {offsets = [0, 2, 0], sizes = [8, 8, 32], strides = [1, 1, 1]} : vector<10x10x32xf32> to vector<8x8x32xf32>
    %65 = vector.extract_strided_slice %35 {offsets = [0, 2, 0], sizes = [1, 1, 32], strides = [1, 1, 1]} : vector<3x3x32xf32> to vector<1x1x32xf32>
    %66 = vector.shape_cast %65 : vector<1x1x32xf32> to vector<32xf32>
    %67 = vector.shape_cast %66 : vector<32xf32> to vector<1x1x32xf32>
    %68 = vector.broadcast %67 : vector<1x1x32xf32> to vector<8x8x32xf32>
    %69 = arith.mulf %64, %68 : vector<8x8x32xf32>
    %70 = arith.addf %63, %69 : vector<8x8x32xf32>
    %71 = vector.extract_strided_slice %48 {offsets = [1, 0, 0], sizes = [8, 8, 32], strides = [1, 1, 1]} : vector<10x10x32xf32> to vector<8x8x32xf32>
    %72 = vector.extract_strided_slice %35 {offsets = [1, 0, 0], sizes = [1, 1, 32], strides = [1, 1, 1]} : vector<3x3x32xf32> to vector<1x1x32xf32>
    %73 = vector.shape_cast %72 : vector<1x1x32xf32> to vector<32xf32>
    %74 = vector.shape_cast %73 : vector<32xf32> to vector<1x1x32xf32>
    %75 = vector.broadcast %74 : vector<1x1x32xf32> to vector<8x8x32xf32>
    %76 = arith.mulf %71, %75 : vector<8x8x32xf32>
    %77 = arith.addf %70, %76 : vector<8x8x32xf32>
    %78 = vector.extract_strided_slice %48 {offsets = [1, 1, 0], sizes = [8, 8, 32], strides = [1, 1, 1]} : vector<10x10x32xf32> to vector<8x8x32xf32>
    %79 = vector.extract_strided_slice %35 {offsets = [1, 1, 0], sizes = [1, 1, 32], strides = [1, 1, 1]} : vector<3x3x32xf32> to vector<1x1x32xf32>
    %80 = vector.shape_cast %79 : vector<1x1x32xf32> to vector<32xf32>
    %81 = vector.shape_cast %80 : vector<32xf32> to vector<1x1x32xf32>
    %82 = vector.broadcast %81 : vector<1x1x32xf32> to vector<8x8x32xf32>
    %83 = arith.mulf %78, %82 : vector<8x8x32xf32>
    %84 = arith.addf %77, %83 : vector<8x8x32xf32>
    %85 = vector.extract_strided_slice %48 {offsets = [1, 2, 0], sizes = [8, 8, 32], strides = [1, 1, 1]} : vector<10x10x32xf32> to vector<8x8x32xf32>
    %86 = vector.extract_strided_slice %35 {offsets = [1, 2, 0], sizes = [1, 1, 32], strides = [1, 1, 1]} : vector<3x3x32xf32> to vector<1x1x32xf32>
    %87 = vector.shape_cast %86 : vector<1x1x32xf32> to vector<32xf32>
    %88 = vector.shape_cast %87 : vector<32xf32> to vector<1x1x32xf32>
    %89 = vector.broadcast %88 : vector<1x1x32xf32> to vector<8x8x32xf32>
    %90 = arith.mulf %85, %89 : vector<8x8x32xf32>
    %91 = arith.addf %84, %90 : vector<8x8x32xf32>
    %92 = vector.extract_strided_slice %48 {offsets = [2, 0, 0], sizes = [8, 8, 32], strides = [1, 1, 1]} : vector<10x10x32xf32> to vector<8x8x32xf32>
    %93 = vector.extract_strided_slice %35 {offsets = [2, 0, 0], sizes = [1, 1, 32], strides = [1, 1, 1]} : vector<3x3x32xf32> to vector<1x1x32xf32>
    %94 = vector.shape_cast %93 : vector<1x1x32xf32> to vector<32xf32>
    %95 = vector.shape_cast %94 : vector<32xf32> to vector<1x1x32xf32>
    %96 = vector.broadcast %95 : vector<1x1x32xf32> to vector<8x8x32xf32>
    %97 = arith.mulf %92, %96 : vector<8x8x32xf32>
    %98 = arith.addf %91, %97 : vector<8x8x32xf32>
    %99 = vector.extract_strided_slice %48 {offsets = [2, 1, 0], sizes = [8, 8, 32], strides = [1, 1, 1]} : vector<10x10x32xf32> to vector<8x8x32xf32>
    %100 = vector.extract_strided_slice %35 {offsets = [2, 1, 0], sizes = [1, 1, 32], strides = [1, 1, 1]} : vector<3x3x32xf32> to vector<1x1x32xf32>
    %101 = vector.shape_cast %100 : vector<1x1x32xf32> to vector<32xf32>
    %102 = vector.shape_cast %101 : vector<32xf32> to vector<1x1x32xf32>
    %103 = vector.broadcast %102 : vector<1x1x32xf32> to vector<8x8x32xf32>
    %104 = arith.mulf %99, %103 : vector<8x8x32xf32>
    %105 = arith.addf %98, %104 : vector<8x8x32xf32>
    %106 = vector.extract_strided_slice %48 {offsets = [2, 2, 0], sizes = [8, 8, 32], strides = [1, 1, 1]} : vector<10x10x32xf32> to vector<8x8x32xf32>
    %107 = vector.extract_strided_slice %35 {offsets = [2, 2, 0], sizes = [1, 1, 32], strides = [1, 1, 1]} : vector<3x3x32xf32> to vector<1x1x32xf32>
    %108 = vector.shape_cast %107 : vector<1x1x32xf32> to vector<32xf32>
    %109 = vector.shape_cast %108 : vector<32xf32> to vector<1x1x32xf32>
    %110 = vector.broadcast %109 : vector<1x1x32xf32> to vector<8x8x32xf32>
    %111 = arith.mulf %106, %110 : vector<8x8x32xf32>
    %112 = arith.addf %105, %111 : vector<8x8x32xf32>
    %113 = vector.shape_cast %112 : vector<8x8x32xf32> to vector<64x32xf32>
    %114 = arith.truncf %113 : vector<64x32xf32> to vector<64x32xbf16>
    %c0_47 = arith.constant 0 : index
    %c0_48 = arith.constant 0 : index
    %c0_49 = arith.constant 0 : index
    %115 = vector.load %arg7[%c0_47, %c0_48, %c0_49] : memref<3x32x32xbf16, #tpu.memory_space<vmem>>, vector<1x32x32xbf16>
    %116 = vector.shape_cast %115 : vector<1x32x32xbf16> to vector<32x32xbf16>
    %cst_50 = arith.constant dense<0.000000e+00> : vector<64x32xf32>
    %117 = tpu.matmul %114, %116, %cst_50 {dimension_numbers = #tpu.dot_dimension_numbers<[1], [0], [0], [1], [0, 0, 1, 1], [], []>} : vector<64x32xbf16>, vector<32x32xbf16>, vector<64x32xf32> -> vector<64x32xf32>
    %c0_51 = arith.constant 0 : index
    %c0_52 = arith.constant 0 : index
    %c0_53 = arith.constant 0 : index
    %118 = vector.load %arg8[%c0_51, %c0_52, %c0_53] : memref<3x1x32xf32, #tpu.memory_space<vmem>>, vector<1x1x32xf32>
    %119 = vector.shape_cast %118 : vector<1x1x32xf32> to vector<1x32xf32>
    %120 = vector.broadcast %119 : vector<1x32xf32> to vector<64x32xf32>
    %121 = arith.mulf %117, %120 : vector<64x32xf32>
    %c0_54 = arith.constant 0 : index
    %c0_55 = arith.constant 0 : index
    %c0_56 = arith.constant 0 : index
    %122 = vector.load %arg9[%c0_54, %c0_55, %c0_56] : memref<3x1x32xf32, #tpu.memory_space<vmem>>, vector<1x1x32xf32>
    %123 = vector.shape_cast %122 : vector<1x1x32xf32> to vector<1x32xf32>
    %124 = vector.broadcast %123 : vector<1x32xf32> to vector<64x32xf32>
    %125 = arith.addf %121, %124 : vector<64x32xf32>
    %c0_57 = arith.constant 0 : index
    %c0_58 = arith.constant 0 : index
    %c0_59 = arith.constant 0 : index
    %126 = vector.load %arg20[%c0_57, %c0_58, %c0_59] : memref<3x64x32xf32, #tpu.memory_space<vmem>>, vector<1x64x32xf32>
    %127 = vector.shape_cast %126 : vector<1x64x32xf32> to vector<64x32xf32>
    %c0_60 = arith.constant 0 : index
    %c0_61 = arith.constant 0 : index
    %c0_62 = arith.constant 0 : index
    %128 = vector.load %arg20[%c0_60, %c0_61, %c0_62] : memref<3x64x32xf32, #tpu.memory_space<vmem>>, vector<1x64x32xf32>
    %129 = vector.shape_cast %128 : vector<1x64x32xf32> to vector<64x32xf32>
    %130 = arith.subf %125, %129 : vector<64x32xf32>
    %cst_63 = arith.constant 5.000000e-01 : f32
    %131 = vector.broadcast %cst_63 : f32 to vector<64x32xf32>
    %132 = arith.mulf %130, %131 : vector<64x32xf32>
    %133 = arith.addf %127, %132 : vector<64x32xf32>
    %cst_64 = arith.constant 1.000000e+00 : f32
    %134 = vector.broadcast %cst_64 : f32 to vector<64x32xf32>
    %135 = arith.cmpf oge, %133, %134 : vector<64x32xf32>
    %cst_65 = arith.constant 0.000000e+00 : f32
    %136 = vector.broadcast %cst_65 : f32 to vector<64x32xf32>
    %137 = arith.select %135, %136, %133 : vector<64x32xi1>, vector<64x32xf32>
    %c0_66 = arith.constant 0 : index
    %c0_67 = arith.constant 0 : index
    %c0_68 = arith.constant 0 : index
    %138 = vector.load %arg20[%c0_66, %c0_67, %c0_68] : memref<3x64x32xf32, #tpu.memory_space<vmem>>, vector<1x64x32xf32>
    %139 = vector.shape_cast %138 : vector<1x64x32xf32> to vector<64x32xf32>
    %140 = vector.shape_cast %137 : vector<64x32xf32> to vector<1x64x32xf32>
    tpu.vector_store %arg20[%c0_66, %c0_67, %c0_68], %140 {strides = array<i32>} : memref<3x64x32xf32, #tpu.memory_space<vmem>>, vector<1x64x32xf32>,
    %cst_69 = arith.constant 1.000000e+00 : f32
    %141 = vector.broadcast %cst_69 : f32 to vector<64x32xf32>
    %142 = arith.cmpf oge, %133, %141 : vector<64x32xf32>
    %143 = arith.extui %142 : vector<64x32xi1> to vector<64x32xi32>
    %144 = arith.sitofp %143 : vector<64x32xi32> to vector<64x32xf32>
    %c1_70 = arith.constant 1 : index
    %c0_71 = arith.constant 0 : index
    %c0_72 = arith.constant 0 : index
    %145 = vector.load %arg3[%c1_70, %c0_71, %c0_72] : memref<3x32x32xbf16, #tpu.memory_space<vmem>>, vector<1x32x32xbf16>
    %146 = vector.shape_cast %145 : vector<1x32x32xbf16> to vector<32x32xbf16>
    %cst_73 = arith.constant dense<0.000000e+00> : vector<64x32xf32>
    %147 = tpu.matmul %20, %146, %cst_73 {dimension_numbers = #tpu.dot_dimension_numbers<[1], [0], [0], [1], [0, 0, 1, 1], [], []>} : vector<64x32xbf16>, vector<32x32xbf16>, vector<64x32xf32> -> vector<64x32xf32>
    %c1_74 = arith.constant 1 : index
    %c0_75 = arith.constant 0 : index
    %c0_76 = arith.constant 0 : index
    %148 = vector.load %arg4[%c1_74, %c0_75, %c0_76] : memref<3x1x32xf32, #tpu.memory_space<vmem>>, vector<1x1x32xf32>
    %149 = vector.shape_cast %148 : vector<1x1x32xf32> to vector<1x32xf32>
    %150 = vector.broadcast %149 : vector<1x32xf32> to vector<64x32xf32>
    %151 = arith.mulf %147, %150 : vector<64x32xf32>
    %c1_77 = arith.constant 1 : index
    %c0_78 = arith.constant 0 : index
    %c0_79 = arith.constant 0 : index
    %152 = vector.load %arg5[%c1_77, %c0_78, %c0_79] : memref<3x1x32xf32, #tpu.memory_space<vmem>>, vector<1x1x32xf32>
    %153 = vector.shape_cast %152 : vector<1x1x32xf32> to vector<1x32xf32>
    %154 = vector.broadcast %153 : vector<1x32xf32> to vector<64x32xf32>
    %155 = arith.addf %151, %154 : vector<64x32xf32>
    %c1_80 = arith.constant 1 : index
    %c0_81 = arith.constant 0 : index
    %c0_82 = arith.constant 0 : index
    %156 = vector.load %arg5[%c1_80, %c0_81, %c0_82] : memref<3x1x32xf32, #tpu.memory_space<vmem>>, vector<1x1x32xf32>
    %157 = vector.shape_cast %156 : vector<1x1x32xf32> to vector<1x32xf32>
    %c1_83 = arith.constant 1 : index
    %c0_84 = arith.constant 0 : index
    %c0_85 = arith.constant 0 : index
    %c0_86 = arith.constant 0 : index
    %158 = vector.load %arg6[%c1_83, %c0_84, %c0_85, %c0_86] : memref<3x3x3x32xf32, #tpu.memory_space<vmem>>, vector<1x3x3x32xf32>
    %159 = vector.shape_cast %158 : vector<1x3x3x32xf32> to vector<3x3x32xf32>
    %160 = vector.shape_cast %155 : vector<64x32xf32> to vector<8x8x32xf32>
    %c1_87 = arith.constant 1 : index
    %c1_88 = arith.constant 1 : index
    %c0_89 = arith.constant 0 : index
    %161 = vector.load %arg22[%c1_87, %c1_88, %c0_89] : memref<10x10x32xf32, #tpu.memory_space<vmem>>, vector<8x8x32xf32>
    tpu.vector_store %arg22[%c1_87, %c1_88, %c0_89], %160 {strides = array<i32>} : memref<10x10x32xf32, #tpu.memory_space<vmem>>, vector<8x8x32xf32>,
    %162 = vector.shape_cast %157 : vector<1x32xf32> to vector<1x1x32xf32>
    %163 = vector.shape_cast %162 : vector<1x1x32xf32> to vector<1x1x32xf32>
    %164 = vector.broadcast %163 : vector<1x1x32xf32> to vector<1x10x32xf32>
    %165 = vector.shape_cast %157 : vector<1x32xf32> to vector<1x1x32xf32>
    %166 = vector.shape_cast %165 : vector<1x1x32xf32> to vector<1x1x32xf32>
    %167 = vector.broadcast %166 : vector<1x1x32xf32> to vector<10x1x32xf32>
    %c0_90 = arith.constant 0 : index
    %c0_91 = arith.constant 0 : index
    %c0_92 = arith.constant 0 : index
    %168 = vector.load %arg22[%c0_90, %c0_91, %c0_92] : memref<10x10x32xf32, #tpu.memory_space<vmem>>, vector<1x10x32xf32>
    tpu.vector_store %arg22[%c0_90, %c0_91, %c0_92], %164 {strides = array<i32>} : memref<10x10x32xf32, #tpu.memory_space<vmem>>, vector<1x10x32xf32>,
    %c9_93 = arith.constant 9 : index
    %c0_94 = arith.constant 0 : index
    %c0_95 = arith.constant 0 : index
    %169 = vector.load %arg22[%c9_93, %c0_94, %c0_95] : memref<10x10x32xf32, #tpu.memory_space<vmem>>, vector<1x10x32xf32>
    tpu.vector_store %arg22[%c9_93, %c0_94, %c0_95], %164 {strides = array<i32>} : memref<10x10x32xf32, #tpu.memory_space<vmem>>, vector<1x10x32xf32>,
    %c0_96 = arith.constant 0 : index
    %c0_97 = arith.constant 0 : index
    %c0_98 = arith.constant 0 : index
    %170 = vector.load %arg22[%c0_96, %c0_97, %c0_98] : memref<10x10x32xf32, #tpu.memory_space<vmem>>, vector<10x1x32xf32>
    tpu.vector_store %arg22[%c0_96, %c0_97, %c0_98], %167 {strides = array<i32>} : memref<10x10x32xf32, #tpu.memory_space<vmem>>, vector<10x1x32xf32>,
    %c0_99 = arith.constant 0 : index
    %c9_100 = arith.constant 9 : index
    %c0_101 = arith.constant 0 : index
    %171 = vector.load %arg22[%c0_99, %c9_100, %c0_101] : memref<10x10x32xf32, #tpu.memory_space<vmem>>, vector<10x1x32xf32>
    tpu.vector_store %arg22[%c0_99, %c9_100, %c0_101], %167 {strides = array<i32>} : memref<10x10x32xf32, #tpu.memory_space<vmem>>, vector<10x1x32xf32>,
    %c0_102 = arith.constant 0 : index
    %c0_103 = arith.constant 0 : index
    %c0_104 = arith.constant 0 : index
    %172 = vector.load %arg22[%c0_102, %c0_103, %c0_104] : memref<10x10x32xf32, #tpu.memory_space<vmem>>, vector<10x10x32xf32>
    %cst_105 = arith.constant 0.000000e+00 : f32
    %173 = vector.broadcast %cst_105 : f32 to vector<8x8x32xf32>
    %174 = vector.extract_strided_slice %172 {offsets = [0, 0, 0], sizes = [8, 8, 32], strides = [1, 1, 1]} : vector<10x10x32xf32> to vector<8x8x32xf32>
    %175 = vector.extract_strided_slice %159 {offsets = [0, 0, 0], sizes = [1, 1, 32], strides = [1, 1, 1]} : vector<3x3x32xf32> to vector<1x1x32xf32>
    %176 = vector.shape_cast %175 : vector<1x1x32xf32> to vector<32xf32>
    %177 = vector.shape_cast %176 : vector<32xf32> to vector<1x1x32xf32>
    %178 = vector.broadcast %177 : vector<1x1x32xf32> to vector<8x8x32xf32>
    %179 = arith.mulf %174, %178 : vector<8x8x32xf32>
    %180 = arith.addf %173, %179 : vector<8x8x32xf32>
    %181 = vector.extract_strided_slice %172 {offsets = [0, 1, 0], sizes = [8, 8, 32], strides = [1, 1, 1]} : vector<10x10x32xf32> to vector<8x8x32xf32>
    %182 = vector.extract_strided_slice %159 {offsets = [0, 1, 0], sizes = [1, 1, 32], strides = [1, 1, 1]} : vector<3x3x32xf32> to vector<1x1x32xf32>
    %183 = vector.shape_cast %182 : vector<1x1x32xf32> to vector<32xf32>
    %184 = vector.shape_cast %183 : vector<32xf32> to vector<1x1x32xf32>
    %185 = vector.broadcast %184 : vector<1x1x32xf32> to vector<8x8x32xf32>
    %186 = arith.mulf %181, %185 : vector<8x8x32xf32>
    %187 = arith.addf %180, %186 : vector<8x8x32xf32>
    %188 = vector.extract_strided_slice %172 {offsets = [0, 2, 0], sizes = [8, 8, 32], strides = [1, 1, 1]} : vector<10x10x32xf32> to vector<8x8x32xf32>
    %189 = vector.extract_strided_slice %159 {offsets = [0, 2, 0], sizes = [1, 1, 32], strides = [1, 1, 1]} : vector<3x3x32xf32> to vector<1x1x32xf32>
    %190 = vector.shape_cast %189 : vector<1x1x32xf32> to vector<32xf32>
    %191 = vector.shape_cast %190 : vector<32xf32> to vector<1x1x32xf32>
    %192 = vector.broadcast %191 : vector<1x1x32xf32> to vector<8x8x32xf32>
    %193 = arith.mulf %188, %192 : vector<8x8x32xf32>
    %194 = arith.addf %187, %193 : vector<8x8x32xf32>
    %195 = vector.extract_strided_slice %172 {offsets = [1, 0, 0], sizes = [8, 8, 32], strides = [1, 1, 1]} : vector<10x10x32xf32> to vector<8x8x32xf32>
    %196 = vector.extract_strided_slice %159 {offsets = [1, 0, 0], sizes = [1, 1, 32], strides = [1, 1, 1]} : vector<3x3x32xf32> to vector<1x1x32xf32>
    %197 = vector.shape_cast %196 : vector<1x1x32xf32> to vector<32xf32>
    %198 = vector.shape_cast %197 : vector<32xf32> to vector<1x1x32xf32>
    %199 = vector.broadcast %198 : vector<1x1x32xf32> to vector<8x8x32xf32>
    %200 = arith.mulf %195, %199 : vector<8x8x32xf32>
    %201 = arith.addf %194, %200 : vector<8x8x32xf32>
    %202 = vector.extract_strided_slice %172 {offsets = [1, 1, 0], sizes = [8, 8, 32], strides = [1, 1, 1]} : vector<10x10x32xf32> to vector<8x8x32xf32>
    %203 = vector.extract_strided_slice %159 {offsets = [1, 1, 0], sizes = [1, 1, 32], strides = [1, 1, 1]} : vector<3x3x32xf32> to vector<1x1x32xf32>
    %204 = vector.shape_cast %203 : vector<1x1x32xf32> to vector<32xf32>
    %205 = vector.shape_cast %204 : vector<32xf32> to vector<1x1x32xf32>
    %206 = vector.broadcast %205 : vector<1x1x32xf32> to vector<8x8x32xf32>
    %207 = arith.mulf %202, %206 : vector<8x8x32xf32>
    %208 = arith.addf %201, %207 : vector<8x8x32xf32>
    %209 = vector.extract_strided_slice %172 {offsets = [1, 2, 0], sizes = [8, 8, 32], strides = [1, 1, 1]} : vector<10x10x32xf32> to vector<8x8x32xf32>
    %210 = vector.extract_strided_slice %159 {offsets = [1, 2, 0], sizes = [1, 1, 32], strides = [1, 1, 1]} : vector<3x3x32xf32> to vector<1x1x32xf32>
    %211 = vector.shape_cast %210 : vector<1x1x32xf32> to vector<32xf32>
    %212 = vector.shape_cast %211 : vector<32xf32> to vector<1x1x32xf32>
    %213 = vector.broadcast %212 : vector<1x1x32xf32> to vector<8x8x32xf32>
    %214 = arith.mulf %209, %213 : vector<8x8x32xf32>
    %215 = arith.addf %208, %214 : vector<8x8x32xf32>
    %216 = vector.extract_strided_slice %172 {offsets = [2, 0, 0], sizes = [8, 8, 32], strides = [1, 1, 1]} : vector<10x10x32xf32> to vector<8x8x32xf32>
    %217 = vector.extract_strided_slice %159 {offsets = [2, 0, 0], sizes = [1, 1, 32], strides = [1, 1, 1]} : vector<3x3x32xf32> to vector<1x1x32xf32>
    %218 = vector.shape_cast %217 : vector<1x1x32xf32> to vector<32xf32>
    %219 = vector.shape_cast %218 : vector<32xf32> to vector<1x1x32xf32>
    %220 = vector.broadcast %219 : vector<1x1x32xf32> to vector<8x8x32xf32>
    %221 = arith.mulf %216, %220 : vector<8x8x32xf32>
    %222 = arith.addf %215, %221 : vector<8x8x32xf32>
    %223 = vector.extract_strided_slice %172 {offsets = [2, 1, 0], sizes = [8, 8, 32], strides = [1, 1, 1]} : vector<10x10x32xf32> to vector<8x8x32xf32>
    %224 = vector.extract_strided_slice %159 {offsets = [2, 1, 0], sizes = [1, 1, 32], strides = [1, 1, 1]} : vector<3x3x32xf32> to vector<1x1x32xf32>
    %225 = vector.shape_cast %224 : vector<1x1x32xf32> to vector<32xf32>
    %226 = vector.shape_cast %225 : vector<32xf32> to vector<1x1x32xf32>
    %227 = vector.broadcast %226 : vector<1x1x32xf32> to vector<8x8x32xf32>
    %228 = arith.mulf %223, %227 : vector<8x8x32xf32>
    %229 = arith.addf %222, %228 : vector<8x8x32xf32>
    %230 = vector.extract_strided_slice %172 {offsets = [2, 2, 0], sizes = [8, 8, 32], strides = [1, 1, 1]} : vector<10x10x32xf32> to vector<8x8x32xf32>
    %231 = vector.extract_strided_slice %159 {offsets = [2, 2, 0], sizes = [1, 1, 32], strides = [1, 1, 1]} : vector<3x3x32xf32> to vector<1x1x32xf32>
    %232 = vector.shape_cast %231 : vector<1x1x32xf32> to vector<32xf32>
    %233 = vector.shape_cast %232 : vector<32xf32> to vector<1x1x32xf32>
    %234 = vector.broadcast %233 : vector<1x1x32xf32> to vector<8x8x32xf32>
    %235 = arith.mulf %230, %234 : vector<8x8x32xf32>
    %236 = arith.addf %229, %235 : vector<8x8x32xf32>
    %237 = vector.shape_cast %236 : vector<8x8x32xf32> to vector<64x32xf32>
    %238 = arith.truncf %237 : vector<64x32xf32> to vector<64x32xbf16>
    %c1_106 = arith.constant 1 : index
    %c0_107 = arith.constant 0 : index
    %c0_108 = arith.constant 0 : index
    %239 = vector.load %arg7[%c1_106, %c0_107, %c0_108] : memref<3x32x32xbf16, #tpu.memory_space<vmem>>, vector<1x32x32xbf16>
    %240 = vector.shape_cast %239 : vector<1x32x32xbf16> to vector<32x32xbf16>
    %cst_109 = arith.constant dense<0.000000e+00> : vector<64x32xf32>
    %241 = tpu.matmul %238, %240, %cst_109 {dimension_numbers = #tpu.dot_dimension_numbers<[1], [0], [0], [1], [0, 0, 1, 1], [], []>} : vector<64x32xbf16>, vector<32x32xbf16>, vector<64x32xf32> -> vector<64x32xf32>
    %c1_110 = arith.constant 1 : index
    %c0_111 = arith.constant 0 : index
    %c0_112 = arith.constant 0 : index
    %242 = vector.load %arg8[%c1_110, %c0_111, %c0_112] : memref<3x1x32xf32, #tpu.memory_space<vmem>>, vector<1x1x32xf32>
    %243 = vector.shape_cast %242 : vector<1x1x32xf32> to vector<1x32xf32>
    %244 = vector.broadcast %243 : vector<1x32xf32> to vector<64x32xf32>
    %245 = arith.mulf %241, %244 : vector<64x32xf32>
    %c1_113 = arith.constant 1 : index
    %c0_114 = arith.constant 0 : index
    %c0_115 = arith.constant 0 : index
    %246 = vector.load %arg9[%c1_113, %c0_114, %c0_115] : memref<3x1x32xf32, #tpu.memory_space<vmem>>, vector<1x1x32xf32>
    %247 = vector.shape_cast %246 : vector<1x1x32xf32> to vector<1x32xf32>
    %248 = vector.broadcast %247 : vector<1x32xf32> to vector<64x32xf32>
    %249 = arith.addf %245, %248 : vector<64x32xf32>
    %c1_116 = arith.constant 1 : index
    %c0_117 = arith.constant 0 : index
    %c0_118 = arith.constant 0 : index
    %250 = vector.load %arg20[%c1_116, %c0_117, %c0_118] : memref<3x64x32xf32, #tpu.memory_space<vmem>>, vector<1x64x32xf32>
    %251 = vector.shape_cast %250 : vector<1x64x32xf32> to vector<64x32xf32>
    %c1_119 = arith.constant 1 : index
    %c0_120 = arith.constant 0 : index
    %c0_121 = arith.constant 0 : index
    %252 = vector.load %arg20[%c1_119, %c0_120, %c0_121] : memref<3x64x32xf32, #tpu.memory_space<vmem>>, vector<1x64x32xf32>
    %253 = vector.shape_cast %252 : vector<1x64x32xf32> to vector<64x32xf32>
    %254 = arith.subf %249, %253 : vector<64x32xf32>
    %cst_122 = arith.constant 5.000000e-01 : f32
    %255 = vector.broadcast %cst_122 : f32 to vector<64x32xf32>
    %256 = arith.mulf %254, %255 : vector<64x32xf32>
    %257 = arith.addf %251, %256 : vector<64x32xf32>
    %cst_123 = arith.constant 1.000000e+00 : f32
    %258 = vector.broadcast %cst_123 : f32 to vector<64x32xf32>
    %259 = arith.cmpf oge, %257, %258 : vector<64x32xf32>
    %cst_124 = arith.constant 0.000000e+00 : f32
    %260 = vector.broadcast %cst_124 : f32 to vector<64x32xf32>
    %261 = arith.select %259, %260, %257 : vector<64x32xi1>, vector<64x32xf32>
    %c1_125 = arith.constant 1 : index
    %c0_126 = arith.constant 0 : index
    %c0_127 = arith.constant 0 : index
    %262 = vector.load %arg20[%c1_125, %c0_126, %c0_127] : memref<3x64x32xf32, #tpu.memory_space<vmem>>, vector<1x64x32xf32>
    %263 = vector.shape_cast %262 : vector<1x64x32xf32> to vector<64x32xf32>
    %264 = vector.shape_cast %261 : vector<64x32xf32> to vector<1x64x32xf32>
    tpu.vector_store %arg20[%c1_125, %c0_126, %c0_127], %264 {strides = array<i32>} : memref<3x64x32xf32, #tpu.memory_space<vmem>>, vector<1x64x32xf32>,
    %cst_128 = arith.constant 1.000000e+00 : f32
    %265 = vector.broadcast %cst_128 : f32 to vector<64x32xf32>
    %266 = arith.cmpf oge, %257, %265 : vector<64x32xf32>
    %267 = arith.extui %266 : vector<64x32xi1> to vector<64x32xi32>
    %268 = arith.sitofp %267 : vector<64x32xi32> to vector<64x32xf32>
    %c2 = arith.constant 2 : index
    %c0_129 = arith.constant 0 : index
    %c0_130 = arith.constant 0 : index
    %269 = vector.load %arg3[%c2, %c0_129, %c0_130] : memref<3x32x32xbf16, #tpu.memory_space<vmem>>, vector<1x32x32xbf16>
    %270 = vector.shape_cast %269 : vector<1x32x32xbf16> to vector<32x32xbf16>
    %cst_131 = arith.constant dense<0.000000e+00> : vector<64x32xf32>
    %271 = tpu.matmul %20, %270, %cst_131 {dimension_numbers = #tpu.dot_dimension_numbers<[1], [0], [0], [1], [0, 0, 1, 1], [], []>} : vector<64x32xbf16>, vector<32x32xbf16>, vector<64x32xf32> -> vector<64x32xf32>
    %c2_132 = arith.constant 2 : index
    %c0_133 = arith.constant 0 : index
    %c0_134 = arith.constant 0 : index
    %272 = vector.load %arg4[%c2_132, %c0_133, %c0_134] : memref<3x1x32xf32, #tpu.memory_space<vmem>>, vector<1x1x32xf32>
    %273 = vector.shape_cast %272 : vector<1x1x32xf32> to vector<1x32xf32>
    %274 = vector.broadcast %273 : vector<1x32xf32> to vector<64x32xf32>
    %275 = arith.mulf %271, %274 : vector<64x32xf32>
    %c2_135 = arith.constant 2 : index
    %c0_136 = arith.constant 0 : index
    %c0_137 = arith.constant 0 : index
    %276 = vector.load %arg5[%c2_135, %c0_136, %c0_137] : memref<3x1x32xf32, #tpu.memory_space<vmem>>, vector<1x1x32xf32>
    %277 = vector.shape_cast %276 : vector<1x1x32xf32> to vector<1x32xf32>
    %278 = vector.broadcast %277 : vector<1x32xf32> to vector<64x32xf32>
    %279 = arith.addf %275, %278 : vector<64x32xf32>
    %c2_138 = arith.constant 2 : index
    %c0_139 = arith.constant 0 : index
    %c0_140 = arith.constant 0 : index
    %280 = vector.load %arg5[%c2_138, %c0_139, %c0_140] : memref<3x1x32xf32, #tpu.memory_space<vmem>>, vector<1x1x32xf32>
    %281 = vector.shape_cast %280 : vector<1x1x32xf32> to vector<1x32xf32>
    %c2_141 = arith.constant 2 : index
    %c0_142 = arith.constant 0 : index
    %c0_143 = arith.constant 0 : index
    %c0_144 = arith.constant 0 : index
    %282 = vector.load %arg6[%c2_141, %c0_142, %c0_143, %c0_144] : memref<3x3x3x32xf32, #tpu.memory_space<vmem>>, vector<1x3x3x32xf32>
    %283 = vector.shape_cast %282 : vector<1x3x3x32xf32> to vector<3x3x32xf32>
    %284 = vector.shape_cast %279 : vector<64x32xf32> to vector<8x8x32xf32>
    %c1_145 = arith.constant 1 : index
    %c1_146 = arith.constant 1 : index
    %c0_147 = arith.constant 0 : index
    %285 = vector.load %arg22[%c1_145, %c1_146, %c0_147] : memref<10x10x32xf32, #tpu.memory_space<vmem>>, vector<8x8x32xf32>
    tpu.vector_store %arg22[%c1_145, %c1_146, %c0_147], %284 {strides = array<i32>} : memref<10x10x32xf32, #tpu.memory_space<vmem>>, vector<8x8x32xf32>,
    %286 = vector.shape_cast %281 : vector<1x32xf32> to vector<1x1x32xf32>
    %287 = vector.shape_cast %286 : vector<1x1x32xf32> to vector<1x1x32xf32>
    %288 = vector.broadcast %287 : vector<1x1x32xf32> to vector<1x10x32xf32>
    %289 = vector.shape_cast %281 : vector<1x32xf32> to vector<1x1x32xf32>
    %290 = vector.shape_cast %289 : vector<1x1x32xf32> to vector<1x1x32xf32>
    %291 = vector.broadcast %290 : vector<1x1x32xf32> to vector<10x1x32xf32>
    %c0_148 = arith.constant 0 : index
    %c0_149 = arith.constant 0 : index
    %c0_150 = arith.constant 0 : index
    %292 = vector.load %arg22[%c0_148, %c0_149, %c0_150] : memref<10x10x32xf32, #tpu.memory_space<vmem>>, vector<1x10x32xf32>
    tpu.vector_store %arg22[%c0_148, %c0_149, %c0_150], %288 {strides = array<i32>} : memref<10x10x32xf32, #tpu.memory_space<vmem>>, vector<1x10x32xf32>,
    %c9_151 = arith.constant 9 : index
    %c0_152 = arith.constant 0 : index
    %c0_153 = arith.constant 0 : index
    %293 = vector.load %arg22[%c9_151, %c0_152, %c0_153] : memref<10x10x32xf32, #tpu.memory_space<vmem>>, vector<1x10x32xf32>
    tpu.vector_store %arg22[%c9_151, %c0_152, %c0_153], %288 {strides = array<i32>} : memref<10x10x32xf32, #tpu.memory_space<vmem>>, vector<1x10x32xf32>,
    %c0_154 = arith.constant 0 : index
    %c0_155 = arith.constant 0 : index
    %c0_156 = arith.constant 0 : index
    %294 = vector.load %arg22[%c0_154, %c0_155, %c0_156] : memref<10x10x32xf32, #tpu.memory_space<vmem>>, vector<10x1x32xf32>
    tpu.vector_store %arg22[%c0_154, %c0_155, %c0_156], %291 {strides = array<i32>} : memref<10x10x32xf32, #tpu.memory_space<vmem>>, vector<10x1x32xf32>,
    %c0_157 = arith.constant 0 : index
    %c9_158 = arith.constant 9 : index
    %c0_159 = arith.constant 0 : index
    %295 = vector.load %arg22[%c0_157, %c9_158, %c0_159] : memref<10x10x32xf32, #tpu.memory_space<vmem>>, vector<10x1x32xf32>
    tpu.vector_store %arg22[%c0_157, %c9_158, %c0_159], %291 {strides = array<i32>} : memref<10x10x32xf32, #tpu.memory_space<vmem>>, vector<10x1x32xf32>,
    %c0_160 = arith.constant 0 : index
    %c0_161 = arith.constant 0 : index
    %c0_162 = arith.constant 0 : index
    %296 = vector.load %arg22[%c0_160, %c0_161, %c0_162] : memref<10x10x32xf32, #tpu.memory_space<vmem>>, vector<10x10x32xf32>
    %cst_163 = arith.constant 0.000000e+00 : f32
    %297 = vector.broadcast %cst_163 : f32 to vector<8x8x32xf32>
    %298 = vector.extract_strided_slice %296 {offsets = [0, 0, 0], sizes = [8, 8, 32], strides = [1, 1, 1]} : vector<10x10x32xf32> to vector<8x8x32xf32>
    %299 = vector.extract_strided_slice %283 {offsets = [0, 0, 0], sizes = [1, 1, 32], strides = [1, 1, 1]} : vector<3x3x32xf32> to vector<1x1x32xf32>
    %300 = vector.shape_cast %299 : vector<1x1x32xf32> to vector<32xf32>
    %301 = vector.shape_cast %300 : vector<32xf32> to vector<1x1x32xf32>
    %302 = vector.broadcast %301 : vector<1x1x32xf32> to vector<8x8x32xf32>
    %303 = arith.mulf %298, %302 : vector<8x8x32xf32>
    %304 = arith.addf %297, %303 : vector<8x8x32xf32>
    %305 = vector.extract_strided_slice %296 {offsets = [0, 1, 0], sizes = [8, 8, 32], strides = [1, 1, 1]} : vector<10x10x32xf32> to vector<8x8x32xf32>
    %306 = vector.extract_strided_slice %283 {offsets = [0, 1, 0], sizes = [1, 1, 32], strides = [1, 1, 1]} : vector<3x3x32xf32> to vector<1x1x32xf32>
    %307 = vector.shape_cast %306 : vector<1x1x32xf32> to vector<32xf32>
    %308 = vector.shape_cast %307 : vector<32xf32> to vector<1x1x32xf32>
    %309 = vector.broadcast %308 : vector<1x1x32xf32> to vector<8x8x32xf32>
    %310 = arith.mulf %305, %309 : vector<8x8x32xf32>
    %311 = arith.addf %304, %310 : vector<8x8x32xf32>
    %312 = vector.extract_strided_slice %296 {offsets = [0, 2, 0], sizes = [8, 8, 32], strides = [1, 1, 1]} : vector<10x10x32xf32> to vector<8x8x32xf32>
    %313 = vector.extract_strided_slice %283 {offsets = [0, 2, 0], sizes = [1, 1, 32], strides = [1, 1, 1]} : vector<3x3x32xf32> to vector<1x1x32xf32>
    %314 = vector.shape_cast %313 : vector<1x1x32xf32> to vector<32xf32>
    %315 = vector.shape_cast %314 : vector<32xf32> to vector<1x1x32xf32>
    %316 = vector.broadcast %315 : vector<1x1x32xf32> to vector<8x8x32xf32>
    %317 = arith.mulf %312, %316 : vector<8x8x32xf32>
    %318 = arith.addf %311, %317 : vector<8x8x32xf32>
    %319 = vector.extract_strided_slice %296 {offsets = [1, 0, 0], sizes = [8, 8, 32], strides = [1, 1, 1]} : vector<10x10x32xf32> to vector<8x8x32xf32>
    %320 = vector.extract_strided_slice %283 {offsets = [1, 0, 0], sizes = [1, 1, 32], strides = [1, 1, 1]} : vector<3x3x32xf32> to vector<1x1x32xf32>
    %321 = vector.shape_cast %320 : vector<1x1x32xf32> to vector<32xf32>
    %322 = vector.shape_cast %321 : vector<32xf32> to vector<1x1x32xf32>
    %323 = vector.broadcast %322 : vector<1x1x32xf32> to vector<8x8x32xf32>
    %324 = arith.mulf %319, %323 : vector<8x8x32xf32>
    %325 = arith.addf %318, %324 : vector<8x8x32xf32>
    %326 = vector.extract_strided_slice %296 {offsets = [1, 1, 0], sizes = [8, 8, 32], strides = [1, 1, 1]} : vector<10x10x32xf32> to vector<8x8x32xf32>
    %327 = vector.extract_strided_slice %283 {offsets = [1, 1, 0], sizes = [1, 1, 32], strides = [1, 1, 1]} : vector<3x3x32xf32> to vector<1x1x32xf32>
    %328 = vector.shape_cast %327 : vector<1x1x32xf32> to vector<32xf32>
    %329 = vector.shape_cast %328 : vector<32xf32> to vector<1x1x32xf32>
    %330 = vector.broadcast %329 : vector<1x1x32xf32> to vector<8x8x32xf32>
    %331 = arith.mulf %326, %330 : vector<8x8x32xf32>
    %332 = arith.addf %325, %331 : vector<8x8x32xf32>
    %333 = vector.extract_strided_slice %296 {offsets = [1, 2, 0], sizes = [8, 8, 32], strides = [1, 1, 1]} : vector<10x10x32xf32> to vector<8x8x32xf32>
    %334 = vector.extract_strided_slice %283 {offsets = [1, 2, 0], sizes = [1, 1, 32], strides = [1, 1, 1]} : vector<3x3x32xf32> to vector<1x1x32xf32>
    %335 = vector.shape_cast %334 : vector<1x1x32xf32> to vector<32xf32>
    %336 = vector.shape_cast %335 : vector<32xf32> to vector<1x1x32xf32>
    %337 = vector.broadcast %336 : vector<1x1x32xf32> to vector<8x8x32xf32>
    %338 = arith.mulf %333, %337 : vector<8x8x32xf32>
    %339 = arith.addf %332, %338 : vector<8x8x32xf32>
    %340 = vector.extract_strided_slice %296 {offsets = [2, 0, 0], sizes = [8, 8, 32], strides = [1, 1, 1]} : vector<10x10x32xf32> to vector<8x8x32xf32>
    %341 = vector.extract_strided_slice %283 {offsets = [2, 0, 0], sizes = [1, 1, 32], strides = [1, 1, 1]} : vector<3x3x32xf32> to vector<1x1x32xf32>
    %342 = vector.shape_cast %341 : vector<1x1x32xf32> to vector<32xf32>
    %343 = vector.shape_cast %342 : vector<32xf32> to vector<1x1x32xf32>
    %344 = vector.broadcast %343 : vector<1x1x32xf32> to vector<8x8x32xf32>
    %345 = arith.mulf %340, %344 : vector<8x8x32xf32>
    %346 = arith.addf %339, %345 : vector<8x8x32xf32>
    %347 = vector.extract_strided_slice %296 {offsets = [2, 1, 0], sizes = [8, 8, 32], strides = [1, 1, 1]} : vector<10x10x32xf32> to vector<8x8x32xf32>
    %348 = vector.extract_strided_slice %283 {offsets = [2, 1, 0], sizes = [1, 1, 32], strides = [1, 1, 1]} : vector<3x3x32xf32> to vector<1x1x32xf32>
    %349 = vector.shape_cast %348 : vector<1x1x32xf32> to vector<32xf32>
    %350 = vector.shape_cast %349 : vector<32xf32> to vector<1x1x32xf32>
    %351 = vector.broadcast %350 : vector<1x1x32xf32> to vector<8x8x32xf32>
    %352 = arith.mulf %347, %351 : vector<8x8x32xf32>
    %353 = arith.addf %346, %352 : vector<8x8x32xf32>
    %354 = vector.extract_strided_slice %296 {offsets = [2, 2, 0], sizes = [8, 8, 32], strides = [1, 1, 1]} : vector<10x10x32xf32> to vector<8x8x32xf32>
    %355 = vector.extract_strided_slice %283 {offsets = [2, 2, 0], sizes = [1, 1, 32], strides = [1, 1, 1]} : vector<3x3x32xf32> to vector<1x1x32xf32>
    %356 = vector.shape_cast %355 : vector<1x1x32xf32> to vector<32xf32>
    %357 = vector.shape_cast %356 : vector<32xf32> to vector<1x1x32xf32>
    %358 = vector.broadcast %357 : vector<1x1x32xf32> to vector<8x8x32xf32>
    %359 = arith.mulf %354, %358 : vector<8x8x32xf32>
    %360 = arith.addf %353, %359 : vector<8x8x32xf32>
    %361 = vector.shape_cast %360 : vector<8x8x32xf32> to vector<64x32xf32>
    %362 = arith.truncf %361 : vector<64x32xf32> to vector<64x32xbf16>
    %c2_164 = arith.constant 2 : index
    %c0_165 = arith.constant 0 : index
    %c0_166 = arith.constant 0 : index
    %363 = vector.load %arg7[%c2_164, %c0_165, %c0_166] : memref<3x32x32xbf16, #tpu.memory_space<vmem>>, vector<1x32x32xbf16>
    %364 = vector.shape_cast %363 : vector<1x32x32xbf16> to vector<32x32xbf16>
    %cst_167 = arith.constant dense<0.000000e+00> : vector<64x32xf32>
    %365 = tpu.matmul %362, %364, %cst_167 {dimension_numbers = #tpu.dot_dimension_numbers<[1], [0], [0], [1], [0, 0, 1, 1], [], []>} : vector<64x32xbf16>, vector<32x32xbf16>, vector<64x32xf32> -> vector<64x32xf32>
    %c2_168 = arith.constant 2 : index
    %c0_169 = arith.constant 0 : index
    %c0_170 = arith.constant 0 : index
    %366 = vector.load %arg8[%c2_168, %c0_169, %c0_170] : memref<3x1x32xf32, #tpu.memory_space<vmem>>, vector<1x1x32xf32>
    %367 = vector.shape_cast %366 : vector<1x1x32xf32> to vector<1x32xf32>
    %368 = vector.broadcast %367 : vector<1x32xf32> to vector<64x32xf32>
    %369 = arith.mulf %365, %368 : vector<64x32xf32>
    %c2_171 = arith.constant 2 : index
    %c0_172 = arith.constant 0 : index
    %c0_173 = arith.constant 0 : index
    %370 = vector.load %arg9[%c2_171, %c0_172, %c0_173] : memref<3x1x32xf32, #tpu.memory_space<vmem>>, vector<1x1x32xf32>
    %371 = vector.shape_cast %370 : vector<1x1x32xf32> to vector<1x32xf32>
    %372 = vector.broadcast %371 : vector<1x32xf32> to vector<64x32xf32>
    %373 = arith.addf %369, %372 : vector<64x32xf32>
    %c2_174 = arith.constant 2 : index
    %c0_175 = arith.constant 0 : index
    %c0_176 = arith.constant 0 : index
    %374 = vector.load %arg20[%c2_174, %c0_175, %c0_176] : memref<3x64x32xf32, #tpu.memory_space<vmem>>, vector<1x64x32xf32>
    %375 = vector.shape_cast %374 : vector<1x64x32xf32> to vector<64x32xf32>
    %c2_177 = arith.constant 2 : index
    %c0_178 = arith.constant 0 : index
    %c0_179 = arith.constant 0 : index
    %376 = vector.load %arg20[%c2_177, %c0_178, %c0_179] : memref<3x64x32xf32, #tpu.memory_space<vmem>>, vector<1x64x32xf32>
    %377 = vector.shape_cast %376 : vector<1x64x32xf32> to vector<64x32xf32>
    %378 = arith.subf %373, %377 : vector<64x32xf32>
    %cst_180 = arith.constant 5.000000e-01 : f32
    %379 = vector.broadcast %cst_180 : f32 to vector<64x32xf32>
    %380 = arith.mulf %378, %379 : vector<64x32xf32>
    %381 = arith.addf %375, %380 : vector<64x32xf32>
    %cst_181 = arith.constant 1.000000e+00 : f32
    %382 = vector.broadcast %cst_181 : f32 to vector<64x32xf32>
    %383 = arith.cmpf oge, %381, %382 : vector<64x32xf32>
    %cst_182 = arith.constant 0.000000e+00 : f32
    %384 = vector.broadcast %cst_182 : f32 to vector<64x32xf32>
    %385 = arith.select %383, %384, %381 : vector<64x32xi1>, vector<64x32xf32>
    %c2_183 = arith.constant 2 : index
    %c0_184 = arith.constant 0 : index
    %c0_185 = arith.constant 0 : index
    %386 = vector.load %arg20[%c2_183, %c0_184, %c0_185] : memref<3x64x32xf32, #tpu.memory_space<vmem>>, vector<1x64x32xf32>
    %387 = vector.shape_cast %386 : vector<1x64x32xf32> to vector<64x32xf32>
    %388 = vector.shape_cast %385 : vector<64x32xf32> to vector<1x64x32xf32>
    tpu.vector_store %arg20[%c2_183, %c0_184, %c0_185], %388 {strides = array<i32>} : memref<3x64x32xf32, #tpu.memory_space<vmem>>, vector<1x64x32xf32>,
    %cst_186 = arith.constant 1.000000e+00 : f32
    %389 = vector.broadcast %cst_186 : f32 to vector<64x32xf32>
    %390 = arith.cmpf oge, %381, %389 : vector<64x32xf32>
    %391 = arith.extui %390 : vector<64x32xi1> to vector<64x32xi32>
    %392 = arith.sitofp %391 : vector<64x32xi32> to vector<64x32xf32>
    %393 = arith.truncf %144 : vector<64x32xf32> to vector<64x32xbf16>
    %394 = tpu.transpose %268, [1, 0] : vector<64x32xf32> -> vector<32x64xf32>
    %395 = arith.truncf %394 : vector<32x64xf32> to vector<32x64xbf16>
    %396 = arith.truncf %392 : vector<64x32xf32> to vector<64x32xbf16>
    %cst_187 = arith.constant dense<0.000000e+00> : vector<32x32xf32>
    %397 = tpu.matmul %395, %396, %cst_187 {dimension_numbers = #tpu.dot_dimension_numbers<[1], [0], [0], [1], [0, 0, 1, 1], [], []>} : vector<32x64xbf16>, vector<64x32xbf16>, vector<32x32xf32> -> vector<32x32xf32>
    %c0_188 = arith.constant 0 : index
    %c0_189 = arith.constant 0 : index
    %398 = vector.load %arg10[%c0_188, %c0_189] : memref<32x32xf32, #tpu.memory_space<vmem>>, vector<32x32xf32>
    %399 = arith.mulf %397, %398 : vector<32x32xf32>
    %400 = arith.truncf %399 : vector<32x32xf32> to vector<32x32xbf16>
    %cst_190 = arith.constant dense<0.000000e+00> : vector<64x32xf32>
    %401 = tpu.matmul %393, %400, %cst_190 {dimension_numbers = #tpu.dot_dimension_numbers<[1], [0], [0], [1], [0, 0, 1, 1], [], []>} : vector<64x32xbf16>, vector<32x32xbf16>, vector<64x32xf32> -> vector<64x32xf32>
    %c0_191 = arith.constant 0 : index
    %c0_192 = arith.constant 0 : index
    %402 = vector.load %arg21[%c0_191, %c0_192] : memref<64x32xf32, #tpu.memory_space<vmem>>, vector<64x32xf32>
    %c0_193 = arith.constant 0 : index
    %c0_194 = arith.constant 0 : index
    %403 = vector.load %arg21[%c0_193, %c0_194] : memref<64x32xf32, #tpu.memory_space<vmem>>, vector<64x32xf32>
    %404 = arith.subf %401, %403 : vector<64x32xf32>
    %cst_195 = arith.constant 5.000000e-01 : f32
    %405 = vector.broadcast %cst_195 : f32 to vector<64x32xf32>
    %406 = arith.mulf %404, %405 : vector<64x32xf32>
    %407 = arith.addf %402, %406 : vector<64x32xf32>
    %cst_196 = arith.constant 4.000000e+00 : f32
    %408 = vector.broadcast %cst_196 : f32 to vector<64x32xf32>
    %409 = arith.cmpf oge, %407, %408 : vector<64x32xf32>
    %cst_197 = arith.constant 0.000000e+00 : f32
    %410 = vector.broadcast %cst_197 : f32 to vector<64x32xf32>
    %411 = arith.select %409, %410, %407 : vector<64x32xi1>, vector<64x32xf32>
    %c0_198 = arith.constant 0 : index
    %c0_199 = arith.constant 0 : index
    %412 = vector.load %arg21[%c0_198, %c0_199] : memref<64x32xf32, #tpu.memory_space<vmem>>, vector<64x32xf32>
    tpu.vector_store %arg21[%c0_198, %c0_199], %411 {strides = array<i32>} : memref<64x32xf32, #tpu.memory_space<vmem>>, vector<64x32xf32>,
    %cst_200 = arith.constant 4.000000e+00 : f32
    %413 = vector.broadcast %cst_200 : f32 to vector<64x32xf32>
    %414 = arith.cmpf oge, %407, %413 : vector<64x32xf32>
    %415 = arith.extui %414 : vector<64x32xi1> to vector<64x32xi32>
    %416 = arith.sitofp %415 : vector<64x32xi32> to vector<64x32xf32>
    %417 = arith.truncf %416 : vector<64x32xf32> to vector<64x32xbf16>
    %c0_201 = arith.constant 0 : index
    %c0_202 = arith.constant 0 : index
    %418 = vector.load %arg11[%c0_201, %c0_202] : memref<32x32xbf16, #tpu.memory_space<vmem>>, vector<32x32xbf16>
    %cst_203 = arith.constant dense<0.000000e+00> : vector<64x32xf32>
    %419 = tpu.matmul %417, %418, %cst_203 {dimension_numbers = #tpu.dot_dimension_numbers<[1], [0], [0], [1], [0, 0, 1, 1], [], []>} : vector<64x32xbf16>, vector<32x32xbf16>, vector<64x32xf32> -> vector<64x32xf32>
    %c0_204 = arith.constant 0 : index
    %c0_205 = arith.constant 0 : index
    %420 = vector.load %arg12[%c0_204, %c0_205] : memref<1x32xf32, #tpu.memory_space<vmem>>, vector<1x32xf32>
    %421 = vector.broadcast %420 : vector<1x32xf32> to vector<64x32xf32>
    %422 = arith.mulf %419, %421 : vector<64x32xf32>
    %c0_206 = arith.constant 0 : index
    %c0_207 = arith.constant 0 : index
    %423 = vector.load %arg13[%c0_206, %c0_207] : memref<1x32xf32, #tpu.memory_space<vmem>>, vector<1x32xf32>
    %424 = vector.broadcast %423 : vector<1x32xf32> to vector<64x32xf32>
    %425 = arith.addf %422, %424 : vector<64x32xf32>
    %c0_208 = arith.constant 0 : index
    %c0_209 = arith.constant 0 : index
    %426 = vector.load %arg13[%c0_208, %c0_209] : memref<1x32xf32, #tpu.memory_space<vmem>>, vector<1x32xf32>
    %c0_210 = arith.constant 0 : index
    %c0_211 = arith.constant 0 : index
    %c0_212 = arith.constant 0 : index
    %427 = vector.load %arg14[%c0_210, %c0_211, %c0_212] : memref<3x3x32xf32, #tpu.memory_space<vmem>>, vector<3x3x32xf32>
    %428 = vector.shape_cast %425 : vector<64x32xf32> to vector<8x8x32xf32>
    %c1_213 = arith.constant 1 : index
    %c1_214 = arith.constant 1 : index
    %c0_215 = arith.constant 0 : index
    %429 = vector.load %arg22[%c1_213, %c1_214, %c0_215] : memref<10x10x32xf32, #tpu.memory_space<vmem>>, vector<8x8x32xf32>
    tpu.vector_store %arg22[%c1_213, %c1_214, %c0_215], %428 {strides = array<i32>} : memref<10x10x32xf32, #tpu.memory_space<vmem>>, vector<8x8x32xf32>,
    %430 = vector.shape_cast %426 : vector<1x32xf32> to vector<1x1x32xf32>
    %431 = vector.shape_cast %430 : vector<1x1x32xf32> to vector<1x1x32xf32>
    %432 = vector.broadcast %431 : vector<1x1x32xf32> to vector<1x10x32xf32>
    %433 = vector.shape_cast %426 : vector<1x32xf32> to vector<1x1x32xf32>
    %434 = vector.shape_cast %433 : vector<1x1x32xf32> to vector<1x1x32xf32>
    %435 = vector.broadcast %434 : vector<1x1x32xf32> to vector<10x1x32xf32>
    %c0_216 = arith.constant 0 : index
    %c0_217 = arith.constant 0 : index
    %c0_218 = arith.constant 0 : index
    %436 = vector.load %arg22[%c0_216, %c0_217, %c0_218] : memref<10x10x32xf32, #tpu.memory_space<vmem>>, vector<1x10x32xf32>
    tpu.vector_store %arg22[%c0_216, %c0_217, %c0_218], %432 {strides = array<i32>} : memref<10x10x32xf32, #tpu.memory_space<vmem>>, vector<1x10x32xf32>,
    %c9_219 = arith.constant 9 : index
    %c0_220 = arith.constant 0 : index
    %c0_221 = arith.constant 0 : index
    %437 = vector.load %arg22[%c9_219, %c0_220, %c0_221] : memref<10x10x32xf32, #tpu.memory_space<vmem>>, vector<1x10x32xf32>
    tpu.vector_store %arg22[%c9_219, %c0_220, %c0_221], %432 {strides = array<i32>} : memref<10x10x32xf32, #tpu.memory_space<vmem>>, vector<1x10x32xf32>,
    %c0_222 = arith.constant 0 : index
    %c0_223 = arith.constant 0 : index
    %c0_224 = arith.constant 0 : index
    %438 = vector.load %arg22[%c0_222, %c0_223, %c0_224] : memref<10x10x32xf32, #tpu.memory_space<vmem>>, vector<10x1x32xf32>
    tpu.vector_store %arg22[%c0_222, %c0_223, %c0_224], %435 {strides = array<i32>} : memref<10x10x32xf32, #tpu.memory_space<vmem>>, vector<10x1x32xf32>,
    %c0_225 = arith.constant 0 : index
    %c9_226 = arith.constant 9 : index
    %c0_227 = arith.constant 0 : index
    %439 = vector.load %arg22[%c0_225, %c9_226, %c0_227] : memref<10x10x32xf32, #tpu.memory_space<vmem>>, vector<10x1x32xf32>
    tpu.vector_store %arg22[%c0_225, %c9_226, %c0_227], %435 {strides = array<i32>} : memref<10x10x32xf32, #tpu.memory_space<vmem>>, vector<10x1x32xf32>,
    %c0_228 = arith.constant 0 : index
    %c0_229 = arith.constant 0 : index
    %c0_230 = arith.constant 0 : index
    %440 = vector.load %arg22[%c0_228, %c0_229, %c0_230] : memref<10x10x32xf32, #tpu.memory_space<vmem>>, vector<10x10x32xf32>
    %cst_231 = arith.constant 0.000000e+00 : f32
    %441 = vector.broadcast %cst_231 : f32 to vector<8x8x32xf32>
    %442 = vector.extract_strided_slice %440 {offsets = [0, 0, 0], sizes = [8, 8, 32], strides = [1, 1, 1]} : vector<10x10x32xf32> to vector<8x8x32xf32>
    %443 = vector.extract_strided_slice %427 {offsets = [0, 0, 0], sizes = [1, 1, 32], strides = [1, 1, 1]} : vector<3x3x32xf32> to vector<1x1x32xf32>
    %444 = vector.shape_cast %443 : vector<1x1x32xf32> to vector<32xf32>
    %445 = vector.shape_cast %444 : vector<32xf32> to vector<1x1x32xf32>
    %446 = vector.broadcast %445 : vector<1x1x32xf32> to vector<8x8x32xf32>
    %447 = arith.mulf %442, %446 : vector<8x8x32xf32>
    %448 = arith.addf %441, %447 : vector<8x8x32xf32>
    %449 = vector.extract_strided_slice %440 {offsets = [0, 1, 0], sizes = [8, 8, 32], strides = [1, 1, 1]} : vector<10x10x32xf32> to vector<8x8x32xf32>
    %450 = vector.extract_strided_slice %427 {offsets = [0, 1, 0], sizes = [1, 1, 32], strides = [1, 1, 1]} : vector<3x3x32xf32> to vector<1x1x32xf32>
    %451 = vector.shape_cast %450 : vector<1x1x32xf32> to vector<32xf32>
    %452 = vector.shape_cast %451 : vector<32xf32> to vector<1x1x32xf32>
    %453 = vector.broadcast %452 : vector<1x1x32xf32> to vector<8x8x32xf32>
    %454 = arith.mulf %449, %453 : vector<8x8x32xf32>
    %455 = arith.addf %448, %454 : vector<8x8x32xf32>
    %456 = vector.extract_strided_slice %440 {offsets = [0, 2, 0], sizes = [8, 8, 32], strides = [1, 1, 1]} : vector<10x10x32xf32> to vector<8x8x32xf32>
    %457 = vector.extract_strided_slice %427 {offsets = [0, 2, 0], sizes = [1, 1, 32], strides = [1, 1, 1]} : vector<3x3x32xf32> to vector<1x1x32xf32>
    %458 = vector.shape_cast %457 : vector<1x1x32xf32> to vector<32xf32>
    %459 = vector.shape_cast %458 : vector<32xf32> to vector<1x1x32xf32>
    %460 = vector.broadcast %459 : vector<1x1x32xf32> to vector<8x8x32xf32>
    %461 = arith.mulf %456, %460 : vector<8x8x32xf32>
    %462 = arith.addf %455, %461 : vector<8x8x32xf32>
    %463 = vector.extract_strided_slice %440 {offsets = [1, 0, 0], sizes = [8, 8, 32], strides = [1, 1, 1]} : vector<10x10x32xf32> to vector<8x8x32xf32>
    %464 = vector.extract_strided_slice %427 {offsets = [1, 0, 0], sizes = [1, 1, 32], strides = [1, 1, 1]} : vector<3x3x32xf32> to vector<1x1x32xf32>
    %465 = vector.shape_cast %464 : vector<1x1x32xf32> to vector<32xf32>
    %466 = vector.shape_cast %465 : vector<32xf32> to vector<1x1x32xf32>
    %467 = vector.broadcast %466 : vector<1x1x32xf32> to vector<8x8x32xf32>
    %468 = arith.mulf %463, %467 : vector<8x8x32xf32>
    %469 = arith.addf %462, %468 : vector<8x8x32xf32>
    %470 = vector.extract_strided_slice %440 {offsets = [1, 1, 0], sizes = [8, 8, 32], strides = [1, 1, 1]} : vector<10x10x32xf32> to vector<8x8x32xf32>
    %471 = vector.extract_strided_slice %427 {offsets = [1, 1, 0], sizes = [1, 1, 32], strides = [1, 1, 1]} : vector<3x3x32xf32> to vector<1x1x32xf32>
    %472 = vector.shape_cast %471 : vector<1x1x32xf32> to vector<32xf32>
    %473 = vector.shape_cast %472 : vector<32xf32> to vector<1x1x32xf32>
    %474 = vector.broadcast %473 : vector<1x1x32xf32> to vector<8x8x32xf32>
    %475 = arith.mulf %470, %474 : vector<8x8x32xf32>
    %476 = arith.addf %469, %475 : vector<8x8x32xf32>
    %477 = vector.extract_strided_slice %440 {offsets = [1, 2, 0], sizes = [8, 8, 32], strides = [1, 1, 1]} : vector<10x10x32xf32> to vector<8x8x32xf32>
    %478 = vector.extract_strided_slice %427 {offsets = [1, 2, 0], sizes = [1, 1, 32], strides = [1, 1, 1]} : vector<3x3x32xf32> to vector<1x1x32xf32>
    %479 = vector.shape_cast %478 : vector<1x1x32xf32> to vector<32xf32>
    %480 = vector.shape_cast %479 : vector<32xf32> to vector<1x1x32xf32>
    %481 = vector.broadcast %480 : vector<1x1x32xf32> to vector<8x8x32xf32>
    %482 = arith.mulf %477, %481 : vector<8x8x32xf32>
    %483 = arith.addf %476, %482 : vector<8x8x32xf32>
    %484 = vector.extract_strided_slice %440 {offsets = [2, 0, 0], sizes = [8, 8, 32], strides = [1, 1, 1]} : vector<10x10x32xf32> to vector<8x8x32xf32>
    %485 = vector.extract_strided_slice %427 {offsets = [2, 0, 0], sizes = [1, 1, 32], strides = [1, 1, 1]} : vector<3x3x32xf32> to vector<1x1x32xf32>
    %486 = vector.shape_cast %485 : vector<1x1x32xf32> to vector<32xf32>
    %487 = vector.shape_cast %486 : vector<32xf32> to vector<1x1x32xf32>
    %488 = vector.broadcast %487 : vector<1x1x32xf32> to vector<8x8x32xf32>
    %489 = arith.mulf %484, %488 : vector<8x8x32xf32>
    %490 = arith.addf %483, %489 : vector<8x8x32xf32>
    %491 = vector.extract_strided_slice %440 {offsets = [2, 1, 0], sizes = [8, 8, 32], strides = [1, 1, 1]} : vector<10x10x32xf32> to vector<8x8x32xf32>
    %492 = vector.extract_strided_slice %427 {offsets = [2, 1, 0], sizes = [1, 1, 32], strides = [1, 1, 1]} : vector<3x3x32xf32> to vector<1x1x32xf32>
    %493 = vector.shape_cast %492 : vector<1x1x32xf32> to vector<32xf32>
    %494 = vector.shape_cast %493 : vector<32xf32> to vector<1x1x32xf32>
    %495 = vector.broadcast %494 : vector<1x1x32xf32> to vector<8x8x32xf32>
    %496 = arith.mulf %491, %495 : vector<8x8x32xf32>
    %497 = arith.addf %490, %496 : vector<8x8x32xf32>
    %498 = vector.extract_strided_slice %440 {offsets = [2, 2, 0], sizes = [8, 8, 32], strides = [1, 1, 1]} : vector<10x10x32xf32> to vector<8x8x32xf32>
    %499 = vector.extract_strided_slice %427 {offsets = [2, 2, 0], sizes = [1, 1, 32], strides = [1, 1, 1]} : vector<3x3x32xf32> to vector<1x1x32xf32>
    %500 = vector.shape_cast %499 : vector<1x1x32xf32> to vector<32xf32>
    %501 = vector.shape_cast %500 : vector<32xf32> to vector<1x1x32xf32>
    %502 = vector.broadcast %501 : vector<1x1x32xf32> to vector<8x8x32xf32>
    %503 = arith.mulf %498, %502 : vector<8x8x32xf32>
    %504 = arith.addf %497, %503 : vector<8x8x32xf32>
    %505 = vector.shape_cast %504 : vector<8x8x32xf32> to vector<64x32xf32>
    %506 = arith.truncf %505 : vector<64x32xf32> to vector<64x32xbf16>
    %c0_232 = arith.constant 0 : index
    %c0_233 = arith.constant 0 : index
    %507 = vector.load %arg15[%c0_232, %c0_233] : memref<32x32xbf16, #tpu.memory_space<vmem>>, vector<32x32xbf16>
    %cst_234 = arith.constant dense<0.000000e+00> : vector<64x32xf32>
    %508 = tpu.matmul %506, %507, %cst_234 {dimension_numbers = #tpu.dot_dimension_numbers<[1], [0], [0], [1], [0, 0, 1, 1], [], []>} : vector<64x32xbf16>, vector<32x32xbf16>, vector<64x32xf32> -> vector<64x32xf32>
    %c0_235 = arith.constant 0 : index
    %c0_236 = arith.constant 0 : index
    %509 = vector.load %arg16[%c0_235, %c0_236] : memref<1x32xf32, #tpu.memory_space<vmem>>, vector<1x32xf32>
    %510 = vector.broadcast %509 : vector<1x32xf32> to vector<64x32xf32>
    %511 = arith.mulf %508, %510 : vector<64x32xf32>
    %512 = arith.addf %4, %511 : vector<64x32xf32>
    %c0_237 = arith.constant 0 : index
    %c0_238 = arith.constant 0 : index
    %513 = vector.load %arg17[%c0_237, %c0_238] : memref<1x32xf32, #tpu.memory_space<vmem>>, vector<1x32xf32>
    %514 = vector.broadcast %513 : vector<1x32xf32> to vector<64x32xf32>
    %515 = arith.addf %512, %514 : vector<64x32xf32>
    %c0_239 = arith.constant 0 : index
    %c0_240 = arith.constant 0 : index
    %c0_241 = arith.constant 0 : index
    %c0_242 = arith.constant 0 : index
    %516 = vector.load %arg18[%c0_239, %c0_240, %c0_241, %c0_242] : memref<1x1x64x32xf32, #tpu.memory_space<vmem>>, vector<1x1x64x32xf32>
    %517 = vector.shape_cast %516 : vector<1x1x64x32xf32> to vector<64x32xf32>
    %518 = vector.shape_cast %515 : vector<64x32xf32> to vector<1x1x64x32xf32>
    tpu.vector_store %arg18[%c0_239, %c0_240, %c0_241, %c0_242], %518 {strides = array<i32>} : memref<1x1x64x32xf32, #tpu.memory_space<vmem>>, vector<1x1x64x32xf32>,
    return
  }
  func.func @transform_0(%arg0: i32, %arg1: i32) -> (i32, i32, i32, i32) {
    %c0_i32 = arith.constant 0 : i32
    %c0_i32_0 = arith.constant 0 : i32
    %c0_i32_1 = arith.constant 0 : i32
    return %arg1, %arg0, %c0_i32, %c0_i32_0 : i32, i32, i32, i32
  }
  func.func @transform_1(%arg0: i32, %arg1: i32) -> (i32, i32, i32) {
    %c0_i32 = arith.constant 0 : i32
    %c0_i32_0 = arith.constant 0 : i32
    %c0_i32_1 = arith.constant 0 : i32
    %c0_i32_2 = arith.constant 0 : i32
    return %c0_i32, %c0_i32_0, %c0_i32_1 : i32, i32, i32
  }
  func.func @transform_2(%arg0: i32, %arg1: i32) -> (i32, i32, i32) {
    %c0_i32 = arith.constant 0 : i32
    %c0_i32_0 = arith.constant 0 : i32
    %c0_i32_1 = arith.constant 0 : i32
    %c0_i32_2 = arith.constant 0 : i32
    return %c0_i32, %c0_i32_0, %c0_i32_1 : i32, i32, i32
  }
  func.func @transform_3(%arg0: i32, %arg1: i32) -> (i32, i32, i32) {
    %c0_i32 = arith.constant 0 : i32
    %c0_i32_0 = arith.constant 0 : i32
    %c0_i32_1 = arith.constant 0 : i32
    %c0_i32_2 = arith.constant 0 : i32
    return %c0_i32, %c0_i32_0, %c0_i32_1 : i32, i32, i32
  }
  func.func @transform_4(%arg0: i32, %arg1: i32) -> (i32, i32, i32, i32) {
    %c0_i32 = arith.constant 0 : i32
    %c0_i32_0 = arith.constant 0 : i32
    %c0_i32_1 = arith.constant 0 : i32
    %c0_i32_2 = arith.constant 0 : i32
    %c0_i32_3 = arith.constant 0 : i32
    return %c0_i32, %c0_i32_0, %c0_i32_1, %c0_i32_2 : i32, i32, i32, i32
  }
  func.func @transform_5(%arg0: i32, %arg1: i32) -> (i32, i32, i32) {
    %c0_i32 = arith.constant 0 : i32
    %c0_i32_0 = arith.constant 0 : i32
    %c0_i32_1 = arith.constant 0 : i32
    %c0_i32_2 = arith.constant 0 : i32
    return %c0_i32, %c0_i32_0, %c0_i32_1 : i32, i32, i32
  }
  func.func @transform_6(%arg0: i32, %arg1: i32) -> (i32, i32, i32) {
    %c0_i32 = arith.constant 0 : i32
    %c0_i32_0 = arith.constant 0 : i32
    %c0_i32_1 = arith.constant 0 : i32
    %c0_i32_2 = arith.constant 0 : i32
    return %c0_i32, %c0_i32_0, %c0_i32_1 : i32, i32, i32
  }
  func.func @transform_7(%arg0: i32, %arg1: i32) -> (i32, i32, i32) {
    %c0_i32 = arith.constant 0 : i32
    %c0_i32_0 = arith.constant 0 : i32
    %c0_i32_1 = arith.constant 0 : i32
    %c0_i32_2 = arith.constant 0 : i32
    return %c0_i32, %c0_i32_0, %c0_i32_1 : i32, i32, i32
  }
  func.func @transform_8(%arg0: i32, %arg1: i32) -> (i32, i32) {
    %c0_i32 = arith.constant 0 : i32
    %c0_i32_0 = arith.constant 0 : i32
    %c0_i32_1 = arith.constant 0 : i32
    return %c0_i32, %c0_i32_0 : i32, i32
  }
  func.func @transform_9(%arg0: i32, %arg1: i32) -> (i32, i32) {
    %c0_i32 = arith.constant 0 : i32
    %c0_i32_0 = arith.constant 0 : i32
    %c0_i32_1 = arith.constant 0 : i32
    return %c0_i32, %c0_i32_0 : i32, i32
  }
  func.func @transform_10(%arg0: i32, %arg1: i32) -> (i32, i32) {
    %c0_i32 = arith.constant 0 : i32
    %c0_i32_0 = arith.constant 0 : i32
    %c0_i32_1 = arith.constant 0 : i32
    return %c0_i32, %c0_i32_0 : i32, i32
  }
  func.func @transform_11(%arg0: i32, %arg1: i32) -> (i32, i32) {
    %c0_i32 = arith.constant 0 : i32
    %c0_i32_0 = arith.constant 0 : i32
    %c0_i32_1 = arith.constant 0 : i32
    return %c0_i32, %c0_i32_0 : i32, i32
  }
  func.func @transform_12(%arg0: i32, %arg1: i32) -> (i32, i32, i32) {
    %c0_i32 = arith.constant 0 : i32
    %c0_i32_0 = arith.constant 0 : i32
    %c0_i32_1 = arith.constant 0 : i32
    %c0_i32_2 = arith.constant 0 : i32
    return %c0_i32, %c0_i32_0, %c0_i32_1 : i32, i32, i32
  }
  func.func @transform_13(%arg0: i32, %arg1: i32) -> (i32, i32) {
    %c0_i32 = arith.constant 0 : i32
    %c0_i32_0 = arith.constant 0 : i32
    %c0_i32_1 = arith.constant 0 : i32
    return %c0_i32, %c0_i32_0 : i32, i32
  }
  func.func @transform_14(%arg0: i32, %arg1: i32) -> (i32, i32) {
    %c0_i32 = arith.constant 0 : i32
    %c0_i32_0 = arith.constant 0 : i32
    %c0_i32_1 = arith.constant 0 : i32
    return %c0_i32, %c0_i32_0 : i32, i32
  }
  func.func @transform_15(%arg0: i32, %arg1: i32) -> (i32, i32) {
    %c0_i32 = arith.constant 0 : i32
    %c0_i32_0 = arith.constant 0 : i32
    %c0_i32_1 = arith.constant 0 : i32
    return %c0_i32, %c0_i32_0 : i32, i32
  }
  func.func @transform_16(%arg0: i32, %arg1: i32) -> (i32, i32, i32, i32) {
    %c0_i32 = arith.constant 0 : i32
    %c0_i32_0 = arith.constant 0 : i32
    %c0_i32_1 = arith.constant 0 : i32
    return %arg1, %arg0, %c0_i32, %c0_i32_0 : i32, i32, i32, i32
  }
}

module attributes {stable_mosaic.version = 11 : i64} {
  func.func @_mlp_kernel(%arg0: i32, %arg1: i32, %arg2: memref<1x64x32xf32, #tpu.memory_space<vmem>>, %arg3: memref<32x128xbf16, #tpu.memory_space<vmem>>, %arg4: memref<1x128xf32, #tpu.memory_space<vmem>>, %arg5: memref<1x128xf32, #tpu.memory_space<vmem>>, %arg6: memref<128x32xbf16, #tpu.memory_space<vmem>>, %arg7: memref<1x32xf32, #tpu.memory_space<vmem>>, %arg8: memref<1x32xf32, #tpu.memory_space<vmem>>, %arg9: memref<1x64x32xf32, #tpu.memory_space<vmem>>, %arg10: memref<64x32xf32, #tpu.memory_space<vmem>>, %arg11: memref<64x128xf32, #tpu.memory_space<vmem>>) attributes {dimension_semantics = [#tpu.dimension_semantics<parallel>, #tpu.dimension_semantics<arbitrary>], iteration_bounds = array<i64: 2, 2>, scalar_prefetch = 0 : i64, scratch_operands = 2 : i64, tpu.core_type = #tpu.core_type<tc>, window_params = [{transform_indices = @transform_0, window_bounds = array<i64: 1, 64, 32>}, {pipeline_mode = #tpu.pipeline_mode<synchronous>, transform_indices = @transform_1, window_bounds = array<i64: 32, 128>}, {pipeline_mode = #tpu.pipeline_mode<synchronous>, transform_indices = @transform_2, window_bounds = array<i64: 1, 128>}, {pipeline_mode = #tpu.pipeline_mode<synchronous>, transform_indices = @transform_3, window_bounds = array<i64: 1, 128>}, {pipeline_mode = #tpu.pipeline_mode<synchronous>, transform_indices = @transform_4, window_bounds = array<i64: 128, 32>}, {pipeline_mode = #tpu.pipeline_mode<synchronous>, transform_indices = @transform_5, window_bounds = array<i64: 1, 32>}, {pipeline_mode = #tpu.pipeline_mode<synchronous>, transform_indices = @transform_6, window_bounds = array<i64: 1, 32>}, {transform_indices = @transform_7, window_bounds = array<i64: 1, 64, 32>}]} {
    %c0_i32 = arith.constant 0 : i32
    %0 = arith.cmpi eq, %arg1, %c0_i32 : i32
    %1 = arith.extui %0 : i1 to i32
    %c0_i32_0 = arith.constant 0 : i32
    %2 = arith.cmpi ne, %1, %c0_i32_0 : i32
    scf.if %2 {
      %cst_39 = arith.constant 0.000000e+00 : f32
      %57 = vector.broadcast %cst_39 : f32 to vector<64x32xf32>
      %c0_40 = arith.constant 0 : index
      %c0_41 = arith.constant 0 : index
      %58 = vector.load %arg10[%c0_40, %c0_41] : memref<64x32xf32, #tpu.memory_space<vmem>>, vector<64x32xf32>
      tpu.vector_store %arg10[%c0_40, %c0_41], %57 {strides = array<i32>} : memref<64x32xf32, #tpu.memory_space<vmem>>, vector<64x32xf32>,
      %cst_42 = arith.constant 0.000000e+00 : f32
      %59 = vector.broadcast %cst_42 : f32 to vector<64x128xf32>
      %c0_43 = arith.constant 0 : index
      %c0_44 = arith.constant 0 : index
      %60 = vector.load %arg11[%c0_43, %c0_44] : memref<64x128xf32, #tpu.memory_space<vmem>>, vector<64x128xf32>
      tpu.vector_store %arg11[%c0_43, %c0_44], %59 {strides = array<i32>} : memref<64x128xf32, #tpu.memory_space<vmem>>, vector<64x128xf32>,
    } else {
    }
    %c0 = arith.constant 0 : index
    %c0_1 = arith.constant 0 : index
    %c0_2 = arith.constant 0 : index
    %3 = vector.load %arg2[%c0, %c0_1, %c0_2] : memref<1x64x32xf32, #tpu.memory_space<vmem>>, vector<1x64x32xf32>
    %4 = vector.shape_cast %3 : vector<1x64x32xf32> to vector<64x32xf32>
    %c0_3 = arith.constant 0 : index
    %c0_4 = arith.constant 0 : index
    %5 = vector.load %arg10[%c0_3, %c0_4] : memref<64x32xf32, #tpu.memory_space<vmem>>, vector<64x32xf32>
    %c0_5 = arith.constant 0 : index
    %c0_6 = arith.constant 0 : index
    %6 = vector.load %arg10[%c0_5, %c0_6] : memref<64x32xf32, #tpu.memory_space<vmem>>, vector<64x32xf32>
    %7 = arith.subf %4, %6 : vector<64x32xf32>
    %cst = arith.constant 5.000000e-01 : f32
    %8 = vector.broadcast %cst : f32 to vector<64x32xf32>
    %9 = arith.mulf %7, %8 : vector<64x32xf32>
    %10 = arith.addf %5, %9 : vector<64x32xf32>
    %cst_7 = arith.constant 1.000000e+00 : f32
    %11 = vector.broadcast %cst_7 : f32 to vector<64x32xf32>
    %12 = arith.cmpf oge, %10, %11 : vector<64x32xf32>
    %cst_8 = arith.constant 0.000000e+00 : f32
    %13 = vector.broadcast %cst_8 : f32 to vector<64x32xf32>
    %14 = arith.select %12, %13, %10 : vector<64x32xi1>, vector<64x32xf32>
    %c0_9 = arith.constant 0 : index
    %c0_10 = arith.constant 0 : index
    %15 = vector.load %arg10[%c0_9, %c0_10] : memref<64x32xf32, #tpu.memory_space<vmem>>, vector<64x32xf32>
    tpu.vector_store %arg10[%c0_9, %c0_10], %14 {strides = array<i32>} : memref<64x32xf32, #tpu.memory_space<vmem>>, vector<64x32xf32>,
    %cst_11 = arith.constant 1.000000e+00 : f32
    %16 = vector.broadcast %cst_11 : f32 to vector<64x32xf32>
    %17 = arith.cmpf oge, %10, %16 : vector<64x32xf32>
    %18 = arith.extui %17 : vector<64x32xi1> to vector<64x32xi32>
    %19 = arith.sitofp %18 : vector<64x32xi32> to vector<64x32xf32>
    %20 = arith.truncf %19 : vector<64x32xf32> to vector<64x32xbf16>
    %c0_12 = arith.constant 0 : index
    %c0_13 = arith.constant 0 : index
    %21 = vector.load %arg3[%c0_12, %c0_13] : memref<32x128xbf16, #tpu.memory_space<vmem>>, vector<32x128xbf16>
    %cst_14 = arith.constant dense<0.000000e+00> : vector<64x128xf32>
    %22 = tpu.matmul %20, %21, %cst_14 {dimension_numbers = #tpu.dot_dimension_numbers<[1], [0], [0], [1], [0, 0, 1, 1], [], []>} : vector<64x32xbf16>, vector<32x128xbf16>, vector<64x128xf32> -> vector<64x128xf32>
    %c0_15 = arith.constant 0 : index
    %c0_16 = arith.constant 0 : index
    %23 = vector.load %arg4[%c0_15, %c0_16] : memref<1x128xf32, #tpu.memory_space<vmem>>, vector<1x128xf32>
    %24 = vector.broadcast %23 : vector<1x128xf32> to vector<64x128xf32>
    %25 = arith.mulf %22, %24 : vector<64x128xf32>
    %c0_17 = arith.constant 0 : index
    %c0_18 = arith.constant 0 : index
    %26 = vector.load %arg5[%c0_17, %c0_18] : memref<1x128xf32, #tpu.memory_space<vmem>>, vector<1x128xf32>
    %27 = vector.broadcast %26 : vector<1x128xf32> to vector<64x128xf32>
    %28 = arith.addf %25, %27 : vector<64x128xf32>
    %c0_19 = arith.constant 0 : index
    %c0_20 = arith.constant 0 : index
    %29 = vector.load %arg11[%c0_19, %c0_20] : memref<64x128xf32, #tpu.memory_space<vmem>>, vector<64x128xf32>
    %c0_21 = arith.constant 0 : index
    %c0_22 = arith.constant 0 : index
    %30 = vector.load %arg11[%c0_21, %c0_22] : memref<64x128xf32, #tpu.memory_space<vmem>>, vector<64x128xf32>
    %31 = arith.subf %28, %30 : vector<64x128xf32>
    %cst_23 = arith.constant 5.000000e-01 : f32
    %32 = vector.broadcast %cst_23 : f32 to vector<64x128xf32>
    %33 = arith.mulf %31, %32 : vector<64x128xf32>
    %34 = arith.addf %29, %33 : vector<64x128xf32>
    %cst_24 = arith.constant 1.000000e+00 : f32
    %35 = vector.broadcast %cst_24 : f32 to vector<64x128xf32>
    %36 = arith.cmpf oge, %34, %35 : vector<64x128xf32>
    %cst_25 = arith.constant 0.000000e+00 : f32
    %37 = vector.broadcast %cst_25 : f32 to vector<64x128xf32>
    %38 = arith.select %36, %37, %34 : vector<64x128xi1>, vector<64x128xf32>
    %c0_26 = arith.constant 0 : index
    %c0_27 = arith.constant 0 : index
    %39 = vector.load %arg11[%c0_26, %c0_27] : memref<64x128xf32, #tpu.memory_space<vmem>>, vector<64x128xf32>
    tpu.vector_store %arg11[%c0_26, %c0_27], %38 {strides = array<i32>} : memref<64x128xf32, #tpu.memory_space<vmem>>, vector<64x128xf32>,
    %cst_28 = arith.constant 1.000000e+00 : f32
    %40 = vector.broadcast %cst_28 : f32 to vector<64x128xf32>
    %41 = arith.cmpf oge, %34, %40 : vector<64x128xf32>
    %42 = arith.extui %41 : vector<64x128xi1> to vector<64x128xi32>
    %43 = arith.sitofp %42 : vector<64x128xi32> to vector<64x128xf32>
    %44 = arith.truncf %43 : vector<64x128xf32> to vector<64x128xbf16>
    %c0_29 = arith.constant 0 : index
    %c0_30 = arith.constant 0 : index
    %45 = vector.load %arg6[%c0_29, %c0_30] : memref<128x32xbf16, #tpu.memory_space<vmem>>, vector<128x32xbf16>
    %cst_31 = arith.constant dense<0.000000e+00> : vector<64x32xf32>
    %46 = tpu.matmul %44, %45, %cst_31 {dimension_numbers = #tpu.dot_dimension_numbers<[1], [0], [0], [1], [0, 0, 1, 1], [], []>} : vector<64x128xbf16>, vector<128x32xbf16>, vector<64x32xf32> -> vector<64x32xf32>
    %c0_32 = arith.constant 0 : index
    %c0_33 = arith.constant 0 : index
    %47 = vector.load %arg7[%c0_32, %c0_33] : memref<1x32xf32, #tpu.memory_space<vmem>>, vector<1x32xf32>
    %48 = vector.broadcast %47 : vector<1x32xf32> to vector<64x32xf32>
    %49 = arith.mulf %46, %48 : vector<64x32xf32>
    %50 = arith.addf %4, %49 : vector<64x32xf32>
    %c0_34 = arith.constant 0 : index
    %c0_35 = arith.constant 0 : index
    %51 = vector.load %arg8[%c0_34, %c0_35] : memref<1x32xf32, #tpu.memory_space<vmem>>, vector<1x32xf32>
    %52 = vector.broadcast %51 : vector<1x32xf32> to vector<64x32xf32>
    %53 = arith.addf %50, %52 : vector<64x32xf32>
    %c0_36 = arith.constant 0 : index
    %c0_37 = arith.constant 0 : index
    %c0_38 = arith.constant 0 : index
    %54 = vector.load %arg9[%c0_36, %c0_37, %c0_38] : memref<1x64x32xf32, #tpu.memory_space<vmem>>, vector<1x64x32xf32>
    %55 = vector.shape_cast %54 : vector<1x64x32xf32> to vector<64x32xf32>
    %56 = vector.shape_cast %53 : vector<64x32xf32> to vector<1x64x32xf32>
    tpu.vector_store %arg9[%c0_36, %c0_37, %c0_38], %56 {strides = array<i32>} : memref<1x64x32xf32, #tpu.memory_space<vmem>>, vector<1x64x32xf32>,
    return
  }
  func.func @transform_0(%arg0: i32, %arg1: i32) -> (i32, i32, i32) {
    %c0_i32 = arith.constant 0 : i32
    %c0_i32_0 = arith.constant 0 : i32
    return %arg1, %arg0, %c0_i32 : i32, i32, i32
  }
  func.func @transform_1(%arg0: i32, %arg1: i32) -> (i32, i32) {
    %c0_i32 = arith.constant 0 : i32
    %c0_i32_0 = arith.constant 0 : i32
    %c0_i32_1 = arith.constant 0 : i32
    return %c0_i32, %c0_i32_0 : i32, i32
  }
  func.func @transform_2(%arg0: i32, %arg1: i32) -> (i32, i32) {
    %c0_i32 = arith.constant 0 : i32
    %c0_i32_0 = arith.constant 0 : i32
    %c0_i32_1 = arith.constant 0 : i32
    return %c0_i32, %c0_i32_0 : i32, i32
  }
  func.func @transform_3(%arg0: i32, %arg1: i32) -> (i32, i32) {
    %c0_i32 = arith.constant 0 : i32
    %c0_i32_0 = arith.constant 0 : i32
    %c0_i32_1 = arith.constant 0 : i32
    return %c0_i32, %c0_i32_0 : i32, i32
  }
  func.func @transform_4(%arg0: i32, %arg1: i32) -> (i32, i32) {
    %c0_i32 = arith.constant 0 : i32
    %c0_i32_0 = arith.constant 0 : i32
    %c0_i32_1 = arith.constant 0 : i32
    return %c0_i32, %c0_i32_0 : i32, i32
  }
  func.func @transform_5(%arg0: i32, %arg1: i32) -> (i32, i32) {
    %c0_i32 = arith.constant 0 : i32
    %c0_i32_0 = arith.constant 0 : i32
    %c0_i32_1 = arith.constant 0 : i32
    return %c0_i32, %c0_i32_0 : i32, i32
  }
  func.func @transform_6(%arg0: i32, %arg1: i32) -> (i32, i32) {
    %c0_i32 = arith.constant 0 : i32
    %c0_i32_0 = arith.constant 0 : i32
    %c0_i32_1 = arith.constant 0 : i32
    return %c0_i32, %c0_i32_0 : i32, i32
  }
  func.func @transform_7(%arg0: i32, %arg1: i32) -> (i32, i32, i32) {
    %c0_i32 = arith.constant 0 : i32
    %c0_i32_0 = arith.constant 0 : i32
    return %arg1, %arg0, %c0_i32 : i32, i32, i32
  }
}

</mosaic_0001>

<bundles_post_ra>
// kernel: ms_block_forward.3
= control target key start
LH: loop header
LB: loop body
LE: loop exit
PB: predicated region body
PF: predicated region fallthrough
CT: control target
= control target key end

     0   :  { %12 = vsyncpa [#allocation5], 0  ;;  %s1495_s0 = inlined_call_operand.vmem [shape: f32[2,128,32], index: 0, kind: input, shape index: {}]   ;;  %s1496_s1 = inlined_call_operand.vmem [shape: bf16[32,128], index: 1, kind: input, shape index: {}]   ;;  %s1497_s2 = inlined_call_operand.vmem [shape: f32[1,128], index: 2, kind: input, shape index: {}]   ;;  %s1498_s3 = inlined_call_operand.vmem [shape: f32[1,128], index: 3, kind: input, shape index: {}]   ;;  %s1499_s4 = inlined_call_operand.vmem [shape: bf16[128,32], index: 4, kind: input, shape index: {}]   ;;  %s1500_s5 = inlined_call_operand.vmem [shape: f32[1,32], index: 5, kind: input, shape index: {}]   ;;  %s1501_s6 = inlined_call_operand.vmem [shape: f32[1,32], index: 6, kind: input, shape index: {}]   ;;  %s1502_s7 = inlined_call_operand.hbm [shape: f32[2,128,32], index: 7, kind: output, shape index: {}]  }
   0x1   :  { %14 = vsyncpa [#allocation5 + $0x1], 0  ;;  %s1225_s24 = smov 0   ;;  %s1227_s25 = smov 0  }
   0x2   :  { %s1229_s26 = smov 0   ;;  %s1231_s27 = smov 0  }
   0x3   :  { %s1233_s28 = smov 0   ;;  %s1235_s29 = smov 0  }
   0x4   :  { %s1237_s30 = smov 0   ;;  %s1239_s8 = smov 0  }
   0x5 LB: > { %s887_s9 = sadd.s32 4294967295, %s1177_s8   ;;  %s888_s10 = sadd.s32 4294967294, %s1177_s8   ;;  %s1177_s8 = sphi %s1239_s8, %s20_s8   ;;  %s1173_s30 = sphi %s1237_s30, %s1517_s30   ;;  %s1169_s29 = sphi %s1235_s29, %s1516_s29   ;;  %s1165_s28 = sphi %s1233_s28, %s1515_s28   ;;  %s1161_s27 = sphi %s1231_s27, %s1514_s27   ;;  %s1157_s26 = sphi %s1229_s26, %s1513_s26   ;;  %s1153_s25 = sphi %s1227_s25, %s1512_s25   ;;  %s1149_s24 = sphi %s1225_s24, %s1511_s24  }
   0x6   : > { %s29_s11 = sadd.s32 1, %s1169_s29  ;;  %s32_s12 = sadd.s32 1, %s1173_s30 }
   0x7   : > { %p30_p0 = scmp.ge.s32.totalorder %s29_s11, 2  ;;  %p205_p1 = scmp.ne.s32.totalorder %s1157_s26, %s1153_s25 }
   0x8   : > { %p206_p2 = scmp.eq.s32.totalorder %s887_s9, 3  ;;  %p211_p5 = scmp.ne.s32.totalorder %s1153_s25, %s1149_s24 }
   0x9   : > { %s1519_s11 = smov (%p30_p0, %s29_s11), 0  ;;  %s1521_s12 = smov (!%p30_p0, %s32_s12), %s1173_s30 }
   0xa   : > { %1505 = sst [smem:[#allocation7_spill]] %s1519_s11  ;;  %s190_s13 = ssub.s32 %s1169_s29, %s1519_s11 }
   0xb   : > { %p1276_p3 = por %p206_p2, %p205_p1  ;;  %p34_p4 = scmp.ge.s32.totalorder %s1521_s12, 2 }
   0xc   : > { %p212_p6 = scmp.eq.s32.totalorder %s888_s10, 3  ;;  %p891_p7 = scmp.ge.s32.totalorder %s1177_s8, 1 }
   0xd   : > { %s1523_s12 = smov (%p34_p4, %s1521_s12), 0  ;;  %p261_p9 = scmp.lt.s32.totalorder %s1177_s8, 5 }
   0xe   : > { %1507 = sst [smem:[#allocation8_spill]] %s1523_s12  ;;  %p1285_p8 = por %p212_p6, %p211_p5 }
   0xf   : > { %s191_s16 = ssub.s32 %s1173_s30, %s1523_s12  ;;  %s195_s17 = sadd.s32 1, %s1157_s26 }
  0x10   : > { %s192_s18 = sor.u32 %s191_s16, %s190_s13  ;;  %p262_p10 = pnand %p891_p7, %p261_p9 }
  0x11   : > { %p193_p11 = scmp.eq.s32.totalorder %s192_s18, 0  ;;  %s294_s20 = sand.u32 (!%p262_p10), 1, %s1153_s25  }
  0x12   : > { %265 = sbr.rel (%p262_p10) target bundleno = 494 (0x1ee), region = 48  ;;  %s1298_s21 = sshll.u32 (!%p262_p10), %s1165_s28, 3 }
  0x13   : > { %s1294_s19 = scalar_select %p193_p11, %s1157_s26, %s195_s17  }
  0x14   : > { %s892_s22 = sshll.u32 (!%p262_p10), %s294_s20, 6  ;;  %p298_p12 = scmp.lt.s32.totalorder (!%p262_p10), %s1161_s27, 1 }
  0x15   : > { %p300_p13 = scmp.lt.s32.totalorder (!%p262_p10), %s1298_s21, 15  ;;  %s1311_s11 = scalar_lea.vmem (!%p262_p10), [#allocation4], %s892_s22 }
  0x16   : > { %p896_p0 = scmp.ne.s32.totalorder (!%p262_p10), %s1161_s27, 0 }
  0x17   : > { %s299_s23 = scalar_select %p298_p12, %s1161_s27, 1 }
  0x18   : > { %s301_s9 = scalar_select %p300_p13, %s1298_s21, 15 }
  0x19   : > { %s894_s10 = sshll.u32 %s299_s23, 4  ;;  %312 = sbr.rel (%p896_p0) target bundleno = 39 (0x27), region = 52 }
  0x1a   : > { %s303_s13 = sadd.s32 %s894_s10, %s301_s9 }
  0x1b   : > { %s895_s16 = sshll.u32 %s303_s13, 3 }
  0x1c   : > { %s1309_s12 = scalar_lea.vmem %s1495_s0, %s895_s16 }
  0x1e   : > { %vm313_vm0 = vcmask 261120   ;;  %v1179_v0 = vmov 0.0  }
  0x1f   : > { %314 = vst.msk [vmem:[#allocation2] sm:$0xff] %vm313_vm0, %v1179_v0  ;;  %315 = vst.msk [vmem:[#allocation2 + $0x8] sm:$0xff] %vm313_vm0, %v1179_v0 }
  0x20   : > { %316 = vst.msk [vmem:[#allocation2 + $0x10] sm:$0xff] %vm313_vm0, %v1179_v0  ;;  %317 = vst.msk [vmem:[#allocation2 + $0x18] sm:$0xff] %vm313_vm0, %v1179_v0 }
  0x21   : > { %318 = vst.msk [vmem:[#allocation2 + $0x20] sm:$0xff] %vm313_vm0, %v1179_v0  ;;  %319 = vst.msk [vmem:[#allocation2 + $0x28] sm:$0xff] %vm313_vm0, %v1179_v0 }
  0x22   : > { %320 = vst.msk [vmem:[#allocation2 + $0x30] sm:$0xff] %vm313_vm0, %v1179_v0  ;;  %321 = vst.msk [vmem:[#allocation2 + $0x38] sm:$0xff] %vm313_vm0, %v1179_v0 }
  0x23   : > { %322 = vst [vmem:[#allocation3 + $0x30] sm:$0xff] %v1179_v0  ;;  %323 = vst [vmem:[#allocation3] sm:$0xff] %v1179_v0 }
  0x24   : > { %324 = vst [vmem:[#allocation3 + $0x18] sm:$0xff] %v1179_v0  ;;  %325 = vst [vmem:[#allocation3 + $0x10] sm:$0xff] %v1179_v0 }
  0x25   : > { %326 = vst [vmem:[#allocation3 + $0x8] sm:$0xff] %v1179_v0  ;;  %327 = vst [vmem:[#allocation3 + $0x20] sm:$0xff] %v1179_v0 }
  0x26   : > { %328 = vst [vmem:[#allocation3 + $0x28] sm:$0xff] %v1179_v0  ;;  %329 = vst [vmem:[#allocation3 + $0x38] sm:$0xff] %v1179_v0 }
  0x27 PF: > { %v1075_v1 = vld [vmem:[%s1496_s1 + $0x8] sm:$0xff]   ;;  %v1076_v2 = vld [vmem:[%s1496_s1] sm:$0xff]   ;;  %v1328_v8 = vld [vmem:[%s1309_s12 + $0x10] sm:$0xff]  ;;  %vm386_vm1 = vcmask 261120   ;;  %v1180_v41 = vmov 0.0   ;;  %s941_s17 = sshll.u32 %s1161_s27, 4 }
  0x28   : > { %963 = vmatprep.subr.bf16.mxu0 %v1075_v1  ;;  %v1321_v3 = vld [vmem:[%s1309_s12] sm:$0xff]  ;;  %v1324_v4 = vld [vmem:[%s1309_s12 + $0x8] sm:$0xff]  ;;  %v1331_v9 = vld [vmem:[%s1309_s12 + $0x18] sm:$0xff]  ;;  %s802_s18 = sadd.s32 %s941_s17, %s1298_s21  ;;  %s805_s28 = sshll.u32 %s1311_s11, 4  ;;  %s1436_s28 = int_to_ptr.vmem [resolvable:$true] %s805_s28 }
  0x29   : > { %v338_v5 = vld [vmem:[#allocation2] sm:$0xff]  ;;  %964 = vmatpush3.bf16.msra.mxu0 %v1075_v1  ;;  %v339_v6 = vld [vmem:[#allocation2 + $0x8] sm:$0xff]  ;;  %v340_v11 = vld [vmem:[#allocation2 + $0x10] sm:$0xff]  ;;  %s942_s27 = sshll.u32 %s802_s18, 7  ;;  %s1444_s9 = scalar_lea.sflag [#allocation5], %s294_s20 }
  0x2a   : > { %v346_v7 = vsub.f32 %v1321_v3, %v338_v5  ;;  %965 = vmatprep.subr.bf16.mxu0 %v1076_v2  ;;  %v347_v10 = vsub.f32 %v1324_v4, %v339_v6  ;;  %v341_v12 = vld [vmem:[#allocation2 + $0x18] sm:$0xff]  ;;  %v1335_v13 = vld [vmem:[%s1309_s12 + $0x20] sm:$0xff]  ;;  %v348_v15 = vsub.f32 %v1328_v8, %v340_v11  ;;  %v1340_v17 = vld [vmem:[%s1309_s12 + $0x28] sm:$0xff]  ;;  %s1434_s23 = scalar_lea.hbm %s1502_s7, %s942_s27  ;;  %s1085_s10 = scalar_lea.vmem %s1436_s28, 1024 }
  0x2b   : > { %v349_v16 = vsub.f32 %v1331_v9, %v341_v12  ;;  %v342_v18 = vld [vmem:[#allocation2 + $0x20] sm:$0xff]  ;;  %v343_v19 = vld [vmem:[#allocation2 + $0x28] sm:$0xff]  ;;  %v1345_v23 = vld [vmem:[%s1309_s12 + $0x30] sm:$0xff]  ;;  %p1086_p1 = scmp.ne.s32.totalorder %s1436_s28, %s1085_s10  ;;  %s1182_s13 = smov [#allocation4]  }
  0x2c   : > { %v354_v14 = vmul.f32 0.5, %v346_v7  ;;  %v355_v20 = vmul.f32 0.5, %v347_v10  ;;  %v350_v21 = vsub.f32 %v1335_v13, %v342_v18  ;;  %v351_v22 = vsub.f32 %v1340_v17, %v343_v19  ;;  %v1348_v24 = vld [vmem:[%s1309_s12 + $0x38] sm:$0xff]  ;;  %v344_v25 = vld [vmem:[#allocation2 + $0x30] sm:$0xff]  ;;  %v1079_v44 = vld [vmem:[%s1499_s4 + $0x28] sm:$0xff]   ;;  %s1089_s12 = sshll.u32 %s1182_s13, 4  ;;  %s1090_s12 = int_to_ptr.vmem [resolvable:$false] %s1089_s12 }
  0x2d   : > { %966 = vmatpush3.bf16.msra.mxu0 %v1076_v2  ;;  %v356_v27 = vmul.f32 0.5, %v348_v15  ;;  %v357_v28 = vmul.f32 0.5, %v349_v16  ;;  %v345_v29 = vld [vmem:[#allocation2 + $0x38] sm:$0xff]  ;;  %v352_v30 = vsub.f32 %v1345_v23, %v344_v25  ;;  %v1078_v39 = vld [vmem:[%s1499_s4 + $0x30] sm:$0xff]   ;;  %v1083_v10 = vld [vmem:[%s1499_s4 + $0x8] sm:$0xff]   ;;  %p1087_p2 = pnand %p1086_p1, %p1276_p3  ;;  %s1091_s16 = scalar_lea.vmem %s1090_s12, 2048 }
  0x2e   : > { %v362_v26 = vadd.f32 %v354_v14, %v338_v5  ;;  %v1077_v31 = vld [vmem:[%s1499_s4 + $0x38] sm:$0xff]   ;;  %v363_v32 = vadd.f32 %v355_v20, %v339_v6  ;;  %v358_v33 = vmul.f32 0.5, %v350_v21  ;;  %v359_v34 = vmul.f32 0.5, %v351_v22  ;;  %v1080_v5 = vld [vmem:[%s1499_s4 + $0x20] sm:$0xff]   ;;  %v1082_v7 = vld [vmem:[%s1499_s4 + $0x10] sm:$0xff]   ;;  %p1092_p5 = scmp.lt.s32.totalorder %s1436_s28, %s1090_s12  ;;  %p1093_p6 = scmp.lt.s32.totalorder %s1091_s16, %s1085_s10 }
  0x2f   : > { %v353_v35 = vsub.f32 %v1348_v24, %v345_v29  ;;  %v364_v36 = vadd.f32 %v356_v27, %v340_v11  ;;  %v365_v37 = vadd.f32 %v357_v28, %v341_v12  ;;  %v360_v38 = vmul.f32 0.5, %v352_v30  ;;  %975 = vmatprep.subr.bf16.mxu1 %v1077_v31  ;;  %v1081_v6 = vld [vmem:[%s1499_s4 + $0x18] sm:$0xff]   ;;  %v1084_v11 = vld [vmem:[%s1499_s4] sm:$0xff]   ;;  %v538_v22 = vld [vmem:[#allocation3 + $0x30] sm:$0xff]  ;;  %p1088_p4 = pneg %p1087_p2 }
  0x30   : > { %vm370_vm2 = vcmp.ge.f32.partialorder %v362_v26, 1.0  ;;  %vm371_vm3 = vcmp.ge.f32.partialorder %v363_v32, 1.0  ;;  %v366_v43 = vadd.f32 %v358_v33, %v342_v18  ;;  %976 = vmatpush3.bf16.msra.mxu1 %v1077_v31  ;;  %v367_v52 = vadd.f32 %v359_v34, %v343_v19  ;;  %v911_v12 = vld [vmem:[%s1497_s2] ss:$0 sm:$0xff]  ;;  %v540_v18 = vld [vmem:[#allocation3 + $0x18] sm:$0xff]  ;;  %p1094_p7 = por %p1093_p6, %p1092_p5 }
  0x31   : > { %v378_v40 = vsel %vm370_vm2, 0.0, %v362_v26  ;;  %v897_v42 = vsel %vm370_vm2, 1.0, %v1180_v41  ;;  %v379_v45 = vsel %vm371_vm3, 0.0, %v363_v32  ;;  %v898_v46 = vsel %vm371_vm3, 1.0, %v1180_v41  ;;  %977 = vmatprep.subr.bf16.mxu1 %v1078_v39  ;;  %v912_v15 = vld [vmem:[%s1498_s3] ss:$0 sm:$0xff] }
  0x32   : > { %387 = vst.msk [vmem:[#allocation2] sm:$0xff] %vm386_vm1, %v378_v40  ;;  %vm372_vm4 = vcmp.ge.f32.partialorder %v364_v36, 1.0  ;;  %vm373_vm5 = vcmp.ge.f32.partialorder %v365_v37, 1.0  ;;  %388 = vst.msk [vmem:[#allocation2 + $0x8] sm:$0xff] %vm386_vm1, %v379_v45  ;;  %v411_v47 = vpack.c.bf16 %v898_v46, %v897_v42  ;;  %vm374_vm6 = vcmp.ge.f32.partialorder %v366_v43, 1.0  ;;  %p1095_p9 = pnand %p1094_p7, %p1088_p4 }
  0x33   : > { %v380_v48 = vsel %vm372_vm4, 0.0, %v364_v36  ;;  %v381_v49 = vsel %vm373_vm5, 0.0, %v365_v37  ;;  %v899_v50 = vsel %vm372_vm4, 1.0, %v1180_v41  ;;  %v900_v51 = vsel %vm373_vm5, 1.0, %v1180_v41 }
  0x34   : > { %389 = vst.msk [vmem:[#allocation2 + $0x10] sm:$0xff] %vm386_vm1, %v380_v48  ;;  %390 = vst.msk [vmem:[#allocation2 + $0x18] sm:$0xff] %vm386_vm1, %v381_v49  ;;  %v361_v53 = vmul.f32 0.5, %v353_v35  ;;  %967 = vmatprep.mubr.msk.bf16.mxu0 %vm386_vm1, %v411_v47  ;;  %v412_v54 = vpack.c.bf16 %v900_v51, %v899_v50  ;;  %v382_v55 = vsel %vm374_vm6, 0.0, %v366_v43  ;;  %v901_v56 = vsel %vm374_vm6, 1.0, %v1180_v41  ;;  %978 = vmatpush3.bf16.msra.mxu1 %v1078_v39  ;;  %v539_v35 = vld [vmem:[#allocation3] sm:$0xff] }
  0x35   : > { %v368_v57 = vadd.f32 %v360_v38, %v344_v25  ;;  %vm375_vm7 = vcmp.ge.f32.partialorder %v367_v52, 1.0  ;;  %391 = vst.msk [vmem:[#allocation2 + $0x20] sm:$0xff] %vm386_vm1, %v382_v55  ;;  %979 = vmatprep.subr.bf16.mxu1 %v1079_v44  ;;  %v542_v48 = vld [vmem:[#allocation3 + $0x8] sm:$0xff]  ;;  %v545_v55 = vld [vmem:[#allocation3 + $0x38] sm:$0xff] }
  0x36   : > { %v369_v58 = vadd.f32 %v361_v53, %v345_v29  ;;  %968 = vmatmul.mubr.msk.bf16.vlgmr.msra.gmra.mxu0 %vm386_vm1, %v412_v54  ;;  %v383_v59 = vsel %vm375_vm7, 0.0, %v367_v52  ;;  %v902_v60 = vsel %vm375_vm7, 1.0, %v1180_v41  ;;  %v541_v29 = vld [vmem:[#allocation3 + $0x10] sm:$0xff] }
  0x37   : > { %vm376_vm8 = vcmp.ge.f32.partialorder %v368_v57, 1.0  ;;  %392 = vst.msk [vmem:[#allocation2 + $0x28] sm:$0xff] %vm386_vm1, %v383_v59  ;;  %v413_v61 = vpack.c.bf16 %v902_v60, %v901_v56 }
  0x38   : > { %vm377_vm9 = vcmp.ge.f32.partialorder %v369_v58, 1.0  ;;  %v384_v62 = vsel %vm376_vm8, 0.0, %v368_v57  ;;  %v903_v63 = vsel %vm376_vm8, 1.0, %v1180_v41  ;;  %980 = vmatpush3.bf16.msra.mxu1 %v1079_v44 }
  0x39   : > { %v385_v0 = vsel %vm377_vm9, 0.0, %v369_v58  ;;  %393 = vst.msk [vmem:[#allocation2 + $0x30] sm:$0xff] %vm386_vm1, %v384_v62  ;;  %v904_v1 = vsel %vm377_vm9, 1.0, %v1180_v41  ;;  %971 = vmatprep.mubr.msk.bf16.mxu0 %vm386_vm1, %v413_v61  ;;  %981 = vmatprep.subr.bf16.mxu1 %v1080_v5  ;;  %v544_v41 = vld [vmem:[#allocation3 + $0x28] sm:$0xff] }
  0x3a   : > { %394 = vst.msk [vmem:[#allocation2 + $0x38] sm:$0xff] %vm386_vm1, %v385_v0  ;;  %v414_v2 = vpack.c.bf16 %v904_v1, %v903_v63  ;;  %v543_v63 = vld [vmem:[#allocation3 + $0x20] sm:$0xff] }
  0x3c   : > { %982 = vmatpush3.bf16.msra.mxu1 %v1080_v5 }
  0x3d   : > { %983 = vmatprep.subr.bf16.mxu1 %v1081_v6 }
  0x3e   : > { %972 = vmatmul.mubr.msk.bf16.gmra.mxu0 %vm386_vm1, %v414_v2 }
  0x40   : > { %984 = vmatpush3.bf16.msra.mxu1 %v1081_v6 }
  0x41   : > { %985 = vmatprep.subr.bf16.mxu1 %v1082_v7 }
  0x44   : > { %986 = vmatpush3.bf16.msra.mxu1 %v1082_v7 }
  0x45   : > { %987 = vmatprep.subr.bf16.mxu1 %v1083_v10 }
  0x48   : > { %988 = vmatpush3.bf16.msra.mxu1 %v1083_v10 }
  0x49   : > { %989 = vmatprep.subr.bf16.mxu1 %v1084_v11 }
  0x4c   : > { %990 = vmatpush3.bf16.msra.mxu1 %v1084_v11 }
  0xf6   : > { %v969_v14 = vpop.f32.mrf.mxu0 }
  0xf7   : > { %v517_v16 = vmul.f32 %v969_v14, %v911_v12 }
  0xf8   : > { %v477_v19 = vpop.f32.mrf.mxu0 }
  0xf9   : > { %v532_v20 = vadd.f32 %v912_v15, %v517_v16  ;;  %v515_v21 = vmul.f32 %v911_v12, %v477_v19 }
  0xfa   : > { %v970_v25 = vpop.f32.mrf.mxu0 }
  0xfb   : > { %v548_v26 = vsub.f32 %v532_v20, %v540_v18  ;;  %v530_v27 = vadd.f32 %v912_v15, %v515_v21  ;;  %v518_v28 = vmul.f32 %v970_v25, %v911_v12 }
  0xfc   : > { %v480_v30 = vpop.f32.mrf.mxu0 }
  0xfd   : > { %v556_v31 = vmul.f32 0.5, %v548_v26  ;;  %v546_v32 = vsub.f32 %v530_v27, %v538_v22  ;;  %v533_v33 = vadd.f32 %v912_v15, %v518_v28  ;;  %v516_v34 = vmul.f32 %v911_v12, %v480_v30  ;;  %v937_v27 = vld [vmem:[%s1500_s5] ss:$0 sm:$0xff] }
  0xfe   : > { %v973_v36 = vpop.f32.mrf.mxu0  ;;  %v938_v30 = vld [vmem:[%s1501_s6] ss:$0 sm:$0xff] }
  0xff   : > { %v554_v37 = vmul.f32 0.5, %v546_v32  ;;  %v549_v38 = vsub.f32 %v533_v33, %v541_v29  ;;  %v531_v39 = vadd.f32 %v912_v15, %v516_v34  ;;  %v521_v40 = vmul.f32 %v973_v36, %v911_v12 }
 0x100   : > { %v493_v42 = vpop.f32.mrf.mxu0  ;;  %v564_v43 = vadd.f32 %v556_v31, %v540_v18  ;;  %v1181_v18 = vmov 1.0|1.0  }
 0x101   : > { %v557_v44 = vmul.f32 0.5, %v549_v38  ;;  %v547_v45 = vsub.f32 %v531_v39, %v539_v35  ;;  %v536_v46 = vadd.f32 %v912_v15, %v521_v40  ;;  %v519_v47 = vmul.f32 %v911_v12, %v493_v42 }
 0x102   : > { %v974_v49 = vpop.f32.mrf.mxu0  ;;  %v562_v50 = vadd.f32 %v554_v37, %v538_v22  ;;  %vm572_vm10 = vcmp.ge.f32.partialorder %v564_v43, 1.0 }
 0x103   : > { %v555_v51 = vmul.f32 0.5, %v547_v45  ;;  %v552_v52 = vsub.f32 %v536_v46, %v544_v41  ;;  %v534_v53 = vadd.f32 %v912_v15, %v519_v47  ;;  %v522_v54 = vmul.f32 %v974_v49, %v911_v12 }
 0x104   : > { %v496_v56 = vpop.f32.mrf.mxu0  ;;  %vm570_vm11 = vcmp.ge.f32.partialorder %v562_v50, 1.0  ;;  %v565_v57 = vadd.f32 %v557_v44, %v541_v29  ;;  %v580_v58 = vsel %vm572_vm10, 0.0, %v564_v43 }
 0x105   : > { %v560_v59 = vmul.f32 0.5, %v552_v52  ;;  %v550_v60 = vsub.f32 %v534_v53, %v542_v48  ;;  %v537_v61 = vadd.f32 %v912_v15, %v522_v54  ;;  %v520_v62 = vmul.f32 %v911_v12, %v496_v56  ;;  %588 = vst [vmem:[#allocation3 + $0x18] sm:$0xff] %v580_v58 }
 0x106   : > { %v563_v0 = vadd.f32 %v555_v51, %v539_v35  ;;  %v578_v1 = vsel %vm570_vm11, 0.0, %v562_v50  ;;  %vm573_vm12 = vcmp.ge.f32.partialorder %v565_v57, 1.0 }
 0x107   : > { %v558_v2 = vmul.f32 0.5, %v550_v60  ;;  %v553_v5 = vsub.f32 %v537_v61, %v545_v55  ;;  %v535_v6 = vadd.f32 %v912_v15, %v520_v62  ;;  %586 = vst [vmem:[#allocation3 + $0x30] sm:$0xff] %v578_v1  ;;  %v581_v7 = vsel %vm573_vm12, 0.0, %v565_v57  ;;  %vm931_vm15 = vmpackc.low %vm573_vm12, %vm572_vm10 }
 0x108   : > { %vm571_vm13 = vcmp.ge.f32.partialorder %v563_v0, 1.0  ;;  %589 = vst [vmem:[#allocation3 + $0x10] sm:$0xff] %v581_v7  ;;  %v568_v10 = vadd.f32 %v560_v59, %v544_v41 }
 0x109   : > { %v561_v11 = vmul.f32 0.5, %v553_v5  ;;  %v551_v14 = vsub.f32 %v535_v6, %v543_v63  ;;  %v579_v16 = vsel %vm571_vm13, 0.0, %v563_v0  ;;  %vm929_vm14 = vmpackc.low %vm571_vm13, %vm570_vm11  ;;  %v566_v12 = vadd.f32 %v558_v2, %v542_v48 }
 0x10a   : > { %587 = vst [vmem:[#allocation3] sm:$0xff] %v579_v16  ;;  %991 = vmatprep.mubr.msk.bf16.mxu1 %vm929_vm14, %v1181_v18  ;;  %vm576_vm0 = vcmp.ge.f32.partialorder %v568_v10, 1.0 }
 0x10b   : > { %v559_v15 = vmul.f32 0.5, %v551_v14  ;;  %992 = vmatmul.mubr.msk.bf16.vlgmr.msra.gmra.mxu1 %vm931_vm15, %v1181_v18  ;;  %vm574_vm2 = vcmp.ge.f32.partialorder %v566_v12, 1.0  ;;  %v569_v19 = vadd.f32 %v561_v11, %v545_v55  ;;  %v584_v20 = vsel %vm576_vm0, 0.0, %v568_v10 }
 0x10c   : > { %v582_v21 = vsel %vm574_vm2, 0.0, %v566_v12  ;;  %592 = vst [vmem:[#allocation3 + $0x28] sm:$0xff] %v584_v20 }
 0x10d   : > { %v567_v22 = vadd.f32 %v559_v15, %v543_v63  ;;  %590 = vst [vmem:[#allocation3 + $0x8] sm:$0xff] %v582_v21  ;;  %vm577_vm3 = vcmp.ge.f32.partialorder %v569_v19, 1.0 }
 0x10e   : > { %v585_v25 = vsel %vm577_vm3, 0.0, %v569_v19  ;;  %vm935_vm6 = vmpackc.low %vm577_vm3, %vm576_vm0 }
 0x10f   : > { %vm575_vm4 = vcmp.ge.f32.partialorder %v567_v22, 1.0  ;;  %593 = vst [vmem:[#allocation3 + $0x38] sm:$0xff] %v585_v25 }
 0x110   : > { %v583_v26 = vsel %vm575_vm4, 0.0, %v567_v22  ;;  %vm933_vm5 = vmpackc.low %vm575_vm4, %vm574_vm2 }
 0x111   : > { %591 = vst [vmem:[#allocation3 + $0x20] sm:$0xff] %v583_v26  ;;  %995 = vmatprep.mubr.msk.bf16.mxu1 %vm933_vm5, %v1181_v18 }
 0x113   : > { %996 = vmatmul.mubr.msk.bf16.gmra.mxu1 %vm935_vm6, %v1181_v18 }
 0x1cb   : > { %v993_v28 = vpop.f32.mrf.mxu1 }
 0x1cc   : > { %v752_v29 = vmul.f32 %v993_v28, %v937_v27 }
 0x1cd   : > { %v712_v31 = vpop.f32.mrf.mxu1 }
 0x1ce   : > { %v760_v32 = vadd.f32 %v752_v29, %v1328_v8  ;;  %v750_v33 = vmul.f32 %v937_v27, %v712_v31 }
 0x1cf   : > { %v994_v34 = vpop.f32.mrf.mxu1 }
 0x1d0   : > { %v775_v35 = vadd.f32 %v938_v30, %v760_v32  ;;  %v758_v36 = vadd.f32 %v750_v33, %v1321_v3  ;;  %v753_v37 = vmul.f32 %v994_v34, %v937_v27 }
 0x1d1   : > { %v715_v38 = vpop.f32.mrf.mxu1 }
 0x1d2   : > { %783 = vst.msk [vmem:[%s1311_s11 + $0x10] sm:$0xff] %vm386_vm1, %v775_v35  ;;  %v773_v39 = vadd.f32 %v938_v30, %v758_v36  ;;  %v761_v40 = vadd.f32 %v753_v37, %v1331_v9  ;;  %v751_v41 = vmul.f32 %v937_v27, %v715_v38 }
 0x1d3   : > { %v997_v42 = vpop.f32.mrf.mxu1 }
 0x1d4   : > { %781 = vst.msk [vmem:[%s1311_s11] sm:$0xff] %vm386_vm1, %v773_v39  ;;  %v776_v8 = vadd.f32 %v938_v30, %v761_v40  ;;  %v759_v43 = vadd.f32 %v751_v41, %v1324_v4  ;;  %v756_v44 = vmul.f32 %v997_v42, %v937_v27 }
 0x1d5   : > { %v728_v3 = vpop.f32.mrf.mxu1 }
 0x1d6   : > { %784 = vst.msk [vmem:[%s1311_s11 + $0x18] sm:$0xff] %vm386_vm1, %v776_v8  ;;  %v774_v45 = vadd.f32 %v938_v30, %v759_v43  ;;  %v764_v46 = vadd.f32 %v756_v44, %v1345_v23  ;;  %v754_v47 = vmul.f32 %v937_v27, %v728_v3 }
 0x1d7   : > { %v998_v9 = vpop.f32.mrf.mxu1 }
 0x1d8   : > { %782 = vst.msk [vmem:[%s1311_s11 + $0x8] sm:$0xff] %vm386_vm1, %v774_v45  ;;  %v779_v48 = vadd.f32 %v938_v30, %v764_v46  ;;  %v762_v49 = vadd.f32 %v754_v47, %v1335_v13  ;;  %v757_v4 = vmul.f32 %v998_v9, %v937_v27 }
 0x1d9   : > { %v731_v50 = vpop.f32.mrf.mxu1 }
 0x1da   : > { %787 = vst.msk [vmem:[%s1311_s11 + $0x30] sm:$0xff] %vm386_vm1, %v779_v48  ;;  %v777_v51 = vadd.f32 %v938_v30, %v762_v49  ;;  %v765_v52 = vadd.f32 %v757_v4, %v1348_v24  ;;  %v755_v23 = vmul.f32 %v937_v27, %v731_v50 }
 0x1dc   : > { %785 = vst.msk [vmem:[%s1311_s11 + $0x20] sm:$0xff] %vm386_vm1, %v777_v51  ;;  %v780_v53 = vadd.f32 %v938_v30, %v765_v52  ;;  %v763_v54 = vadd.f32 %v755_v23, %v1340_v17 }
 0x1de   : > { %788 = vst.msk [vmem:[%s1311_s11 + $0x38] sm:$0xff] %vm386_vm1, %v780_v53  ;;  %v778_v13 = vadd.f32 %v938_v30, %v763_v54 }
 0x1e0   : > { %786 = vst.msk [vmem:[%s1311_s11 + $0x28] sm:$0xff] %vm386_vm1, %v778_v13 }
 0x1e1   : > { %1098 = shalt.err (!%p1095_p9)
}
 0x1e2   : > { %s1099_s11 = scalar_lea.hbm %s1434_s23, 1024  ;;  %s1103_s18 = scalar_lea.hbm %s1502_s7, 4096 }
 0x1e3   : > { %p1100_p10 = scmp.ne.s32.totalorder %s1434_s23, %s1099_s11  ;;  %p1104_p13 = scmp.lt.s32.totalorder %s1434_s23, %s1502_s7 }
 0x1e4   : > { %p1105_p0 = scmp.lt.s32.totalorder %s1103_s18, %s1099_s11 }
 0x1e5   : > { %p1101_p11 = pnand %p1100_p10, %p1276_p3 }
 0x1e6   : > { %p1106_p1 = por %p1105_p0, %p1104_p13 }
 0x1e7   : > { %p1102_p12 = pneg %p1101_p11 }
 0x1e9   : > { %p1107_p2 = pnand %p1106_p1, %p1102_p12 }
 0x1eb   : > { %1110 = shalt.err (!%p1107_p2)
}
 0x1ec   : > { %s1183_s22 = smov 128   ;;  %s1184_s10 = smov 8  }
 0x1ed   : > { %999 = dma.vmem_to_hbm [thread:$0]  (%p1276_p3), %s1436_s28, 1024, %s1434_s23, %s1444_s9, %s1183_s22, %s1183_s22, %s1184_s10  }
 0x1ee PF: > { %p1005_p4 = scmp.ge.s32.totalorder %s1177_s8, 2  ;;  %s820_s13 = sand.u32 1, %s1149_s24  }
 0x1ef   : > { %s821_s12 = scalar_lea.sflag [#allocation5], %s820_s13 }
 0x1f0   : > { %p1002_p5 = pnand %p1005_p4, %p1285_p8 }
 0x1f2   : > { %p1003_p6 = pneg %p1002_p5 }
 0x1f4   : > { %1144 = dma.done.wait (%p1003_p6), %s821_s12, 1024  }
 0x1f5   : > { %1146 = vsyncadd (%p1003_p6), %s821_s12, 4294966272  ;;  %s20_s8 = sadd.s32 1, %s1177_s8   ;;  %s1509_s14 = sld [smem:[#allocation7_spill]] }
 0x1f6   : > { %p17_p7 = scmp.ge.s32.totalorder %s20_s8, 6   ;;  %s1510_s23 = sld [smem:[#allocation8_spill]] }
 0x1f7   : > { %s1511_s24 = smov %s1153_s25  ;;  %s1512_s25 = smov %s1157_s26 }
 0x1f8   : > { %s1513_s26 = smov %s1294_s19  ;;  %s1514_s27 = smov %s1169_s29 }
 0x1f9   : > { %s1515_s28 = smov %s1173_s30  ;;  %19 = sbr.rel (!%p17_p7) target bundleno = 5 (0x5), region = 87 }
 0x1fb   : > { %s1516_s29 = smov %s1509_s14 }
 0x1fc   : > { %s1517_s30 = smov %s1510_s23 }
 0x1fe   :  { %826 = vsyncpa [#allocation5], 1 }
 0x1ff   :  { %828 = vsyncpa [#allocation5 + $0x1], 1 }

// kernel: ms_block_forward.2
= control target key start
LH: loop header
LB: loop body
LE: loop exit
PB: predicated region body
PF: predicated region fallthrough
CT: control target
= control target key end

     0   :  { %s8293_s0 = inlined_call_operand.hbm [shape: f32[2,2,64,32], index: 0, kind: input, shape index: {}]   ;;  %s8294_s1 = inlined_call_operand.vmem [shape: bf16[3,32,32], index: 1, kind: input, shape index: {}]   ;;  %s8295_s2 = inlined_call_operand.hbm [shape: f32[3,1,32], index: 2, kind: input, shape index: {}]   ;;  %s8296_s3 = inlined_call_operand.hbm [shape: f32[3,1,32], index: 3, kind: input, shape index: {}]   ;;  %s8297_s4 = inlined_call_operand.vmem [shape: f32[3,3,3,32], index: 4, kind: input, shape index: {}]   ;;  %s8298_s5 = inlined_call_operand.vmem [shape: bf16[3,32,32], index: 5, kind: input, shape index: {}]   ;;  %s8299_s6 = inlined_call_operand.hbm [shape: f32[3,1,32], index: 6, kind: input, shape index: {}]   ;;  %s8300_s7 = inlined_call_operand.hbm [shape: f32[3,1,32], index: 7, kind: input, shape index: {}]   ;;  %s8301_s8 = inlined_call_operand.vmem [shape: f32[32,32], index: 8, kind: input, shape index: {}]   ;;  %s8302_s9 = inlined_call_operand.hbm [shape: bf16[32,32], index: 9, kind: input, shape index: {}]   ;;  %s8303_s10 = inlined_call_operand.hbm [shape: f32[1,32], index: 10, kind: input, shape index: {}]   ;;  %s8304_s11 = inlined_call_operand.hbm [shape: f32[1,32], index: 11, kind: input, shape index: {}]   ;;  %s8305_s12 = inlined_call_operand.hbm [shape: f32[3,3,32], index: 12, kind: input, shape index: {}]   ;;  %s8306_s13 = inlined_call_operand.hbm [shape: bf16[32,32], index: 13, kind: input, shape index: {}]   ;;  %s8307_s14 = inlined_call_operand.hbm [shape: f32[1,32], index: 14, kind: input, shape index: {}]   ;;  %s8308_s15 = inlined_call_operand.hbm [shape: f32[1,32], index: 15, kind: input, shape index: {}]   ;;  %s8309_s16 = inlined_call_operand.vmem [shape: f32[2,2,64,32], index: 16, kind: output, shape index: {}]  }
   0x1   :  { %8344 = sst [smem:[#allocation49_spill]] %s8293_s0 }
   0x2   :  { %8345 = sst [smem:[#allocation50_spill]] %s8294_s1 }
   0x3   :  { %8346 = sst [smem:[#allocation51_spill]] %s8295_s2 }
   0x4   :  { %8347 = sst [smem:[#allocation52_spill]] %s8296_s3 }
   0x5   :  { %8348 = sst [smem:[#allocation53_spill]] %s8297_s4 }
   0x6   :  { %8349 = sst [smem:[#allocation54_spill]] %s8298_s5 }
   0x7   :  { %8350 = sst [smem:[#allocation55_spill]] %s8299_s6 }
   0x8   :  { %8351 = sst [smem:[#allocation56_spill]] %s8300_s7 }
   0x9   :  { %8352 = sst [smem:[#allocation57_spill]] %s8301_s8 }
   0xa   :  { %8353 = sst [smem:[#allocation58_spill]] %s8302_s9 }
   0xb   :  { %8354 = sst [smem:[#allocation59_spill]] %s8303_s10 }
   0xc   :  { %8355 = sst [smem:[#allocation60_spill]] %s8304_s11 }
   0xd   :  { %8356 = sst [smem:[#allocation61_spill]] %s8305_s12 }
   0xe   :  { %8357 = sst [smem:[#allocation62_spill]] %s8306_s13 }
   0xf   :  { %8358 = sst [smem:[#allocation63_spill]] %s8307_s14 }
  0x10   :  { %8359 = sst [smem:[#allocation64_spill]] %s8309_s16 }
  0x11   :  { %21 = vsyncpa [#allocation7], 0 }
  0x12   :  { %23 = vsyncpa [#allocation7 + $0x1], 0 }
  0x13   :  { %24 = vsyncpa [#allocation9], 0 }
  0x14   :  { %25 = vsyncpa [#allocation12], 0 }
  0x15   :  { %26 = vsyncpa [#allocation15], 0 }
  0x16   :  { %27 = vsyncpa [#allocation18], 0 }
  0x17   :  { %28 = vsyncpa [#allocation21], 0 }
  0x18   :  { %29 = vsyncpa [#allocation24], 0  ;;  %s5913_s21 = smov 0   ;;  %s5915_s22 = smov 0  }
  0x19   :  { %s5917_s23 = smov 0   ;;  %s5919_s24 = smov 0  }
  0x1a   :  { %s5921_s25 = smov 0   ;;  %s5923_s26 = smov 0  }
  0x1b   :  { %s5925_s27 = smov 0   ;;  %s5927_s28 = smov 0  }
  0x1c LB: > { %8360 = sst [smem:[#allocation32_spill]] %s5793_s25  ;;  %s4832_s29 = sadd.s32 4294967295, %s5805_s28   ;;  %s5805_s28 = sphi %s5927_s28, %s35_s28   ;;  %s5801_s27 = sphi %s5925_s27, %s8432_s27   ;;  %s5797_s26 = sphi %s5923_s26, %s8431_s26   ;;  %s5793_s25 = sphi %s5921_s25, %s8430_s25   ;;  %s5789_s24 = sphi %s5919_s24, %s8429_s24   ;;  %s5785_s23 = sphi %s5917_s23, %s8428_s23   ;;  %s5781_s22 = sphi %s5915_s22, %s8427_s22   ;;  %s5777_s21 = sphi %s5913_s21, %s8426_s21  }
  0x1d   : > { %p4834_p0 = scmp.ge.s32.totalorder %s5805_s28, 1  ;;  %p5955_p1 = scmp.eq.s32.totalorder %s4832_s29, 0 }
  0x1e   : > { %p423_p2 = scmp.lt.s32.totalorder %s5805_s28, 5  ;;  %s5807_s17 = smov [#allocation8]  }
  0x1f   : > { %s8361_s30 = scalar_select %p5955_p1, 1, 0 }
  0x20   : > { %p5960_p3 = pnand %p4834_p0, %p423_p2  ;;  %s438_s18 = sshll.u32 %s5807_s17, 4  ;;  %s439_s18 = int_to_ptr.vmem [resolvable:$true] %s438_s18 }
  0x21   : > { %s5808_s20 = smov [#allocation11]   ;;  %s5809_s8 = smov [#allocation14]  }
  0x22   : > { %s8362_s0 = scalar_select %p5960_p3, 1, 0 }
  0x23   : > { %p5232_p4 = pneg %p5960_p3  ;;  %s470_s29 = sshll.u32 %s5808_s20, 4  ;;  %s5972_s29 = int_to_ptr.vmem [resolvable:$true] %s470_s29 }
  0x24   : > { %s5974_s4 = sshll.u32 %s5809_s8, 4  ;;  %s5412_s17 = scalar_lea.vmem %s439_s18, 48  ;;  %s500_s4 = int_to_ptr.vmem [resolvable:$true] %s5974_s4 }
  0x25   : > { %p5968_p5 = pnand %p5232_p4, %p5955_p1  ;;  %p5413_p7 = scmp.ne.s32.totalorder %s439_s18, %s5412_s17 }
  0x26   : > { %s5419_s1 = scalar_lea.vmem %s439_s18, 64  ;;  %p5420_p10 = scmp.lt.s32.totalorder %s439_s18, %s439_s18 }
  0x27   : > { %p5978_p6 = pneg %p5968_p5  ;;  %p5421_p11 = scmp.lt.s32.totalorder %s5419_s1, %s5412_s17 }
  0x29   : > { %p5415_p8 = pnand %p5413_p7, %p5978_p6  ;;  %p5422_p12 = por %p5421_p11, %p5420_p10 }
  0x2b   : > { %p5416_p9 = pneg %p5415_p8 }
  0x2d   : > { %p5423_p13 = pnand %p5422_p12, %p5416_p9 }
  0x2f   : > { %5426 = shalt.err (!%p5423_p13)
}
  0x30   : > { %s8315_s20 = smov 16   ;;  %s8317_s8 = smov 1  }
  0x31   : > { %s8365_s2 = sld [smem:[#allocation51_spill]]  ;;  %s5438_s1 = scalar_lea.vmem %s5972_s29, 48 }
  0x32   : > { %p5439_p0 = scmp.ne.s32.totalorder %s5972_s29, %s5438_s1  ;;  %s5445_s17 = scalar_lea.vmem %s5972_s29, 64 }
  0x33   : > { %p5446_p7 = scmp.lt.s32.totalorder %s5972_s29, %s5972_s29  ;;  %p5447_p8 = scmp.lt.s32.totalorder %s5445_s17, %s5438_s1 }
  0x34   : > { %p5441_p2 = pnand %p5439_p0, %p5978_p6 }
  0x35   : > { %p5448_p9 = por %p5447_p8, %p5446_p7 }
  0x36   : > { %p5442_p4 = pneg %p5441_p2 }
  0x37   : > { %5235 = dma.hbm_to_vmem [thread:$0]  (!%p5968_p5), %s8365_s2, 48, %s439_s18, [#allocation9], %s8315_s20, %s8315_s20, %s8317_s8  }
  0x38   : > { %p5449_p10 = pnand %p5448_p9, %p5442_p4 }
  0x3a   : > { %5452 = shalt.err (!%p5449_p10)
}
  0x3b   : > { %s8366_s6 = sld [smem:[#allocation55_spill]]  ;;  %s5464_s18 = scalar_lea.vmem %s500_s4, 256 }
  0x3c   : > { %p5465_p11 = scmp.ne.s32.totalorder %s500_s4, %s5464_s18  ;;  %p5472_p0 = scmp.lt.s32.totalorder %s500_s4, %s500_s4 }
  0x3d   : > { %p5473_p2 = scmp.lt.s32.totalorder %s5464_s18, %s5464_s18 }
  0x3e   : > { %p5467_p12 = pnand %p5465_p11, %p5978_p6 }
  0x3f   : > { %p5474_p4 = por %p5473_p2, %p5472_p0 }
  0x40   : > { %p5468_p13 = pneg %p5467_p12 }
  0x41   : > { %5241 = dma.hbm_to_vmem [thread:$0]  (!%p5968_p5), %s8366_s6, 48, %s5972_s29, [#allocation12], %s8315_s20, %s8315_s20, %s8317_s8  }
  0x42   : > { %p5475_p7 = pnand %p5474_p4, %p5468_p13 }
  0x44   : > { %5478 = shalt.err (!%p5475_p7)
}
  0x45   : > { %s8322_s1 = smov 64   ;;  %s8323_s17 = smov 4  }
  0x46   : > { %s8367_s9 = sld [smem:[#allocation58_spill]]  ;;  %s5814_s25 = smov [#allocation17]  }
  0x47   : > { %s524_s20 = sshll.u32 %s5814_s25, 4  ;;  %s5815_s8 = smov [#allocation20]   ;;  %s525_s20 = int_to_ptr.vmem [resolvable:$true] %s524_s20 }
  0x48   : > { %s547_s18 = sshll.u32 %s5815_s8, 4  ;;  %s5490_s2 = scalar_lea.vmem %s525_s20, 16  ;;  %s548_s18 = int_to_ptr.vmem [resolvable:$true] %s547_s18 }
  0x49   : > { %p5491_p8 = scmp.ne.s32.totalorder %s525_s20, %s5490_s2  ;;  %s5497_s6 = scalar_lea.vmem %s525_s20, 32 }
  0x4a   : > { %p5498_p11 = scmp.lt.s32.totalorder %s525_s20, %s525_s20  ;;  %p5499_p12 = scmp.lt.s32.totalorder %s5497_s6, %s5490_s2 }
  0x4b   : > { %p5493_p9 = pnand %p5491_p8, %p5978_p6 }
  0x4c   : > { %5247 = dma.hbm_to_vmem [thread:$0]  (!%p5968_p5), %s8367_s9, 256, %s500_s4, [#allocation15], %s8322_s1, %s8322_s1, %s8323_s17  }
  0x4d   : > { %p5494_p10 = pneg %p5493_p9  ;;  %p5500_p13 = por %p5499_p12, %p5498_p11 }
  0x4f   : > { %p5501_p0 = pnand %p5500_p13, %p5494_p10 }
  0x51   : > { %5504 = shalt.err (!%p5501_p0)
}
  0x52   : > { %s8368_s11 = sld [smem:[#allocation60_spill]]  ;;  %s5516_s8 = scalar_lea.vmem %s548_s18, 256 }
  0x53   : > { %p5517_p2 = scmp.ne.s32.totalorder %s548_s18, %s5516_s8  ;;  %p5524_p8 = scmp.lt.s32.totalorder %s548_s18, %s548_s18 }
  0x54   : > { %p5525_p9 = scmp.lt.s32.totalorder %s5516_s8, %s5516_s8 }
  0x55   : > { %p5519_p4 = pnand %p5517_p2, %p5978_p6 }
  0x56   : > { %p5526_p3 = por %p5525_p9, %p5524_p8 }
  0x57   : > { %p5520_p7 = pneg %p5519_p4 }
  0x58   : > { %5253 = dma.hbm_to_vmem [thread:$0]  (!%p5968_p5), %s8368_s11, 16, %s525_s20, [#allocation18]  }
  0x59   : > { %p5527_p1 = pnand %p5526_p3, %p5520_p7 }
  0x5b   : > { %5530 = shalt.err (!%p5527_p1)
}
  0x5c   : > { %s8369_s13 = sld [smem:[#allocation62_spill]]  ;;  %s5816_s20 = smov [#allocation10]  }
  0x5d   : > { %s451_s16 = sshll.u32 %s5816_s20, 4  ;;  %s5817_s25 = smov [#allocation13]   ;;  %s452_s16 = int_to_ptr.vmem [resolvable:$true] %s451_s16 }
  0x5e   : > { %s483_s29 = sshll.u32 %s5817_s25, 4  ;;  %s5542_s4 = scalar_lea.vmem %s452_s16, 48  ;;  %s484_s29 = int_to_ptr.vmem [resolvable:$true] %s483_s29 }
  0x5f   : > { %p5543_p10 = scmp.ne.s32.totalorder %s452_s16, %s5542_s4  ;;  %s5549_s8 = scalar_lea.vmem %s452_s16, 64 }
  0x60   : > { %p5550_p11 = scmp.lt.s32.totalorder %s452_s16, %s452_s16  ;;  %p5551_p12 = scmp.lt.s32.totalorder %s5549_s8, %s5542_s4 }
  0x61   : > { %p5545_p3 = pnand %p5543_p10, %p5978_p6 }
  0x62   : > { %5259 = dma.hbm_to_vmem [thread:$0]  (!%p5968_p5), %s8369_s13, 256, %s548_s18, [#allocation21], %s8322_s1, %s8322_s1, %s8323_s17  }
  0x63   : > { %p5546_p1 = pneg %p5545_p3  ;;  %p5552_p13 = por %p5551_p12, %p5550_p11 }
  0x65   : > { %p5553_p0 = pnand %p5552_p13, %p5546_p1 }
  0x67   : > { %5556 = shalt.err (!%p5553_p0)
}
  0x68   : > { %s8370_s2 = smov 1   ;;  %s8371_s18 = smov 16  }
  0x69   : > { %s8372_s3 = sld [smem:[#allocation52_spill]]  ;;  %s5568_s25 = scalar_lea.vmem %s484_s29, 48 }
  0x6a   : > { %p5569_p2 = scmp.ne.s32.totalorder %s484_s29, %s5568_s25  ;;  %s5575_s4 = scalar_lea.vmem %s484_s29, 64 }
  0x6b   : > { %p5576_p8 = scmp.lt.s32.totalorder %s484_s29, %s484_s29  ;;  %p5577_p9 = scmp.lt.s32.totalorder %s5575_s4, %s5568_s25 }
  0x6c   : > { %p5571_p4 = pnand %p5569_p2, %p5978_p6 }
  0x6d   : > { %p5578_p10 = por %p5577_p9, %p5576_p8 }
  0x6e   : > { %p5572_p7 = pneg %p5571_p4 }
  0x6f   : > { %5238 = dma.hbm_to_vmem [thread:$0]  (!%p5968_p5), %s8372_s3, 48, %s452_s16, [#allocation9], %s8371_s18, %s8371_s18, %s8370_s2  }
  0x70   : > { %p5579_p3 = pnand %p5578_p10, %p5572_p7 }
  0x72   : > { %5582 = shalt.err (!%p5579_p3)
}
  0x73   : > { %s8373_s7 = sld [smem:[#allocation56_spill]]  ;;  %s5818_s16 = smov [#allocation16]  }
  0x74   : > { %s513_s20 = sshll.u32 %s5818_s16, 4  ;;  %s5819_s1 = smov [#allocation19]   ;;  %s514_s20 = int_to_ptr.vmem [resolvable:$true] %s513_s20 }
  0x75   : > { %s534_s17 = sshll.u32 %s5819_s1, 4  ;;  %s5594_s3 = scalar_lea.vmem %s514_s20, 16  ;;  %s535_s17 = int_to_ptr.vmem [resolvable:$true] %s534_s17 }
  0x76   : > { %p5595_p1 = scmp.ne.s32.totalorder %s514_s20, %s5594_s3  ;;  %s5601_s25 = scalar_lea.vmem %s514_s20, 32 }
  0x77   : > { %p5602_p13 = scmp.lt.s32.totalorder %s514_s20, %s514_s20  ;;  %p5603_p0 = scmp.lt.s32.totalorder %s5601_s25, %s5594_s3 }
  0x78   : > { %p5597_p11 = pnand %p5595_p1, %p5978_p6 }
  0x79   : > { %5244 = dma.hbm_to_vmem [thread:$0]  (!%p5968_p5), %s8373_s7, 48, %s484_s29, [#allocation12], %s8371_s18, %s8371_s18, %s8370_s2  }
  0x7a   : > { %p5598_p12 = pneg %p5597_p11  ;;  %p5604_p2 = por %p5603_p0, %p5602_p13 }
  0x7c   : > { %p5605_p4 = pnand %p5604_p2, %p5598_p12 }
  0x7e   : > { %5608 = shalt.err (!%p5605_p4)
}
  0x7f   : > { %s8374_s10 = sld [smem:[#allocation59_spill]]  ;;  %s5620_s1 = scalar_lea.vmem %s535_s17, 192 }
  0x80   : > { %p5621_p7 = scmp.ne.s32.totalorder %s535_s17, %s5620_s1  ;;  %p5628_p10 = scmp.lt.s32.totalorder %s535_s17, %s535_s17 }
  0x81   : > { %p5629_p3 = scmp.lt.s32.totalorder %s5620_s1, %s5620_s1 }
  0x82   : > { %p5623_p8 = pnand %p5621_p7, %p5978_p6 }
  0x83   : > { %p5630_p1 = por %p5629_p3, %p5628_p10 }
  0x84   : > { %p5624_p9 = pneg %p5623_p8 }
  0x85   : > { %5250 = dma.hbm_to_vmem [thread:$0]  (!%p5968_p5), %s8374_s10, 16, %s514_s20, [#allocation15]  }
  0x86   : > { %p5631_p11 = pnand %p5630_p1, %p5624_p9 }
  0x88   : > { %5634 = shalt.err (!%p5631_p11)
}
  0x89   : > { %s8375_s3 = smov 4   ;;  %s8376_s2 = smov 64  }
  0x8a   : > { %s8377_s12 = sld [smem:[#allocation61_spill]]  ;;  %s5820_s6 = smov [#allocation22]  }
  0x8b   : > { %s561_s16 = sshll.u32 %s5820_s6, 4  ;;  %s5821_s20 = smov [#allocation23]   ;;  %s562_s16 = int_to_ptr.vmem [resolvable:$true] %s561_s16 }
  0x8c   : > { %s572_s25 = sshll.u32 %s5821_s20, 4  ;;  %s5646_s4 = scalar_lea.vmem %s562_s16, 16  ;;  %s573_s25 = int_to_ptr.vmem [resolvable:$true] %s572_s25 }
  0x8d   : > { %p5647_p12 = scmp.ne.s32.totalorder %s562_s16, %s5646_s4  ;;  %s5653_s29 = scalar_lea.vmem %s562_s16, 32 }
  0x8e   : > { %p5654_p2 = scmp.lt.s32.totalorder %s562_s16, %s562_s16  ;;  %p5655_p4 = scmp.lt.s32.totalorder %s5653_s29, %s5646_s4 }
  0x8f   : > { %p5649_p13 = pnand %p5647_p12, %p5978_p6 }
  0x90   : > { %5256 = dma.hbm_to_vmem [thread:$0]  (!%p5968_p5), %s8377_s12, 192, %s535_s17, [#allocation18], %s8376_s2, %s8376_s2, %s8375_s3  }
  0x91   : > { %p5650_p0 = pneg %p5649_p13  ;;  %p5656_p7 = por %p5655_p4, %p5654_p2 }
  0x93   : > { %p5657_p8 = pnand %p5656_p7, %p5650_p0 }
  0x95   : > { %5660 = shalt.err (!%p5657_p8)
}
  0x96   : > { %s8378_s14 = sld [smem:[#allocation63_spill]]  ;;  %s5672_s3 = scalar_lea.vmem %s573_s25, 16 }
  0x97   : > { %p5673_p9 = scmp.ne.s32.totalorder %s573_s25, %s5672_s3  ;;  %s5679_s2 = scalar_lea.vmem %s573_s25, 32 }
  0x98   : > { %p5680_p1 = scmp.lt.s32.totalorder %s573_s25, %s573_s25  ;;  %p5681_p11 = scmp.lt.s32.totalorder %s5679_s2, %s5672_s3 }
  0x99   : > { %p5675_p10 = pnand %p5673_p9, %p5978_p6 }
  0x9a   : > { %p5682_p12 = por %p5681_p11, %p5680_p1 }
  0x9b   : > { %p5676_p3 = pneg %p5675_p10 }
  0x9c   : > { %5262 = dma.hbm_to_vmem [thread:$0]  (!%p5968_p5), %s8378_s14, 16, %s562_s16, [#allocation21]  }
  0x9d   : > { %p5683_p13 = pnand %p5682_p12, %p5676_p3 }
  0x9f   : > { %5686 = shalt.err (!%p5683_p13)
}
  0xa0   : > { %5265 = dma.hbm_to_vmem [thread:$0]  (!%p5968_p5), %s8308_s15, 16, %s573_s25, [#allocation24]  }
  0xa1   : > { %s44_s5 = sadd.s32 1, %s5797_s26  ;;  %s47_s19 = sadd.s32 1, %s5801_s27 }
  0xa2   : > { %p45_p6 = scmp.ge.s32.totalorder %s44_s5, 2  ;;  %s56_s6 = sadd.s32 1, %s5785_s23 }
  0xa3   : > { %p63_p0 = scmp.ne.s32.totalorder %s5785_s23, %s5781_s22  ;;  %p64_p2 = scmp.eq.s32.totalorder %s5805_s28, 0 }
  0xa4   : > { %s8434_s5 = smov (%p45_p6, %s44_s5), 0  ;;  %s8436_s19 = smov (!%p45_p6, %s47_s19), %s5801_s27 }
  0xa5   : > { %s51_s16 = ssub.s32 %s5797_s26, %s8434_s5  ;;  %p49_p4 = scmp.ge.s32.totalorder %s8436_s19, 2 }
  0xa6   : > { %p69_p7 = scmp.ne.s32.totalorder %s5781_s22, %s5777_s21  ;;  %p6100_p8 = por %p64_p2, %p63_p0 }
  0xa7   : > { %p5281_p5 = scmp.lt.s32.totalorder %s5805_s28, 4  ;;  %s8438_s19 = smov (%p49_p4, %s8436_s19), 0 }
  0xa8   : > { %p8380_p9 = scmp.ne.s32.totalorder %s8361_s30, 0  ;;  %s583_s4 = sand.u32 1, %s5785_s23  }
  0xa9   : > { %s52_s29 = ssub.s32 %s5801_s27, %s8438_s19  ;;  %s4847_s17 = sshll.u32 %s583_s4, 6 }
  0xaa   : > { %p6109_p10 = por %p8380_p9, %p69_p7  ;;  %s53_s1 = sor.u32 %s52_s29, %s51_s16 }
  0xab   : > { %p54_p3 = scmp.eq.s32.totalorder %s53_s1, 0  ;;  %s4848_s21 = sshll.u32 %s5801_s27, 3 }
  0xac   : > { %s4849_s3 = sshll.u32 %s5797_s26, 4  ;;  %s587_s8 = scalar_lea.vmem [#allocation6], %s4847_s17 }
  0xad   : > { %s6119_s2 = scalar_select %p54_p3, %s5785_s23, %s56_s6  }
  0xae   : > { %s593_s18 = sadd.s32 %s4849_s3, %s4848_s21  ;;  %s596_s7 = sshll.u32 %s587_s8, 4  ;;  %s597_s7 = int_to_ptr.vmem [resolvable:$true] %s596_s7 }
  0xaf   : > { %s4850_s9 = sshll.u32 %s593_s18, 7  ;;  %s8382_s12 = sld [smem:[#allocation49_spill]] }
  0xb0   : > { %p6128_p1 = pnand %p5281_p5, %p6100_p8  ;;  %s584_s16 = scalar_lea.sflag [#allocation7], %s583_s4 }
  0xb1   : > { %s5700_s6 = scalar_lea.vmem %s597_s7, 1024  ;;  %s5822_s29 = smov [#allocation6]  }
  0xb2   : > { %p5689_p11 = pneg %p6128_p1  ;;  %p5701_p12 = scmp.ne.s32.totalorder %s597_s7, %s5700_s6 }
  0xb3   : > { %s5705_s1 = sshll.u32 %s5822_s29, 4  ;;  %s5706_s1 = int_to_ptr.vmem [resolvable:$false] %s5705_s1 }
  0xb4   : > { %p5703_p13 = pnand %p5701_p12, %p5689_p11  ;;  %s5707_s17 = scalar_lea.vmem %s5706_s1, 2048 }
  0xb5   : > { %s595_s13 = scalar_lea.hbm %s8382_s12, %s4850_s9  ;;  %p5708_p0 = scmp.lt.s32.totalorder %s597_s7, %s5706_s1 }
  0xb6   : > { %p5704_p6 = pneg %p5703_p13  ;;  %p5709_p2 = scmp.lt.s32.totalorder %s5707_s17, %s5700_s6 }
  0xb8   : > { %p5710_p4 = por %p5709_p2, %p5708_p0 }
  0xba   : > { %p5711_p7 = pnand %p5710_p4, %p5704_p6 }
  0xbc   : > { %5714 = shalt.err (!%p5711_p7)
}
  0xbd   : > { %s5823_s9 = smov 128   ;;  %s5824_s10 = smov 8  }
  0xbe   : > { %5269 = dma.hbm_to_vmem [thread:$0]  (!%p6128_p1), %s595_s13, 1024, %s597_s7, %s584_s16, %s5823_s9, %s5823_s9, %s5824_s10  }
  0xbf   : > { %p8384_p8 = scmp.ne.s32.totalorder %s8362_s0, 0 }
  0xc1   : > { %608 = sbr.rel (%p8384_p8) target bundleno = 1883 (0x75b), region = 84 }
  0xc6   : > { %s610_s11 = sand.u32 1, %s5781_s22  }
  0xc7   : > { %s4852_s12 = sshll.u32 %s610_s11, 6  ;;  %s611_s20 = scalar_lea.sflag [#allocation7], %s610_s11 }
  0xc8   : > { %s6139_s4 = scalar_lea.vmem [#allocation6], %s4852_s12 }
  0xc9   : > { %5748 = dma.done.wait (%p6109_p10), %s611_s20, 1024  }
  0xca   : > { %5750 = vsyncadd (%p6109_p10), %s611_s20, 4294966272  ;;  %p8385_p5 = scmp.ne.s32.totalorder %s8361_s30, 0 }
  0xcc   : > { %5752 = dma.done.wait (%p8385_p5), [#allocation9], 96  }
  0xcd   : > { %5754 = vsyncadd (%p8385_p5), [#allocation9], 4294967200 }
  0xce   : > { %5756 = dma.done.wait (%p8385_p5), [#allocation12], 96  }
  0xcf   : > { %5758 = vsyncadd (%p8385_p5), [#allocation12], 4294967200 }
  0xd0   : > { %5760 = dma.done.wait (%p8385_p5), [#allocation15], 272  }
  0xd1   : > { %5762 = vsyncadd (%p8385_p5), [#allocation15], 4294967024 }
  0xd2   : > { %5764 = dma.done.wait (%p8385_p5), [#allocation18], 208  }
  0xd3   : > { %5766 = vsyncadd (%p8385_p5), [#allocation18], 4294967088 }
  0xd4   : > { %5768 = dma.done.wait (%p8385_p5), [#allocation21], 272  }
  0xd5   : > { %5770 = vsyncadd (%p8385_p5), [#allocation21], 4294967024 }
  0xd6   : > { %5772 = dma.done.wait (%p8385_p5), [#allocation24], 16  }
  0xd7   : > { %5774 = vsyncadd (%p8385_p5), [#allocation24], 4294967280  ;;  %s8386_s7 = sld [smem:[#allocation32_spill]]  ;;  %p711_p9 = scmp.lt.s32.totalorder %s5789_s24, 1 }
  0xd8   : > { %s8387_s8 = sld [smem:[#allocation64_spill]]  ;;  %p4867_p3 = scmp.ne.s32.totalorder %s5789_s24, 0 }
  0xd9   : > { %s712_s13 = scalar_select %p711_p9, %s5789_s24, 1 }
  0xdb   : > { %s4865_s14 = sshll.u32 %s712_s13, 4 }
  0xdd   : > { %p713_p10 = scmp.lt.s32.totalorder %s8386_s7, 1 }
  0xdf   : > { %s8440_s7 = smov (!%p713_p10, %s8386_s7), 1  ;;  %724 = sbr.rel (%p4867_p3) target bundleno = 249 (0xf9), region = 136 }
  0xe0   : > { %s4864_s0 = sshll.u32 %s8440_s7, 3 }
  0xe1   : > { %s717_s25 = sadd.s32 %s4865_s14, %s4864_s0 }
  0xe2   : > { %s4866_s21 = sshll.u32 %s717_s25, 3 }
  0xe3   : > { %s6176_s16 = scalar_lea.vmem %s8387_s8, %s4866_s21 }
  0xe4   : > { %vm725_vm0 = vcmask 261120   ;;  %v5825_v0 = vmov 0.0  }
  0xe5   : > { %726 = vst.msk [vmem:[#allocation2] sm:$0xff] %vm725_vm0, %v5825_v0  ;;  %727 = vst.msk [vmem:[#allocation2 + $0x8] sm:$0xff] %vm725_vm0, %v5825_v0 }
  0xe6   : > { %728 = vst.msk [vmem:[#allocation2 + $0x10] sm:$0xff] %vm725_vm0, %v5825_v0  ;;  %729 = vst.msk [vmem:[#allocation2 + $0x18] sm:$0xff] %vm725_vm0, %v5825_v0 }
  0xe7   : > { %730 = vst.msk [vmem:[#allocation2 + $0x20] sm:$0xff] %vm725_vm0, %v5825_v0  ;;  %731 = vst.msk [vmem:[#allocation2 + $0x28] sm:$0xff] %vm725_vm0, %v5825_v0 }
  0xe8   : > { %732 = vst.msk [vmem:[#allocation2 + $0x30] sm:$0xff] %vm725_vm0, %v5825_v0  ;;  %733 = vst.msk [vmem:[#allocation2 + $0x38] sm:$0xff] %vm725_vm0, %v5825_v0 }
  0xe9   : > { %734 = vst.msk [vmem:[#allocation3] sm:$0xff] %vm725_vm0, %v5825_v0  ;;  %735 = vst.msk [vmem:[#allocation3 + $0x8] sm:$0xff] %vm725_vm0, %v5825_v0 }
  0xea   : > { %736 = vst.msk [vmem:[#allocation3 + $0x10] sm:$0xff] %vm725_vm0, %v5825_v0  ;;  %737 = vst.msk [vmem:[#allocation3 + $0x18] sm:$0xff] %vm725_vm0, %v5825_v0 }
  0xeb   : > { %738 = vst.msk [vmem:[#allocation3 + $0x20] sm:$0xff] %vm725_vm0, %v5825_v0  ;;  %739 = vst.msk [vmem:[#allocation3 + $0x28] sm:$0xff] %vm725_vm0, %v5825_v0 }
  0xec   : > { %740 = vst.msk [vmem:[#allocation3 + $0x30] sm:$0xff] %vm725_vm0, %v5825_v0  ;;  %741 = vst.msk [vmem:[#allocation3 + $0x38] sm:$0xff] %vm725_vm0, %v5825_v0 }
  0xed   : > { %742 = vst.msk [vmem:[#allocation3 + $0x40] sm:$0xff] %vm725_vm0, %v5825_v0  ;;  %743 = vst.msk [vmem:[#allocation3 + $0x48] sm:$0xff] %vm725_vm0, %v5825_v0 }
  0xee   : > { %744 = vst.msk [vmem:[#allocation3 + $0x50] sm:$0xff] %vm725_vm0, %v5825_v0  ;;  %745 = vst.msk [vmem:[#allocation3 + $0x58] sm:$0xff] %vm725_vm0, %v5825_v0 }
  0xef   : > { %746 = vst.msk [vmem:[#allocation3 + $0x60] sm:$0xff] %vm725_vm0, %v5825_v0  ;;  %747 = vst.msk [vmem:[#allocation3 + $0x68] sm:$0xff] %vm725_vm0, %v5825_v0 }
  0xf0   : > { %748 = vst.msk [vmem:[#allocation3 + $0x70] sm:$0xff] %vm725_vm0, %v5825_v0  ;;  %749 = vst.msk [vmem:[#allocation3 + $0x78] sm:$0xff] %vm725_vm0, %v5825_v0 }
  0xf1   : > { %750 = vst.msk [vmem:[#allocation3 + $0x80] sm:$0xff] %vm725_vm0, %v5825_v0  ;;  %751 = vst.msk [vmem:[#allocation3 + $0x88] sm:$0xff] %vm725_vm0, %v5825_v0 }
  0xf2   : > { %752 = vst.msk [vmem:[#allocation3 + $0x90] sm:$0xff] %vm725_vm0, %v5825_v0  ;;  %753 = vst.msk [vmem:[#allocation3 + $0x98] sm:$0xff] %vm725_vm0, %v5825_v0 }
  0xf3   : > { %754 = vst.msk [vmem:[#allocation3 + $0xa0] sm:$0xff] %vm725_vm0, %v5825_v0  ;;  %755 = vst.msk [vmem:[#allocation3 + $0xa8] sm:$0xff] %vm725_vm0, %v5825_v0 }
  0xf4   : > { %756 = vst.msk [vmem:[#allocation3 + $0xb0] sm:$0xff] %vm725_vm0, %v5825_v0  ;;  %757 = vst.msk [vmem:[#allocation3 + $0xb8] sm:$0xff] %vm725_vm0, %v5825_v0 }
  0xf5   : > { %758 = vst.msk [vmem:[#allocation4] sm:$0xff] %vm725_vm0, %v5825_v0  ;;  %759 = vst.msk [vmem:[#allocation4 + $0x8] sm:$0xff] %vm725_vm0, %v5825_v0 }
  0xf6   : > { %760 = vst.msk [vmem:[#allocation4 + $0x10] sm:$0xff] %vm725_vm0, %v5825_v0  ;;  %761 = vst.msk [vmem:[#allocation4 + $0x18] sm:$0xff] %vm725_vm0, %v5825_v0 }
  0xf7   : > { %762 = vst.msk [vmem:[#allocation4 + $0x20] sm:$0xff] %vm725_vm0, %v5825_v0  ;;  %763 = vst.msk [vmem:[#allocation4 + $0x28] sm:$0xff] %vm725_vm0, %v5825_v0 }
  0xf8   : > { %764 = vst.msk [vmem:[#allocation4 + $0x30] sm:$0xff] %vm725_vm0, %v5825_v0  ;;  %765 = vst.msk [vmem:[#allocation4 + $0x38] sm:$0xff] %vm725_vm0, %v5825_v0 }
  0xf9 PF: > { %s8388_s6 = sld [smem:[#allocation50_spill]]  ;;  %v766_v3 = vld [vmem:[%s6139_s4] sm:$0xff]  ;;  %v767_v4 = vld [vmem:[%s6139_s4 + $0x8] sm:$0xff]  ;;  %v768_v8 = vld [vmem:[%s6139_s4 + $0x10] sm:$0xff]  ;;  %vm822_vm1 = vcmask 261120   ;;  %v8324_v40 = vmov 0.0  }
  0xfa   : > { %v774_v5 = vld [vmem:[#allocation2] sm:$0xff]  ;;  %v775_v6 = vld [vmem:[#allocation2 + $0x8] sm:$0xff]  ;;  %v769_v9 = vld [vmem:[%s6139_s4 + $0x18] sm:$0xff]  ;;  %vm987_vm10 = vcmask 254976   ;;  %vm992_vm11 = vcmask 253952   ;;  %s8390_s25 = sld [smem:[#allocation54_spill]] }
  0xfb   : > { %v782_v7 = vsub.f32 %v766_v3, %v774_v5  ;;  %v783_v10 = vsub.f32 %v767_v4, %v775_v6  ;;  %v776_v11 = vld [vmem:[#allocation2 + $0x10] sm:$0xff]  ;;  %v777_v12 = vld [vmem:[#allocation2 + $0x18] sm:$0xff]  ;;  %v770_v13 = vld [vmem:[%s6139_s4 + $0x20] sm:$0xff]  ;;  %v961_v4 = vlaneseq  ;;  %s8393_s1 = sld [smem:[#allocation53_spill]]  ;;  %vm1089_vm12 = vcmask 1046528  }
  0xfc   : > { %v784_v15 = vsub.f32 %v768_v8, %v776_v11  ;;  %v785_v16 = vsub.f32 %v769_v9, %v777_v12  ;;  %v771_v17 = vld [vmem:[%s6139_s4 + $0x28] sm:$0xff]  ;;  %v778_v18 = vld [vmem:[#allocation2 + $0x20] sm:$0xff]  ;;  %v772_v23 = vld [vmem:[%s6139_s4 + $0x30] sm:$0xff]  ;;  %vm1166_vm13 = vcmask 1045504   ;;  %s8425_s13 = sld [smem:[#allocation57_spill]] }
  0xfd   : > { %v790_v14 = vmul.f32 0.5, %v782_v7  ;;  %v779_v19 = vld [vmem:[#allocation2 + $0x28] sm:$0xff]  ;;  %v791_v20 = vmul.f32 0.5, %v783_v10  ;;  %v786_v21 = vsub.f32 %v770_v13, %v778_v18  ;;  %v773_v24 = vld [vmem:[%s6139_s4 + $0x38] sm:$0xff]  ;;  %v780_v25 = vld [vmem:[#allocation2 + $0x30] sm:$0xff] }
  0xfe   : > { %v787_v22 = vsub.f32 %v771_v17, %v779_v19  ;;  %v792_v27 = vmul.f32 0.5, %v784_v15  ;;  %v793_v28 = vmul.f32 0.5, %v785_v16  ;;  %v781_v29 = vld [vmem:[#allocation2 + $0x38] sm:$0xff]  ;;  %v788_v30 = vsub.f32 %v772_v23, %v780_v25  ;;  %v959_v7 = vld [vmem:[#allocation10] sm:$0x1] }
  0xff   : > { %v5377_v1 = vld [vmem:[%s8388_s6 + $0x8] sm:$0xff]   ;;  %v5378_v2 = vld [vmem:[%s8388_s6] sm:$0xff]   ;;  %v798_v26 = vadd.f32 %v790_v14, %v774_v5  ;;  %v5379_v31 = vld [vmem:[%s8388_s6 + $0x18] sm:$0xff]   ;;  %v799_v32 = vadd.f32 %v791_v20, %v775_v6  ;;  %v794_v33 = vmul.f32 0.5, %v786_v21  ;;  %v789_v35 = vsub.f32 %v773_v24, %v781_v29  ;;  %996 = vst.msk [vmem:[#allocation5 + $0x30] sm:$0x1] %vm992_vm11, %v959_v7 }
 0x100   : > { %5066 = vmatprep.subr.bf16.mxu0 %v5377_v1  ;;  %v795_v34 = vmul.f32 0.5, %v787_v22  ;;  %v800_v36 = vadd.f32 %v792_v27, %v776_v11  ;;  %v801_v37 = vadd.f32 %v793_v28, %v777_v12  ;;  %v796_v38 = vmul.f32 0.5, %v788_v30  ;;  %v5380_v52 = vld [vmem:[%s8388_s6 + $0x10] sm:$0xff]   ;;  %v5381_v63 = vld [vmem:[%s8388_s6 + $0x28] sm:$0xff]   ;;  %v5382_v3 = vld [vmem:[%s8388_s6 + $0x20] sm:$0xff]   ;;  %s8391_s3 = smov %s8390_s25 }
 0x101   : > { %5067 = vmatpush3.bf16.msra.mxu0 %v5377_v1  ;;  %vm806_vm2 = vcmp.ge.f32.partialorder %v798_v26, 1.0  ;;  %vm807_vm3 = vcmp.ge.f32.partialorder %v799_v32, 1.0  ;;  %v802_v42 = vadd.f32 %v794_v33, %v778_v18  ;;  %v797_v51 = vmul.f32 0.5, %v789_v35  ;;  %1006 = vst.msk [vmem:[#allocation5 + $0x39] sm:$0x1] %vm992_vm11, %v959_v7  ;;  %v5383_v13 = vld [vmem:[%s8390_s25 + $0x8] sm:$0xff]  }
 0x102   : > { %5068 = vmatprep.subr.bf16.mxu0 %v5378_v2  ;;  %v814_v39 = vsel %vm806_vm2, 0.0, %v798_v26  ;;  %v4868_v41 = vsel %vm806_vm2, 1.0, %v8324_v40  ;;  %v815_v43 = vsel %vm807_vm3, 0.0, %v799_v32  ;;  %v4869_v44 = vsel %vm807_vm3, 1.0, %v8324_v40  ;;  %994 = vst.msk [vmem:[#allocation5 + $0x10] sm:$0x1] %vm992_vm11, %v959_v7  ;;  %5078 = vmatprep.subr.bf16.mxu1 %v5383_v13 }
 0x103   : > { %823 = vst.msk [vmem:[#allocation2] sm:$0xff] %vm822_vm1, %v814_v39  ;;  %vm808_vm4 = vcmp.ge.f32.partialorder %v800_v36, 1.0  ;;  %vm809_vm5 = vcmp.ge.f32.partialorder %v801_v37, 1.0  ;;  %824 = vst.msk [vmem:[#allocation2 + $0x8] sm:$0xff] %vm822_vm1, %v815_v43  ;;  %v847_v45 = vpack.c.bf16 %v4869_v44, %v4868_v41  ;;  %v803_v50 = vadd.f32 %v795_v34, %v779_v19  ;;  %v6306_v9 = vld [vmem:[#allocation10 + $0x1] sm:$0x1]  ;;  %5079 = vmatpush3.bf16.msra.mxu1 %v5383_v13 }
 0x104   : > { %v816_v46 = vsel %vm808_vm4, 0.0, %v800_v36  ;;  %v817_v47 = vsel %vm809_vm5, 0.0, %v801_v37  ;;  %v4870_v48 = vsel %vm808_vm4, 1.0, %v8324_v40  ;;  %v4871_v49 = vsel %vm809_vm5, 1.0, %v8324_v40  ;;  %995 = vst.msk [vmem:[#allocation5 + $0x20] sm:$0x1] %vm992_vm11, %v959_v7 }
 0x105   : > { %5069 = vmatpush3.bf16.msra.mxu0 %v5378_v2  ;;  %825 = vst.msk [vmem:[#allocation2 + $0x10] sm:$0xff] %vm822_vm1, %v816_v46  ;;  %826 = vst.msk [vmem:[#allocation2 + $0x18] sm:$0xff] %vm822_vm1, %v817_v47  ;;  %vm810_vm6 = vcmp.ge.f32.partialorder %v802_v42, 1.0  ;;  %5070 = vmatprep.mubr.msk.bf16.mxu0 %vm822_vm1, %v847_v45  ;;  %v848_v53 = vpack.c.bf16 %v4871_v49, %v4870_v48  ;;  %v804_v56 = vadd.f32 %v796_v38, %v780_v25  ;;  %v5384_v14 = vld [vmem:[%s8391_s3] sm:$0xff]   ;;  %v6339_v17 = vld [vmem:[%s8391_s3 + $0x18] sm:$0xff]  }
 0x106   : > { %5090 = vmatprep.subr.bf16.mxu0 %v5379_v31  ;;  %v818_v54 = vsel %vm810_vm6, 0.0, %v802_v42  ;;  %v4872_v55 = vsel %vm810_vm6, 1.0, %v8324_v40  ;;  %vm811_vm7 = vcmp.ge.f32.partialorder %v803_v50, 1.0  ;;  %v805_v57 = vadd.f32 %v797_v51, %v781_v29  ;;  %997 = vst.msk [vmem:[#allocation5 + $0x40] sm:$0x1] %vm992_vm11, %v959_v7  ;;  %5080 = vmatprep.subr.bf16.mxu1 %v5384_v14 }
 0x107   : > { %827 = vst.msk [vmem:[#allocation2 + $0x20] sm:$0xff] %vm822_vm1, %v818_v54  ;;  %v819_v58 = vsel %vm811_vm7, 0.0, %v803_v50  ;;  %v4873_v59 = vsel %vm811_vm7, 1.0, %v8324_v40  ;;  %vm812_vm8 = vcmp.ge.f32.partialorder %v804_v56, 1.0  ;;  %v962_v5 = vshrl.u32 %v961_v4, 7  ;;  %5081 = vmatpush3.bf16.msra.mxu1 %v5384_v14 }
 0x108   : > { %5071 = vmatmul.mubr.msk.bf16.vlgmr.msra.gmra.mxu0 %vm822_vm1, %v848_v53  ;;  %828 = vst.msk [vmem:[#allocation2 + $0x28] sm:$0xff] %vm822_vm1, %v819_v58  ;;  %v849_v60 = vpack.c.bf16 %v4873_v59, %v4872_v55  ;;  %vm813_vm9 = vcmp.ge.f32.partialorder %v805_v57, 1.0  ;;  %v820_v61 = vsel %vm812_vm8, 0.0, %v804_v56  ;;  %v4874_v62 = vsel %vm812_vm8, 1.0, %v8324_v40  ;;  %5102 = vmatprep.subr.bf16.mxu1 %v6339_v17  ;;  %v974_v19 = vld [vmem:[%s8393_s1] sm:$0x7] }
 0x109   : > { %5091 = vmatpush3.bf16.msra.mxu0 %v5379_v31  ;;  %v821_v0 = vsel %vm813_vm9, 0.0, %v805_v57  ;;  %829 = vst.msk [vmem:[#allocation2 + $0x30] sm:$0xff] %vm822_vm1, %v820_v61  ;;  %v4875_v1 = vsel %vm813_vm9, 1.0, %v8324_v40  ;;  %v6273_v6 = vsub.s32 0, %v962_v5  ;;  %v6342_v18 = vsub.s32 1, %v962_v5 }
 0x10a   : > { %5092 = vmatprep.subr.bf16.mxu0 %v5380_v52  ;;  %5074 = vmatprep.mubr.msk.bf16.mxu0 %vm822_vm1, %v849_v60  ;;  %830 = vst.msk [vmem:[#allocation2 + $0x38] sm:$0xff] %vm822_vm1, %v821_v0  ;;  %v850_v2 = vpack.c.bf16 %v4875_v1, %v4874_v62  ;;  %v6350_v21 = vsub.s32 2, %v962_v5  ;;  %v4902_v22 = vld [vmem:[%s8393_s1 + $0xc] sm:$0x7]  ;;  %v6355_v23 = vld [vmem:[#allocation10 + $0x2] sm:$0x1] }
 0x10b   : > { %8389 = vst [vmem:[#allocation33_spill] sm:$0xff] %v6273_v6  ;;  %v6276_v8 = vrot.slane %v959_v7, %v6273_v6  ;;  %998 = vst.msk [vmem:[#allocation5 + $0x50] sm:$0x1] %vm992_vm11, %v959_v7  ;;  %v6310_v10 = vrot.slane %v6306_v9, %v6273_v6  ;;  %v6348_v20 = vrot.slane %v974_v19, %v6342_v18  ;;  %v6386_v38 = vld [vmem:[#allocation8] ss:$0 sm:$0xff] }
 0x10c   : > { %999 = vst.msk [vmem:[#allocation5 + $0x60] sm:$0x1] %vm992_vm11, %v959_v7  ;;  %1000 = vst.msk [vmem:[#allocation5 + $0x70] sm:$0x1] %vm992_vm11, %v959_v7  ;;  %v6361_v26 = vrot.slane %v6355_v23, %v6273_v6  ;;  %v6364_v27 = vrot.slane %v974_v19, %v6350_v21  ;;  %v6367_v30 = vrot.slane %v4902_v22, %v6342_v18  ;;  %v976_v39 = vld [vmem:[%s8393_s1 + $0x8] sm:$0x7] }
 0x10d   : > { %5093 = vmatpush3.bf16.msra.mxu0 %v5380_v52  ;;  %986 = vst.msk [vmem:[#allocation5] sm:$0xff] %vm822_vm1, %v6276_v8  ;;  %990 = vst.msk [vmem:[#allocation5 + $0x90] sm:$0xff] %vm822_vm1, %v6276_v8  ;;  %v6374_v31 = vrot.slane %v974_v19, %v6273_v6  ;;  %v6384_v37 = vrot.slane %v4902_v22, %v6350_v21  ;;  %v6395_v46 = vrot.slane %v4902_v22, %v6273_v6  ;;  %v975_v59 = vld [vmem:[%s8393_s1 + $0x4] sm:$0x7] }
 0x10e   : > { %5114 = vmatprep.subr.bf16.mxu0 %v5381_v63  ;;  %988 = vst.msk [vmem:[#allocation5 + $0x8] sm:$0x3] %vm987_vm10, %v6276_v8  ;;  %991 = vst.msk [vmem:[#allocation5 + $0x98] sm:$0x3] %vm987_vm10, %v6276_v8  ;;  %v6399_v50 = vrot.slane %v976_v39, %v6342_v18  ;;  %v6404_v56 = vrot.slane %v976_v39, %v6350_v21  ;;  %v6424_v13 = vrot.slane %v975_v59, %v6273_v6 }
 0x10f   : > { %1001 = vst.msk [vmem:[#allocation5 + $0x80] sm:$0x1] %vm992_vm11, %v959_v7  ;;  %1004 = vst.msk [vmem:[#allocation5 + $0x19] sm:$0x1] %vm992_vm11, %v959_v7  ;;  %v6427_v14 = vrot.slane %v975_v59, %v6342_v18 }
 0x110   : > { %5075 = vmatmul.mubr.msk.bf16.gmra.mxu0 %vm822_vm1, %v850_v2  ;;  %1005 = vst.msk [vmem:[#allocation5 + $0x29] sm:$0x1] %vm992_vm11, %v959_v7  ;;  %1007 = vst.msk [vmem:[#allocation5 + $0x49] sm:$0x1] %vm992_vm11, %v959_v7 }
 0x111   : > { %5094 = vmatprep.mubr.msk.bf16.mxu0 %vm822_vm1, %v847_v45  ;;  %1008 = vst.msk [vmem:[#allocation5 + $0x59] sm:$0x1] %vm992_vm11, %v959_v7  ;;  %1009 = vst.msk [vmem:[#allocation5 + $0x69] sm:$0x1] %vm992_vm11, %v959_v7 }
 0x112   : > { %1010 = vst.msk [vmem:[#allocation5 + $0x79] sm:$0x1] %vm992_vm11, %v959_v7  ;;  %1011 = vst.msk [vmem:[#allocation5 + $0x89] sm:$0x1] %vm992_vm11, %v959_v7 }
 0x113   : > { %993 = vst.msk [vmem:[#allocation5] sm:$0x1] %vm992_vm11, %v959_v7  ;;  %1002 = vst.msk [vmem:[#allocation5 + $0x90] sm:$0x1] %vm992_vm11, %v959_v7 }
 0x114   : > { %1003 = vst.msk [vmem:[#allocation5 + $0x9] sm:$0x1] %vm992_vm11, %v959_v7  ;;  %1012 = vst.msk [vmem:[#allocation5 + $0x99] sm:$0x1] %vm992_vm11, %v959_v7 }
 0x115   : > { %8392 = vst [vmem:[#allocation34_spill] sm:$0xff] %v6342_v18  ;;  %8394 = vst [vmem:[#allocation35_spill] sm:$0xff] %v6350_v21 }
 0x116   : > { %8395 = vst [vmem:[#allocation36_spill] sm:$0xff] %v6361_v26 }
 0x118   : > { %5095 = vmatmul.mubr.msk.bf16.vlgmr.msra.gmra.mxu0 %vm822_vm1, %v848_v53 }
 0x119   : > { %5098 = vmatprep.mubr.msk.bf16.mxu0 %vm822_vm1, %v849_v60  ;;  %5115 = vmatpush3.bf16.msra.mxu0 %v5381_v63 }
 0x11a   : > { %5116 = vmatprep.subr.bf16.mxu0 %v5382_v3  ;;  %v1013_v11 = vld [vmem:[#allocation5] sm:$0xff]  ;;  %v6326_v15 = vld [vmem:[#allocation5 + $0x90] sm:$0xff] }
 0x11b   : > { %v1014_v12 = vld [vmem:[#allocation5 + $0x8] sm:$0x3]  ;;  %1860 = vst.msk [vmem:[#allocation5] sm:$0xff] %vm822_vm1, %v6310_v10  ;;  %v1032_v16 = vld [vmem:[#allocation5 + $0x98] sm:$0x3]  ;;  %1862 = vst.msk [vmem:[#allocation5 + $0x90] sm:$0xff] %vm822_vm1, %v6310_v10  ;;  %v1057_v24 = vmul.f32 %v6348_v20, %v1013_v11  ;;  %v1134_v34 = vmul.f32 %v6364_v27, %v1013_v11  ;;  %v1037_v41 = vmul.f32 %v6374_v31, %v1013_v11 }
 0x11c   : > { %1861 = vst.msk [vmem:[#allocation5 + $0x8] sm:$0x3] %vm987_vm10, %v6310_v10  ;;  %1863 = vst.msk [vmem:[#allocation5 + $0x98] sm:$0x3] %vm987_vm10, %v6310_v10  ;;  %v1058_v25 = vmul.f32 %v6348_v20, %v1014_v12  ;;  %v1135_v42 = vmul.f32 %v6364_v27, %v1014_v12  ;;  %v1418_v61 = vmul.f32 %v6399_v50, %v1032_v16 }
 0x11d   : > { %5117 = vmatpush3.bf16.msra.mxu0 %v5382_v3  ;;  %1864 = vst.msk [vmem:[#allocation5] sm:$0x1] %vm992_vm11, %v6306_v9  ;;  %1874 = vst.msk [vmem:[#allocation5 + $0x9] sm:$0x1] %vm992_vm11, %v6306_v9  ;;  %v1090_v32 = vrot.slane %v1057_v24, 1  ;;  %v1493_v63 = vmul.f32 %v6404_v56, %v6326_v15  ;;  %v1494_v0 = vmul.f32 %v6404_v56, %v1032_v16 }
 0x11e   : > { %1873 = vst.msk [vmem:[#allocation5 + $0x90] sm:$0x1] %vm992_vm11, %v6306_v9  ;;  %1883 = vst.msk [vmem:[#allocation5 + $0x99] sm:$0x1] %vm992_vm11, %v6306_v9  ;;  %v1091_v33 = vrot.slane %v1058_v25, 1  ;;  %v1168_v55 = vrot.slane %v1135_v42, 2  ;;  %v6430_v16 = vrot.slane %v975_v59, %v6350_v21 }
 0x11f   : > { %v1457_v25 = vrot.slane %v1418_v61, 1 }
 0x120   : > { %5099 = vmatmul.mubr.msk.bf16.gmra.mxu0 %vm822_vm1, %v850_v2  ;;  %v1092_v43 = vsel %vm1089_vm12, %v1090_v32, %v1091_v33  ;;  %v6439_v32 = vrot.slane %v976_v39, %v6273_v6  ;;  %v1532_v33 = vrot.slane %v1493_v63, 2 }
 0x121   : > { %5118 = vmatprep.mubr.msk.bf16.mxu0 %vm822_vm1, %v847_v45  ;;  %v1167_v45 = vrot.slane %v1134_v34, 2  ;;  %v1122_v54 = vadd.f32 %v1092_v43, %v1037_v41  ;;  %v1533_v34 = vrot.slane %v1494_v0, 2 }
 0x122   : > { %v6450_v39 = vmul.f32 %v6439_v32, %v6326_v15 }
 0x123   : > { %v1169_v12 = vsel %vm1166_vm13, %v1167_v45, %v1168_v55 }
 0x124   : > { %v1884_v28 = vld [vmem:[#allocation5] sm:$0xff]  ;;  %v1885_v29 = vld [vmem:[#allocation5 + $0x8] sm:$0x3]  ;;  %v1199_v43 = vadd.f32 %v1169_v12, %v1122_v54 }
 0x125   : > { %2749 = vst.msk [vmem:[#allocation5] sm:$0xff] %vm822_vm1, %v6361_v26  ;;  %v1928_v35 = vmul.f32 %v6367_v30, %v1884_v28  ;;  %v1929_v36 = vmul.f32 %v6367_v30, %v1885_v29  ;;  %v2004_v51 = vmul.f32 %v6384_v37, %v1884_v28  ;;  %v2005_v52 = vmul.f32 %v6384_v37, %v1885_v29 }
 0x126   : > { %2750 = vst.msk [vmem:[#allocation5 + $0x8] sm:$0x3] %vm987_vm10, %v6361_v26  ;;  %v1908_v1 = vmul.f32 %v6395_v46, %v1884_v28  ;;  %v4903_v28 = vld [vmem:[%s8393_s1 + $0x10] sm:$0x7] }
 0x127   : > { %2753 = vst.msk [vmem:[#allocation5] sm:$0x1] %vm992_vm11, %v6355_v23  ;;  %2763 = vst.msk [vmem:[#allocation5 + $0x9] sm:$0x1] %vm992_vm11, %v6355_v23  ;;  %v1960_v47 = vrot.slane %v1928_v35, 1  ;;  %v1961_v48 = vrot.slane %v1929_v36, 1 }
 0x128   : > { %5119 = vmatmul.mubr.msk.bf16.vlgmr.msra.gmra.mxu0 %vm822_vm1, %v848_v53  ;;  %v2036_v5 = vrot.slane %v2004_v51, 2  ;;  %v2037_v7 = vrot.slane %v2005_v52, 2  ;;  %v4904_v35 = vld [vmem:[%s8393_s1 + $0x14] sm:$0x7] }
 0x129   : > { %5122 = vmatprep.mubr.msk.bf16.mxu0 %vm822_vm1, %v849_v60  ;;  %v1417_v60 = vmul.f32 %v6399_v50, %v6326_v15  ;;  %v6468_v15 = vrot.slane %v4904_v35, %v6273_v6  ;;  %v6483_v61 = vrot.slane %v4904_v35, %v6350_v21 }
 0x12b   : > { %v1456_v24 = vrot.slane %v1417_v60, 1  ;;  %8397 = vst [vmem:[#allocation38_spill] sm:$0xff] %v6468_v15  ;;  %v6480_v60 = vrot.slane %v4904_v35, %v6342_v18  ;;  %8401 = vst [vmem:[#allocation42_spill] sm:$0xff] %v6483_v61 }
 0x12d   : > { %8400 = vst [vmem:[#allocation41_spill] sm:$0xff] %v6480_v60 }
 0x130   : > { %5123 = vmatmul.mubr.msk.bf16.gmra.mxu0 %vm822_vm1, %v850_v2  ;;  %v1962_v2 = vsel %vm1089_vm12, %v1960_v47, %v1961_v48  ;;  %v6453_v47 = vrot.slane %v4903_v28, %v6273_v6  ;;  %v6456_v48 = vrot.slane %v4903_v28, %v6342_v18 }
 0x131   : > { %v1992_v36 = vadd.f32 %v1962_v2, %v1908_v1 }
 0x1c8   : > { %v5072_v44 = vpop.f32.mrf.mxu0 }
 0x1c9   : > { %v953_v49 = vmul.f32 %v5072_v44, %v6386_v38  ;;  %v2038_v44 = vsel %vm1166_vm13, %v2036_v5, %v2037_v7  ;;  %v6504_v5 = vld [vmem:[#allocation8 + $0x1] ss:$0 sm:$0xff] }
 0x1ca   : > { %v913_v53 = vpop.f32.mrf.mxu0  ;;  %v6477_v59 = vadd.f32 %v2038_v44, %v1992_v36 }
 0x1cb   : > { %v968_v57 = vadd.f32 %v6276_v8, %v953_v49  ;;  %v951_v58 = vmul.f32 %v6386_v38, %v913_v53  ;;  %v6459_v49 = vrot.slane %v4903_v28, %v6350_v21  ;;  %v6465_v53 = vsel %vm1089_vm12, %v1456_v24, %v1457_v25 }
 0x1cc   : > { %v5073_v62 = vpop.f32.mrf.mxu0  ;;  %8399 = vst [vmem:[#allocation40_spill] sm:$0xff] %v6477_v59 }
 0x1cd   : > { %980 = vst.msk [vmem:[#allocation5 + $0x31] sm:$0xff] %vm822_vm1, %v968_v57  ;;  %v966_v3 = vadd.f32 %v6276_v8, %v951_v58  ;;  %v954_v4 = vmul.f32 %v5073_v62, %v6386_v38  ;;  %8396 = vst [vmem:[#allocation37_spill] sm:$0xff] %v6459_v49  ;;  %v6475_v58 = vsel %vm1166_vm13, %v1532_v33, %v1533_v34 }
 0x1ce   : > { %v916_v11 = vpop.f32.mrf.mxu0  ;;  %8398 = vst [vmem:[#allocation39_spill] sm:$0xff] %v6475_v58 }
 0x1cf   : > { %978 = vst.msk [vmem:[#allocation5 + $0x11] sm:$0xff] %vm822_vm1, %v966_v3  ;;  %v969_v19 = vadd.f32 %v6276_v8, %v954_v4  ;;  %v952_v22 = vmul.f32 %v6386_v38, %v916_v11 }
 0x1d0   : > { %v5076_v29 = vpop.f32.mrf.mxu0 }
 0x1d1   : > { %981 = vst.msk [vmem:[#allocation5 + $0x41] sm:$0xff] %vm822_vm1, %v969_v19  ;;  %v967_v41 = vadd.f32 %v6276_v8, %v952_v22  ;;  %v957_v42 = vmul.f32 %v5076_v29, %v6386_v38 }
 0x1d2   : > { %v929_v45 = vpop.f32.mrf.mxu0 }
 0x1d3   : > { %979 = vst.msk [vmem:[#allocation5 + $0x21] sm:$0xff] %vm822_vm1, %v967_v41  ;;  %v972_v51 = vadd.f32 %v6276_v8, %v957_v42  ;;  %v955_v52 = vmul.f32 %v6386_v38, %v929_v45 }
 0x1d4   : > { %v6470_v54 = vld [vmem:[#allocation5 + $0x30] sm:$0xff]  ;;  %v6472_v55 = vld [vmem:[#allocation5 + $0x38] sm:$0x3]  ;;  %v5077_v57 = vpop.f32.mrf.mxu0 }
 0x1d5   : > { %1867 = vst.msk [vmem:[#allocation5 + $0x30] sm:$0x1] %vm992_vm11, %v6306_v9  ;;  %1877 = vst.msk [vmem:[#allocation5 + $0x39] sm:$0x1] %vm992_vm11, %v6306_v9  ;;  %v970_v62 = vadd.f32 %v6276_v8, %v955_v52  ;;  %v958_v63 = vmul.f32 %v5077_v57, %v6386_v38  ;;  %v6494_v0 = vmul.f32 %v6439_v32, %v6470_v54 }
 0x1d6   : > { %984 = vst.msk [vmem:[#allocation5 + $0x71] sm:$0xff] %vm822_vm1, %v972_v51  ;;  %v6498_v1 = vmul.f32 %v6399_v50, %v6470_v54  ;;  %v6500_v2 = vld [vmem:[#allocation5 + $0x10] sm:$0xff]  ;;  %v6502_v3 = vld [vmem:[#allocation5 + $0x18] sm:$0x3]  ;;  %v932_v4 = vpop.f32.mrf.mxu0  ;;  %v6508_v7 = vmul.f32 %v6399_v50, %v6472_v55  ;;  %v6512_v11 = vmul.f32 %v6404_v56, %v6470_v54  ;;  %v6516_v12 = vmul.f32 %v6404_v56, %v6472_v55 }
 0x1d7   : > { %v6520_v19 = vmul.f32 %v6374_v31, %v6470_v54  ;;  %1865 = vst.msk [vmem:[#allocation5 + $0x10] sm:$0x1] %vm992_vm11, %v6306_v9  ;;  %1875 = vst.msk [vmem:[#allocation5 + $0x19] sm:$0x1] %vm992_vm11, %v6306_v9  ;;  %v973_v22 = vadd.f32 %v6276_v8, %v958_v63  ;;  %v956_v24 = vmul.f32 %v6386_v38, %v932_v4 }
 0x1d8   : > { %982 = vst.msk [vmem:[#allocation5 + $0x51] sm:$0xff] %vm822_vm1, %v970_v62  ;;  %v1038_v25 = vmul.f32 %v6374_v31, %v6500_v2  ;;  %v1059_v28 = vmul.f32 %v6348_v20, %v6500_v2  ;;  %v6533_v29 = vld [vmem:[#allocation5 + $0x40] sm:$0xff]  ;;  %v6535_v33 = vld [vmem:[#allocation5 + $0x48] sm:$0x3]  ;;  %v5096_v34 = vpop.f32.mrf.mxu0  ;;  %v1060_v35 = vmul.f32 %v6348_v20, %v6502_v3  ;;  %v1136_v36 = vmul.f32 %v6364_v27, %v6500_v2 }
 0x1d9   : > { %v1137_v38 = vmul.f32 %v6364_v27, %v6502_v3  ;;  %v1211_v41 = vmul.f32 %v6424_v13, %v6500_v2  ;;  %1868 = vst.msk [vmem:[#allocation5 + $0x40] sm:$0x1] %vm992_vm11, %v6306_v9  ;;  %1878 = vst.msk [vmem:[#allocation5 + $0x49] sm:$0x1] %vm992_vm11, %v6306_v9  ;;  %v971_v42 = vadd.f32 %v6276_v8, %v956_v24 }
 0x1da   : > { %985 = vst.msk [vmem:[#allocation5 + $0x81] sm:$0xff] %vm822_vm1, %v973_v22  ;;  %v1826_v44 = vmul.f32 %v5096_v34, %v6504_v5  ;;  %v1093_v45 = vrot.slane %v1059_v28, 1  ;;  %v1231_v51 = vmul.f32 %v6427_v14, %v6500_v2  ;;  %v6554_v52 = vld [vmem:[#allocation5 + $0x20] sm:$0xff]  ;;  %v6556_v57 = vld [vmem:[#allocation5 + $0x28] sm:$0x3]  ;;  %v1785_v62 = vpop.f32.mrf.mxu0  ;;  %v1094_v63 = vrot.slane %v1060_v35, 1 }
 0x1db   : > { %v1170_v4 = vrot.slane %v1136_v36, 2  ;;  %v1171_v40 = vrot.slane %v1137_v38, 2  ;;  %v1219_v21 = vadd.f32 %v1211_v41, %v1199_v43  ;;  %1866 = vst.msk [vmem:[#allocation5 + $0x20] sm:$0x1] %vm992_vm11, %v6306_v9  ;;  %1876 = vst.msk [vmem:[#allocation5 + $0x29] sm:$0x1] %vm992_vm11, %v6306_v9  ;;  %v1824_v22 = vmul.f32 %v6504_v5, %v1785_v62 }
 0x1dc   : > { %983 = vst.msk [vmem:[#allocation5 + $0x61] sm:$0xff] %vm822_vm1, %v971_v42  ;;  %v1842_v8 = vadd.f32 %v6310_v10, %v1826_v44  ;;  %v1212_v24 = vmul.f32 %v6424_v13, %v6554_v52  ;;  %v1232_v28 = vmul.f32 %v6427_v14, %v6502_v3  ;;  %v5097_v35 = vpop.f32.mrf.mxu0  ;;  %v1095_v36 = vsel %vm1089_vm12, %v1093_v45, %v1094_v63 }
 0x1dd   : > { %v6569_v34 = vld [vmem:[#allocation5 + $0x70] sm:$0xff]  ;;  %v6571_v43 = vld [vmem:[#allocation5 + $0x78] sm:$0x3]  ;;  %v1172_v38 = vsel %vm1166_vm13, %v1170_v4, %v1171_v40  ;;  %v1233_v41 = vmul.f32 %v6427_v14, %v6554_v52  ;;  %v1234_v42 = vmul.f32 %v6427_v14, %v6556_v57  ;;  %v1840_v44 = vadd.f32 %v6310_v10, %v1824_v22 }
 0x1de   : > { %1871 = vst.msk [vmem:[#allocation5 + $0x70] sm:$0x1] %vm992_vm11, %v6306_v9  ;;  %1881 = vst.msk [vmem:[#allocation5 + $0x79] sm:$0x1] %vm992_vm11, %v6306_v9  ;;  %v1827_v45 = vmul.f32 %v5097_v35, %v6504_v5  ;;  %v1123_v62 = vadd.f32 %v1095_v36, %v1038_v25  ;;  %v1263_v40 = vrot.slane %v1231_v51, 1  ;;  %v1788_v18 = vpop.f32.mrf.mxu0  ;;  %v1264_v6 = vrot.slane %v1232_v28, 1 }
 0x1df   : > { %1854 = vst.msk [vmem:[#allocation5 + $0x31] sm:$0xff] %vm822_vm1, %v1842_v8  ;;  %v6586_v63 = vld [vmem:[#allocation5 + $0x50] sm:$0xff]  ;;  %v6588_v4 = vld [vmem:[#allocation5 + $0x58] sm:$0x3]  ;;  %v1266_v61 = vrot.slane %v1233_v41, 1  ;;  %v1267_v60 = vrot.slane %v1234_v42, 1  ;;  %v1307_v15 = vmul.f32 %v6430_v16, %v6500_v2  ;;  %v1825_v51 = vmul.f32 %v6504_v5, %v1788_v18 }
 0x1e0   : > { %1869 = vst.msk [vmem:[#allocation5 + $0x50] sm:$0x1] %vm992_vm11, %v6306_v9  ;;  %1879 = vst.msk [vmem:[#allocation5 + $0x59] sm:$0x1] %vm992_vm11, %v6306_v9  ;;  %v1843_v25 = vadd.f32 %v6310_v10, %v1827_v45  ;;  %v1200_v8 = vadd.f32 %v1172_v38, %v1123_v62  ;;  %v1308_v22 = vmul.f32 %v6430_v16, %v6502_v3  ;;  %v5100_v2 = vpop.f32.mrf.mxu0  ;;  %v6620_v38 = vld [vmem:[#allocation5 + $0x98] sm:$0x3] }
 0x1e1   : > { %1852 = vst.msk [vmem:[#allocation5 + $0x11] sm:$0xff] %vm822_vm1, %v1840_v44  ;;  %v6601_v28 = vld [vmem:[#allocation5 + $0x80] sm:$0xff]  ;;  %v6603_v35 = vld [vmem:[#allocation5 + $0x88] sm:$0x3]  ;;  %v1265_v36 = vsel %vm1089_vm12, %v1263_v40, %v1264_v6  ;;  %v1268_v41 = vsel %vm1089_vm12, %v1266_v61, %v1267_v60  ;;  %v1309_v42 = vmul.f32 %v6430_v16, %v6554_v52  ;;  %v1310_v44 = vmul.f32 %v6430_v16, %v6556_v57  ;;  %v6618_v61 = vld [vmem:[#allocation5 + $0x90] sm:$0xff] }
 0x1e2   : > { %1882 = vst.msk [vmem:[#allocation5 + $0x89] sm:$0x1] %vm992_vm11, %v6306_v9  ;;  %1872 = vst.msk [vmem:[#allocation5 + $0x80] sm:$0x1] %vm992_vm11, %v6306_v9  ;;  %v1841_v18 = vadd.f32 %v6310_v10, %v1825_v51  ;;  %v1830_v6 = vmul.f32 %v5100_v2, %v6504_v5  ;;  %v1220_v3 = vadd.f32 %v1212_v24, %v1200_v8  ;;  %v1801_v40 = vpop.f32.mrf.mxu0  ;;  %v1339_v49 = vrot.slane %v1307_v15, 2 }
 0x1e3   : > { %1855 = vst.msk [vmem:[#allocation5 + $0x41] sm:$0xff] %vm822_vm1, %v1843_v25  ;;  %v1295_v60 = vadd.f32 %v1265_v36, %v1219_v21  ;;  %8402 = vst [vmem:[#allocation43_spill] sm:$0xff] %v6618_v61  ;;  %v6622_v45 = vld [vmem:[#allocation5 + $0x60] sm:$0xff]  ;;  %v6624_v62 = vld [vmem:[#allocation5 + $0x68] sm:$0x3]  ;;  %v1340_v59 = vrot.slane %v1308_v22, 2  ;;  %v1383_v25 = vmul.f32 %v6439_v32, %v6554_v52  ;;  %v1828_v15 = vmul.f32 %v6504_v5, %v1801_v40 }
 0x1e4   : > { %8403 = vst [vmem:[#allocation44_spill] sm:$0xff] %v6620_v38  ;;  %v1342_v58 = vrot.slane %v1309_v42, 2  ;;  %2751 = vst.msk [vmem:[#allocation5 + $0x90] sm:$0xff] %vm822_vm1, %v6361_v26  ;;  %v1846_v21 = vadd.f32 %v6310_v10, %v1830_v6  ;;  %v1296_v24 = vadd.f32 %v1268_v41, %v1220_v3  ;;  %v1343_v51 = vrot.slane %v1310_v44, 2  ;;  %v5101_v22 = vpop.f32.mrf.mxu0 }
 0x1e5   : > { %2752 = vst.msk [vmem:[#allocation5 + $0x98] sm:$0x3] %vm987_vm10, %v6361_v26  ;;  %v1341_v2 = vsel %vm1166_vm13, %v1339_v49, %v1340_v59  ;;  %v1404_v36 = vmul.f32 %v6399_v50, %v6556_v57  ;;  %v1438_v41 = vrot.slane %v6498_v1, 1  ;;  %v1844_v44 = vadd.f32 %v6310_v10, %v1828_v15 }
 0x1e6   : > { %1870 = vst.msk [vmem:[#allocation5 + $0x60] sm:$0x1] %vm992_vm11, %v6306_v9  ;;  %1880 = vst.msk [vmem:[#allocation5 + $0x69] sm:$0x1] %vm992_vm11, %v6306_v9  ;;  %v6643_v8 = vld [vmem:[#allocation5 + $0x30] sm:$0xff]  ;;  %v1403_v9 = vmul.f32 %v6399_v50, %v6554_v52  ;;  %v1344_v6 = vsel %vm1166_vm13, %v1342_v58, %v1343_v51  ;;  %v1371_v3 = vadd.f32 %v1341_v2, %v1295_v60  ;;  %v1804_v49 = vpop.f32.mrf.mxu0  ;;  %v1439_v26 = vrot.slane %v6508_v7, 1 }
 0x1e7   : > { %1853 = vst.msk [vmem:[#allocation5 + $0x21] sm:$0xff] %vm822_vm1, %v1841_v18  ;;  %v6651_v42 = vld [vmem:[#allocation5 + $0x38] sm:$0x3]  ;;  %1858 = vst.msk [vmem:[#allocation5 + $0x71] sm:$0xff] %vm822_vm1, %v1846_v21  ;;  %v1831_v18 = vmul.f32 %v5101_v22, %v6504_v5  ;;  %v1372_v59 = vadd.f32 %v1344_v6, %v1296_v24  ;;  %v1436_v40 = vrot.slane %v1404_v36, 1  ;;  %v1829_v60 = vmul.f32 %v6504_v5, %v1804_v49 }
 0x1e8   : > { %2762 = vst.msk [vmem:[#allocation5 + $0x90] sm:$0x1] %vm992_vm11, %v6355_v23  ;;  %2772 = vst.msk [vmem:[#allocation5 + $0x99] sm:$0x1] %vm992_vm11, %v6355_v23  ;;  %v1435_v1 = vrot.slane %v1403_v9, 1  ;;  %v6662_v21 = vld [vmem:[#allocation5 + $0x10] sm:$0xff]  ;;  %v1391_v51 = vadd.f32 %v1383_v25, %v1371_v3  ;;  %v1479_v22 = vmul.f32 %v6404_v56, %v6554_v52  ;;  %v1440_v5 = vsel %vm1089_vm12, %v1438_v41, %v1439_v26 }
 0x1e9   : > { %2756 = vst.msk [vmem:[#allocation5 + $0x30] sm:$0x1] %vm992_vm11, %v6355_v23  ;;  %2766 = vst.msk [vmem:[#allocation5 + $0x39] sm:$0x1] %vm992_vm11, %v6355_v23  ;;  %v6664_v15 = vld [vmem:[#allocation5 + $0x18] sm:$0x3]  ;;  %v1847_v58 = vadd.f32 %v6310_v10, %v1831_v18  ;;  %v1392_v2 = vadd.f32 %v6494_v0, %v1372_v59  ;;  %v1480_v25 = vmul.f32 %v6404_v56, %v6556_v57 }
 0x1ea   : > { %1856 = vst.msk [vmem:[#allocation5 + $0x51] sm:$0xff] %vm822_vm1, %v1844_v44  ;;  %v6675_v7 = vld [vmem:[#allocation5 + $0x40] sm:$0xff]  ;;  %v6677_v24 = vld [vmem:[#allocation5 + $0x48] sm:$0x3]  ;;  %v1437_v9 = vsel %vm1089_vm12, %v1435_v1, %v1436_v40  ;;  %v1845_v36 = vadd.f32 %v6310_v10, %v1829_v60  ;;  %v1511_v18 = vrot.slane %v1479_v22, 2  ;;  %v1514_v6 = vrot.slane %v6512_v11, 2 }
 0x1eb   : > { %2754 = vst.msk [vmem:[#allocation5 + $0x10] sm:$0x1] %vm992_vm11, %v6355_v23  ;;  %2764 = vst.msk [vmem:[#allocation5 + $0x19] sm:$0x1] %vm992_vm11, %v6355_v23  ;;  %v1467_v44 = vadd.f32 %v1437_v9, %v1391_v51  ;;  %v1468_v26 = vadd.f32 %v1440_v5, %v1392_v2  ;;  %v1512_v41 = vrot.slane %v1480_v25, 2  ;;  %v1515_v3 = vrot.slane %v6516_v12, 2 }
 0x1ec   : > { %1859 = vst.msk [vmem:[#allocation5 + $0x81] sm:$0xff] %vm822_vm1, %v1847_v58  ;;  %v1039_v49 = vmul.f32 %v6374_v31, %v6554_v52  ;;  %1857 = vst.msk [vmem:[#allocation5 + $0x61] sm:$0xff] %vm822_vm1, %v1845_v36  ;;  %v1061_v11 = vmul.f32 %v6348_v20, %v6554_v52  ;;  %v1062_v59 = vmul.f32 %v6348_v20, %v6556_v57 }
 0x1ed   : > { %2757 = vst.msk [vmem:[#allocation5 + $0x40] sm:$0x1] %vm992_vm11, %v6355_v23  ;;  %2767 = vst.msk [vmem:[#allocation5 + $0x49] sm:$0x1] %vm992_vm11, %v6355_v23  ;;  %v1063_v1 = vmul.f32 %v6348_v20, %v6470_v54  ;;  %v1064_v40 = vmul.f32 %v6348_v20, %v6472_v55  ;;  %v1513_v58 = vsel %vm1166_vm13, %v1511_v18, %v1512_v41 }
 0x1ee   : > { %v6691_v0 = vld [vmem:[#allocation5 + $0x20] sm:$0xff]  ;;  %v6696_v10 = vld [vmem:[#allocation5 + $0x28] sm:$0x3]  ;;  %v6711_v12 = vld [vmem:[#allocation5 + $0x70] sm:$0xff]  ;;  %v1516_v60 = vsel %vm1166_vm13, %v1514_v6, %v1515_v3  ;;  %v1138_v51 = vmul.f32 %v6364_v27, %v6554_v52  ;;  %v1139_v22 = vmul.f32 %v6364_v27, %v6556_v57  ;;  %v1543_v9 = vadd.f32 %v1513_v58, %v1467_v44 }
 0x1ef   : > { %2755 = vst.msk [vmem:[#allocation5 + $0x20] sm:$0x1] %vm992_vm11, %v6355_v23  ;;  %2765 = vst.msk [vmem:[#allocation5 + $0x29] sm:$0x1] %vm992_vm11, %v6355_v23  ;;  %v6719_v2 = vld [vmem:[#allocation5 + $0x78] sm:$0x3]  ;;  %v1544_v5 = vadd.f32 %v1516_v60, %v1468_v26  ;;  %v1140_v57 = vmul.f32 %v6364_v27, %v6470_v54  ;;  %v1141_v44 = vmul.f32 %v6364_v27, %v6472_v55 }
 0x1f0   : > { %8404 = vst [vmem:[#allocation45_spill] sm:$0xff] %v6711_v12  ;;  %8405 = vst [vmem:[#allocation46_spill] sm:$0xff] %v6719_v2  ;;  %v1096_v25 = vrot.slane %v1061_v11, 1  ;;  %v1097_v36 = vrot.slane %v1062_v59, 1  ;;  %v1099_v52 = vrot.slane %v1063_v1, 1  ;;  %v1100_v41 = vrot.slane %v1064_v40, 1 }
 0x1f1   : > { %2760 = vst.msk [vmem:[#allocation5 + $0x70] sm:$0x1] %vm992_vm11, %v6355_v23  ;;  %2770 = vst.msk [vmem:[#allocation5 + $0x79] sm:$0x1] %vm992_vm11, %v6355_v23  ;;  %v6725_v18 = vld [vmem:[#allocation5 + $0x50] sm:$0xff]  ;;  %v1551_v26 = vpack.c.bf16 %v1544_v5, %v1543_v9  ;;  %v1173_v11 = vrot.slane %v1138_v51, 2  ;;  %v1213_v9 = vmul.f32 %v6424_v13, %v6470_v54  ;;  %v1214_v5 = vmul.f32 %v6424_v13, %v6533_v29 }
 0x1f2   : > { %v6727_v6 = vld [vmem:[#allocation5 + $0x58] sm:$0x3]  ;;  %v1098_v3 = vsel %vm1089_vm12, %v1096_v25, %v1097_v36  ;;  %v1174_v59 = vrot.slane %v1139_v22, 2  ;;  %2758 = vst.msk [vmem:[#allocation5 + $0x50] sm:$0x1] %vm992_vm11, %v6355_v23  ;;  %v1101_v1 = vsel %vm1089_vm12, %v1099_v52, %v1100_v41  ;;  %v1176_v58 = vrot.slane %v1140_v57, 2 }
 0x1f3   : > { %2768 = vst.msk [vmem:[#allocation5 + $0x59] sm:$0x1] %vm992_vm11, %v6355_v23  ;;  %v1124_v40 = vadd.f32 %v1098_v3, %v1039_v49  ;;  %v1177_v60 = vrot.slane %v1141_v44, 2  ;;  %v6739_v38 = vld [vmem:[#allocation5 + $0x80] sm:$0xff]  ;;  %v6741_v61 = vld [vmem:[#allocation5 + $0x88] sm:$0x3]  ;;  %5082 = vmatprep.mubr.msk.bf16.mxu1 %vm822_vm1, %v1551_v26  ;;  %v1125_v51 = vadd.f32 %v1101_v1, %v6520_v19  ;;  %v1235_v19 = vmul.f32 %v6427_v14, %v6470_v54 }
 0x1f4   : > { %8406 = vst [vmem:[#allocation47_spill] sm:$0xff] %v6739_v38  ;;  %8407 = vst [vmem:[#allocation48_spill] sm:$0xff] %v6741_v61  ;;  %v1175_v22 = vsel %vm1166_vm13, %v1173_v11, %v1174_v59  ;;  %v6754_v49 = vld [vmem:[#allocation5 + $0x60] sm:$0xff]  ;;  %v1236_v52 = vmul.f32 %v6427_v14, %v6472_v55  ;;  %v6761_v41 = vld [vmem:[#allocation5 + $0x68] sm:$0x3]  ;;  %v1237_v44 = vmul.f32 %v6427_v14, %v6533_v29 }
 0x1f5   : > { %2761 = vst.msk [vmem:[#allocation5 + $0x80] sm:$0x1] %vm992_vm11, %v6355_v23  ;;  %2771 = vst.msk [vmem:[#allocation5 + $0x89] sm:$0x1] %vm992_vm11, %v6355_v23  ;;  %v1178_v25 = vsel %vm1166_vm13, %v1176_v58, %v1177_v60  ;;  %v1201_v36 = vadd.f32 %v1175_v22, %v1124_v40  ;;  %v1238_v26 = vmul.f32 %v6427_v14, %v6535_v33  ;;  %v1269_v59 = vrot.slane %v1235_v19, 1 }
 0x1f6   : > { %v1202_v57 = vadd.f32 %v1178_v25, %v1125_v51  ;;  %v1311_v3 = vmul.f32 %v6430_v16, %v6470_v54  ;;  %2759 = vst.msk [vmem:[#allocation5 + $0x60] sm:$0x1] %vm992_vm11, %v6355_v23  ;;  %2769 = vst.msk [vmem:[#allocation5 + $0x69] sm:$0x1] %vm992_vm11, %v6355_v23  ;;  %v1270_v1 = vrot.slane %v1236_v52, 1  ;;  %v1312_v40 = vmul.f32 %v6430_v16, %v6472_v55 }
 0x1f7   : > { %v1221_v11 = vadd.f32 %v1213_v9, %v1201_v36  ;;  %v1272_v60 = vrot.slane %v1237_v44, 1  ;;  %v1273_v51 = vrot.slane %v1238_v26, 1  ;;  %v1313_v22 = vmul.f32 %v6430_v16, %v6533_v29 }
 0x1f8   : > { %v1222_v58 = vadd.f32 %v1214_v5, %v1202_v57  ;;  %v1271_v54 = vsel %vm1089_vm12, %v1269_v59, %v1270_v1  ;;  %v1314_v25 = vmul.f32 %v6430_v16, %v6535_v33  ;;  %v1345_v61 = vrot.slane %v1311_v3, 2 }
 0x1f9   : > { %v1346_v38 = vrot.slane %v1312_v40, 2  ;;  %v1274_v23 = vsel %vm1089_vm12, %v1272_v60, %v1273_v51  ;;  %v1297_v9 = vadd.f32 %v1271_v54, %v1221_v11  ;;  %v1348_v36 = vrot.slane %v1313_v22, 2 }
 0x1fa   : > { %v1385_v55 = vmul.f32 %v6439_v32, %v6533_v29  ;;  %v1298_v5 = vadd.f32 %v1274_v23, %v1222_v58  ;;  %v1349_v52 = vrot.slane %v1314_v25, 2  ;;  %v1386_v57 = vmul.f32 %v6439_v32, %v6586_v63 }
 0x1fb   : > { %v1347_v19 = vsel %vm1166_vm13, %v1345_v61, %v1346_v38  ;;  %v1407_v26 = vmul.f32 %v6399_v50, %v6533_v29  ;;  %v1408_v3 = vmul.f32 %v6399_v50, %v6535_v33  ;;  %v1409_v11 = vmul.f32 %v6399_v50, %v6586_v63 }
 0x1fc   : > { %v1373_v44 = vadd.f32 %v1347_v19, %v1297_v9  ;;  %v1350_v59 = vsel %vm1166_vm13, %v1348_v36, %v1349_v52  ;;  %v1410_v1 = vmul.f32 %v6399_v50, %v6588_v4  ;;  %v1483_v61 = vmul.f32 %v6404_v56, %v6533_v29 }
 0x1fd   : > { %v1484_v38 = vmul.f32 %v6404_v56, %v6535_v33  ;;  %v1374_v40 = vadd.f32 %v1350_v59, %v1298_v5  ;;  %v1441_v60 = vrot.slane %v1407_v26, 1  ;;  %v1442_v51 = vrot.slane %v1408_v3, 1 }
 0x1fe   : > { %v1393_v58 = vadd.f32 %v1385_v55, %v1373_v44  ;;  %v1444_v22 = vrot.slane %v1409_v11, 1  ;;  %v1445_v54 = vrot.slane %v1410_v1, 1  ;;  %v1485_v25 = vmul.f32 %v6404_v56, %v6586_v63 }
 0x1ff   : > { %v1486_v23 = vmul.f32 %v6404_v56, %v6588_v4  ;;  %v1394_v9 = vadd.f32 %v1386_v57, %v1374_v40  ;;  %v1443_v36 = vsel %vm1089_vm12, %v1441_v60, %v1442_v51  ;;  %v1517_v19 = vrot.slane %v1483_v61, 2 }
 0x200   : > { %v1518_v52 = vrot.slane %v1484_v38, 2  ;;  %v1446_v2 = vsel %vm1089_vm12, %v1444_v22, %v1445_v54  ;;  %v1469_v12 = vadd.f32 %v1443_v36, %v1393_v58  ;;  %v1520_v5 = vrot.slane %v1485_v25, 2  ;;  %v5386_v36 = vld [vmem:[%s8391_s3 + $0x10] sm:$0xff]  }
 0x201   : > { %v1521_v55 = vrot.slane %v1486_v23, 2  ;;  %v1470_v44 = vadd.f32 %v1446_v2, %v1394_v9  ;;  %v1041_v3 = vmul.f32 %v6374_v31, %v6533_v29  ;;  %v1042_v11 = vmul.f32 %v6374_v31, %v6586_v63 }
 0x202   : > { %v1519_v26 = vsel %vm1166_vm13, %v1517_v19, %v1518_v52  ;;  %v1065_v1 = vmul.f32 %v6348_v20, %v6533_v29  ;;  %v1066_v61 = vmul.f32 %v6348_v20, %v6535_v33  ;;  %v1067_v2 = vmul.f32 %v6348_v20, %v6586_v63 }
 0x203   : > { %v1522_v57 = vsel %vm1166_vm13, %v1520_v5, %v1521_v55  ;;  %v1545_v59 = vadd.f32 %v1519_v26, %v1469_v12  ;;  %v1068_v40 = vmul.f32 %v6348_v20, %v6588_v4  ;;  %v1142_v58 = vmul.f32 %v6364_v27, %v6533_v29 }
 0x204   : > { %v1546_v38 = vadd.f32 %v1522_v57, %v1470_v44  ;;  %v1102_v60 = vrot.slane %v1065_v1, 1  ;;  %v1103_v51 = vrot.slane %v1066_v61, 1  ;;  %v1143_v12 = vmul.f32 %v6364_v27, %v6535_v33 }
 0x205   : > { %v1144_v22 = vmul.f32 %v6364_v27, %v6586_v63  ;;  %v1105_v25 = vrot.slane %v1067_v2, 1  ;;  %v1106_v23 = vrot.slane %v1068_v40, 1  ;;  %v1145_v9 = vmul.f32 %v6364_v27, %v6588_v4 }
 0x206   : > { %v1552_v54 = vpack.c.bf16 %v1546_v38, %v1545_v59  ;;  %v1104_v29 = vsel %vm1089_vm12, %v1102_v60, %v1103_v51  ;;  %v1179_v19 = vrot.slane %v1142_v58, 2  ;;  %v1180_v52 = vrot.slane %v1143_v12, 2 }
 0x207   : > { %v1182_v5 = vrot.slane %v1144_v22, 2  ;;  %v1107_v33 = vsel %vm1089_vm12, %v1105_v25, %v1106_v23  ;;  %v1126_v55 = vadd.f32 %v1104_v29, %v1041_v3  ;;  %v1183_v44 = vrot.slane %v1145_v9, 2 }
 0x208   : > { %5083 = vmatmul.mubr.msk.bf16.vlgmr.msra.gmra.mxu1 %vm822_vm1, %v1552_v54  ;;  %v1215_v26 = vmul.f32 %v6424_v13, %v6586_v63  ;;  %v1127_v57 = vadd.f32 %v1107_v33, %v1042_v11  ;;  %v1181_v59 = vsel %vm1166_vm13, %v1179_v19, %v1180_v52  ;;  %v1216_v1 = vmul.f32 %v6424_v13, %v6622_v45  ;;  %v6849_v11 = vld [vmem:[%s8391_s3 + $0x28] sm:$0xff]  }
 0x209   : > { %v1239_v61 = vmul.f32 %v6427_v14, %v6586_v63  ;;  %5103 = vmatpush3.bf16.msra.mxu1 %v6339_v17  ;;  %v1184_v38 = vsel %vm1166_vm13, %v1182_v5, %v1183_v44  ;;  %v1203_v2 = vadd.f32 %v1181_v59, %v1126_v55  ;;  %v1240_v3 = vmul.f32 %v6427_v14, %v6588_v4 }
 0x20a   : > { %v1241_v40 = vmul.f32 %v6427_v14, %v6622_v45  ;;  %5104 = vmatprep.subr.bf16.mxu1 %v5386_v36  ;;  %v1204_v58 = vadd.f32 %v1184_v38, %v1127_v57  ;;  %v1242_v60 = vmul.f32 %v6427_v14, %v6624_v62  ;;  %v1315_v51 = vmul.f32 %v6430_v16, %v6586_v63 }
 0x20b   : > { %v1275_v17 = vrot.slane %v1239_v61, 1  ;;  %v1223_v12 = vadd.f32 %v1215_v26, %v1203_v2  ;;  %v1276_v22 = vrot.slane %v1240_v3, 1  ;;  %v1316_v25 = vmul.f32 %v6430_v16, %v6588_v4 }
 0x20c   : > { %v1278_v54 = vrot.slane %v1241_v40, 1  ;;  %v1224_v23 = vadd.f32 %v1216_v1, %v1204_v58  ;;  %v1279_v9 = vrot.slane %v1242_v60, 1  ;;  %v1317_v29 = vmul.f32 %v6430_v16, %v6622_v45 }
 0x20d   : > { %v1318_v19 = vmul.f32 %v6430_v16, %v6624_v62  ;;  %5105 = vmatpush3.bf16.msra.mxu1 %v5386_v36  ;;  %v1277_v52 = vsel %vm1089_vm12, %v1275_v17, %v1276_v22  ;;  %v1351_v5 = vrot.slane %v1315_v51, 2  ;;  %v1352_v33 = vrot.slane %v1316_v25, 2 }
 0x20e   : > { %v1387_v63 = vmul.f32 %v6439_v32, %v6622_v45  ;;  %5126 = vmatprep.subr.bf16.mxu1 %v6849_v11  ;;  %v1280_v4 = vsel %vm1089_vm12, %v1278_v54, %v1279_v9  ;;  %v1299_v55 = vadd.f32 %v1277_v52, %v1223_v12  ;;  %v1354_v44 = vrot.slane %v1317_v29, 2 }
 0x20f   : > { %v1355_v26 = vrot.slane %v1318_v19, 2  ;;  %v1300_v57 = vadd.f32 %v1280_v4, %v1224_v23  ;;  %v1353_v59 = vsel %vm1166_vm13, %v1351_v5, %v1352_v33  ;;  %v1388_v36 = vmul.f32 %v6439_v32, %v6569_v34 }
 0x210   : > { %v1411_v1 = vmul.f32 %v6399_v50, %v6622_v45  ;;  %v1375_v38 = vadd.f32 %v1353_v59, %v1299_v55  ;;  %v1412_v2 = vmul.f32 %v6399_v50, %v6624_v62  ;;  %v1413_v3 = vmul.f32 %v6399_v50, %v6569_v34 }
 0x211   : > { %v1356_v61 = vsel %vm1166_vm13, %v1354_v44, %v1355_v26  ;;  %v1414_v58 = vmul.f32 %v6399_v50, %v6571_v43  ;;  %v1487_v17 = vmul.f32 %v6404_v56, %v6622_v45  ;;  %v1488_v54 = vmul.f32 %v6404_v56, %v6624_v62 }
 0x212   : > { %v1376_v40 = vadd.f32 %v1356_v61, %v1300_v57  ;;  %v1447_v60 = vrot.slane %v1411_v1, 1  ;;  %v1395_v51 = vadd.f32 %v1387_v63, %v1375_v38  ;;  %v1448_v12 = vrot.slane %v1412_v2, 1 }
 0x213   : > { %v1450_v22 = vrot.slane %v1413_v3, 1  ;;  %v1451_v23 = vrot.slane %v1414_v58, 1  ;;  %v1489_v9 = vmul.f32 %v6404_v56, %v6569_v34  ;;  %v1490_v29 = vmul.f32 %v6404_v56, %v6571_v43 }
 0x214   : > { %v1396_v25 = vadd.f32 %v1388_v36, %v1376_v40  ;;  %v1449_v19 = vsel %vm1089_vm12, %v1447_v60, %v1448_v12  ;;  %v1523_v52 = vrot.slane %v1487_v17, 2  ;;  %v1524_v5 = vrot.slane %v1488_v54, 2 }
 0x215   : > { %v1043_v33 = vmul.f32 %v6374_v31, %v6622_v45  ;;  %v1452_v63 = vsel %vm1089_vm12, %v1450_v22, %v1451_v23  ;;  %v1471_v4 = vadd.f32 %v1449_v19, %v1395_v51  ;;  %v1526_v55 = vrot.slane %v1489_v9, 2 }
 0x216   : > { %v1527_v44 = vrot.slane %v1490_v29, 2  ;;  %v1472_v26 = vadd.f32 %v1452_v63, %v1396_v25  ;;  %v1525_v57 = vsel %vm1166_vm13, %v1523_v52, %v1524_v5  ;;  %v1044_v59 = vmul.f32 %v6374_v31, %v6569_v34 }
 0x217   : > { %v1069_v36 = vmul.f32 %v6348_v20, %v6622_v45  ;;  %v1547_v61 = vadd.f32 %v1525_v57, %v1471_v4  ;;  %v1070_v38 = vmul.f32 %v6348_v20, %v6624_v62  ;;  %v1071_v2 = vmul.f32 %v6348_v20, %v6569_v34 }
 0x218   : > { %v1528_v1 = vsel %vm1166_vm13, %v1526_v55, %v1527_v44  ;;  %v1072_v40 = vmul.f32 %v6348_v20, %v6571_v43  ;;  %v1146_v31 = vmul.f32 %v6364_v27, %v6622_v45  ;;  %v1147_v51 = vmul.f32 %v6364_v27, %v6624_v62 }
 0x219   : > { %v1548_v3 = vadd.f32 %v1528_v1, %v1472_v26  ;;  %v1108_v58 = vrot.slane %v1069_v36, 1  ;;  %v1109_v60 = vrot.slane %v1070_v38, 1  ;;  %v1111_v17 = vrot.slane %v1071_v2, 1 }
 0x21a   : > { %v1148_v12 = vmul.f32 %v6364_v27, %v6569_v34  ;;  %v1112_v54 = vrot.slane %v1072_v40, 1  ;;  %v1149_v25 = vmul.f32 %v6364_v27, %v6571_v43  ;;  %v1185_v23 = vrot.slane %v1146_v31, 2 }
 0x21b   : > { %v1553_v22 = vpack.c.bf16 %v1548_v3, %v1547_v61  ;;  %v1110_v20 = vsel %vm1089_vm12, %v1108_v58, %v1109_v60  ;;  %v1186_v9 = vrot.slane %v1147_v51, 2  ;;  %v1217_v45 = vmul.f32 %v6424_v13, %v6569_v34 }
 0x21c   : > { %v1188_v29 = vrot.slane %v1148_v12, 2  ;;  %v1113_v62 = vsel %vm1089_vm12, %v1111_v17, %v1112_v54  ;;  %v1128_v19 = vadd.f32 %v1110_v20, %v1043_v33  ;;  %v1189_v52 = vrot.slane %v1149_v25, 2 }
 0x21d   : > { %5086 = vmatprep.mubr.msk.bf16.mxu1 %vm822_vm1, %v1553_v22  ;;  %v1218_v5 = vmul.f32 %v6424_v13, %v6601_v28  ;;  %v1129_v63 = vadd.f32 %v1113_v62, %v1044_v59  ;;  %v1187_v27 = vsel %vm1166_vm13, %v1185_v23, %v1186_v9  ;;  %v1243_v4 = vmul.f32 %v6427_v14, %v6569_v34 }
 0x21e   : > { %v1244_v55 = vmul.f32 %v6427_v14, %v6571_v43  ;;  %v1190_v44 = vsel %vm1166_vm13, %v1188_v29, %v1189_v52  ;;  %v1205_v26 = vadd.f32 %v1187_v27, %v1128_v19  ;;  %v1245_v57 = vmul.f32 %v6427_v14, %v6601_v28 }
 0x21f   : > { %v1246_v33 = vmul.f32 %v6427_v14, %v6603_v35  ;;  %v1206_v36 = vadd.f32 %v1190_v44, %v1129_v63  ;;  %v1281_v13 = vrot.slane %v1243_v4, 1  ;;  %v1319_v1 = vmul.f32 %v6430_v16, %v6569_v34 }
 0x220   : > { %v1282_v59 = vrot.slane %v1244_v55, 1  ;;  %v1225_v61 = vadd.f32 %v1217_v45, %v1205_v26  ;;  %v1284_v38 = vrot.slane %v1245_v57, 1  ;;  %v1320_v3 = vmul.f32 %v6430_v16, %v6571_v43 }
 0x221   : > { %v1285_v2 = vrot.slane %v1246_v33, 1  ;;  %v1226_v40 = vadd.f32 %v1218_v5, %v1206_v36  ;;  %v1321_v31 = vmul.f32 %v6430_v16, %v6601_v28  ;;  %v1322_v14 = vmul.f32 %v6430_v16, %v6603_v35 }
 0x222   : > { %v1283_v58 = vsel %vm1089_vm12, %v1281_v13, %v1282_v59  ;;  %v1357_v51 = vrot.slane %v1319_v1, 2  ;;  %v1358_v34 = vrot.slane %v1320_v3, 2  ;;  %v1389_v43 = vmul.f32 %v6439_v32, %v6601_v28  ;;  %v8408_v3 = vld [vmem:[#allocation39_spill] sm:$0xff] }
 0x223   : > { %v1286_v60 = vsel %vm1089_vm12, %v1284_v38, %v1285_v2  ;;  %v1301_v17 = vadd.f32 %v1283_v58, %v1225_v61  ;;  %v1360_v22 = vrot.slane %v1321_v31, 2  ;;  %v1361_v54 = vrot.slane %v1322_v14, 2 }
 0x224   : > { %v1302_v12 = vadd.f32 %v1286_v60, %v1226_v40  ;;  %v1359_v25 = vsel %vm1166_vm13, %v1357_v51, %v1358_v34  ;;  %v1415_v23 = vmul.f32 %v6399_v50, %v6601_v28  ;;  %v1416_v20 = vmul.f32 %v6399_v50, %v6603_v35 }
 0x225   : > { %v1491_v16 = vmul.f32 %v6404_v56, %v6601_v28  ;;  %v1362_v9 = vsel %vm1166_vm13, %v1360_v22, %v1361_v54  ;;  %v1377_v29 = vadd.f32 %v1359_v25, %v1301_v17  ;;  %v1492_v45 = vmul.f32 %v6404_v56, %v6603_v35  ;;  %v8410_v54 = vld [vmem:[#allocation37_spill] sm:$0xff] }
 0x226   : > { %v1909_v32 = vmul.f32 %v6395_v46, %v6662_v21  ;;  %v1378_v62 = vadd.f32 %v1362_v9, %v1302_v12  ;;  %v1453_v19 = vrot.slane %v1415_v23, 1  ;;  %v1454_v52 = vrot.slane %v1416_v20, 1 }
 0x227   : > { %v1529_v5 = vrot.slane %v1491_v16, 2  ;;  %v1397_v63 = vadd.f32 %v1389_v43, %v1377_v29  ;;  %v1530_v27 = vrot.slane %v1492_v45, 2  ;;  %v1930_v50 = vmul.f32 %v6367_v30, %v6662_v21 }
 0x228   : > { %v1931_v28 = vmul.f32 %v6367_v30, %v6664_v15  ;;  %v1398_v4 = vadd.f32 %v6450_v39, %v1378_v62  ;;  %v1455_v55 = vsel %vm1089_vm12, %v1453_v19, %v1454_v52  ;;  %v2006_v56 = vmul.f32 %v6384_v37, %v6662_v21 }
 0x229   : > { %v2007_v35 = vmul.f32 %v6384_v37, %v6664_v15  ;;  %v1473_v44 = vadd.f32 %v1455_v55, %v1397_v63  ;;  %v1531_v26 = vsel %vm1166_vm13, %v1529_v5, %v1530_v27  ;;  %v1963_v57 = vrot.slane %v1930_v50, 1  ;;  %v8412_v55 = vld [vmem:[#allocation41_spill] sm:$0xff] }
 0x22a   : > { %v1964_v33 = vrot.slane %v1931_v28, 1  ;;  %v1474_v36 = vadd.f32 %v6465_v53, %v1398_v4  ;;  %v2039_v13 = vrot.slane %v2006_v56, 2  ;;  %v2080_v39 = vmul.f32 %v6453_v47, %v6662_v21  ;;  %v8409_v53 = vld [vmem:[#allocation40_spill] sm:$0xff] }
 0x22b   : > { %v2040_v59 = vrot.slane %v2007_v35, 2  ;;  %v1549_v1 = vadd.f32 %v1531_v26, %v1473_v44  ;;  %v2081_v38 = vmul.f32 %v6453_v47, %v6691_v0  ;;  %v2100_v2 = vmul.f32 %v6456_v48, %v6662_v21 }
 0x22c   : > { %v1965_v61 = vsel %vm1089_vm12, %v1963_v57, %v1964_v33  ;;  %v1550_v40 = vadd.f32 %v8408_v3, %v1474_v36  ;;  %v2088_v14 = vadd.f32 %v2080_v39, %v8409_v53  ;;  %v2101_v60 = vmul.f32 %v6456_v48, %v6664_v15  ;;  %v8413_v36 = vld [vmem:[#allocation42_spill] sm:$0xff] }
 0x22d   : > { %v1993_v58 = vadd.f32 %v1965_v61, %v1909_v32  ;;  %v2041_v31 = vsel %vm1166_vm13, %v2039_v13, %v2040_v59  ;;  %v2102_v17 = vmul.f32 %v6456_v48, %v6691_v0  ;;  %v2103_v51 = vmul.f32 %v6456_v48, %v6696_v10 }
 0x22e   : > { %v2132_v34 = vrot.slane %v2100_v2, 1  ;;  %v1554_v12 = vpack.c.bf16 %v1550_v40, %v1549_v1  ;;  %v2176_v43 = vmul.f32 %v8410_v54, %v6662_v21  ;;  %v2177_v25 = vmul.f32 %v8410_v54, %v6664_v15  ;;  %v8411_v15 = vld [vmem:[#allocation38_spill] sm:$0xff] }
 0x22f   : > { %v2069_v22 = vadd.f32 %v2041_v31, %v1993_v58  ;;  %v2133_v23 = vrot.slane %v2101_v60, 1  ;;  %v2135_v20 = vrot.slane %v2102_v17, 1  ;;  %v2136_v16 = vrot.slane %v2103_v51, 1 }
 0x230   : > { %v2178_v9 = vmul.f32 %v8410_v54, %v6691_v0  ;;  %5087 = vmatmul.mubr.msk.bf16.gmra.mxu1 %vm822_vm1, %v1554_v12  ;;  %v2179_v45 = vmul.f32 %v8410_v54, %v6696_v10  ;;  %v2208_v32 = vrot.slane %v2176_v43, 2  ;;  %v2209_v62 = vrot.slane %v2177_v25, 2 }
 0x231   : > { %v2089_v29 = vadd.f32 %v2081_v38, %v2069_v22  ;;  %v2134_v19 = vsel %vm1089_vm12, %v2132_v34, %v2133_v23  ;;  %v2137_v21 = vsel %vm1089_vm12, %v2135_v20, %v2136_v16  ;;  %v2252_v5 = vmul.f32 %v8411_v15, %v6691_v0 }
 0x232   : > { %v2211_v52 = vrot.slane %v2178_v9, 2  ;;  %v2164_v63 = vadd.f32 %v2134_v19, %v2088_v14  ;;  %v2210_v50 = vsel %vm1166_vm13, %v2208_v32, %v2209_v62  ;;  %v2212_v28 = vrot.slane %v2179_v45, 2 }
 0x233   : > { %v2165_v27 = vadd.f32 %v2137_v21, %v2089_v29  ;;  %v2253_v4 = vmul.f32 %v8411_v15, %v6643_v8  ;;  %v2272_v56 = vmul.f32 %v8412_v55, %v6691_v0  ;;  %v2273_v35 = vmul.f32 %v8412_v55, %v6696_v10 }
 0x234   : > { %v2274_v44 = vmul.f32 %v8412_v55, %v6643_v8  ;;  %v2213_v26 = vsel %vm1166_vm13, %v2211_v52, %v2212_v28  ;;  %v2240_v57 = vadd.f32 %v2210_v50, %v2164_v63  ;;  %v2275_v33 = vmul.f32 %v8412_v55, %v6651_v42 }
 0x235   : > { %v2348_v13 = vmul.f32 %v8413_v36, %v6691_v0  ;;  %v2241_v59 = vadd.f32 %v2213_v26, %v2165_v27  ;;  %v2304_v39 = vrot.slane %v2272_v56, 1  ;;  %v2305_v1 = vrot.slane %v2273_v35, 1 }
 0x236   : > { %v2307_v61 = vrot.slane %v2274_v44, 1  ;;  %v2260_v38 = vadd.f32 %v2252_v5, %v2240_v57  ;;  %v2308_v2 = vrot.slane %v2275_v33, 1  ;;  %v2349_v3 = vmul.f32 %v8413_v36, %v6696_v10 }
 0x237   : > { %v2350_v40 = vmul.f32 %v8413_v36, %v6643_v8  ;;  %v2261_v58 = vadd.f32 %v2253_v4, %v2241_v59  ;;  %v2306_v31 = vsel %vm1089_vm12, %v2304_v39, %v2305_v1  ;;  %v2351_v53 = vmul.f32 %v8413_v36, %v6651_v42 }
 0x238   : > { %v2380_v14 = vrot.slane %v2348_v13, 2  ;;  %v2309_v60 = vsel %vm1089_vm12, %v2307_v61, %v2308_v2  ;;  %v2336_v17 = vadd.f32 %v2306_v31, %v2260_v38  ;;  %v2381_v51 = vrot.slane %v2349_v3, 2 }
 0x239   : > { %v2383_v34 = vrot.slane %v2350_v40, 2  ;;  %v2337_v12 = vadd.f32 %v2309_v60, %v2261_v58  ;;  %v2384_v22 = vrot.slane %v2351_v53, 2  ;;  %v1910_v43 = vmul.f32 %v6395_v46, %v6691_v0 }
 0x23a   : > { %v1911_v25 = vmul.f32 %v6395_v46, %v6643_v8  ;;  %v2382_v23 = vsel %vm1166_vm13, %v2380_v14, %v2381_v51  ;;  %v1932_v20 = vmul.f32 %v6367_v30, %v6691_v0  ;;  %v1933_v16 = vmul.f32 %v6367_v30, %v6696_v10 }
 0x23b   : > { %v1934_v9 = vmul.f32 %v6367_v30, %v6643_v8  ;;  %v2385_v29 = vsel %vm1166_vm13, %v2383_v34, %v2384_v22  ;;  %v2412_v45 = vadd.f32 %v2382_v23, %v2336_v17  ;;  %v1935_v32 = vmul.f32 %v6367_v30, %v6651_v42 }
 0x23c   : > { %v2008_v62 = vmul.f32 %v6384_v37, %v6691_v0  ;;  %v2413_v19 = vadd.f32 %v2385_v29, %v2337_v12  ;;  %v1966_v21 = vrot.slane %v1932_v20, 1  ;;  %v1967_v52 = vrot.slane %v1933_v16, 1 }
 0x23d   : > { %v1969_v5 = vrot.slane %v1934_v9, 1  ;;  %v1970_v63 = vrot.slane %v1935_v32, 1  ;;  %v2009_v27 = vmul.f32 %v6384_v37, %v6696_v10  ;;  %v2010_v50 = vmul.f32 %v6384_v37, %v6643_v8 }
 0x23e   : > { %v2011_v28 = vmul.f32 %v6384_v37, %v6651_v42  ;;  %v2420_v4 = vpack.c.bf16 %v2413_v19, %v2412_v45  ;;  %v1968_v56 = vsel %vm1089_vm12, %v1966_v21, %v1967_v52  ;;  %v2042_v35 = vrot.slane %v2008_v62, 2 }
 0x23f   : > { %v2082_v0 = vmul.f32 %v6453_v47, %v6643_v8  ;;  %v1971_v44 = vsel %vm1089_vm12, %v1969_v5, %v1970_v63  ;;  %v1994_v26 = vadd.f32 %v1968_v56, %v1910_v43  ;;  %v2043_v57 = vrot.slane %v2009_v27, 2 }
 0x240   : > { %v2045_v33 = vrot.slane %v2010_v50, 2  ;;  %5106 = vmatprep.mubr.msk.bf16.mxu1 %vm822_vm1, %v2420_v4  ;;  %v1995_v10 = vadd.f32 %v1971_v44, %v1911_v25  ;;  %v2046_v13 = vrot.slane %v2011_v28, 2  ;;  %v2083_v59 = vmul.f32 %v6453_v47, %v6675_v7 }
 0x241   : > { %v2104_v39 = vmul.f32 %v6456_v48, %v6643_v8  ;;  %v2044_v1 = vsel %vm1166_vm13, %v2042_v35, %v2043_v57  ;;  %v2105_v61 = vmul.f32 %v6456_v48, %v6651_v42  ;;  %v2106_v38 = vmul.f32 %v6456_v48, %v6675_v7 }
 0x242   : > { %v2107_v2 = vmul.f32 %v6456_v48, %v6677_v24  ;;  %v2047_v3 = vsel %vm1166_vm13, %v2045_v33, %v2046_v13  ;;  %v2070_v40 = vadd.f32 %v2044_v1, %v1994_v26  ;;  %v2180_v31 = vmul.f32 %v8410_v54, %v6643_v8 }
 0x243   : > { %v2138_v58 = vrot.slane %v2104_v39, 1  ;;  %v2071_v53 = vadd.f32 %v2047_v3, %v1995_v10  ;;  %v2139_v14 = vrot.slane %v2105_v61, 1  ;;  %v2141_v60 = vrot.slane %v2106_v38, 1 }
 0x244   : > { %v2142_v17 = vrot.slane %v2107_v2, 1  ;;  %v2090_v51 = vadd.f32 %v2082_v0, %v2070_v40  ;;  %v2181_v34 = vmul.f32 %v8410_v54, %v6651_v42  ;;  %v2182_v12 = vmul.f32 %v8410_v54, %v6675_v7 }
 0x245   : > { %v2183_v22 = vmul.f32 %v8410_v54, %v6677_v24  ;;  %v2091_v43 = vadd.f32 %v2083_v59, %v2071_v53  ;;  %v2140_v25 = vsel %vm1089_vm12, %v2138_v58, %v2139_v14  ;;  %v2214_v8 = vrot.slane %v2180_v31, 2 }
 0x246   : > { %v2143_v23 = vsel %vm1089_vm12, %v2141_v60, %v2142_v17  ;;  %v2166_v20 = vadd.f32 %v2140_v25, %v2090_v51  ;;  %v2215_v16 = vrot.slane %v2181_v34, 2  ;;  %v2217_v9 = vrot.slane %v2182_v12, 2 }
 0x247   : > { %v2218_v29 = vrot.slane %v2183_v22, 2  ;;  %v2167_v45 = vadd.f32 %v2143_v23, %v2091_v43  ;;  %v2254_v42 = vmul.f32 %v8411_v15, %v6675_v7  ;;  %v2255_v32 = vmul.f32 %v8411_v15, %v6725_v18 }
 0x248   : > { %v2276_v62 = vmul.f32 %v8412_v55, %v6675_v7  ;;  %v2216_v19 = vsel %vm1166_vm13, %v2214_v8, %v2215_v16  ;;  %v2277_v52 = vmul.f32 %v8412_v55, %v6677_v24  ;;  %v2278_v5 = vmul.f32 %v8412_v55, %v6725_v18 }
 0x249   : > { %v2219_v21 = vsel %vm1166_vm13, %v2217_v9, %v2218_v29  ;;  %v2242_v63 = vadd.f32 %v2216_v19, %v2166_v20  ;;  %v2279_v50 = vmul.f32 %v8412_v55, %v6727_v6  ;;  %v2352_v35 = vmul.f32 %v8413_v36, %v6675_v7 }
 0x24a   : > { %v2243_v27 = vadd.f32 %v2219_v21, %v2167_v45  ;;  %v2310_v28 = vrot.slane %v2276_v62, 1  ;;  %v2311_v4 = vrot.slane %v2277_v52, 1  ;;  %v2313_v56 = vrot.slane %v2278_v5, 1 }
 0x24b   : > { %v2353_v0 = vmul.f32 %v8413_v36, %v6677_v24  ;;  %v2262_v44 = vadd.f32 %v2254_v42, %v2242_v63  ;;  %v2314_v57 = vrot.slane %v2279_v50, 1  ;;  %v2354_v33 = vmul.f32 %v8413_v36, %v6725_v18 }
 0x24c   : > { %v2263_v26 = vadd.f32 %v2255_v32, %v2243_v27  ;;  %v2312_v10 = vsel %vm1089_vm12, %v2310_v28, %v2311_v4  ;;  %v2355_v13 = vmul.f32 %v8413_v36, %v6727_v6  ;;  %v2386_v59 = vrot.slane %v2352_v35, 2 }
 0x24d   : > { %v2387_v39 = vrot.slane %v2353_v0, 2  ;;  %v2315_v1 = vsel %vm1089_vm12, %v2313_v56, %v2314_v57  ;;  %v2338_v61 = vadd.f32 %v2312_v10, %v2262_v44  ;;  %v2389_v38 = vrot.slane %v2354_v33, 2 }
 0x24e   : > { %v1912_v2 = vmul.f32 %v6395_v46, %v6675_v7  ;;  %v2339_v3 = vadd.f32 %v2315_v1, %v2263_v26  ;;  %v2390_v58 = vrot.slane %v2355_v13, 2  ;;  %v1913_v31 = vmul.f32 %v6395_v46, %v6725_v18 }
 0x24f   : > { %v2388_v40 = vsel %vm1166_vm13, %v2386_v59, %v2387_v39  ;;  %v1936_v14 = vmul.f32 %v6367_v30, %v6675_v7  ;;  %v1937_v60 = vmul.f32 %v6367_v30, %v6677_v24  ;;  %v1938_v17 = vmul.f32 %v6367_v30, %v6725_v18 }
 0x250   : > { %v2414_v53 = vadd.f32 %v2388_v40, %v2338_v61  ;;  %v2391_v51 = vsel %vm1166_vm13, %v2389_v38, %v2390_v58  ;;  %v1939_v34 = vmul.f32 %v6367_v30, %v6727_v6  ;;  %v2012_v12 = vmul.f32 %v6384_v37, %v6675_v7 }
 0x251   : > { %v2013_v22 = vmul.f32 %v6384_v37, %v6677_v24  ;;  %v2415_v43 = vadd.f32 %v2391_v51, %v2339_v3  ;;  %v1972_v25 = vrot.slane %v1936_v14, 1  ;;  %v1973_v23 = vrot.slane %v1937_v60, 1  ;;  %v5388_v24 = vld [vmem:[%s8391_s3 + $0x20] sm:$0xff]  }
 0x252   : > { %v1975_v8 = vrot.slane %v1938_v17, 1  ;;  %v1976_v20 = vrot.slane %v1939_v34, 1  ;;  %v2014_v16 = vmul.f32 %v6384_v37, %v6725_v18  ;;  %v2015_v9 = vmul.f32 %v6384_v37, %v6727_v6  ;;  %v8414_v60 = vld [vmem:[#allocation45_spill] sm:$0xff]  ;;  %v7147_v34 = vpop.f32.mrf.mxu0 }
 0x253   : > { %v2048_v29 = vrot.slane %v2012_v12, 2  ;;  %v2421_v45 = vpack.c.bf16 %v2415_v43, %v2414_v53  ;;  %v1974_v42 = vsel %vm1089_vm12, %v1972_v25, %v1973_v23  ;;  %v2049_v32 = vrot.slane %v2013_v22, 2 }
 0x254   : > { %v2084_v7 = vmul.f32 %v6453_v47, %v6725_v18  ;;  %v1977_v62 = vsel %vm1089_vm12, %v1975_v8, %v1976_v20  ;;  %v1996_v19 = vadd.f32 %v1974_v42, %v1912_v2  ;;  %v2051_v21 = vrot.slane %v2014_v16, 2  ;;  %v8415_v8 = vld [vmem:[#allocation46_spill] sm:$0xff] }
 0x255   : > { %v2052_v52 = vrot.slane %v2015_v9, 2  ;;  %5107 = vmatmul.mubr.msk.bf16.vlgmr.msra.gmra.mxu1 %vm822_vm1, %v2421_v45  ;;  %v1997_v5 = vadd.f32 %v1977_v62, %v1913_v31  ;;  %v2050_v63 = vsel %vm1166_vm13, %v2048_v29, %v2049_v32  ;;  %v2085_v27 = vmul.f32 %v6453_v47, %v6754_v49 }
 0x256   : > { %v2108_v50 = vmul.f32 %v6456_v48, %v6725_v18  ;;  %v2072_v4 = vadd.f32 %v2050_v63, %v1996_v19  ;;  %v2109_v56 = vmul.f32 %v6456_v48, %v6727_v6  ;;  %v2110_v35 = vmul.f32 %v6456_v48, %v6754_v49  ;;  %5127 = vmatpush3.bf16.msra.mxu1 %v6849_v11 }
 0x257   : > { %v2053_v28 = vsel %vm1166_vm13, %v2051_v21, %v2052_v52  ;;  %v2111_v44 = vmul.f32 %v6456_v48, %v6761_v41  ;;  %v2184_v57 = vmul.f32 %v8410_v54, %v6725_v18  ;;  %5128 = vmatprep.subr.bf16.mxu1 %v5388_v24  ;;  %v2185_v59 = vmul.f32 %v8410_v54, %v6727_v6  ;;  %v7164_v21 = vpop.f32.mrf.mxu0 }
 0x258   : > { %v2073_v0 = vadd.f32 %v2053_v28, %v1997_v5  ;;  %v2144_v26 = vrot.slane %v2108_v50, 1  ;;  %v2092_v33 = vadd.f32 %v2084_v7, %v2072_v4  ;;  %v2145_v10 = vrot.slane %v2109_v56, 1 }
 0x259   : > { %v2147_v13 = vrot.slane %v2110_v35, 1  ;;  %v2148_v1 = vrot.slane %v2111_v44, 1  ;;  %v2186_v11 = vmul.f32 %v8410_v54, %v6754_v49  ;;  %v2187_v61 = vmul.f32 %v8410_v54, %v6761_v41 }
 0x25a   : > { %v2093_v39 = vadd.f32 %v2085_v27, %v2073_v0  ;;  %v2146_v38 = vsel %vm1089_vm12, %v2144_v26, %v2145_v10  ;;  %v2220_v2 = vrot.slane %v2184_v57, 2  ;;  %v2221_v3 = vrot.slane %v2185_v59, 2  ;;  %5129 = vmatpush3.bf16.msra.mxu1 %v5388_v24  ;;  %v7180_v59 = vpop.f32.mrf.mxu0 }
 0x25b   : > { %v2256_v18 = vmul.f32 %v8411_v15, %v6754_v49  ;;  %v2149_v40 = vsel %vm1089_vm12, %v2147_v13, %v2148_v1  ;;  %v2168_v58 = vadd.f32 %v2146_v38, %v2092_v33  ;;  %v2223_v6 = vrot.slane %v2186_v11, 2 }
 0x25c   : > { %v2224_v31 = vrot.slane %v2187_v61, 2  ;;  %v2169_v53 = vadd.f32 %v2149_v40, %v2093_v39  ;;  %v2222_v14 = vsel %vm1166_vm13, %v2220_v2, %v2221_v3  ;;  %v2257_v17 = vmul.f32 %v8411_v15, %v8414_v60 }
 0x25d   : > { %v2280_v51 = vmul.f32 %v8412_v55, %v6754_v49  ;;  %v2244_v22 = vadd.f32 %v2222_v14, %v2168_v58  ;;  %v2281_v43 = vmul.f32 %v8412_v55, %v6761_v41  ;;  %v2282_v25 = vmul.f32 %v8412_v55, %v8414_v60  ;;  %v7195_v14 = vpop.f32.mrf.mxu0 }
 0x25e   : > { %v2225_v12 = vsel %vm1166_vm13, %v2223_v6, %v2224_v31  ;;  %v2283_v20 = vmul.f32 %v8412_v55, %v8415_v8  ;;  %v2356_v9 = vmul.f32 %v8413_v36, %v6754_v49  ;;  %v2357_v32 = vmul.f32 %v8413_v36, %v6761_v41 }
 0x25f   : > { %v2245_v23 = vadd.f32 %v2225_v12, %v2169_v53  ;;  %v2316_v16 = vrot.slane %v2280_v51, 1  ;;  %v2264_v29 = vadd.f32 %v2256_v18, %v2244_v22  ;;  %v2317_v45 = vrot.slane %v2281_v43, 1  ;;  %v8416_v12 = vld [vmem:[#allocation47_spill] sm:$0xff] }
 0x260   : > { %v2319_v42 = vrot.slane %v2282_v25, 1  ;;  %v2320_v24 = vrot.slane %v2283_v20, 1  ;;  %v2358_v62 = vmul.f32 %v8413_v36, %v8414_v60  ;;  %v2359_v19 = vmul.f32 %v8413_v36, %v8415_v8 }
 0x261   : > { %v2265_v7 = vadd.f32 %v2257_v17, %v2245_v23  ;;  %v2318_v52 = vsel %vm1089_vm12, %v2316_v16, %v2317_v45  ;;  %v2392_v5 = vrot.slane %v2356_v9, 2  ;;  %v2393_v63 = vrot.slane %v2357_v32, 2 }
 0x262   : > { %v1914_v27 = vmul.f32 %v6395_v46, %v6754_v49  ;;  %v2321_v50 = vsel %vm1089_vm12, %v2319_v42, %v2320_v24  ;;  %v2340_v28 = vadd.f32 %v2318_v52, %v2264_v29  ;;  %v2395_v4 = vrot.slane %v2358_v62, 2  ;;  %v8417_v29 = vld [vmem:[#allocation48_spill] sm:$0xff]  ;;  %v5124_v24 = vpop.f32.mrf.mxu0 }
 0x263   : > { %v2396_v56 = vrot.slane %v2359_v19, 2  ;;  %v2341_v35 = vadd.f32 %v2321_v50, %v2265_v7  ;;  %v2394_v0 = vsel %vm1166_vm13, %v2392_v5, %v2393_v63  ;;  %v1915_v44 = vmul.f32 %v6395_v46, %v8414_v60 }
 0x264   : > { %v1940_v26 = vmul.f32 %v6367_v30, %v6754_v49  ;;  %v2416_v33 = vadd.f32 %v2394_v0, %v2340_v28  ;;  %v1941_v10 = vmul.f32 %v6367_v30, %v6761_v41  ;;  %v1942_v13 = vmul.f32 %v6367_v30, %v8414_v60 }
 0x265   : > { %v2397_v57 = vsel %vm1166_vm13, %v2395_v4, %v2396_v56  ;;  %v1943_v1 = vmul.f32 %v6367_v30, %v8415_v8  ;;  %v2016_v46 = vmul.f32 %v6384_v37, %v6754_v49  ;;  %v2017_v2 = vmul.f32 %v6384_v37, %v6761_v41 }
 0x266   : > { %v2417_v39 = vadd.f32 %v2397_v57, %v2341_v35  ;;  %v1978_v11 = vrot.slane %v1940_v26, 1  ;;  %v1979_v61 = vrot.slane %v1941_v10, 1  ;;  %v1981_v38 = vrot.slane %v1942_v13, 1  ;;  %v2690_v26 = vpop.f32.mrf.mxu0 }
 0x267   : > { %v2018_v3 = vmul.f32 %v6384_v37, %v8414_v60  ;;  %v1982_v40 = vrot.slane %v1943_v1, 1  ;;  %v2019_v58 = vmul.f32 %v6384_v37, %v8415_v8  ;;  %v2054_v6 = vrot.slane %v2016_v46, 2  ;;  %v8419_v46 = vld [vmem:[#allocation44_spill] sm:$0xff] }
 0x268   : > { %v2422_v18 = vpack.c.bf16 %v2417_v39, %v2416_v33  ;;  %v1980_v30 = vsel %vm1089_vm12, %v1978_v11, %v1979_v61  ;;  %v2055_v31 = vrot.slane %v2017_v2, 2  ;;  %v2086_v49 = vmul.f32 %v6453_v47, %v8414_v60  ;;  %v8418_v33 = vld [vmem:[#allocation43_spill] sm:$0xff] }
 0x269   : > { %v2057_v53 = vrot.slane %v2018_v3, 2  ;;  %v1983_v41 = vsel %vm1089_vm12, %v1981_v38, %v1982_v40  ;;  %v1998_v17 = vadd.f32 %v1980_v30, %v1914_v27  ;;  %v2058_v51 = vrot.slane %v2019_v58, 2  ;;  %v4935_v30 = vld [vmem:[#allocation8 + $0x2] ss:$0 sm:$0xff] }
 0x26a   : > { %5110 = vmatprep.mubr.msk.bf16.mxu1 %vm822_vm1, %v2422_v18  ;;  %v2087_v22 = vmul.f32 %v6453_v47, %v8416_v12  ;;  %v1999_v37 = vadd.f32 %v1983_v41, %v1915_v44  ;;  %v2056_v43 = vsel %vm1166_vm13, %v2054_v6, %v2055_v31  ;;  %v2112_v25 = vmul.f32 %v6456_v48, %v8414_v60  ;;  %v5125_v31 = vpop.f32.mrf.mxu0 }
 0x26b   : > { %v2113_v23 = vmul.f32 %v6456_v48, %v8415_v8  ;;  %v2059_v20 = vsel %vm1166_vm13, %v2057_v53, %v2058_v51  ;;  %v2074_v16 = vadd.f32 %v2056_v43, %v1998_v17  ;;  %v2114_v9 = vmul.f32 %v6456_v48, %v8416_v12 }
 0x26c   : > { %v2115_v45 = vmul.f32 %v6456_v48, %v8417_v29  ;;  %v2075_v42 = vadd.f32 %v2059_v20, %v1999_v37  ;;  %v2150_v47 = vrot.slane %v2112_v25, 1  ;;  %v2188_v7 = vmul.f32 %v8410_v54, %v8414_v60 }
 0x26d   : > { %v2151_v32 = vrot.slane %v2113_v23, 1  ;;  %v2094_v62 = vadd.f32 %v2086_v49, %v2074_v16  ;;  %v2153_v19 = vrot.slane %v2114_v9, 1  ;;  %v2189_v5 = vmul.f32 %v8410_v54, %v8415_v8 }
 0x26e   : > { %v2154_v52 = vrot.slane %v2115_v45, 1  ;;  %v2095_v63 = vadd.f32 %v2087_v22, %v2075_v42  ;;  %v2190_v50 = vmul.f32 %v8410_v54, %v8416_v12  ;;  %v2191_v48 = vmul.f32 %v8410_v54, %v8417_v29  ;;  %v2693_v45 = vpop.f32.mrf.mxu0 }
 0x26f   : > { %v2152_v27 = vsel %vm1089_vm12, %v2150_v47, %v2151_v32  ;;  %v2226_v60 = vrot.slane %v2188_v7, 2  ;;  %v2227_v56 = vrot.slane %v2189_v5, 2  ;;  %v2258_v8 = vmul.f32 %v8411_v15, %v8416_v12  ;;  %v8420_v47 = vld [vmem:[#allocation36_spill] sm:$0xff] }
 0x270   : > { %v2155_v28 = vsel %vm1089_vm12, %v2153_v19, %v2154_v52  ;;  %v2170_v4 = vadd.f32 %v2152_v27, %v2094_v62  ;;  %v2229_v0 = vrot.slane %v2190_v50, 2  ;;  %v2230_v44 = vrot.slane %v2191_v48, 2  ;;  %v4936_v62 = vld [vmem:[%s8393_s1 + $0x18] sm:$0x7]  ;;  %v2773_v27 = vld [vmem:[#allocation5] sm:$0xff] }
 0x271   : > { %v2171_v35 = vadd.f32 %v2155_v28, %v2095_v63  ;;  %v2228_v57 = vsel %vm1166_vm13, %v2226_v60, %v2227_v56  ;;  %v2259_v10 = vmul.f32 %v8411_v15, %v8418_v33  ;;  %v2284_v54 = vmul.f32 %v8412_v55, %v8416_v12  ;;  %v2774_v50 = vld [vmem:[#allocation5 + $0x8] sm:$0x3]  ;;  %v4938_v28 = vld [vmem:[%s8393_s1 + $0x20] sm:$0x7]  ;;  %v8422_v56 = vld [vmem:[#allocation34_spill] sm:$0xff] }
 0x272   : > { %v2285_v13 = vmul.f32 %v8412_v55, %v8417_v29  ;;  %v2231_v39 = vsel %vm1166_vm13, %v2229_v0, %v2230_v44  ;;  %v2246_v1 = vadd.f32 %v2228_v57, %v2170_v4  ;;  %v2286_v11 = vmul.f32 %v8412_v55, %v8418_v33  ;;  %v8421_v4 = vld [vmem:[#allocation33_spill] sm:$0xff]  ;;  %v8423_v0 = vld [vmem:[#allocation35_spill] sm:$0xff] }
 0x273   : > { %v2287_v61 = vmul.f32 %v8412_v55, %v8419_v46  ;;  %v2247_v38 = vadd.f32 %v2231_v39, %v2171_v35  ;;  %v2322_v2 = vrot.slane %v2284_v54, 1  ;;  %v2360_v15 = vmul.f32 %v8413_v36, %v8416_v12  ;;  %v7289_v39 = vld [vmem:[#allocation17] sm:$0x1] }
 0x274   : > { %v2323_v3 = vrot.slane %v2285_v13, 1  ;;  %v2266_v18 = vadd.f32 %v2258_v8, %v2246_v1  ;;  %v2325_v40 = vrot.slane %v2286_v11, 1  ;;  %v2361_v6 = vmul.f32 %v8413_v36, %v8417_v29 }
 0x275   : > { %v2326_v58 = vrot.slane %v2287_v61, 1  ;;  %v2267_v53 = vadd.f32 %v2259_v10, %v2247_v38  ;;  %v2362_v55 = vmul.f32 %v8413_v36, %v8418_v33  ;;  %v2363_v41 = vmul.f32 %v8413_v36, %v8419_v46  ;;  %v7302_v38 = vld [vmem:[#allocation5 + $0x90] sm:$0xff] }
 0x276   : > { %v2324_v49 = vsel %vm1089_vm12, %v2322_v2, %v2323_v3  ;;  %v2398_v12 = vrot.slane %v2360_v15, 2  ;;  %v2399_v22 = vrot.slane %v2361_v6, 2  ;;  %v2715_v23 = vmul.f32 %v7147_v34, %v4935_v30  ;;  %v7304_v2 = vld [vmem:[#allocation5 + $0x98] sm:$0x3] }
 0x277   : > { %v2327_v17 = vsel %vm1089_vm12, %v2325_v40, %v2326_v58  ;;  %v2342_v51 = vadd.f32 %v2324_v49, %v2266_v18  ;;  %v2401_v43 = vrot.slane %v2362_v55, 2  ;;  %v2402_v25 = vrot.slane %v2363_v41, 2 }
 0x278   : > { %v2343_v37 = vadd.f32 %v2327_v17, %v2267_v53  ;;  %v2400_v20 = vsel %vm1166_vm13, %v2398_v12, %v2399_v22  ;;  %v2713_v16 = vmul.f32 %v4935_v30, %v7164_v21  ;;  %v2716_v9 = vmul.f32 %v7180_v59, %v4935_v30 }
 0x279   : > { %v2714_v29 = vmul.f32 %v4935_v30, %v7195_v14  ;;  %v2403_v36 = vsel %vm1166_vm13, %v2401_v43, %v2402_v25  ;;  %v2418_v42 = vadd.f32 %v2400_v20, %v2342_v51  ;;  %v2731_v32 = vadd.f32 %v8420_v47, %v2715_v23 }
 0x27a   : > { %v2719_v7 = vmul.f32 %v5124_v24, %v4935_v30  ;;  %v2419_v34 = vadd.f32 %v2403_v36, %v2343_v37  ;;  %v2729_v19 = vadd.f32 %v8420_v47, %v2713_v16  ;;  %v2732_v21 = vadd.f32 %v8420_v47, %v2716_v9  ;;  %v4937_v24 = vld [vmem:[%s8393_s1 + $0x1c] sm:$0x7] }
 0x27b   : > { %v2730_v59 = vadd.f32 %v8420_v47, %v2714_v29  ;;  %2743 = vst.msk [vmem:[#allocation5 + $0x31] sm:$0xff] %vm822_vm1, %v2731_v32  ;;  %v2717_v52 = vmul.f32 %v4935_v30, %v2690_v26  ;;  %v2720_v5 = vmul.f32 %v5125_v31, %v4935_v30  ;;  %v2718_v63 = vmul.f32 %v4935_v30, %v2693_v45 }
 0x27c   : > { %v2735_v14 = vadd.f32 %v8420_v47, %v2719_v7  ;;  %v2423_v48 = vpack.c.bf16 %v2419_v34, %v2418_v42  ;;  %2741 = vst.msk [vmem:[#allocation5 + $0x11] sm:$0xff] %vm822_vm1, %v2729_v19  ;;  %2744 = vst.msk [vmem:[#allocation5 + $0x41] sm:$0xff] %vm822_vm1, %v2732_v21  ;;  %v7270_v60 = vrot.slane %v4936_v62, %v8421_v4 }
 0x27d   : > { %2742 = vst.msk [vmem:[#allocation5 + $0x21] sm:$0xff] %vm822_vm1, %v2730_v59  ;;  %v7273_v35 = vrot.slane %v4936_v62, %v8422_v56  ;;  %v7276_v44 = vrot.slane %v4936_v62, %v8423_v0  ;;  %v2733_v8 = vadd.f32 %v8420_v47, %v2717_v52  ;;  %v2736_v26 = vadd.f32 %v8420_v47, %v2720_v5 }
 0x27e   : > { %2747 = vst.msk [vmem:[#allocation5 + $0x71] sm:$0xff] %vm822_vm1, %v2735_v14  ;;  %v2734_v57 = vadd.f32 %v8420_v47, %v2718_v63  ;;  %5111 = vmatmul.mubr.msk.bf16.gmra.mxu1 %vm822_vm1, %v2423_v48  ;;  %v7287_v13 = vrot.slane %v4937_v24, %v8421_v4  ;;  %v2797_v1 = vmul.f32 %v7270_v60, %v2773_v27 }
 0x27f   : > { %v2817_v33 = vmul.f32 %v7273_v35, %v2773_v27  ;;  %v2818_v10 = vmul.f32 %v7273_v35, %v2774_v50  ;;  %v2893_v54 = vmul.f32 %v7276_v44, %v2773_v27  ;;  %2745 = vst.msk [vmem:[#allocation5 + $0x51] sm:$0xff] %vm822_vm1, %v2733_v8  ;;  %2748 = vst.msk [vmem:[#allocation5 + $0x81] sm:$0xff] %vm822_vm1, %v2736_v26 }
 0x280   : > { %2746 = vst.msk [vmem:[#allocation5 + $0x61] sm:$0xff] %vm822_vm1, %v2734_v57  ;;  %v2894_v11 = vmul.f32 %v7276_v44, %v2774_v50  ;;  %v7297_v46 = vrot.slane %v4937_v24, %v8422_v56  ;;  %v7300_v61 = vrot.slane %v4938_v28, %v8421_v4  ;;  %v7307_v40 = vrot.slane %v4938_v28, %v8422_v56 }
 0x281   : > { %v2849_v3 = vrot.slane %v2817_v33, 1  ;;  %v2850_v15 = vrot.slane %v2818_v10, 1  ;;  %v2925_v18 = vrot.slane %v2893_v54, 2  ;;  %v7310_v6 = vrot.slane %v4937_v24, %v8423_v0 }
 0x282   : > { %v2926_v58 = vrot.slane %v2894_v11, 2  ;;  %v7313_v30 = vrot.slane %v4938_v28, %v8423_v0  ;;  %v7317_v31 = vrot.slane %v7289_v39, %v8421_v4  ;;  %v7319_v53 = vld [vmem:[#allocation5 + $0x30] sm:$0xff]  ;;  %v7321_v49 = vld [vmem:[#allocation5 + $0x38] sm:$0x3]  ;;  %v7326_v41 = vmul.f32 %v7300_v61, %v7302_v38 }
 0x283   : > { %v2851_v55 = vsel %vm1089_vm12, %v2849_v3, %v2850_v15  ;;  %v7330_v17 = vmul.f32 %v7307_v40, %v7302_v38  ;;  %v7334_v51 = vmul.f32 %v7307_v40, %v7304_v2  ;;  %v2775_v12 = vld [vmem:[#allocation5 + $0x10] sm:$0xff]  ;;  %v7336_v22 = vld [vmem:[#allocation5 + $0x18] sm:$0x3]  ;;  %v7343_v23 = vmul.f32 %v7300_v61, %v7319_v53  ;;  %3940 = vst.msk [vmem:[#allocation5 + $0x39] sm:$0x1] %vm992_vm11, %v7289_v39  ;;  %v7378_v42 = vld [vmem:[#allocation5 + $0x40] sm:$0xff] }
 0x284   : > { %v7338_v37 = vld [vmem:[#allocation5 + $0x20] sm:$0xff]  ;;  %v2881_v43 = vadd.f32 %v2851_v55, %v2797_v1  ;;  %v2927_v25 = vsel %vm1166_vm13, %v2925_v18, %v2926_v58  ;;  %v7347_v20 = vmul.f32 %v7307_v40, %v7319_v53  ;;  %3923 = vst.msk [vmem:[#allocation5] sm:$0xff] %vm822_vm1, %v7317_v31  ;;  %3925 = vst.msk [vmem:[#allocation5 + $0x90] sm:$0xff] %vm822_vm1, %v7317_v31  ;;  %v7361_v16 = vld [vmem:[#allocation5 + $0x28] sm:$0x3] }
 0x285   : > { %3924 = vst.msk [vmem:[#allocation5 + $0x8] sm:$0x3] %vm987_vm10, %v7317_v31  ;;  %3926 = vst.msk [vmem:[#allocation5 + $0x98] sm:$0x3] %vm987_vm10, %v7317_v31  ;;  %v2798_v9 = vmul.f32 %v7270_v60, %v2775_v12  ;;  %v2819_v29 = vmul.f32 %v7273_v35, %v2775_v12  ;;  %v2820_v45 = vmul.f32 %v7273_v35, %v7336_v22  ;;  %v7380_v47 = vld [vmem:[#allocation5 + $0x48] sm:$0x3] }
 0x286   : > { %3930 = vst.msk [vmem:[#allocation5 + $0x30] sm:$0x1] %vm992_vm11, %v7289_v39  ;;  %v2895_v36 = vmul.f32 %v7276_v44, %v2775_v12  ;;  %3927 = vst.msk [vmem:[#allocation5] sm:$0x1] %vm992_vm11, %v7289_v39  ;;  %v2896_v32 = vmul.f32 %v7276_v44, %v7336_v22  ;;  %v2957_v7 = vadd.f32 %v2927_v25, %v2881_v43  ;;  %v7397_v19 = vld [vmem:[#allocation5 + $0x70] sm:$0xff]  ;;  %v7422_v57 = vld [vmem:[#allocation5 + $0x80] sm:$0xff] }
 0x287   : > { %3928 = vst.msk [vmem:[#allocation5 + $0x10] sm:$0x1] %vm992_vm11, %v7289_v39  ;;  %3937 = vst.msk [vmem:[#allocation5 + $0x9] sm:$0x1] %vm992_vm11, %v7289_v39  ;;  %v2969_v62 = vmul.f32 %v7287_v13, %v2775_v12  ;;  %v2970_v34 = vmul.f32 %v7287_v13, %v7338_v37  ;;  %v7399_v21 = vld [vmem:[#allocation5 + $0x78] sm:$0x3]  ;;  %v2989_v5 = vmul.f32 %v7297_v46, %v2775_v12 }
 0x288   : > { %3938 = vst.msk [vmem:[#allocation5 + $0x19] sm:$0x1] %vm992_vm11, %v7289_v39  ;;  %3929 = vst.msk [vmem:[#allocation5 + $0x20] sm:$0x1] %vm992_vm11, %v7289_v39  ;;  %v2852_v59 = vrot.slane %v2819_v29, 1  ;;  %v2853_v14 = vrot.slane %v2820_v45, 1  ;;  %v2990_v48 = vmul.f32 %v7297_v46, %v7336_v22  ;;  %v2991_v28 = vmul.f32 %v7297_v46, %v7338_v37 }
 0x289   : > { %3936 = vst.msk [vmem:[#allocation5 + $0x90] sm:$0x1] %vm992_vm11, %v7289_v39  ;;  %3946 = vst.msk [vmem:[#allocation5 + $0x99] sm:$0x1] %vm992_vm11, %v7289_v39  ;;  %v2928_v52 = vrot.slane %v2895_v36, 2  ;;  %v7402_v63 = vld [vmem:[#allocation5 + $0x50] sm:$0xff]  ;;  %v2977_v50 = vadd.f32 %v2969_v62, %v2957_v7  ;;  %v2992_v10 = vmul.f32 %v7297_v46, %v7361_v16  ;;  %v3065_v1 = vmul.f32 %v7310_v6, %v2775_v12 }
 0x28a   : > { %3939 = vst.msk [vmem:[#allocation5 + $0x29] sm:$0x1] %vm992_vm11, %v7289_v39  ;;  %3941 = vst.msk [vmem:[#allocation5 + $0x49] sm:$0x1] %vm992_vm11, %v7289_v39  ;;  %v7404_v24 = vld [vmem:[#allocation5 + $0x58] sm:$0x3]  ;;  %v2854_v33 = vsel %vm1089_vm12, %v2852_v59, %v2853_v14  ;;  %v3066_v12 = vmul.f32 %v7310_v6, %v7336_v22  ;;  %v3067_v43 = vmul.f32 %v7310_v6, %v7338_v37 }
 0x28b   : > { %3931 = vst.msk [vmem:[#allocation5 + $0x40] sm:$0x1] %vm992_vm11, %v7289_v39  ;;  %3944 = vst.msk [vmem:[#allocation5 + $0x79] sm:$0x1] %vm992_vm11, %v7289_v39  ;;  %v2929_v27 = vrot.slane %v2896_v32, 2  ;;  %v7418_v8 = vld [vmem:[#allocation5 + $0x60] sm:$0xff]  ;;  %v2882_v3 = vadd.f32 %v2854_v33, %v2798_v9  ;;  %v3068_v25 = vmul.f32 %v7310_v6, %v7361_v16  ;;  %v3141_v36 = vmul.f32 %v7300_v61, %v7338_v37 }
 0x28c   : > { %3934 = vst.msk [vmem:[#allocation5 + $0x70] sm:$0x1] %vm992_vm11, %v7289_v39  ;;  %3942 = vst.msk [vmem:[#allocation5 + $0x59] sm:$0x1] %vm992_vm11, %v7289_v39  ;;  %v7420_v26 = vld [vmem:[#allocation5 + $0x68] sm:$0x3]  ;;  %v3161_v14 = vmul.f32 %v7307_v40, %v7338_v37 }
 0x28d   : > { %3932 = vst.msk [vmem:[#allocation5 + $0x50] sm:$0x1] %vm992_vm11, %v7289_v39  ;;  %v3021_v54 = vrot.slane %v2989_v5, 1  ;;  %3943 = vst.msk [vmem:[#allocation5 + $0x69] sm:$0x1] %vm992_vm11, %v7289_v39  ;;  %v2930_v15 = vsel %vm1166_vm13, %v2928_v52, %v2929_v27  ;;  %v3022_v18 = vrot.slane %v2990_v48, 1  ;;  %v3162_v52 = vmul.f32 %v7307_v40, %v7361_v16 }
 0x28e   : > { %3933 = vst.msk [vmem:[#allocation5 + $0x60] sm:$0x1] %vm992_vm11, %v7289_v39  ;;  %v7432_v11 = vld [vmem:[#allocation5 + $0x88] sm:$0x3]  ;;  %3935 = vst.msk [vmem:[#allocation5 + $0x80] sm:$0x1] %vm992_vm11, %v7289_v39  ;;  %v2958_v29 = vadd.f32 %v2930_v15, %v2882_v3  ;;  %v3164_v27 = vmul.f32 %v7307_v40, %v7321_v49  ;;  %v3238_v3 = vmul.f32 %v7313_v30, %v7361_v16 }
 0x28f   : > { %v3024_v58 = vrot.slane %v2991_v28, 1  ;;  %3945 = vst.msk [vmem:[#allocation5 + $0x89] sm:$0x1] %vm992_vm11, %v7289_v39  ;;  %v3025_v55 = vrot.slane %v2992_v10, 1  ;;  %v3023_v9 = vsel %vm1089_vm12, %v3021_v54, %v3022_v18  ;;  %v3097_v45 = vrot.slane %v3065_v1, 2 }
 0x290   : > { %v3053_v39 = vadd.f32 %v3023_v9, %v2977_v50  ;;  %v3098_v7 = vrot.slane %v3066_v12, 2  ;;  %v3100_v62 = vrot.slane %v3067_v43, 2  ;;  %v2978_v59 = vadd.f32 %v2970_v34, %v2958_v29 }
 0x291   : > { %v3026_v32 = vsel %vm1089_vm12, %v3024_v58, %v3025_v55  ;;  %v3101_v22 = vrot.slane %v3068_v25, 2  ;;  %v3196_v48 = vrot.slane %v7347_v20, 1  ;;  %v3237_v50 = vmul.f32 %v7313_v30, %v7338_v37 }
 0x292   : > { %v3099_v5 = vsel %vm1166_vm13, %v3097_v45, %v3098_v7  ;;  %v3054_v28 = vadd.f32 %v3026_v32, %v2978_v59  ;;  %v3193_v10 = vrot.slane %v3161_v14, 1  ;;  %v3194_v54 = vrot.slane %v3162_v52, 1 }
 0x293   : > { %v3102_v34 = vsel %vm1166_vm13, %v3100_v62, %v3101_v22  ;;  %v3129_v33 = vadd.f32 %v3099_v5, %v3053_v39  ;;  %v3197_v1 = vrot.slane %v3164_v27, 1  ;;  %v3239_v15 = vmul.f32 %v7313_v30, %v7319_v53 }
 0x294   : > { %v3130_v18 = vadd.f32 %v3102_v34, %v3054_v28  ;;  %v3240_v20 = vmul.f32 %v7313_v30, %v7321_v49  ;;  %v3269_v55 = vrot.slane %v3237_v50, 2  ;;  %v3195_v12 = vsel %vm1089_vm12, %v3193_v10, %v3194_v54 }
 0x295   : > { %v3149_v58 = vadd.f32 %v3141_v36, %v3129_v33  ;;  %v3198_v43 = vsel %vm1089_vm12, %v3196_v48, %v3197_v1  ;;  %v3270_v25 = vrot.slane %v3238_v3, 2  ;;  %v3272_v29 = vrot.slane %v3239_v15, 2 }
 0x296   : > { %v3150_v9 = vadd.f32 %v7343_v23, %v3130_v18  ;;  %v3273_v32 = vrot.slane %v3240_v20, 2  ;;  %v2799_v39 = vmul.f32 %v7270_v60, %v7338_v37  ;;  %v2800_v36 = vmul.f32 %v7270_v60, %v7319_v53 }
 0x297   : > { %v3225_v45 = vadd.f32 %v3195_v12, %v3149_v58  ;;  %v3271_v7 = vsel %vm1166_vm13, %v3269_v55, %v3270_v25  ;;  %v2821_v62 = vmul.f32 %v7273_v35, %v7338_v37  ;;  %v2822_v59 = vmul.f32 %v7273_v35, %v7361_v16 }
 0x298   : > { %v3226_v22 = vadd.f32 %v3198_v43, %v3150_v9  ;;  %v3274_v14 = vsel %vm1166_vm13, %v3272_v29, %v3273_v32  ;;  %v2823_v52 = vmul.f32 %v7273_v35, %v7319_v53  ;;  %v2824_v5 = vmul.f32 %v7273_v35, %v7321_v49 }
 0x299   : > { %v3301_v23 = vadd.f32 %v3271_v7, %v3225_v45  ;;  %v2855_v27 = vrot.slane %v2821_v62, 1  ;;  %v2856_v48 = vrot.slane %v2822_v59, 1  ;;  %v2897_v50 = vmul.f32 %v7276_v44, %v7338_v37 }
 0x29a   : > { %v3302_v28 = vadd.f32 %v3274_v14, %v3226_v22  ;;  %v2858_v34 = vrot.slane %v2823_v52, 1  ;;  %v2898_v33 = vmul.f32 %v7276_v44, %v7361_v16  ;;  %v2899_v10 = vmul.f32 %v7276_v44, %v7319_v53 }
 0x29b   : > { %v2857_v54 = vsel %vm1089_vm12, %v2855_v27, %v2856_v48  ;;  %v2859_v1 = vrot.slane %v2824_v5, 1  ;;  %v2900_v3 = vmul.f32 %v7276_v44, %v7321_v49  ;;  %v2931_v15 = vrot.slane %v2897_v50, 2 }
 0x29c   : > { %v3309_v18 = vpack.c.bf16 %v3302_v28, %v3301_v23  ;;  %v2883_v58 = vadd.f32 %v2857_v54, %v2799_v39  ;;  %v2932_v20 = vrot.slane %v2898_v33, 2  ;;  %v2934_v55 = vrot.slane %v2899_v10, 2 }
 0x29d   : > { %v2860_v37 = vsel %vm1089_vm12, %v2858_v34, %v2859_v1  ;;  %v2935_v12 = vrot.slane %v2900_v3, 2  ;;  %v2971_v16 = vmul.f32 %v7287_v13, %v7319_v53  ;;  %v2972_v43 = vmul.f32 %v7287_v13, %v7378_v42 }
 0x29e   : > { %5130 = vmatprep.mubr.msk.bf16.mxu1 %vm822_vm1, %v3309_v18  ;;  %v2884_v25 = vadd.f32 %v2860_v37, %v2800_v36  ;;  %v2933_v29 = vsel %vm1166_vm13, %v2931_v15, %v2932_v20  ;;  %v2993_v9 = vmul.f32 %v7297_v46, %v7319_v53  ;;  %v2994_v45 = vmul.f32 %v7297_v46, %v7321_v49 }
 0x29f   : > { %v2936_v32 = vsel %vm1166_vm13, %v2934_v55, %v2935_v12  ;;  %v2959_v39 = vadd.f32 %v2933_v29, %v2883_v58  ;;  %v2995_v7 = vmul.f32 %v7297_v46, %v7378_v42  ;;  %v2996_v62 = vmul.f32 %v7297_v46, %v7380_v47 }
 0x2a0   : > { %v2960_v59 = vadd.f32 %v2936_v32, %v2884_v25  ;;  %v3027_v22 = vrot.slane %v2993_v9, 1  ;;  %v3028_v36 = vrot.slane %v2994_v45, 1  ;;  %v3069_v14 = vmul.f32 %v7310_v6, %v7319_v53 }
 0x2a1   : > { %v2979_v23 = vadd.f32 %v2971_v16, %v2959_v39  ;;  %v3030_v52 = vrot.slane %v2995_v7, 1  ;;  %v3031_v5 = vrot.slane %v2996_v62, 1  ;;  %v3070_v27 = vmul.f32 %v7310_v6, %v7321_v49 }
 0x2a2   : > { %v2980_v48 = vadd.f32 %v2972_v43, %v2960_v59  ;;  %v3029_v50 = vsel %vm1089_vm12, %v3027_v22, %v3028_v36  ;;  %v3071_v28 = vmul.f32 %v7310_v6, %v7378_v42  ;;  %v3072_v34 = vmul.f32 %v7310_v6, %v7380_v47 }
 0x2a3   : > { %v3032_v33 = vsel %vm1089_vm12, %v3030_v52, %v3031_v5  ;;  %v3055_v10 = vadd.f32 %v3029_v50, %v2979_v23  ;;  %v3103_v54 = vrot.slane %v3069_v14, 2  ;;  %v3104_v53 = vrot.slane %v3070_v27, 2 }
 0x2a4   : > { %v3056_v1 = vadd.f32 %v3032_v33, %v2980_v48  ;;  %v3106_v3 = vrot.slane %v3071_v28, 2  ;;  %v3107_v15 = vrot.slane %v3072_v34, 2  ;;  %v3143_v49 = vmul.f32 %v7300_v61, %v7378_v42 }
 0x2a5   : > { %v3105_v18 = vsel %vm1166_vm13, %v3103_v54, %v3104_v53  ;;  %v3144_v58 = vmul.f32 %v7300_v61, %v7402_v63  ;;  %v3165_v20 = vmul.f32 %v7307_v40, %v7378_v42  ;;  %v3166_v55 = vmul.f32 %v7307_v40, %v7380_v47 }
 0x2a6   : > { %v3108_v37 = vsel %vm1166_vm13, %v3106_v3, %v3107_v15  ;;  %v3131_v12 = vadd.f32 %v3105_v18, %v3055_v10  ;;  %v3167_v16 = vmul.f32 %v7307_v40, %v7402_v63  ;;  %v3168_v43 = vmul.f32 %v7307_v40, %v7404_v24 }
 0x2a7   : > { %v3132_v25 = vadd.f32 %v3108_v37, %v3056_v1  ;;  %v3199_v29 = vrot.slane %v3165_v20, 1  ;;  %v3200_v9 = vrot.slane %v3166_v55, 1  ;;  %v3241_v45 = vmul.f32 %v7313_v30, %v7378_v42 }
 0x2a8   : > { %v3151_v32 = vadd.f32 %v3143_v49, %v3131_v12  ;;  %v3202_v39 = vrot.slane %v3167_v16, 1  ;;  %v3203_v7 = vrot.slane %v3168_v43, 1  ;;  %v3242_v62 = vmul.f32 %v7313_v30, %v7380_v47 }
 0x2a9   : > { %v3152_v59 = vadd.f32 %v3144_v58, %v3132_v25  ;;  %v3201_v22 = vsel %vm1089_vm12, %v3199_v29, %v3200_v9  ;;  %v3243_v36 = vmul.f32 %v7313_v30, %v7402_v63  ;;  %v3244_v14 = vmul.f32 %v7313_v30, %v7404_v24 }
 0x2aa   : > { %v3204_v23 = vsel %vm1089_vm12, %v3202_v39, %v3203_v7  ;;  %v3227_v52 = vadd.f32 %v3201_v22, %v3151_v32  ;;  %v3275_v5 = vrot.slane %v3241_v45, 2  ;;  %v3276_v27 = vrot.slane %v3242_v62, 2 }
 0x2ab   : > { %v3228_v48 = vadd.f32 %v3204_v23, %v3152_v59  ;;  %v3278_v50 = vrot.slane %v3243_v36, 2  ;;  %v3279_v28 = vrot.slane %v3244_v14, 2  ;;  %v2801_v34 = vmul.f32 %v7270_v60, %v7378_v42 }
 0x2ac   : > { %v3277_v33 = vsel %vm1166_vm13, %v3275_v5, %v3276_v27  ;;  %v2802_v10 = vmul.f32 %v7270_v60, %v7402_v63  ;;  %v2825_v54 = vmul.f32 %v7273_v35, %v7378_v42  ;;  %v2826_v53 = vmul.f32 %v7273_v35, %v7380_v47 }
 0x2ad   : > { %v3280_v1 = vsel %vm1166_vm13, %v3278_v50, %v3279_v28  ;;  %v3303_v3 = vadd.f32 %v3277_v33, %v3227_v52  ;;  %v2827_v15 = vmul.f32 %v7273_v35, %v7402_v63  ;;  %v2828_v49 = vmul.f32 %v7273_v35, %v7404_v24 }
 0x2ae   : > { %v3304_v18 = vadd.f32 %v3280_v1, %v3228_v48  ;;  %v2861_v58 = vrot.slane %v2825_v54, 1  ;;  %v2862_v20 = vrot.slane %v2826_v53, 1  ;;  %v2901_v55 = vmul.f32 %v7276_v44, %v7378_v42 }
 0x2af   : > { %v2864_v37 = vrot.slane %v2827_v15, 1  ;;  %v2865_v12 = vrot.slane %v2828_v49, 1  ;;  %v2902_v16 = vmul.f32 %v7276_v44, %v7380_v47  ;;  %v2903_v43 = vmul.f32 %v7276_v44, %v7402_v63 }
 0x2b0   : > { %v3310_v25 = vpack.c.bf16 %v3304_v18, %v3303_v3  ;;  %v2863_v29 = vsel %vm1089_vm12, %v2861_v58, %v2862_v20  ;;  %v2904_v9 = vmul.f32 %v7276_v44, %v7404_v24  ;;  %v2937_v45 = vrot.slane %v2901_v55, 2 }
 0x2b1   : > { %v2866_v32 = vsel %vm1089_vm12, %v2864_v37, %v2865_v12  ;;  %v2885_v39 = vadd.f32 %v2863_v29, %v2801_v34  ;;  %v2938_v7 = vrot.slane %v2902_v16, 2  ;;  %v2940_v42 = vrot.slane %v2903_v43, 2 }
 0x2b2   : > { %5131 = vmatmul.mubr.msk.bf16.vlgmr.msra.gmra.mxu1 %vm822_vm1, %v3310_v25  ;;  %v2886_v62 = vadd.f32 %v2866_v32, %v2802_v10  ;;  %v2941_v59 = vrot.slane %v2904_v9, 2  ;;  %v2973_v47 = vmul.f32 %v7287_v13, %v7402_v63  ;;  %v2974_v22 = vmul.f32 %v7287_v13, %v7418_v8 }
 0x2b3   : > { %v2939_v36 = vsel %vm1166_vm13, %v2937_v45, %v2938_v7  ;;  %v2997_v14 = vmul.f32 %v7297_v46, %v7402_v63  ;;  %v2998_v23 = vmul.f32 %v7297_v46, %v7404_v24  ;;  %v2999_v52 = vmul.f32 %v7297_v46, %v7418_v8 }
 0x2b4   : > { %v2942_v5 = vsel %vm1166_vm13, %v2940_v42, %v2941_v59  ;;  %v2961_v27 = vadd.f32 %v2939_v36, %v2885_v39  ;;  %v3000_v48 = vmul.f32 %v7297_v46, %v7420_v26  ;;  %v3073_v50 = vmul.f32 %v7310_v6, %v7402_v63 }
 0x2b5   : > { %v2962_v28 = vadd.f32 %v2942_v5, %v2886_v62  ;;  %v3033_v34 = vrot.slane %v2997_v14, 1  ;;  %v3034_v33 = vrot.slane %v2998_v23, 1  ;;  %v3036_v10 = vrot.slane %v2999_v52, 1 }
 0x2b6   : > { %v2981_v54 = vadd.f32 %v2973_v47, %v2961_v27  ;;  %v3037_v53 = vrot.slane %v3000_v48, 1  ;;  %v3074_v1 = vmul.f32 %v7310_v6, %v7404_v24  ;;  %v3075_v3 = vmul.f32 %v7310_v6, %v7418_v8 }
 0x2b7   : > { %v2982_v15 = vadd.f32 %v2974_v22, %v2962_v28  ;;  %v3035_v49 = vsel %vm1089_vm12, %v3033_v34, %v3034_v33  ;;  %v3076_v18 = vmul.f32 %v7310_v6, %v7420_v26  ;;  %v3109_v58 = vrot.slane %v3073_v50, 2 }
 0x2b8   : > { %v3038_v63 = vsel %vm1089_vm12, %v3036_v10, %v3037_v53  ;;  %v3057_v20 = vadd.f32 %v3035_v49, %v2981_v54  ;;  %v3110_v55 = vrot.slane %v3074_v1, 2  ;;  %v3112_v37 = vrot.slane %v3075_v3, 2 }
 0x2b9   : > { %v3058_v12 = vadd.f32 %v3038_v63, %v2982_v15  ;;  %v3113_v16 = vrot.slane %v3076_v18, 2  ;;  %v3145_v24 = vmul.f32 %v7300_v61, %v7418_v8  ;;  %v3146_v43 = vmul.f32 %v7300_v61, %v7397_v19 }
 0x2ba   : > { %v3111_v25 = vsel %vm1166_vm13, %v3109_v58, %v3110_v55  ;;  %v3169_v29 = vmul.f32 %v7307_v40, %v7418_v8  ;;  %v3170_v9 = vmul.f32 %v7307_v40, %v7420_v26  ;;  %v3171_v45 = vmul.f32 %v7307_v40, %v7397_v19 }
 0x2bb   : > { %v3114_v32 = vsel %vm1166_vm13, %v3112_v37, %v3113_v16  ;;  %v3133_v39 = vadd.f32 %v3111_v25, %v3057_v20  ;;  %v3172_v7 = vmul.f32 %v7307_v40, %v7399_v21  ;;  %v3245_v42 = vmul.f32 %v7313_v30, %v7418_v8 }
 0x2bc   : > { %v3134_v62 = vadd.f32 %v3114_v32, %v3058_v12  ;;  %v3205_v59 = vrot.slane %v3169_v29, 1  ;;  %v3206_v47 = vrot.slane %v3170_v9, 1  ;;  %v3208_v22 = vrot.slane %v3171_v45, 1 }
 0x2bd   : > { %v3153_v36 = vadd.f32 %v3145_v24, %v3133_v39  ;;  %v3209_v14 = vrot.slane %v3172_v7, 1  ;;  %v3246_v23 = vmul.f32 %v7313_v30, %v7420_v26  ;;  %v3247_v52 = vmul.f32 %v7313_v30, %v7397_v19 }
 0x2be   : > { %v3154_v5 = vadd.f32 %v3146_v43, %v3134_v62  ;;  %v3207_v27 = vsel %vm1089_vm12, %v3205_v59, %v3206_v47  ;;  %v3248_v48 = vmul.f32 %v7313_v30, %v7399_v21  ;;  %v3281_v50 = vrot.slane %v3245_v42, 2 }
 0x2bf   : > { %v3210_v28 = vsel %vm1089_vm12, %v3208_v22, %v3209_v14  ;;  %v3229_v34 = vadd.f32 %v3207_v27, %v3153_v36  ;;  %v3282_v33 = vrot.slane %v3246_v23, 2  ;;  %v3284_v10 = vrot.slane %v3247_v52, 2 }
 0x2c0   : > { %v3230_v54 = vadd.f32 %v3210_v28, %v3154_v5  ;;  %v3285_v53 = vrot.slane %v3248_v48, 2  ;;  %v2803_v1 = vmul.f32 %v7270_v60, %v7418_v8  ;;  %v2804_v3 = vmul.f32 %v7270_v60, %v7397_v19 }
 0x2c1   : > { %v3283_v15 = vsel %vm1166_vm13, %v3281_v50, %v3282_v33  ;;  %v2829_v49 = vmul.f32 %v7273_v35, %v7418_v8  ;;  %v2830_v18 = vmul.f32 %v7273_v35, %v7420_v26  ;;  %v2831_v58 = vmul.f32 %v7273_v35, %v7397_v19 }
 0x2c2   : > { %v3286_v63 = vsel %vm1166_vm13, %v3284_v10, %v3285_v53  ;;  %v3305_v20 = vadd.f32 %v3283_v15, %v3229_v34  ;;  %v2832_v55 = vmul.f32 %v7273_v35, %v7399_v21  ;;  %v2905_v60 = vmul.f32 %v7276_v44, %v7418_v8 }
 0x2c3   : > { %v3306_v37 = vadd.f32 %v3286_v63, %v3230_v54  ;;  %v2867_v12 = vrot.slane %v2829_v49, 1  ;;  %v2868_v16 = vrot.slane %v2830_v18, 1  ;;  %v2870_v24 = vrot.slane %v2831_v58, 1 }
 0x2c4   : > { %v2871_v43 = vrot.slane %v2832_v55, 1  ;;  %v2906_v25 = vmul.f32 %v7276_v44, %v7420_v26  ;;  %v2907_v29 = vmul.f32 %v7276_v44, %v7397_v19  ;;  %v2908_v9 = vmul.f32 %v7276_v44, %v7399_v21 }
 0x2c5   : > { %v3311_v45 = vpack.c.bf16 %v3306_v37, %v3305_v20  ;;  %v2869_v35 = vsel %vm1089_vm12, %v2867_v12, %v2868_v16  ;;  %v2943_v32 = vrot.slane %v2905_v60, 2  ;;  %v2975_v8 = vmul.f32 %v7287_v13, %v7397_v19 }
 0x2c6   : > { %v2872_v39 = vsel %vm1089_vm12, %v2870_v24, %v2871_v43  ;;  %v2887_v7 = vadd.f32 %v2869_v35, %v2803_v1  ;;  %v2944_v42 = vrot.slane %v2906_v25, 2  ;;  %v2946_v62 = vrot.slane %v2907_v29, 2 }
 0x2c7   : > { %5134 = vmatprep.mubr.msk.bf16.mxu1 %vm822_vm1, %v3311_v45  ;;  %v2888_v26 = vadd.f32 %v2872_v39, %v2804_v3  ;;  %v2947_v59 = vrot.slane %v2908_v9, 2  ;;  %v2976_v47 = vmul.f32 %v7287_v13, %v7422_v57  ;;  %v3001_v44 = vmul.f32 %v7297_v46, %v7397_v19 }
 0x2c8   : > { %v2945_v22 = vsel %vm1166_vm13, %v2943_v32, %v2944_v42  ;;  %v3002_v36 = vmul.f32 %v7297_v46, %v7399_v21  ;;  %v3003_v14 = vmul.f32 %v7297_v46, %v7422_v57  ;;  %v3004_v23 = vmul.f32 %v7297_v46, %v7432_v11  ;;  %v5084_v33 = vpop.f32.mrf.mxu1  ;;  %v7687_v42 = vld [vmem:[#allocation13] ss:$0 sm:$0xff] }
 0x2c9   : > { %v2948_v52 = vsel %vm1166_vm13, %v2946_v62, %v2947_v59  ;;  %v2963_v5 = vadd.f32 %v2945_v22, %v2887_v7  ;;  %v3039_v27 = vrot.slane %v3001_v44, 1  ;;  %v3077_v13 = vmul.f32 %v7310_v6, %v7397_v19 }
 0x2ca   : > { %v2964_v48 = vadd.f32 %v2948_v52, %v2888_v26  ;;  %v3040_v50 = vrot.slane %v3002_v36, 1  ;;  %v3042_v28 = vrot.slane %v3003_v14, 1  ;;  %v3043_v34 = vrot.slane %v3004_v23, 1  ;;  %v1617_v49 = vpop.f32.mrf.mxu1  ;;  %v1678_v23 = vld [vmem:[#allocation3] sm:$0xff] }
 0x2cb   : > { %v2983_v10 = vadd.f32 %v2975_v8, %v2963_v5  ;;  %v3078_v54 = vmul.f32 %v7310_v6, %v7399_v21  ;;  %v3079_v53 = vmul.f32 %v7310_v6, %v7422_v57  ;;  %v3080_v46 = vmul.f32 %v7310_v6, %v7432_v11 }
 0x2cc   : > { %v2984_v1 = vadd.f32 %v2976_v47, %v2964_v48  ;;  %v3041_v3 = vsel %vm1089_vm12, %v3039_v27, %v3040_v50  ;;  %v3044_v19 = vsel %vm1089_vm12, %v3042_v28, %v3043_v34  ;;  %v3115_v15 = vrot.slane %v3077_v13, 2  ;;  %v5085_v37 = vpop.f32.mrf.mxu1  ;;  %v1681_v13 = vld [vmem:[#allocation3 + $0x18] sm:$0xff]  ;;  %v1679_v48 = vld [vmem:[#allocation3 + $0x8] sm:$0xff] }
 0x2cd   : > { %v3059_v18 = vadd.f32 %v3041_v3, %v2983_v10  ;;  %v3116_v58 = vrot.slane %v3078_v54, 2  ;;  %v3118_v63 = vrot.slane %v3079_v53, 2  ;;  %v3119_v20 = vrot.slane %v3080_v46, 2 }
 0x2ce   : > { %v3060_v55 = vadd.f32 %v3044_v19, %v2984_v1  ;;  %v3147_v21 = vmul.f32 %v7300_v61, %v7422_v57  ;;  %v3173_v60 = vmul.f32 %v7307_v40, %v7422_v57  ;;  %v3174_v6 = vmul.f32 %v7307_v40, %v7432_v11  ;;  %v7674_v61 = vld [vmem:[#allocation11] ss:$0 sm:$0xff]  ;;  %v1620_v62 = vpop.f32.mrf.mxu1 }
 0x2cf   : > { %v3117_v12 = vsel %vm1166_vm13, %v3115_v15, %v3116_v58  ;;  %v3120_v16 = vsel %vm1166_vm13, %v3118_v63, %v3119_v20  ;;  %v3214_v24 = vrot.slane %v7330_v17, 1  ;;  %v3215_v43 = vrot.slane %v7334_v51, 1 }
 0x2d0   : > { %v3135_v25 = vadd.f32 %v3117_v12, %v3059_v18  ;;  %v3136_v29 = vadd.f32 %v3120_v16, %v3060_v55  ;;  %v3211_v9 = vrot.slane %v3173_v60, 1  ;;  %v3212_v45 = vrot.slane %v3174_v6, 1 }
 0x2d1   : > { %v3216_v35 = vsel %vm1089_vm12, %v3214_v24, %v3215_v43  ;;  %v3249_v40 = vmul.f32 %v7313_v30, %v7422_v57  ;;  %v3250_v32 = vmul.f32 %v7313_v30, %v7432_v11  ;;  %v3251_v8 = vmul.f32 %v7313_v30, %v7302_v38  ;;  %v1680_v38 = vld [vmem:[#allocation3 + $0x10] sm:$0xff] }
 0x2d2   : > { %v3155_v17 = vadd.f32 %v3147_v21, %v3135_v25  ;;  %v3156_v51 = vadd.f32 %v7326_v41, %v3136_v29  ;;  %v3213_v39 = vsel %vm1089_vm12, %v3211_v9, %v3212_v45  ;;  %v3252_v7 = vmul.f32 %v7313_v30, %v7304_v2  ;;  %v1684_v45 = vld [vmem:[#allocation3 + $0x30] sm:$0xff] }
 0x2d3   : > { %v3287_v26 = vrot.slane %v3249_v40, 2  ;;  %v3288_v59 = vrot.slane %v3250_v32, 2  ;;  %v3290_v57 = vrot.slane %v3251_v8, 2  ;;  %v1657_v47 = vmul.f32 %v5084_v33, %v7674_v61  ;;  %v1682_v8 = vld [vmem:[#allocation3 + $0x20] sm:$0xff] }
 0x2d4   : > { %v3231_v11 = vadd.f32 %v3213_v39, %v3155_v17  ;;  %v3232_v44 = vadd.f32 %v3216_v35, %v3156_v51  ;;  %v3291_v22 = vrot.slane %v3252_v7, 2  ;;  %v1655_v36 = vmul.f32 %v7674_v61, %v1617_v49 }
 0x2d5   : > { %v3289_v41 = vsel %vm1166_vm13, %v3287_v26, %v3288_v59  ;;  %v1672_v14 = vadd.f32 %v7687_v42, %v1657_v47  ;;  %v1658_v2 = vmul.f32 %v5085_v37, %v7674_v61  ;;  %v1656_v30 = vmul.f32 %v7674_v61, %v1620_v62  ;;  %v1685_v62 = vld [vmem:[#allocation3 + $0x38] sm:$0xff] }
 0x2d6   : > { %v3292_v52 = vsel %vm1166_vm13, %v3290_v57, %v3291_v22  ;;  %v3307_v5 = vadd.f32 %v3289_v41, %v3231_v11  ;;  %v1670_v27 = vadd.f32 %v7687_v42, %v1655_v36  ;;  %v8424_v55 = vmov 0.0  }
 0x2d7   : > { %v3308_v50 = vadd.f32 %v3292_v52, %v3232_v44  ;;  %v1688_v28 = vsub.f32 %v1672_v14, %v1680_v38  ;;  %v1673_v34 = vadd.f32 %v7687_v42, %v1658_v2  ;;  %v1671_v33 = vadd.f32 %v7687_v42, %v1656_v30  ;;  %v1683_v44 = vld [vmem:[#allocation3 + $0x28] sm:$0xff] }
 0x2d8   : > { %v1686_v10 = vsub.f32 %v1670_v27, %v1678_v23 }
 0x2d9   : > { %v3312_v54 = vpack.c.bf16 %v3308_v50, %v3307_v5  ;;  %v1696_v53 = vmul.f32 0.5, %v1688_v28  ;;  %v1689_v46 = vsub.f32 %v1673_v34, %v1681_v13  ;;  %v1687_v1 = vsub.f32 %v1671_v33, %v1679_v48 }
 0x2da   : > { %v1694_v3 = vmul.f32 0.5, %v1686_v10 }
 0x2db   : > { %5135 = vmatmul.mubr.msk.bf16.gmra.mxu1 %vm822_vm1, %v3312_v54  ;;  %v1704_v19 = vadd.f32 %v1696_v53, %v1680_v38  ;;  %v1697_v15 = vmul.f32 0.5, %v1689_v46  ;;  %v1695_v49 = vmul.f32 0.5, %v1687_v1  ;;  %v7743_v54 = vld [vmem:[#allocation11 + $0x1] ss:$0 sm:$0xff]  ;;  %v7745_v46 = vld [vmem:[#allocation13 + $0x1] ss:$0 sm:$0xff] }
 0x2dc   : > { %v1702_v18 = vadd.f32 %v1694_v3, %v1678_v23  ;;  %v2553_v3 = vld [vmem:[#allocation3 + $0x50] sm:$0xff] }
 0x2dd   : > { %vm1712_vm14 = vcmp.ge.f32.partialorder %v1704_v19, 1.0  ;;  %v1705_v58 = vadd.f32 %v1697_v15, %v1681_v13  ;;  %v1703_v63 = vadd.f32 %v1695_v49, %v1679_v48 }
 0x2de   : > { %v1720_v20 = vsel %vm1712_vm14, 0.0, %v1704_v19  ;;  %v7701_v21 = vsel %vm1712_vm14, 1.0, %v8424_v55  ;;  %vm1710_vm15 = vcmp.ge.f32.partialorder %v1702_v18, 1.0 }
 0x2df   : > { %1728 = vst.msk [vmem:[#allocation3 + $0x10] sm:$0xff] %vm822_vm1, %v1720_v20  ;;  %v1718_v60 = vsel %vm1710_vm15, 0.0, %v1702_v18  ;;  %vm1713_vm0 = vcmp.ge.f32.partialorder %v1705_v58, 1.0  ;;  %vm1711_vm2 = vcmp.ge.f32.partialorder %v1703_v63, 1.0  ;;  %v4951_v6 = vsel %vm1710_vm15, 1.0, %v8424_v55  ;;  %v2551_v18 = vld [vmem:[#allocation3 + $0x40] sm:$0xff] }
 0x2e0   : > { %1726 = vst.msk [vmem:[#allocation3] sm:$0xff] %vm822_vm1, %v1718_v60  ;;  %v1721_v37 = vsel %vm1713_vm0, 0.0, %v1705_v58  ;;  %v7707_v12 = vsel %vm1713_vm0, 1.0, %v8424_v55  ;;  %v1719_v16 = vsel %vm1711_vm2, 0.0, %v1703_v63  ;;  %v4952_v24 = vsel %vm1711_vm2, 1.0, %v8424_v55 }
 0x2e1   : > { %1729 = vst.msk [vmem:[#allocation3 + $0x18] sm:$0xff] %vm822_vm1, %v1721_v37  ;;  %v3513_v43 = vpack.c.bf16 %v7707_v12, %v7701_v21  ;;  %1727 = vst.msk [vmem:[#allocation3 + $0x8] sm:$0xff] %vm822_vm1, %v1719_v16  ;;  %v3512_v25 = vpack.c.bf16 %v4952_v24, %v4951_v6  ;;  %v2554_v6 = vld [vmem:[#allocation3 + $0x58] sm:$0xff]  ;;  %v3713_v12 = vld [vmem:[#allocation4] sm:$0xff] }
 0x2e3   : > { %5154 = vmatprep.mubr.msk.bf16.mxu1 %vm822_vm1, %v3512_v25 }
 0x2f0   : > { %v5088_v29 = vpop.f32.mrf.mxu1 }
 0x2f1   : > { %v1661_v9 = vmul.f32 %v5088_v29, %v7674_v61 }
 0x2f2   : > { %v1633_v35 = vpop.f32.mrf.mxu1 }
 0x2f3   : > { %v1676_v40 = vadd.f32 %v7687_v42, %v1661_v9  ;;  %v1659_v32 = vmul.f32 %v7674_v61, %v1633_v35  ;;  %v2552_v9 = vld [vmem:[#allocation3 + $0x48] sm:$0xff] }
 0x2f4   : > { %v5089_v17 = vpop.f32.mrf.mxu1 }
 0x2f5   : > { %v1692_v51 = vsub.f32 %v1676_v40, %v1684_v45  ;;  %v1674_v39 = vadd.f32 %v7687_v42, %v1659_v32  ;;  %v1662_v7 = vmul.f32 %v5089_v17, %v7674_v61 }
 0x2f6   : > { %v1636_v26 = vpop.f32.mrf.mxu1 }
 0x2f7   : > { %v1700_v59 = vmul.f32 0.5, %v1692_v51  ;;  %v1690_v57 = vsub.f32 %v1674_v39, %v1682_v8  ;;  %v1677_v47 = vadd.f32 %v7687_v42, %v1662_v7  ;;  %v1660_v11 = vmul.f32 %v7674_v61, %v1636_v26 }
 0x2f9   : > { %v1708_v22 = vadd.f32 %v1700_v59, %v1684_v45  ;;  %v1698_v38 = vmul.f32 0.5, %v1690_v57  ;;  %v1693_v36 = vsub.f32 %v1677_v47, %v1685_v62  ;;  %v1675_v41 = vadd.f32 %v7687_v42, %v1660_v11 }
 0x2fb   : > { %vm1716_vm3 = vcmp.ge.f32.partialorder %v1708_v22, 1.0  ;;  %v1706_v14 = vadd.f32 %v1698_v38, %v1682_v8  ;;  %v1701_v23 = vmul.f32 0.5, %v1693_v36  ;;  %v1691_v2 = vsub.f32 %v1675_v41, %v1683_v44 }
 0x2fc   : > { %v1724_v30 = vsel %vm1716_vm3, 0.0, %v1708_v22  ;;  %v7726_v48 = vsel %vm1716_vm3, 1.0, %v8424_v55 }
 0x2fd   : > { %1732 = vst.msk [vmem:[#allocation3 + $0x30] sm:$0xff] %vm822_vm1, %v1724_v30  ;;  %vm1714_vm4 = vcmp.ge.f32.partialorder %v1706_v14, 1.0  ;;  %v1709_v52 = vadd.f32 %v1701_v23, %v1685_v62  ;;  %v1699_v5 = vmul.f32 0.5, %v1691_v2 }
 0x2fe   : > { %v1722_v27 = vsel %vm1714_vm4, 0.0, %v1706_v14  ;;  %v7735_v34 = vsel %vm1714_vm4, 1.0, %v8424_v55  ;;  %v2557_v14 = vld [vmem:[#allocation3 + $0x70] sm:$0xff] }
 0x2ff   : > { %1730 = vst.msk [vmem:[#allocation3 + $0x20] sm:$0xff] %vm822_vm1, %v1722_v27  ;;  %vm1717_vm5 = vcmp.ge.f32.partialorder %v1709_v52, 1.0  ;;  %v1707_v61 = vadd.f32 %v1699_v5, %v1683_v44 }
 0x300   : > { %v1725_v13 = vsel %vm1717_vm5, 0.0, %v1709_v52  ;;  %v7729_v42 = vsel %vm1717_vm5, 1.0, %v8424_v55  ;;  %v2555_v52 = vld [vmem:[#allocation3 + $0x60] sm:$0xff] }
 0x301   : > { %1733 = vst.msk [vmem:[#allocation3 + $0x38] sm:$0xff] %vm822_vm1, %v1725_v13  ;;  %vm1715_vm6 = vcmp.ge.f32.partialorder %v1707_v61, 1.0  ;;  %v3515_v50 = vpack.c.bf16 %v7729_v42, %v7726_v48 }
 0x302   : > { %v1723_v28 = vsel %vm1715_vm6, 0.0, %v1707_v61  ;;  %v7738_v33 = vsel %vm1715_vm6, 1.0, %v8424_v55 }
 0x303   : > { %1731 = vst.msk [vmem:[#allocation3 + $0x28] sm:$0xff] %vm822_vm1, %v1723_v28  ;;  %v3514_v10 = vpack.c.bf16 %v7738_v33, %v7735_v34  ;;  %v2558_v28 = vld [vmem:[#allocation3 + $0x78] sm:$0xff] }
 0x315   : > { %v5108_v53 = vpop.f32.mrf.mxu1 }
 0x316   : > { %v2528_v1 = vmul.f32 %v5108_v53, %v7743_v54 }
 0x317   : > { %v2487_v19 = vpop.f32.mrf.mxu1 }
 0x318   : > { %v2544_v15 = vadd.f32 %v7745_v46, %v2528_v1  ;;  %v2526_v49 = vmul.f32 %v7743_v54, %v2487_v19 }
 0x319   : > { %v5109_v58 = vpop.f32.mrf.mxu1 }
 0x31a   : > { %v2561_v63 = vsub.f32 %v2544_v15, %v2553_v3  ;;  %v2542_v20 = vadd.f32 %v7745_v46, %v2526_v49  ;;  %v2529_v60 = vmul.f32 %v5109_v58, %v7743_v54  ;;  %v2556_v49 = vld [vmem:[#allocation3 + $0x68] sm:$0xff] }
 0x31b   : > { %v2490_v37 = vpop.f32.mrf.mxu1 }
 0x31c   : > { %v2569_v16 = vmul.f32 0.5, %v2561_v63  ;;  %v2559_v24 = vsub.f32 %v2542_v20, %v2551_v18  ;;  %v2545_v25 = vadd.f32 %v7745_v46, %v2529_v60  ;;  %v2527_v29 = vmul.f32 %v7743_v54, %v2490_v37 }
 0x31e   : > { %v2562_v45 = vsub.f32 %v2545_v25, %v2554_v6  ;;  %v2543_v35 = vadd.f32 %v7745_v46, %v2527_v29  ;;  %v2567_v40 = vmul.f32 0.5, %v2559_v24  ;;  %v2577_v32 = vadd.f32 %v2569_v16, %v2553_v3 }
 0x320   : > { %v2570_v8 = vmul.f32 0.5, %v2562_v45  ;;  %v2560_v17 = vsub.f32 %v2543_v35, %v2552_v9  ;;  %v2575_v51 = vadd.f32 %v2567_v40, %v2551_v18  ;;  %vm2585_vm7 = vcmp.ge.f32.partialorder %v2577_v32, 1.0 }
 0x321   : > { %v2593_v39 = vsel %vm2585_vm7, 0.0, %v2577_v32  ;;  %v4919_v22 = vsel %vm2585_vm7, 1.0, %v8424_v55 }
 0x322   : > { %v2568_v7 = vmul.f32 0.5, %v2560_v17  ;;  %vm2583_vm8 = vcmp.ge.f32.partialorder %v2575_v51, 1.0  ;;  %2601 = vst.msk [vmem:[#allocation3 + $0x50] sm:$0xff] %vm822_vm1, %v2593_v39  ;;  %v2578_v62 = vadd.f32 %v2570_v8, %v2554_v6  ;;  %v4949_v17 = vld [vmem:[#allocation11 + $0x2] ss:$0 sm:$0xff] }
 0x323   : > { %v4917_v26 = vsel %vm2583_vm8, 1.0, %v8424_v55  ;;  %v2591_v59 = vsel %vm2583_vm8, 0.0, %v2575_v51  ;;  %v4950_v39 = vld [vmem:[#allocation13 + $0x2] ss:$0 sm:$0xff] }
 0x324   : > { %3516 = vxpose.xlu0.b32.start [1/8] (short) (narrow) %v4917_v26, 32  ;;  %2599 = vst.msk [vmem:[#allocation3 + $0x40] sm:$0xff] %vm822_vm1, %v2591_v59  ;;  %v2576_v57 = vadd.f32 %v2568_v7, %v2552_v9  ;;  %vm2586_vm9 = vcmp.ge.f32.partialorder %v2578_v62, 1.0  ;;  %v3442_v7 = vld [vmem:[#allocation3 + $0x90] sm:$0xff] }
 0x325   : > { %v2594_v47 = vsel %vm2586_vm9, 0.0, %v2578_v62  ;;  %v4920_v38 = vsel %vm2586_vm9, 1.0, %v8424_v55 }
 0x326   : > { %vm2584_vm10 = vcmp.ge.f32.partialorder %v2576_v57, 1.0  ;;  %2602 = vst.msk [vmem:[#allocation3 + $0x58] sm:$0xff] %vm822_vm1, %v2594_v47 }
 0x327   : > { %v4918_v11 = vsel %vm2584_vm10, 1.0, %v8424_v55  ;;  %v2592_v44 = vsel %vm2584_vm10, 0.0, %v2576_v57  ;;  %v3440_v57 = vld [vmem:[#allocation3 + $0x80] sm:$0xff] }
 0x328   : > { %3517 = vxpose.xlu0.b32.cont [2/8] (short) (narrow) %v4918_v11, 32  ;;  %2600 = vst.msk [vmem:[#allocation3 + $0x48] sm:$0xff] %vm822_vm1, %v2592_v44 }
 0x32c   : > { %3518 = vxpose.xlu0.b32.cont [3/8] (short) (narrow) %v4919_v22, 32 }
 0x330   : > { %3519 = vxpose.xlu0.b32.cont [4/8] (short) (narrow) %v4920_v38, 32  ;;  %v3443_v38 = vld [vmem:[#allocation3 + $0x98] sm:$0xff] }
 0x33e   : > { %v5112_v36 = vpop.f32.mrf.mxu1 }
 0x33f   : > { %v2532_v41 = vmul.f32 %v5112_v36, %v7743_v54 }
 0x340   : > { %v2503_v23 = vpop.f32.mrf.mxu1 }
 0x341   : > { %v2548_v2 = vadd.f32 %v7745_v46, %v2532_v41  ;;  %v2530_v30 = vmul.f32 %v7743_v54, %v2503_v23 }
 0x342   : > { %v5113_v5 = vpop.f32.mrf.mxu1 }
 0x343   : > { %v2565_v27 = vsub.f32 %v2548_v2, %v2557_v14  ;;  %v2546_v61 = vadd.f32 %v7745_v46, %v2530_v30  ;;  %v2533_v13 = vmul.f32 %v5113_v5, %v7743_v54  ;;  %v3441_v30 = vld [vmem:[#allocation3 + $0x88] sm:$0xff] }
 0x344   : > { %v2506_v53 = vpop.f32.mrf.mxu1 }
 0x345   : > { %v2573_v1 = vmul.f32 0.5, %v2565_v27  ;;  %v2563_v3 = vsub.f32 %v2546_v61, %v2555_v52  ;;  %v2549_v19 = vadd.f32 %v7745_v46, %v2533_v13  ;;  %v2531_v15 = vmul.f32 %v7743_v54, %v2506_v53 }
 0x347   : > { %v2571_v18 = vmul.f32 0.5, %v2563_v3  ;;  %v2566_v58 = vsub.f32 %v2549_v19, %v2558_v28  ;;  %v2547_v63 = vadd.f32 %v7745_v46, %v2531_v15  ;;  %v2581_v20 = vadd.f32 %v2573_v1, %v2557_v14 }
 0x349   : > { %v2574_v60 = vmul.f32 0.5, %v2566_v58  ;;  %v2564_v6 = vsub.f32 %v2547_v63, %v2556_v49  ;;  %v2579_v37 = vadd.f32 %v2571_v18, %v2555_v52  ;;  %vm2589_vm11 = vcmp.ge.f32.partialorder %v2581_v20, 1.0 }
 0x34a   : > { %v2597_v16 = vsel %vm2589_vm11, 0.0, %v2581_v20  ;;  %v4923_v40 = vsel %vm2589_vm11, 1.0, %v8424_v55 }
 0x34b   : > { %v2572_v24 = vmul.f32 0.5, %v2564_v6  ;;  %vm2587_vm14 = vcmp.ge.f32.partialorder %v2579_v37, 1.0  ;;  %2605 = vst.msk [vmem:[#allocation3 + $0x70] sm:$0xff] %vm822_vm1, %v2597_v16  ;;  %v2582_v25 = vadd.f32 %v2574_v60, %v2558_v28  ;;  %v3446_v60 = vld [vmem:[#allocation3 + $0xb0] sm:$0xff] }
 0x34c   : > { %v4921_v29 = vsel %vm2587_vm14, 1.0, %v8424_v55  ;;  %v2595_v54 = vsel %vm2587_vm14, 0.0, %v2579_v37 }
 0x34d   : > { %3520 = vxpose.xlu0.b32.cont [5/8] (short) (narrow) %v4921_v29, 32  ;;  %2603 = vst.msk [vmem:[#allocation3 + $0x60] sm:$0xff] %vm822_vm1, %v2595_v54  ;;  %v2580_v9 = vadd.f32 %v2572_v24, %v2556_v49  ;;  %vm2590_vm15 = vcmp.ge.f32.partialorder %v2582_v25, 1.0  ;;  %v3444_v24 = vld [vmem:[#allocation3 + $0xa0] sm:$0xff] }
 0x34e   : > { %v2598_v46 = vsel %vm2590_vm15, 0.0, %v2582_v25  ;;  %v4924_v32 = vsel %vm2590_vm15, 1.0, %v8424_v55 }
 0x34f   : > { %vm2588_vm0 = vcmp.ge.f32.partialorder %v2580_v9, 1.0  ;;  %2606 = vst.msk [vmem:[#allocation3 + $0x78] sm:$0xff] %vm822_vm1, %v2598_v46  ;;  %v3447_v46 = vld [vmem:[#allocation3 + $0xb8] sm:$0xff] }
 0x350   : > { %v4922_v45 = vsel %vm2588_vm0, 1.0, %v8424_v55  ;;  %v2596_v35 = vsel %vm2588_vm0, 0.0, %v2580_v9  ;;  %vm3570_vm0 = vcmask 523264  }
 0x351   : > { %3521 = vxpose.xlu0.b32.cont [6/8] (short) (narrow) %v4922_v45, 32  ;;  %2604 = vst.msk [vmem:[#allocation3 + $0x68] sm:$0xff] %vm822_vm1, %v2596_v35 }
 0x355   : > { %3522 = vxpose.xlu0.b32.cont [7/8] (short) (narrow) %v4923_v40, 32 }
 0x359   : > { %3523 = vxpose.xlu0.b32.end [8/8] (short) (narrow) %v4924_v32, 32 }
 0x372   : > { %v5132_v8 = vpop.f32.mrf.mxu1 }
 0x373   : > { %v3417_v51 = vmul.f32 %v5132_v8, %v4949_v17 }
 0x374   : > { %v3376_v62 = vpop.f32.mrf.mxu1 }
 0x375   : > { %v3433_v26 = vadd.f32 %v4950_v39, %v3417_v51  ;;  %v3415_v59 = vmul.f32 %v4949_v17, %v3376_v62  ;;  %v3445_v51 = vld [vmem:[#allocation3 + $0xa8] sm:$0xff] }
 0x376   : > { %v5133_v47 = vpop.f32.mrf.mxu1 }
 0x377   : > { %v3450_v11 = vsub.f32 %v3433_v26, %v3442_v7  ;;  %v3431_v44 = vadd.f32 %v4950_v39, %v3415_v59  ;;  %v3418_v22 = vmul.f32 %v5133_v47, %v4949_v17 }
 0x378   : > { %v3379_v36 = vpop.f32.mrf.mxu1 }
 0x379   : > { %v3458_v41 = vmul.f32 0.5, %v3450_v11  ;;  %v3448_v14 = vsub.f32 %v3431_v44, %v3440_v57  ;;  %v3434_v23 = vadd.f32 %v4950_v39, %v3418_v22  ;;  %v3416_v2 = vmul.f32 %v4949_v17, %v3379_v36 }
 0x37b   : > { %v3456_v52 = vmul.f32 0.5, %v3448_v14  ;;  %v3451_v5 = vsub.f32 %v3434_v23, %v3443_v38  ;;  %v3432_v27 = vadd.f32 %v4950_v39, %v3416_v2  ;;  %v7783_v61 = vadd.f32 %v3458_v41, %v3442_v7 }
 0x37d   : > { %v3459_v13 = vmul.f32 0.5, %v3451_v5  ;;  %v3449_v28 = vsub.f32 %v3432_v27, %v3441_v30  ;;  %vm3474_vm2 = vcmp.ge.f32.partialorder %v7783_v61, 1.0  ;;  %v7786_v53 = vadd.f32 %v3456_v52, %v3440_v57 }
 0x37e   : > { %v3482_v1 = vsel %vm3474_vm2, 0.0, %v7783_v61 }
 0x37f   : > { %v3457_v3 = vmul.f32 0.5, %v3449_v28  ;;  %v3467_v19 = vadd.f32 %v3459_v13, %v3443_v38  ;;  %3490 = vst.msk [vmem:[#allocation3 + $0x90] sm:$0xff] %vm822_vm1, %v3482_v1  ;;  %vm3472_vm3 = vcmp.ge.f32.partialorder %v7786_v53, 1.0  ;;  %v3628_v13 = vld [vmem:[%s8425_s13 + $0x10] sm:$0xff]  ;;  %v3626_v1 = vld [vmem:[%s8425_s13] sm:$0xff] }
 0x380   : > { %v3480_v15 = vsel %vm3472_vm3, 0.0, %v7786_v53  ;;  %v3629_v53 = vld [vmem:[%s8425_s13 + $0x18] sm:$0xff] }
 0x381   : > { %vm3475_vm4 = vcmp.ge.f32.partialorder %v3467_v19, 1.0  ;;  %v3465_v49 = vadd.f32 %v3457_v3, %v3441_v30  ;;  %3488 = vst.msk [vmem:[#allocation3 + $0x80] sm:$0xff] %vm822_vm1, %v3480_v15 }
 0x382   : > { %v3483_v18 = vsel %vm3475_vm4, 0.0, %v3467_v19  ;;  %vm4971_vm14 = vmpackc.low %vm3475_vm4, %vm3474_vm2  ;;  %v3627_v19 = vld [vmem:[%s8425_s13 + $0x8] sm:$0xff] }
 0x383   : > { %3491 = vst.msk [vmem:[#allocation3 + $0x98] sm:$0xff] %vm822_vm1, %v3483_v18  ;;  %vm3473_vm5 = vcmp.ge.f32.partialorder %v3465_v49, 1.0 }
 0x384   : > { %v3481_v58 = vsel %vm3473_vm5, 0.0, %v3465_v49  ;;  %vm4973_vm15 = vmpackc.low %vm3473_vm5, %vm3472_vm3 }
 0x385   : > { %3489 = vst.msk [vmem:[#allocation3 + $0x88] sm:$0xff] %vm822_vm1, %v3481_v58 }
 0x39b   : > { %v5136_v63 = vpop.f32.mrf.mxu1 }
 0x39c   : > { %v3421_v20 = vmul.f32 %v5136_v63, %v4949_v17 }
 0x39d   : > { %v3392_v6 = vpop.f32.mrf.mxu1 }
 0x39e   : > { %v3437_v37 = vadd.f32 %v4950_v39, %v3421_v20  ;;  %v3419_v16 = vmul.f32 %v4949_v17, %v3392_v6  ;;  %v5389_v6 = vld [vmem:[#allocation14 + $0x8] sm:$0xff]  }
 0x39f   : > { %v5137_v25 = vpop.f32.mrf.mxu1 }
 0x3a0   : > { %v3454_v29 = vsub.f32 %v3437_v37, %v3446_v60  ;;  %v3435_v54 = vadd.f32 %v4950_v39, %v3419_v16  ;;  %v3422_v9 = vmul.f32 %v5137_v25, %v4949_v17  ;;  %v5390_v37 = vld [vmem:[#allocation14] sm:$0xff]   ;;  %v3716_v25 = vld [vmem:[#allocation4 + $0x18] sm:$0xff] }
 0x3a1   : > { %v3395_v45 = vpop.f32.mrf.mxu1  ;;  %v3715_v16 = vld [vmem:[#allocation4 + $0x10] sm:$0xff] }
 0x3a2   : > { %v3462_v35 = vmul.f32 0.5, %v3454_v29  ;;  %v3452_v40 = vsub.f32 %v3435_v54, %v3444_v24  ;;  %v3438_v32 = vadd.f32 %v4950_v39, %v3422_v9  ;;  %v3420_v8 = vmul.f32 %v4949_v17, %v3395_v45  ;;  %v3714_v29 = vld [vmem:[#allocation4 + $0x8] sm:$0xff]  ;;  %v3719_v9 = vld [vmem:[#allocation4 + $0x30] sm:$0xff] }
 0x3a4   : > { %v3460_v7 = vmul.f32 0.5, %v3452_v40  ;;  %v3455_v62 = vsub.f32 %v3438_v32, %v3447_v46  ;;  %v3436_v26 = vadd.f32 %v4950_v39, %v3420_v8  ;;  %v3470_v59 = vadd.f32 %v3462_v35, %v3446_v60  ;;  %v3717_v8 = vld [vmem:[#allocation4 + $0x20] sm:$0xff] }
 0x3a5   : > { %v5827_v39 = vmov 1.0|1.0  }
 0x3a6   : > { %v3463_v57 = vmul.f32 0.5, %v3455_v62  ;;  %v3453_v47 = vsub.f32 %v3436_v26, %v3445_v51  ;;  %vm3478_vm6 = vcmp.ge.f32.partialorder %v3470_v59, 1.0  ;;  %v3468_v11 = vadd.f32 %v3460_v7, %v3444_v24 }
 0x3a7   : > { %v3486_v44 = vsel %vm3478_vm6, 0.0, %v3470_v59 }
 0x3a8   : > { %v3461_v22 = vmul.f32 0.5, %v3453_v47  ;;  %v3471_v38 = vadd.f32 %v3463_v57, %v3447_v46  ;;  %3494 = vst.msk [vmem:[#allocation3 + $0xb0] sm:$0xff] %vm822_vm1, %v3486_v44  ;;  %vm3476_vm7 = vcmp.ge.f32.partialorder %v3468_v11, 1.0  ;;  %v3720_v44 = vld [vmem:[#allocation4 + $0x38] sm:$0xff] }
 0x3a9   : > { %v3484_v36 = vsel %vm3476_vm7, 0.0, %v3468_v11 }
 0x3aa   : > { %vm3479_vm8 = vcmp.ge.f32.partialorder %v3471_v38, 1.0  ;;  %v3469_v41 = vadd.f32 %v3461_v22, %v3445_v51  ;;  %3492 = vst.msk [vmem:[#allocation3 + $0xa0] sm:$0xff] %vm822_vm1, %v3484_v36 }
 0x3ab   : > { %v3487_v17 = vsel %vm3479_vm8, 0.0, %v3471_v38  ;;  %vm4967_vm9 = vmpackc.low %vm3479_vm8, %vm3478_vm6 }
 0x3ac   : > { %3495 = vst.msk [vmem:[#allocation3 + $0xb8] sm:$0xff] %vm822_vm1, %v3487_v17  ;;  %5138 = vmatprep.subr.msk.bf16.mxu0 %vm4967_vm9, %v5827_v39  ;;  %vm3477_vm10 = vcmp.ge.f32.partialorder %v3469_v41, 1.0 }
 0x3ad   : > { %5139 = vmatpush3.bf16.msk.msra.mxu0 %vm4967_vm9, %v5827_v39  ;;  %v3485_v14 = vsel %vm3477_vm10, 0.0, %v3469_v41  ;;  %vm4969_vm11 = vmpackc.low %vm3477_vm10, %vm3476_vm7  ;;  %v3718_v41 = vld [vmem:[#allocation4 + $0x28] sm:$0xff] }
 0x3ae   : > { %3493 = vst.msk [vmem:[#allocation3 + $0xa8] sm:$0xff] %vm822_vm1, %v3485_v14  ;;  %5140 = vmatprep.subr.msk.bf16.mxu0 %vm4969_vm11, %v5827_v39 }
 0x3b1   : > { %5141 = vmatpush3.bf16.msk.msra.mxu0 %vm4969_vm11, %v5827_v39 }
 0x3b2   : > { %5142 = vmatprep.subr.msk.bf16.mxu0 %vm4971_vm14, %v5827_v39 }
 0x3b5   : > { %5143 = vmatpush3.bf16.msk.msra.mxu0 %vm4971_vm14, %v5827_v39 }
 0x3b6   : > { %5144 = vmatprep.subr.msk.bf16.mxu0 %vm4973_vm15, %v5827_v39 }
 0x3b9   : > { %5145 = vmatpush3.bf16.msk.msra.mxu0 %vm4973_vm15, %v5827_v39  ;;  %v3532_v23 = vpop.trf.xlu0 }
 0x3ba   : > { %5162 = vmatprep.subr.bf16.mxu0 %v5389_v6 }
 0x3bd   : > { %v3533_v2 = vpop.trf.xlu0 }
 0x3be   : > { %v3548_v30 = vpack.c.bf16 %v3533_v2, %v3532_v23 }
 0x3c0   : > { %5146 = vmatprep.mubr.msk.bf16.mxu0 %vm3570_vm0, %v3548_v30 }
 0x3c1   : > { %v3534_v52 = vpop.trf.xlu0 }
 0x3c5   : > { %v3535_v5 = vpop.trf.xlu0 }
 0x3c6   : > { %v3549_v27 = vpack.c.bf16 %v3535_v5, %v3534_v52 }
 0x3c8   : > { %5147 = vmatmul.mubr.msk.bf16.vlgmr.msra.gmra.mxu0 %vm3570_vm0, %v3549_v27 }
 0x3c9   : > { %5163 = vmatpush3.bf16.msra.mxu0 %v5389_v6 }
 0x3ca   : > { %5164 = vmatprep.subr.bf16.mxu0 %v5390_v37 }
 0x3cd   : > { %5165 = vmatpush3.bf16.msra.mxu0 %v5390_v37 }
 0x488   : > { %v5148_v61 = vpop.f32.mrf.mxu0 }
 0x489   : > { %v3632_v15 = vmul.f32 %v5148_v61, %v3628_v13 }
 0x48a   : > { %v3611_v28 = vpop.f32.mrf.mxu0 }
 0x48b   : > { %v3630_v58 = vmul.f32 %v3626_v1, %v3611_v28 }
 0x48c   : > { %v5149_v3 = vpop.f32.mrf.mxu0 }
 0x48d   : > { %v3633_v49 = vmul.f32 %v5149_v3, %v3629_v53 }
 0x48e   : > { %v3614_v18 = vpop.f32.mrf.mxu0 }
 0x48f   : > { %v3635_v63 = vpack.c.bf16 %v3633_v49, %v3632_v15  ;;  %v3631_v20 = vmul.f32 %v3627_v19, %v3614_v18 }
 0x491   : > { %v3634_v60 = vpack.c.bf16 %v3631_v20, %v3630_v58  ;;  %5150 = vmatprep.subr.bf16.mxu1 %v3635_v63 }
 0x492   : > { %5151 = vmatpush3.bf16.msra.mxu1 %v3635_v63 }
 0x493   : > { %5152 = vmatprep.subr.bf16.mxu1 %v3634_v60 }
 0x496   : > { %5153 = vmatpush3.bf16.msra.mxu1 %v3634_v60 }
 0x499   : > { %5155 = vmatmul.mubr.msk.bf16.vlgmr.msra.gmra.mxu1 %vm822_vm1, %v3513_v43 }
 0x49a   : > { %5158 = vmatprep.mubr.msk.bf16.mxu1 %vm822_vm1, %v3514_v10 }
 0x4a1   : > { %5159 = vmatmul.mubr.msk.bf16.gmra.mxu1 %vm822_vm1, %v3515_v50 }
 0x559   : > { %v5156_v21 = vpop.f32.mrf.mxu1 }
 0x55a   : > { %v3723_v43 = vsub.f32 %v5156_v21, %v3715_v16  ;;  %v5391_v21 = vld [vmem:[#allocation20 + $0x8] sm:$0xff]  }
 0x55b   : > { %v3682_v24 = vpop.f32.mrf.mxu1  ;;  %5174 = vmatprep.subr.bf16.mxu1 %v5391_v21 }
 0x55c   : > { %v3731_v34 = vmul.f32 0.5, %v3723_v43  ;;  %v3721_v33 = vsub.f32 %v3682_v24, %v3713_v12  ;;  %5175 = vmatpush3.bf16.msra.mxu1 %v5391_v21  ;;  %v3912_v43 = vld [vmem:[#allocation19] sm:$0x7] }
 0x55d   : > { %v5157_v10 = vpop.f32.mrf.mxu1  ;;  %v7862_v24 = vrot.slane %v3912_v43, %v8422_v56 }
 0x55e   : > { %v3739_v54 = vadd.f32 %v3731_v34, %v3715_v16  ;;  %v3729_v48 = vmul.f32 0.5, %v3721_v33  ;;  %v3724_v42 = vsub.f32 %v5157_v10, %v3716_v25  ;;  %v7867_v10 = vrot.slane %v3912_v43, %v8423_v0 }
 0x55f   : > { %v3685_v50 = vpop.f32.mrf.mxu1 }
 0x560   : > { %vm3747_vm2 = vcmp.ge.f32.partialorder %v3739_v54, 4.0  ;;  %v3737_v46 = vadd.f32 %v3729_v48, %v3713_v12  ;;  %v3732_v45 = vmul.f32 0.5, %v3724_v42  ;;  %v3722_v35 = vsub.f32 %v3685_v50, %v3714_v29  ;;  %v5392_v12 = vld [vmem:[#allocation20] sm:$0xff]  }
 0x561   : > { %v3755_v40 = vsel %vm3747_vm2, 0.0, %v3739_v54  ;;  %v5160_v32 = vpop.f32.mrf.mxu1  ;;  %v4983_v22 = vsel %vm3747_vm2, 1.0, %v8424_v55  ;;  %5176 = vmatprep.subr.bf16.mxu1 %v5392_v12  ;;  %v7872_v54 = vrot.slane %v3912_v43, %v8421_v4 }
 0x562   : > { %3763 = vst.msk [vmem:[#allocation4 + $0x10] sm:$0xff] %vm822_vm1, %v3755_v40  ;;  %vm3745_vm3 = vcmp.ge.f32.partialorder %v3737_v46, 4.0  ;;  %v3740_v51 = vadd.f32 %v3732_v45, %v3716_v25  ;;  %v3730_v7 = vmul.f32 0.5, %v3722_v35  ;;  %v3727_v62 = vsub.f32 %v5160_v32, %v3719_v9  ;;  %5177 = vmatpush3.bf16.msra.mxu1 %v5392_v12  ;;  %v3947_v25 = vld [vmem:[#allocation5] sm:$0xff] }
 0x563   : > { %v3753_v26 = vsel %vm3745_vm3, 0.0, %v3737_v46  ;;  %v3698_v59 = vpop.f32.mrf.mxu1  ;;  %v4981_v23 = vsel %vm3745_vm3, 1.0, %v8424_v55  ;;  %v3991_v34 = vmul.f32 %v7862_v24, %v3947_v25 }
 0x564   : > { %3761 = vst.msk [vmem:[#allocation4] sm:$0xff] %vm822_vm1, %v3753_v26  ;;  %vm3748_vm4 = vcmp.ge.f32.partialorder %v3740_v51, 4.0  ;;  %v3738_v57 = vadd.f32 %v3730_v7, %v3714_v29  ;;  %v3735_v47 = vmul.f32 0.5, %v3727_v62  ;;  %v3725_v11 = vsub.f32 %v3698_v59, %v3717_v8  ;;  %v7869_v29 = vld [vmem:[#allocation16] ss:$0 sm:$0xff] }
 0x565   : > { %v3756_v38 = vsel %vm3748_vm4, 0.0, %v3740_v51  ;;  %v5161_v36 = vpop.f32.mrf.mxu1  ;;  %v4984_v17 = vsel %vm3748_vm4, 1.0, %v8424_v55  ;;  %v4023_v42 = vrot.slane %v3991_v34, 1  ;;  %v3971_v51 = vmul.f32 %v7872_v54, %v3947_v25 }
 0x566   : > { %3764 = vst.msk [vmem:[#allocation4 + $0x18] sm:$0xff] %vm822_vm1, %v3756_v38  ;;  %vm3746_vm5 = vcmp.ge.f32.partialorder %v3738_v57, 4.0  ;;  %v3743_v39 = vadd.f32 %v3735_v47, %v3719_v9  ;;  %v3733_v14 = vmul.f32 0.5, %v3725_v11  ;;  %v3728_v52 = vsub.f32 %v5161_v36, %v3720_v44  ;;  %v3965_v11 = vld [vmem:[#allocation5 + $0x90] sm:$0xff] }
 0x567   : > { %v3754_v2 = vsel %vm3746_vm5, 0.0, %v3738_v57  ;;  %v4982_v30 = vsel %vm3746_vm5, 1.0, %v8424_v55  ;;  %v3701_v5 = vpop.f32.mrf.mxu1  ;;  %v3786_v28 = vpack.c.bf16 %v4984_v17, %v4983_v22  ;;  %v4067_v9 = vmul.f32 %v7867_v10, %v3947_v25 }
 0x568   : > { %3762 = vst.msk [vmem:[#allocation4 + $0x8] sm:$0xff] %vm822_vm1, %v3754_v2  ;;  %v3785_v27 = vpack.c.bf16 %v4982_v30, %v4981_v23  ;;  %vm3751_vm6 = vcmp.ge.f32.partialorder %v3743_v39, 4.0  ;;  %v3741_v61 = vadd.f32 %v3733_v14, %v3717_v8  ;;  %v3726_v13 = vsub.f32 %v3701_v5, %v3718_v41  ;;  %v3914_v8 = vld [vmem:[#allocation19 + $0x8] sm:$0x7] }
 0x569   : > { %v3759_v53 = vsel %vm3751_vm6, 0.0, %v3743_v39  ;;  %v3736_v1 = vmul.f32 0.5, %v3728_v52  ;;  %v4987_v6 = vsel %vm3751_vm6, 1.0, %v8424_v55  ;;  %v4099_v26 = vrot.slane %v4067_v9, 2  ;;  %v3913_v39 = vld [vmem:[#allocation19 + $0x4] sm:$0x7] }
 0x56a   : > { %3767 = vst.msk [vmem:[#allocation4 + $0x30] sm:$0xff] %vm822_vm1, %v3759_v53  ;;  %vm3749_vm7 = vcmp.ge.f32.partialorder %v3741_v61, 4.0  ;;  %v3734_v3 = vmul.f32 0.5, %v3726_v13  ;;  %5166 = vmatprep.mubr.msk.bf16.mxu0 %vm822_vm1, %v3785_v27  ;;  %v7885_v38 = vrot.slane %v3914_v8, %v8422_v56  ;;  %v7888_v36 = vrot.slane %v3914_v8, %v8423_v0 }
 0x56b   : > { %v3757_v19 = vsel %vm3749_vm7, 0.0, %v3741_v61  ;;  %v3744_v15 = vadd.f32 %v3736_v1, %v3720_v44  ;;  %5167 = vmatmul.mubr.msk.bf16.vlgmr.msra.gmra.mxu0 %vm822_vm1, %v3786_v28  ;;  %v4985_v63 = vsel %vm3749_vm7, 1.0, %v8424_v55  ;;  %v3966_v44 = vld [vmem:[#allocation5 + $0x98] sm:$0x3]  ;;  %v7907_v13 = vrot.slane %v3914_v8, %v8421_v4 }
 0x56c   : > { %3765 = vst.msk [vmem:[#allocation4 + $0x20] sm:$0xff] %vm822_vm1, %v3757_v19  ;;  %v3742_v49 = vadd.f32 %v3734_v3, %v3718_v41  ;;  %v7895_v30 = vmul.f32 %v7885_v38, %v3965_v11  ;;  %v7898_v52 = vmul.f32 %v7885_v38, %v3966_v44  ;;  %v7901_v5 = vmul.f32 %v7888_v36, %v3965_v11 }
 0x56d   : > { %vm3752_vm8 = vcmp.ge.f32.partialorder %v3744_v15, 4.0  ;;  %v7910_v53 = vrot.slane %v3913_v39, %v8421_v4  ;;  %v7913_v1 = vrot.slane %v3913_v39, %v8422_v56  ;;  %v7916_v3 = vrot.slane %v3913_v39, %v8423_v0 }
 0x56e   : > { %v3760_v18 = vsel %vm3752_vm8, 0.0, %v3744_v15  ;;  %v4988_v58 = vsel %vm3752_vm8, 1.0, %v8424_v55  ;;  %vm3750_vm9 = vcmp.ge.f32.partialorder %v3742_v49, 4.0  ;;  %v4388_v56 = vrot.slane %v7895_v30, 1 }
 0x56f   : > { %3768 = vst.msk [vmem:[#allocation4 + $0x38] sm:$0xff] %vm822_vm1, %v3760_v18  ;;  %v3758_v20 = vsel %vm3750_vm9, 0.0, %v3742_v49  ;;  %v4986_v60 = vsel %vm3750_vm9, 1.0, %v8424_v55  ;;  %v3788_v16 = vpack.c.bf16 %v4988_v58, %v4987_v6  ;;  %v3948_v55 = vld [vmem:[#allocation5 + $0x8] sm:$0x3]  ;;  %v7922_v18 = vmul.f32 %v7907_v13, %v3965_v11 }
 0x570   : > { %3766 = vst.msk [vmem:[#allocation4 + $0x28] sm:$0xff] %vm822_vm1, %v3758_v20  ;;  %v3787_v37 = vpack.c.bf16 %v4986_v60, %v4985_v63  ;;  %v3992_v33 = vmul.f32 %v7862_v24, %v3948_v55  ;;  %v4068_v46 = vmul.f32 %v7867_v10, %v3948_v55  ;;  %v4389_v0 = vrot.slane %v7898_v52, 1 }
 0x571   : > { %v7931_v20 = vmul.f32 %v7888_v36, %v3966_v44  ;;  %v4464_v60 = vrot.slane %v7901_v5, 2  ;;  %v5393_v5 = vld [vmem:[%s6139_s4 + $0x10] sm:$0xff] }
 0x572   : > { %5170 = vmatprep.mubr.msk.bf16.mxu0 %vm822_vm1, %v3787_v37  ;;  %v4024_v50 = vrot.slane %v3992_v33, 1  ;;  %v4100_v59 = vrot.slane %v4068_v46, 2 }
 0x573   : > { %5171 = vmatmul.mubr.msk.bf16.gmra.mxu0 %vm822_vm1, %v3788_v16 }
 0x574   : > { %v4025_v62 = vsel %vm1089_vm12, %v4023_v42, %v4024_v50  ;;  %v4101_v2 = vsel %vm1166_vm13, %v4099_v26, %v4100_v59 }
 0x575   : > { %v4055_v14 = vadd.f32 %v4025_v62, %v3971_v51 }
 0x577   : > { %v4131_v49 = vadd.f32 %v4101_v2, %v4055_v14 }
 0x62b   : > { %v5168_v48 = vpop.f32.mrf.mxu0 }
 0x62c   : > { %v3891_v45 = vmul.f32 %v5168_v48, %v7869_v29 }
 0x62d   : > { %v3851_v35 = vpop.f32.mrf.mxu0 }
 0x62e   : > { %v3906_v40 = vadd.f32 %v7317_v31, %v3891_v45  ;;  %v3889_v32 = vmul.f32 %v7869_v29, %v3851_v35 }
 0x62f   : > { %v5169_v7 = vpop.f32.mrf.mxu0 }
 0x630   : > { %3917 = vst.msk [vmem:[#allocation5 + $0x31] sm:$0xff] %vm822_vm1, %v3906_v40  ;;  %v3904_v57 = vadd.f32 %v7317_v31, %v3889_v32  ;;  %v3892_v47 = vmul.f32 %v5169_v7, %v7869_v29 }
 0x631   : > { %v3854_v22 = vpop.f32.mrf.mxu0 }
 0x632   : > { %3915 = vst.msk [vmem:[#allocation5 + $0x11] sm:$0xff] %vm822_vm1, %v3904_v57  ;;  %v3907_v41 = vadd.f32 %v7317_v31, %v3892_v47  ;;  %v3890_v17 = vmul.f32 %v7869_v29, %v3854_v22 }
 0x633   : > { %v5172_v23 = vpop.f32.mrf.mxu0 }
 0x634   : > { %3918 = vst.msk [vmem:[#allocation5 + $0x41] sm:$0xff] %vm822_vm1, %v3907_v41  ;;  %v3905_v27 = vadd.f32 %v7317_v31, %v3890_v17  ;;  %v3895_v61 = vmul.f32 %v5172_v23, %v7869_v29 }
 0x635   : > { %v3867_v28 = vpop.f32.mrf.mxu0 }
 0x636   : > { %3916 = vst.msk [vmem:[#allocation5 + $0x21] sm:$0xff] %vm822_vm1, %v3905_v27  ;;  %v3910_v19 = vadd.f32 %v7317_v31, %v3895_v61  ;;  %v3893_v15 = vmul.f32 %v7869_v29, %v3867_v28 }
 0x637   : > { %v5173_v58 = vpop.f32.mrf.mxu0  ;;  %v7924_v63 = vld [vmem:[#allocation5 + $0x30] sm:$0xff]  ;;  %v7926_v4 = vld [vmem:[#allocation5 + $0x38] sm:$0x3] }
 0x638   : > { %3921 = vst.msk [vmem:[#allocation5 + $0x71] sm:$0xff] %vm822_vm1, %v3910_v19  ;;  %v3908_v6 = vadd.f32 %v7317_v31, %v3893_v15  ;;  %v3896_v37 = vmul.f32 %v5173_v58, %v7869_v29  ;;  %v7939_v16 = vmul.f32 %v7862_v24, %v7926_v4  ;;  %v7943_v21 = vmul.f32 %v7867_v10, %v7926_v4 }
 0x639   : > { %v3870_v12 = vpop.f32.mrf.mxu0  ;;  %v3949_v43 = vld [vmem:[#allocation5 + $0x10] sm:$0xff]  ;;  %v3950_v25 = vld [vmem:[#allocation5 + $0x18] sm:$0x3]  ;;  %v7947_v55 = vmul.f32 %v7907_v13, %v7924_v63  ;;  %v7951_v34 = vmul.f32 %v7885_v38, %v7924_v63  ;;  %v7955_v33 = vmul.f32 %v7885_v38, %v7926_v4  ;;  %v7959_v48 = vmul.f32 %v7888_v36, %v7924_v63 }
 0x63a   : > { %3919 = vst.msk [vmem:[#allocation5 + $0x51] sm:$0xff] %vm822_vm1, %v3908_v6  ;;  %v3911_v42 = vadd.f32 %v7317_v31, %v3896_v37  ;;  %v3894_v50 = vmul.f32 %v7869_v29, %v3870_v12  ;;  %v3972_v9 = vmul.f32 %v7872_v54, %v3949_v43  ;;  %v3993_v46 = vmul.f32 %v7862_v24, %v3949_v43 }
 0x63b   : > { %v3994_v45 = vmul.f32 %v7862_v24, %v3950_v25  ;;  %v4033_v35 = vrot.slane %v7939_v16, 1  ;;  %v4069_v40 = vmul.f32 %v7867_v10, %v3949_v43  ;;  %v4070_v32 = vmul.f32 %v7867_v10, %v3950_v25 }
 0x63c   : > { %3922 = vst.msk [vmem:[#allocation5 + $0x81] sm:$0xff] %vm822_vm1, %v3911_v42  ;;  %v3909_v8 = vadd.f32 %v7317_v31, %v3894_v50  ;;  %v4026_v51 = vrot.slane %v3993_v46, 1  ;;  %v4109_v7 = vrot.slane %v7943_v21, 2  ;;  %v4143_v29 = vmul.f32 %v7910_v53, %v3949_v43 }
 0x63d   : > { %v7974_v62 = vld [vmem:[#allocation5 + $0x20] sm:$0xff]  ;;  %v3952_v26 = vld [vmem:[#allocation5 + $0x28] sm:$0x3]  ;;  %v4027_v59 = vrot.slane %v3994_v45, 1  ;;  %v4102_v57 = vrot.slane %v4069_v40, 2  ;;  %v4103_v47 = vrot.slane %v4070_v32, 2  ;;  %v4163_v11 = vmul.f32 %v7913_v1, %v3949_v43 }
 0x63e   : > { %3920 = vst.msk [vmem:[#allocation5 + $0x61] sm:$0xff] %vm822_vm1, %v3909_v8  ;;  %v7979_v44 = vmul.f32 %v7862_v24, %v3952_v26  ;;  %v7982_v31 = vmul.f32 %v7867_v10, %v3952_v26  ;;  %v4144_v22 = vmul.f32 %v7910_v53, %v7974_v62  ;;  %v4151_v41 = vadd.f32 %v4143_v29, %v4131_v49 }
 0x63f   : > { %v4028_v17 = vsel %vm1089_vm12, %v4026_v51, %v4027_v59  ;;  %v4104_v39 = vsel %vm1166_vm13, %v4102_v57, %v4103_v47  ;;  %v4164_v14 = vmul.f32 %v7913_v1, %v3950_v25  ;;  %v4165_v23 = vmul.f32 %v7913_v1, %v7974_v62 }
 0x640   : > { %v4030_v2 = vrot.slane %v7979_v44, 1  ;;  %v4056_v27 = vadd.f32 %v4028_v17, %v3972_v9  ;;  %v4106_v61 = vrot.slane %v7982_v31, 2  ;;  %v4166_v28 = vmul.f32 %v7913_v1, %v3952_v26 }
 0x641   : > { %v4195_v19 = vrot.slane %v4163_v11, 1  ;;  %v4196_v15 = vrot.slane %v4164_v14, 1  ;;  %v4198_v58 = vrot.slane %v4165_v23, 1  ;;  %v4239_v49 = vmul.f32 %v7916_v3, %v3949_v43 }
 0x642   : > { %v4132_v6 = vadd.f32 %v4104_v39, %v4056_v27  ;;  %v4199_v37 = vrot.slane %v4166_v28, 1  ;;  %v4240_v12 = vmul.f32 %v7916_v3, %v3950_v25  ;;  %v4241_v42 = vmul.f32 %v7916_v3, %v7974_v62 }
 0x643   : > { %v4197_v50 = vsel %vm1089_vm12, %v4195_v19, %v4196_v15  ;;  %v4242_v9 = vmul.f32 %v7916_v3, %v3952_v26  ;;  %v4271_v46 = vrot.slane %v4239_v49, 2  ;;  %v4315_v45 = vmul.f32 %v7907_v13, %v7974_v62 }
 0x644   : > { %v4152_v40 = vadd.f32 %v4144_v22, %v4132_v6  ;;  %v4200_v32 = vsel %vm1089_vm12, %v4198_v58, %v4199_v37  ;;  %v4227_v8 = vadd.f32 %v4197_v50, %v4151_v41  ;;  %v4272_v43 = vrot.slane %v4240_v12, 2 }
 0x645   : > { %v4274_v51 = vrot.slane %v4241_v42, 2  ;;  %v4275_v29 = vrot.slane %v4242_v9, 2  ;;  %v4335_v25 = vmul.f32 %v7885_v38, %v7974_v62  ;;  %v4336_v59 = vmul.f32 %v7885_v38, %v3952_v26 }
 0x646   : > { %v4228_v57 = vadd.f32 %v4200_v32, %v4152_v40  ;;  %v4273_v47 = vsel %vm1166_vm13, %v4271_v46, %v4272_v43  ;;  %v4370_v11 = vrot.slane %v7951_v34, 1  ;;  %v4371_v17 = vrot.slane %v7955_v33, 1  ;;  %v8026_v40 = vld [vmem:[#allocation5 + $0x40] sm:$0xff] }
 0x647   : > { %v4276_v22 = vsel %vm1166_vm13, %v4274_v51, %v4275_v29  ;;  %v4303_v39 = vadd.f32 %v4273_v47, %v4227_v8  ;;  %v4367_v14 = vrot.slane %v4335_v25, 1  ;;  %v4368_v41 = vrot.slane %v4336_v59, 1  ;;  %v8037_v47 = vld [vmem:[#allocation5 + $0x48] sm:$0x3] }
 0x648   : > { %v4304_v23 = vadd.f32 %v4276_v22, %v4228_v57  ;;  %v4372_v27 = vsel %vm1089_vm12, %v4370_v11, %v4371_v17  ;;  %v4411_v28 = vmul.f32 %v7888_v36, %v7974_v62  ;;  %v4412_v19 = vmul.f32 %v7888_v36, %v3952_v26 }
 0x649   : > { %v4323_v15 = vadd.f32 %v4315_v45, %v4303_v39  ;;  %v4369_v58 = vsel %vm1089_vm12, %v4367_v14, %v4368_v41  ;;  %v4414_v34 = vmul.f32 %v7888_v36, %v7926_v4  ;;  %v4446_v33 = vrot.slane %v7959_v48, 2 }
 0x64a   : > { %v4324_v49 = vadd.f32 %v7947_v55, %v4304_v23  ;;  %v4443_v6 = vrot.slane %v4411_v28, 2  ;;  %v4444_v37 = vrot.slane %v4412_v19, 2  ;;  %v3973_v12 = vmul.f32 %v7872_v54, %v7974_v62 }
 0x64b   : > { %v4399_v42 = vadd.f32 %v4369_v58, %v4323_v15  ;;  %v4447_v50 = vrot.slane %v4414_v34, 2  ;;  %v3974_v26 = vmul.f32 %v7872_v54, %v7924_v63  ;;  %v3995_v9 = vmul.f32 %v7862_v24, %v7974_v62  ;;  %v8066_v58 = vld [vmem:[#allocation5 + $0x50] sm:$0xff] }
 0x64c   : > { %v4400_v46 = vadd.f32 %v4372_v27, %v4324_v49  ;;  %v4445_v45 = vsel %vm1166_vm13, %v4443_v6, %v4444_v37  ;;  %v3997_v55 = vmul.f32 %v7862_v24, %v7924_v63  ;;  %v4071_v48 = vmul.f32 %v7867_v10, %v7974_v62 }
 0x64d   : > { %v4448_v32 = vsel %vm1166_vm13, %v4446_v33, %v4447_v50  ;;  %v4475_v8 = vadd.f32 %v4445_v45, %v4399_v42  ;;  %v4029_v43 = vrot.slane %v3995_v9, 1  ;;  %v4073_v51 = vmul.f32 %v7867_v10, %v7924_v63  ;;  %v8073_v50 = vld [vmem:[#allocation5 + $0x58] sm:$0x3] }
 0x64e   : > { %v4476_v29 = vadd.f32 %v4448_v32, %v4400_v46  ;;  %v4032_v25 = vrot.slane %v3997_v55, 1  ;;  %v4105_v59 = vrot.slane %v4071_v48, 2  ;;  %v4145_v57 = vmul.f32 %v7910_v53, %v7924_v63 }
 0x64f   : > { %v4031_v11 = vsel %vm1089_vm12, %v4029_v43, %v4030_v2  ;;  %v4108_v62 = vrot.slane %v4073_v51, 2  ;;  %v4146_v17 = vmul.f32 %v7910_v53, %v8026_v40  ;;  %v4167_v22 = vmul.f32 %v7913_v1, %v7924_v63 }
 0x650   : > { %v4483_v39 = vpack.c.bf16 %v4476_v29, %v4475_v8  ;;  %v4034_v14 = vsel %vm1089_vm12, %v4032_v25, %v4033_v35  ;;  %v4057_v41 = vadd.f32 %v4031_v11, %v3973_v12  ;;  %v4107_v23 = vsel %vm1166_vm13, %v4105_v59, %v4106_v61 }
 0x651   : > { %v4058_v44 = vadd.f32 %v4034_v14, %v3974_v26  ;;  %v4110_v2 = vsel %vm1166_vm13, %v4108_v62, %v4109_v7  ;;  %v4168_v27 = vmul.f32 %v7913_v1, %v7926_v4  ;;  %v4169_v28 = vmul.f32 %v7913_v1, %v8026_v40 }
 0x652   : > { %5178 = vmatprep.mubr.msk.bf16.mxu1 %vm822_vm1, %v4483_v39  ;;  %v4133_v16 = vadd.f32 %v4107_v23, %v4057_v41  ;;  %v4170_v35 = vmul.f32 %v7913_v1, %v8037_v47  ;;  %v4201_v31 = vrot.slane %v4167_v22, 1  ;;  %v4243_v61 = vmul.f32 %v7916_v3, %v7924_v63 }
 0x653   : > { %v4134_v19 = vadd.f32 %v4110_v2, %v4058_v44  ;;  %v4202_v21 = vrot.slane %v4168_v27, 1  ;;  %v4204_v15 = vrot.slane %v4169_v28, 1  ;;  %v4244_v7 = vmul.f32 %v7916_v3, %v7926_v4 }
 0x654   : > { %v4153_v34 = vadd.f32 %v4145_v57, %v4133_v16  ;;  %v4205_v33 = vrot.slane %v4170_v35, 1  ;;  %v4245_v49 = vmul.f32 %v7916_v3, %v8026_v40  ;;  %v4246_v6 = vmul.f32 %v7916_v3, %v8037_v47 }
 0x655   : > { %v4154_v37 = vadd.f32 %v4146_v17, %v4134_v19  ;;  %v4203_v12 = vsel %vm1089_vm12, %v4201_v31, %v4202_v21  ;;  %v4277_v63 = vrot.slane %v4243_v61, 2  ;;  %v4278_v42 = vrot.slane %v4244_v7, 2 }
 0x656   : > { %v4206_v26 = vsel %vm1089_vm12, %v4204_v15, %v4205_v33  ;;  %v4229_v4 = vadd.f32 %v4203_v12, %v4153_v34  ;;  %v4280_v9 = vrot.slane %v4245_v49, 2  ;;  %v4281_v46 = vrot.slane %v4246_v6, 2 }
 0x657   : > { %v4230_v45 = vadd.f32 %v4206_v26, %v4154_v37  ;;  %v4279_v55 = vsel %vm1166_vm13, %v4277_v63, %v4278_v42  ;;  %v4317_v48 = vmul.f32 %v7907_v13, %v8026_v40  ;;  %v4318_v32 = vmul.f32 %v7907_v13, %v8066_v58 }
 0x658   : > { %v4282_v8 = vsel %vm1166_vm13, %v4280_v9, %v4281_v46  ;;  %v4305_v43 = vadd.f32 %v4279_v55, %v4229_v4  ;;  %v4339_v51 = vmul.f32 %v7885_v38, %v8026_v40  ;;  %v4340_v29 = vmul.f32 %v7885_v38, %v8037_v47  ;;  %v8118_v55 = vld [vmem:[#allocation5 + $0x60] sm:$0xff] }
 0x659   : > { %v4306_v25 = vadd.f32 %v4282_v8, %v4230_v45  ;;  %v4341_v59 = vmul.f32 %v7885_v38, %v8066_v58  ;;  %v4342_v57 = vmul.f32 %v7885_v38, %v8073_v50  ;;  %v4415_v11 = vmul.f32 %v7888_v36, %v8026_v40 }
 0x65a   : > { %v4325_v62 = vadd.f32 %v4317_v48, %v4305_v43  ;;  %v4373_v17 = vrot.slane %v4339_v51, 1  ;;  %v4374_v22 = vrot.slane %v4340_v29, 1  ;;  %v4416_v39 = vmul.f32 %v7888_v36, %v8037_v47 }
 0x65b   : > { %v4326_v14 = vadd.f32 %v4318_v32, %v4306_v25  ;;  %v4376_v41 = vrot.slane %v4341_v59, 1  ;;  %v4377_v23 = vrot.slane %v4342_v57, 1  ;;  %v4417_v44 = vmul.f32 %v7888_v36, %v8066_v58  ;;  %v8127_v25 = vld [vmem:[#allocation5 + $0x68] sm:$0x3] }
 0x65c   : > { %v4375_v2 = vsel %vm1089_vm12, %v4373_v17, %v4374_v22  ;;  %v4418_v27 = vmul.f32 %v7888_v36, %v8073_v50  ;;  %v4449_v28 = vrot.slane %v4415_v11, 2  ;;  %v4450_v16 = vrot.slane %v4416_v39, 2 }
 0x65d   : > { %v4378_v35 = vsel %vm1089_vm12, %v4376_v41, %v4377_v23  ;;  %v4401_v31 = vadd.f32 %v4375_v2, %v4325_v62  ;;  %v4452_v61 = vrot.slane %v4417_v44, 2  ;;  %v3975_v19 = vmul.f32 %v7872_v54, %v8026_v40 }
 0x65e   : > { %v4402_v21 = vadd.f32 %v4378_v35, %v4326_v14  ;;  %v4451_v15 = vsel %vm1166_vm13, %v4449_v28, %v4450_v16  ;;  %v4453_v7 = vrot.slane %v4418_v27, 2  ;;  %v3976_v34 = vmul.f32 %v7872_v54, %v8066_v58 }
 0x65f   : > { %v4477_v33 = vadd.f32 %v4451_v15, %v4401_v31  ;;  %v3999_v49 = vmul.f32 %v7862_v24, %v8026_v40  ;;  %v4000_v6 = vmul.f32 %v7862_v24, %v8037_v47  ;;  %v4001_v37 = vmul.f32 %v7862_v24, %v8066_v58  ;;  %v8147_v15 = vld [vmem:[#allocation5 + $0x70] sm:$0xff] }
 0x660   : > { %v4454_v12 = vsel %vm1166_vm13, %v4452_v61, %v4453_v7  ;;  %v4002_v63 = vmul.f32 %v7862_v24, %v8073_v50  ;;  %v4075_v42 = vmul.f32 %v7867_v10, %v8026_v40  ;;  %v4076_v26 = vmul.f32 %v7867_v10, %v8037_v47 }
 0x661   : > { %v4478_v4 = vadd.f32 %v4454_v12, %v4402_v21  ;;  %v4035_v9 = vrot.slane %v3999_v49, 1  ;;  %v4036_v46 = vrot.slane %v4000_v6, 1  ;;  %v4038_v45 = vrot.slane %v4001_v37, 1 }
 0x662   : > { %v4039_v48 = vrot.slane %v4002_v63, 1  ;;  %v4077_v32 = vmul.f32 %v7867_v10, %v8066_v58  ;;  %v4078_v8 = vmul.f32 %v7867_v10, %v8073_v50  ;;  %v4111_v43 = vrot.slane %v4075_v42, 2  ;;  %v8156_v63 = vld [vmem:[#allocation5 + $0x78] sm:$0x3] }
 0x663   : > { %v4484_v51 = vpack.c.bf16 %v4478_v4, %v4477_v33  ;;  %v4037_v40 = vsel %vm1089_vm12, %v4035_v9, %v4036_v46  ;;  %v4112_v29 = vrot.slane %v4076_v26, 2  ;;  %v4147_v47 = vmul.f32 %v7910_v53, %v8066_v58 }
 0x664   : > { %v4040_v59 = vsel %vm1089_vm12, %v4038_v45, %v4039_v48  ;;  %v4059_v57 = vadd.f32 %v4037_v40, %v3975_v19  ;;  %v4114_v11 = vrot.slane %v4077_v32, 2  ;;  %v4115_v62 = vrot.slane %v4078_v8, 2 }
 0x665   : > { %5179 = vmatmul.mubr.msk.bf16.vlgmr.msra.gmra.mxu1 %vm822_vm1, %v4484_v51  ;;  %v4060_v17 = vadd.f32 %v4040_v59, %v3976_v34  ;;  %v4113_v22 = vsel %vm1166_vm13, %v4111_v43, %v4112_v29  ;;  %v4148_v39 = vmul.f32 %v7910_v53, %v8118_v55  ;;  %v4171_v14 = vmul.f32 %v7913_v1, %v8066_v58 }
 0x666   : > { %v4116_v41 = vsel %vm1166_vm13, %v4114_v11, %v4115_v62  ;;  %v4135_v23 = vadd.f32 %v4113_v22, %v4059_v57  ;;  %v4172_v44 = vmul.f32 %v7913_v1, %v8073_v50  ;;  %v4173_v2 = vmul.f32 %v7913_v1, %v8118_v55 }
 0x667   : > { %v4136_v27 = vadd.f32 %v4116_v41, %v4060_v17  ;;  %v4174_v28 = vmul.f32 %v7913_v1, %v8127_v25  ;;  %v4207_v16 = vrot.slane %v4171_v14, 1  ;;  %v4247_v35 = vmul.f32 %v7916_v3, %v8066_v58 }
 0x668   : > { %v4155_v31 = vadd.f32 %v4147_v47, %v4135_v23  ;;  %v4208_v61 = vrot.slane %v4172_v44, 1  ;;  %v4210_v19 = vrot.slane %v4173_v2, 1  ;;  %v4248_v21 = vmul.f32 %v7916_v3, %v8073_v50 }
 0x669   : > { %v4156_v7 = vadd.f32 %v4148_v39, %v4136_v27  ;;  %v4211_v34 = vrot.slane %v4174_v28, 1  ;;  %v4249_v33 = vmul.f32 %v7916_v3, %v8118_v55  ;;  %v4250_v49 = vmul.f32 %v7916_v3, %v8127_v25 }
 0x66a   : > { %v4209_v6 = vsel %vm1089_vm12, %v4207_v16, %v4208_v61  ;;  %v4283_v37 = vrot.slane %v4247_v35, 2  ;;  %v4284_v58 = vrot.slane %v4248_v21, 2  ;;  %v4319_v12 = vmul.f32 %v7907_v13, %v8118_v55 }
 0x66b   : > { %v4212_v50 = vsel %vm1089_vm12, %v4210_v19, %v4211_v34  ;;  %v4231_v42 = vadd.f32 %v4209_v6, %v4155_v31  ;;  %v4286_v26 = vrot.slane %v4249_v33, 2  ;;  %v4287_v4 = vrot.slane %v4250_v49, 2 }
 0x66c   : > { %v4232_v9 = vadd.f32 %v4212_v50, %v4156_v7  ;;  %v4285_v46 = vsel %vm1166_vm13, %v4283_v37, %v4284_v58  ;;  %v4320_v45 = vmul.f32 %v7907_v13, %v8147_v15  ;;  %v4343_v48 = vmul.f32 %v7885_v38, %v8118_v55  ;;  %v3963_v50 = vld [vmem:[#allocation5 + $0x80] sm:$0xff] }
 0x66d   : > { %v4288_v32 = vsel %vm1166_vm13, %v4286_v26, %v4287_v4  ;;  %v4307_v8 = vadd.f32 %v4285_v46, %v4231_v42  ;;  %v4344_v43 = vmul.f32 %v7885_v38, %v8127_v25  ;;  %v4345_v51 = vmul.f32 %v7885_v38, %v8147_v15 }
 0x66e   : > { %v4308_v40 = vadd.f32 %v4288_v32, %v4232_v9  ;;  %v4346_v29 = vmul.f32 %v7885_v38, %v8156_v63  ;;  %v4379_v47 = vrot.slane %v4343_v48, 1  ;;  %v4419_v59 = vmul.f32 %v7888_v36, %v8118_v55 }
 0x66f   : > { %v4327_v57 = vadd.f32 %v4319_v12, %v4307_v8  ;;  %v4380_v11 = vrot.slane %v4344_v43, 1  ;;  %v4382_v62 = vrot.slane %v4345_v51, 1  ;;  %v4420_v17 = vmul.f32 %v7888_v36, %v8127_v25 }
 0x670   : > { %v4328_v22 = vadd.f32 %v4320_v45, %v4308_v40  ;;  %v4383_v39 = vrot.slane %v4346_v29, 1  ;;  %v4421_v14 = vmul.f32 %v7888_v36, %v8147_v15  ;;  %v4422_v41 = vmul.f32 %v7888_v36, %v8156_v63 }
 0x671   : > { %v4381_v23 = vsel %vm1089_vm12, %v4379_v47, %v4380_v11  ;;  %v4455_v44 = vrot.slane %v4419_v59, 2  ;;  %v4456_v2 = vrot.slane %v4420_v17, 2  ;;  %v3977_v27 = vmul.f32 %v7872_v54, %v8118_v55 }
 0x672   : > { %v4384_v28 = vsel %vm1089_vm12, %v4382_v62, %v4383_v39  ;;  %v4403_v16 = vadd.f32 %v4381_v23, %v4327_v57  ;;  %v4458_v35 = vrot.slane %v4421_v14, 2  ;;  %v4459_v31 = vrot.slane %v4422_v41, 2 }
 0x673   : > { %v4404_v61 = vadd.f32 %v4384_v28, %v4328_v22  ;;  %v4457_v19 = vsel %vm1166_vm13, %v4455_v44, %v4456_v2  ;;  %v3978_v21 = vmul.f32 %v7872_v54, %v8147_v15  ;;  %v4003_v7 = vmul.f32 %v7862_v24, %v8118_v55 }
 0x674   : > { %v4460_v34 = vsel %vm1166_vm13, %v4458_v35, %v4459_v31  ;;  %v4479_v33 = vadd.f32 %v4457_v19, %v4403_v16  ;;  %v4004_v49 = vmul.f32 %v7862_v24, %v8127_v25  ;;  %v4005_v6 = vmul.f32 %v7862_v24, %v8147_v15 }
 0x675   : > { %v4480_v37 = vadd.f32 %v4460_v34, %v4404_v61  ;;  %v4006_v58 = vmul.f32 %v7862_v24, %v8156_v63  ;;  %v4041_v12 = vrot.slane %v4003_v7, 1  ;;  %v4079_v54 = vmul.f32 %v7867_v10, %v8118_v55  ;;  %v3964_v24 = vld [vmem:[#allocation5 + $0x88] sm:$0x3] }
 0x676   : > { %v4042_v42 = vrot.slane %v4004_v49, 1  ;;  %v4044_v26 = vrot.slane %v4005_v6, 1  ;;  %v4080_v4 = vmul.f32 %v7867_v10, %v8127_v25  ;;  %v4081_v9 = vmul.f32 %v7867_v10, %v8147_v15 }
 0x677   : > { %v4485_v46 = vpack.c.bf16 %v4480_v37, %v4479_v33  ;;  %v4045_v45 = vrot.slane %v4006_v58, 1  ;;  %v4082_v48 = vmul.f32 %v7867_v10, %v8156_v63  ;;  %v4117_v32 = vrot.slane %v4079_v54, 2 }
 0x678   : > { %v4043_v8 = vsel %vm1089_vm12, %v4041_v12, %v4042_v42  ;;  %v4118_v43 = vrot.slane %v4080_v4, 2  ;;  %v4120_v55 = vrot.slane %v4081_v9, 2  ;;  %v4149_v51 = vmul.f32 %v7910_v53, %v8147_v15 }
 0x679   : > { %5182 = vmatprep.mubr.msk.bf16.mxu1 %vm822_vm1, %v4485_v46  ;;  %v4046_v25 = vsel %vm1089_vm12, %v4044_v26, %v4045_v45  ;;  %v4061_v40 = vadd.f32 %v4043_v8, %v3977_v27  ;;  %v4121_v29 = vrot.slane %v4082_v48, 2  ;;  %v4150_v47 = vmul.f32 %v7910_v53, %v3963_v50 }
 0x67a   : > { %v4062_v59 = vadd.f32 %v4046_v25, %v3978_v21  ;;  %v4119_v10 = vsel %vm1166_vm13, %v4117_v32, %v4118_v43  ;;  %v4175_v57 = vmul.f32 %v7913_v1, %v8147_v15  ;;  %v4176_v11 = vmul.f32 %v7913_v1, %v8156_v63  ;;  %v5003_v43 = vld [vmem:[#allocation23] ss:$0 sm:$0xff] }
 0x67b   : > { %v4122_v62 = vsel %vm1166_vm13, %v4120_v55, %v4121_v29  ;;  %v4137_v17 = vadd.f32 %v4119_v10, %v4061_v40  ;;  %v4177_v22 = vmul.f32 %v7913_v1, %v3963_v50  ;;  %v4178_v39 = vmul.f32 %v7913_v1, %v3964_v24  ;;  %v5394_v29 = vld [vmem:[%s6139_s4] sm:$0xff] }
 0x67c   : > { %v4138_v14 = vadd.f32 %v4122_v62, %v4062_v59  ;;  %v4213_v41 = vrot.slane %v4175_v57, 1  ;;  %v4214_v23 = vrot.slane %v4176_v11, 1  ;;  %v4251_v53 = vmul.f32 %v7916_v3, %v8147_v15  ;;  %v5395_v11 = vld [vmem:[%s6139_s4 + $0x18] sm:$0xff] }
 0x67d   : > { %v4157_v44 = vadd.f32 %v4149_v51, %v4137_v17  ;;  %v4216_v2 = vrot.slane %v4177_v22, 1  ;;  %v4217_v27 = vrot.slane %v4178_v39, 1  ;;  %v4252_v28 = vmul.f32 %v7916_v3, %v8156_v63  ;;  %v5396_v39 = vld [vmem:[%s6139_s4 + $0x8] sm:$0xff] }
 0x67e   : > { %v4158_v16 = vadd.f32 %v4150_v47, %v4138_v14  ;;  %v4215_v35 = vsel %vm1089_vm12, %v4213_v41, %v4214_v23  ;;  %v4253_v31 = vmul.f32 %v7916_v3, %v3963_v50  ;;  %v4254_v61 = vmul.f32 %v7916_v3, %v3964_v24 }
 0x67f   : > { %v4218_v1 = vsel %vm1089_vm12, %v4216_v2, %v4217_v27  ;;  %v4233_v19 = vadd.f32 %v4215_v35, %v4157_v44  ;;  %v4289_v21 = vrot.slane %v4251_v53, 2  ;;  %v4290_v7 = vrot.slane %v4252_v28, 2  ;;  %v5397_v2 = vld [vmem:[%s6139_s4 + $0x30] sm:$0xff] }
 0x680   : > { %v4234_v34 = vadd.f32 %v4218_v1, %v4158_v16  ;;  %v4292_v15 = vrot.slane %v4253_v31, 2  ;;  %v4293_v33 = vrot.slane %v4254_v61, 2  ;;  %v4465_v49 = vrot.slane %v7931_v20, 2  ;;  %v5398_v31 = vld [vmem:[%s6139_s4 + $0x20] sm:$0xff] }
 0x681   : > { %v4291_v6 = vsel %vm1166_vm13, %v4289_v21, %v4290_v7  ;;  %v4347_v63 = vmul.f32 %v7885_v38, %v3963_v50  ;;  %v4348_v37 = vmul.f32 %v7885_v38, %v3964_v24  ;;  %v4423_v58 = vmul.f32 %v7888_v36, %v3963_v50  ;;  %v5399_v7 = vld [vmem:[%s6139_s4 + $0x38] sm:$0xff] }
 0x682   : > { %v4294_v3 = vsel %vm1166_vm13, %v4292_v15, %v4293_v33  ;;  %v4309_v12 = vadd.f32 %v4291_v6, %v4233_v19  ;;  %v4321_v54 = vmul.f32 %v7907_v13, %v3963_v50  ;;  %v4424_v42 = vmul.f32 %v7888_v36, %v3964_v24 }
 0x683   : > { %v4310_v26 = vadd.f32 %v4294_v3, %v4234_v34  ;;  %v4385_v4 = vrot.slane %v4347_v63, 1  ;;  %v4386_v9 = vrot.slane %v4348_v37, 1  ;;  %v4461_v46 = vrot.slane %v4423_v58, 2 }
 0x684   : > { %v4329_v20 = vadd.f32 %v4321_v54, %v4309_v12  ;;  %v4390_v38 = vsel %vm1089_vm12, %v4388_v56, %v4389_v0  ;;  %v4462_v45 = vrot.slane %v4424_v42, 2  ;;  %v4466_v36 = vsel %vm1166_vm13, %v4464_v60, %v4465_v49  ;;  %v5002_v56 = vld [vmem:[#allocation22] ss:$0 sm:$0xff]  ;;  %v5400_v49 = vld [vmem:[%s6139_s4 + $0x28] sm:$0xff] }
 0x685   : > { %v4330_v48 = vadd.f32 %v7922_v18, %v4310_v26  ;;  %v4387_v32 = vsel %vm1089_vm12, %v4385_v4, %v4386_v9 }
 0x686   : > { %v4405_v13 = vadd.f32 %v4387_v32, %v4329_v20  ;;  %v4463_v24 = vsel %vm1166_vm13, %v4461_v46, %v4462_v45 }
 0x687   : > { %v4406_v50 = vadd.f32 %v4390_v38, %v4330_v48 }
 0x688   : > { %v4481_v52 = vadd.f32 %v4463_v24, %v4405_v13 }
 0x689   : > { %v4482_v8 = vadd.f32 %v4466_v36, %v4406_v50 }
 0x68b   : > { %v4486_v30 = vpack.c.bf16 %v4482_v8, %v4481_v52 }
 0x68d   : > { %5183 = vmatmul.mubr.msk.bf16.gmra.mxu1 %vm822_vm1, %v4486_v30 }
 0x725   : > { %v5180_v18 = vpop.f32.mrf.mxu1 }
 0x726   : > { %v4589_v0 = vmul.f32 %v5180_v18, %v5002_v56 }
 0x727   : > { %v4549_v55 = vpop.f32.mrf.mxu1 }
 0x728   : > { %v4597_v60 = vadd.f32 %v5393_v5, %v4589_v0  ;;  %v4587_v51 = vmul.f32 %v5002_v56, %v4549_v55 }
 0x729   : > { %v5181_v25 = vpop.f32.mrf.mxu1 }
 0x72a   : > { %v4612_v40 = vadd.f32 %v5003_v43, %v4597_v60  ;;  %v4595_v47 = vadd.f32 %v5394_v29, %v4587_v51  ;;  %v4590_v59 = vmul.f32 %v5181_v25, %v5002_v56 }
 0x72b   : > { %v4552_v10 = vpop.f32.mrf.mxu1 }
 0x72c   : > { %4620 = vst.msk [vmem:[%s6176_s16 + $0x10] sm:$0xff] %vm822_vm1, %v4612_v40  ;;  %v4610_v57 = vadd.f32 %v5003_v43, %v4595_v47  ;;  %v4598_v62 = vadd.f32 %v5395_v11, %v4590_v59  ;;  %v4588_v17 = vmul.f32 %v5002_v56, %v4552_v10 }
 0x72e   : > { %4618 = vst.msk [vmem:[%s6176_s16] sm:$0xff] %vm822_vm1, %v4610_v57  ;;  %v4613_v22 = vadd.f32 %v5003_v43, %v4598_v62  ;;  %v4596_v14 = vadd.f32 %v5396_v39, %v4588_v17 }
 0x730   : > { %4621 = vst.msk [vmem:[%s6176_s16 + $0x18] sm:$0xff] %vm822_vm1, %v4613_v22  ;;  %v4611_v41 = vadd.f32 %v5003_v43, %v4596_v14 }
 0x732   : > { %4619 = vst.msk [vmem:[%s6176_s16 + $0x8] sm:$0xff] %vm822_vm1, %v4611_v41 }
 0x74d   : > { %v5184_v23 = vpop.f32.mrf.mxu1 }
 0x74e   : > { %v4593_v53 = vmul.f32 %v5184_v23, %v5002_v56 }
 0x74f   : > { %v4565_v44 = vpop.f32.mrf.mxu1 }
 0x750   : > { %v4601_v27 = vadd.f32 %v5397_v2, %v4593_v53  ;;  %v4591_v28 = vmul.f32 %v5002_v56, %v4565_v44 }
 0x751   : > { %v5185_v16 = vpop.f32.mrf.mxu1 }
 0x752   : > { %v4616_v35 = vadd.f32 %v5003_v43, %v4601_v27  ;;  %v4599_v61 = vadd.f32 %v5398_v31, %v4591_v28  ;;  %v4594_v1 = vmul.f32 %v5185_v16, %v5002_v56 }
 0x753   : > { %v4568_v19 = vpop.f32.mrf.mxu1 }
 0x754   : > { %4624 = vst.msk [vmem:[%s6176_s16 + $0x30] sm:$0xff] %vm822_vm1, %v4616_v35  ;;  %v4614_v21 = vadd.f32 %v5003_v43, %v4599_v61  ;;  %v4602_v34 = vadd.f32 %v5399_v7, %v4594_v1  ;;  %v4592_v15 = vmul.f32 %v5002_v56, %v4568_v19 }
 0x756   : > { %4622 = vst.msk [vmem:[%s6176_s16 + $0x20] sm:$0xff] %vm822_vm1, %v4614_v21  ;;  %v4617_v33 = vadd.f32 %v5003_v43, %v4602_v34  ;;  %v4600_v6 = vadd.f32 %v5400_v49, %v4592_v15 }
 0x758   : > { %4625 = vst.msk [vmem:[%s6176_s16 + $0x38] sm:$0xff] %vm822_vm1, %v4617_v33  ;;  %v4615_v63 = vadd.f32 %v5003_v43, %v4600_v6 }
 0x75a   : > { %4623 = vst.msk [vmem:[%s6176_s16 + $0x28] sm:$0xff] %vm822_vm1, %v4615_v63 }
 0x75b PF: > { %s35_s28 = sadd.s32 1, %s5805_s28   ;;  %s8426_s21 = smov %s5781_s22 }
 0x75c   : > { %p32_p1 = scmp.ge.s32.totalorder %s35_s28, 6   ;;  %s8427_s22 = smov %s5785_s23 }
 0x75d   : > { %s8428_s23 = smov %s6119_s2  ;;  %s8429_s24 = smov %s5797_s26 }
 0x75e   : > { %s8430_s25 = smov %s5801_s27  ;;  %s8431_s26 = smov %s8434_s5 }
 0x75f   : > { %s8432_s27 = smov %s8438_s19  ;;  %34 = sbr.rel (!%p32_p1) target bundleno = 28 (0x1c), region = 190 }
 0x764   :  { %4655 = vsyncpa [#allocation7], 1 }
 0x765   :  { %4657 = vsyncpa [#allocation7 + $0x1], 1 }
 0x766   :  { %4658 = vsyncpa [#allocation9], 1 }
 0x767   :  { %4659 = vsyncpa [#allocation12], 1 }
 0x768   :  { %4660 = vsyncpa [#allocation15], 1 }
 0x769   :  { %4661 = vsyncpa [#allocation18], 1 }
 0x76a   :  { %4662 = vsyncpa [#allocation21], 1 }
 0x76b   :  { %4663 = vsyncpa [#allocation24], 1 }

</bundles_post_ra>
